<compile_context>
chip_gen: v6e
topology: v6e:2x2x1
jax: 0.10.0
libtpu: 0.0.40
codegen_flags: <defaults>
</compile_context>

<pallas_src>
import functools

import jax
import jax.numpy as jnp
from jax.experimental import pallas as pl
from jax.experimental.pallas import tpu as pltpu

HP = 128          # lane-padded hidden size per direction (both layers)
FCP = 128         # lane-padded head width (fc1 out / fc2 out / logits)
G4 = 4 * HP       # width of the 4 fused gates of one direction


# ----------------------------------------------------------------------------
# Fused kernel: layer1 (bi-LSTM) -> layer2 (bi-LSTM) -> maxpool/fc1/relu/fc2/
# softmax.
# ----------------------------------------------------------------------------
def fused_kernel(x_ref,
                 wih1_ref, b1_ref, whh1f_ref, whh1b_ref,
                 wih2_ref, b2_ref, whh2f_ref, whh2b_ref,
                 w1_ref, bfc1_ref, w2_ref, bfc2_ref,
                 out_ref,
                 h1_ref, h2_ref):
    T, N, E = x_ref.shape

    def run_layer(x2d, wih_ref, b_ref, whhf_ref, whhb_ref, hcat_ref):
        # Hoisted input projection + bias for BOTH directions: one
        # (T*N, Din) x (Din, 8*HP) MXU matmul per layer.
        xp = (jnp.dot(x2d, wih_ref[...], preferred_element_type=jnp.float32)
              + b_ref[...])                                   # (T*N, 8*HP)

        def recur(whh_ref, gate_off, lane_off, reverse):
            whh = whh_ref[...]                                # (HP, 4*HP)
            h = jnp.zeros((N, HP), jnp.float32)
            c = jnp.zeros((N, HP), jnp.float32)
            order = range(T - 1, -1, -1) if reverse else range(T)
            for t in order:                                   # fully unrolled
                gates = xp[t * N:(t + 1) * N, gate_off:gate_off + G4] + jnp.dot(
                    h, whh, preferred_element_type=jnp.float32)  # (N, 4*HP)
                i_g = jax.nn.sigmoid(gates[:, 0 * HP:1 * HP])
                f_g = jax.nn.sigmoid(gates[:, 1 * HP:2 * HP])
                g_g = jnp.tanh(gates[:, 2 * HP:3 * HP])
                o_g = jax.nn.sigmoid(gates[:, 3 * HP:4 * HP])
                c = f_g * c + i_g * g_g
                h = o_g * jnp.tanh(c)
                # Write at the *original* time index -> bwd output is already
                # in time order; lane_off selects the fwd/bwd concat half.
                hcat_ref[t, :, lane_off:lane_off + HP] = h

        recur(whhf_ref, 0, 0, False)      # forward direction
        recur(whhb_ref, G4, HP, True)     # backward direction

    # ---- layer 1 (input: embeddings (T, N, E)) ----
    x2d = x_ref[...].reshape(T * N, E)
    run_layer(x2d, wih1_ref, b1_ref, whh1f_ref, whh1b_ref, h1_ref)

    # ---- layer 2 (input: padded concat (T, N, 2*HP) already in VMEM) ----
    h1_2d = h1_ref[...].reshape(T * N, 2 * HP)
    run_layer(h1_2d, wih2_ref, b2_ref, whh2f_ref, whh2b_ref, h2_ref)

    # ---- head: max over N, fc1 + ReLU, fc2, softmax over classes ----
    pooled = jnp.max(h2_ref[...], axis=1)                     # (T, 2*HP)
    hdn = jnp.maximum(
        jnp.dot(pooled, w1_ref[...], preferred_element_type=jnp.float32)
        + bfc1_ref[...], 0.0)                                 # (T, FCP)
    logits = (jnp.dot(hdn, w2_ref[...], preferred_element_type=jnp.float32)
              + bfc2_ref[...])                                # pad lanes=-1e30
    m = jnp.max(logits, axis=1, keepdims=True)
    e = jnp.exp(logits - m)
    out_ref[...] = e * pl.reciprocal(jnp.sum(e, axis=1, keepdims=True),
                                     approx=True)


def _full_spec(shape):
    return pl.BlockSpec(shape, lambda *_: (0,) * len(shape))


def fused_forward(x, *pparams):
    T, N, E = x.shape
    args = (x,) + tuple(pparams)
    return pl.pallas_call(
        fused_kernel,
        out_shape=jax.ShapeDtypeStruct((T, FCP), jnp.float32),
        grid=(1,),
        in_specs=[_full_spec(a.shape) for a in args],
        out_specs=_full_spec((T, FCP)),
        scratch_shapes=[
            pltpu.VMEM((T, N, 2 * HP), jnp.float32),   # layer-1 bi output
            pltpu.VMEM((T, N, 2 * HP), jnp.float32),   # layer-2 bi output
        ],
        compiler_params=pltpu.CompilerParams(
            dimension_semantics=("arbitrary",),
            vmem_limit_bytes=32 * 1024 * 1024),
    )(*args)


# ----------------------------------------------------------------------------
# Full forward pass (mirrors lstm.forward).  Embedding gather stays in JAX.
# TODO(synk): nn.Dropout layers are identity at inference and are omitted.
# ----------------------------------------------------------------------------
@functools.partial(jax.jit, static_argnames=("label_nums",))
def forward(ids, emb_table, pparams, *, label_nums):
    # nn.Embedding: data-dependent HBM row gather kept in plain JAX glue.
    x = emb_table[ids]                       # (B=T, S=N, 768)
    out_pad = fused_forward(x, *pparams)     # (B, 128) lane-dense
    return out_pad[:, :label_nums]           # (B, label_nums)


# ----------------------------------------------------------------------------
# Parameter init (PyTorch reinitialize shapes/schemes) + fused lane padding.
# ----------------------------------------------------------------------------
def xavier_uniform(key, shape):
    fan_out, fan_in = shape
    limit = (6.0 / (fan_in + fan_out)) ** 0.5
    return jax.random.uniform(key, shape, jnp.float32, -limit, limit)


def orthogonal(key, shape):
    rows, cols = shape
    a = jax.random.normal(key, (rows, cols), jnp.float32)
    q, r = jnp.linalg.qr(a)
    return q * jnp.sign(jnp.diagonal(r))


def init_lstm_dir(key, din, H):
    """Raw PyTorch-convention params: w_ih (4H, din), w_hh (4H, H), b (4H,)."""
    k1, k2 = jax.random.split(key)
    w_ih = xavier_uniform(k1, (4 * H, din))                    # xavier
    w_hh = orthogonal(k2, (4 * H, H))                          # orthogonal
    b = jnp.zeros((4 * H,), jnp.float32).at[H:2 * H].set(1.0)  # b_ih+b_hh, f=1
    return w_ih, w_hh, b


def fuse_pad_layer(raw_f, raw_b, *, din_pad, row_map):
    """Fuse one bi-LSTM layer's params for the kernel.

    Returns (wih_p, b_p, whhf_p, whhb_p) where wih_p is (din_pad, 8*HP) with
    fwd gates in lanes [0, 4*HP) and bwd gates in [4*HP, 8*HP), each gate
    padded to HP lanes.  row_map: tuples (dst0, dst1, src0, src1) scattering
    the real input rows of w_ih into the padded kernel feature layout.
    """
    wih_p = jnp.zeros((din_pad, 8 * HP), jnp.float32)
    b_p = jnp.zeros((1, 8 * HP), jnp.float32)
    whh_ps = []
    for d, (w_ih, w_hh, b) in enumerate((raw_f, raw_b)):
        H = w_hh.shape[1]
        goff = d * G4
        whh_p = jnp.zeros((HP, 4 * HP), jnp.float32)
        for g in range(4):
            wg = w_ih[g * H:(g + 1) * H, :].T                  # (din, H)
            col0 = goff + g * HP
            for dst0, dst1, src0, src1 in row_map:
                wih_p = wih_p.at[dst0:dst1, col0:col0 + H].set(wg[src0:src1, :])
            whh_p = whh_p.at[0:H, g * HP:g * HP + H].set(
                w_hh[g * H:(g + 1) * H, :].T)
            b_p = b_p.at[0, col0:col0 + H].set(b[g * H:(g + 1) * H])
        whh_ps.append(whh_p)
    return wih_p, b_p, whh_ps[0], whh_ps[1]


def pad_head_params(w1, b1, w2, b2, H2, label_nums):
    """Map fc1/fc2 onto the lane-padded layer-2 concat layout."""
    f1 = w1.shape[0]                                           # 50
    w1_t = w1.T                                                # (50, 50)
    w1p = jnp.zeros((2 * HP, FCP), jnp.float32)
    w1p = w1p.at[0:H2, 0:f1].set(w1_t[0:H2, :])                # fwd half rows
    w1p = w1p.at[HP:HP + H2, 0:f1].set(w1_t[H2:2 * H2, :])     # bwd half rows
    b1p = jnp.zeros((1, FCP), jnp.float32).at[0, 0:f1].set(b1)
    w2p = jnp.zeros((FCP, FCP), jnp.float32).at[0:w2.shape[1], 0:label_nums].set(w2.T)
    # Padded class lanes get -1e30 so they vanish under softmax.
    b2p = jnp.full((1, FCP), -1e30, jnp.float32).at[0, 0:label_nums].set(b2)
    return w1p, b1p, w2p, b2p


# ----------------------------------------------------------------------------
# Pure-JAX reference (for correctness check).
# ----------------------------------------------------------------------------
def lstm_ref_dir(x, w_ih, w_hh, b, reverse):
    T, N, _ = x.shape
    H = w_hh.shape[1]
    h = jnp.zeros((N, H), jnp.float32)
    c = jnp.zeros((N, H), jnp.float32)
    outs = [None] * T
    order = range(T - 1, -1, -1) if reverse else range(T)
    for t in order:
        gates = x[t] @ w_ih.T + h @ w_hh.T + b
        i = jax.nn.sigmoid(gates[:, 0:H])
        f = jax.nn.sigmoid(gates[:, H:2 * H])
        g = jnp.tanh(gates[:, 2 * H:3 * H])
        o = jax.nn.sigmoid(gates[:, 3 * H:4 * H])
        c = f * c + i * g
        h = o * jnp.tanh(c)
        outs[t] = h
    return jnp.stack(outs, axis=0)


def reference_forward(ids, emb, raw1f, raw1b, raw2f, raw2b, w1, b1, w2, b2):
    x = emb[ids]
    h1 = jnp.concatenate([lstm_ref_dir(x, *raw1f, False),
                          lstm_ref_dir(x, *raw1b, True)], axis=-1)
    h2 = jnp.concatenate([lstm_ref_dir(h1, *raw2f, False),
                          lstm_ref_dir(h1, *raw2b, True)], axis=-1)
    pooled = jnp.max(h2, axis=1)
    hdn = jnp.maximum(pooled @ w1.T + b1, 0.0)
    logits = hdn @ w2.T + b2
    return jax.nn.softmax(logits, axis=1)


if __name__ == "__main__":
    B, S = 2, 8                 # inputs: (batch=2, seq=8) token ids
    VOCAB, E = 30524, 768
    H1, H2 = 50, 25
    LABEL_NUMS = 4

    key = jax.random.PRNGKey(0)
    keys = jax.random.split(key, 8)

    emb_table = jax.random.normal(keys[0], (VOCAB, E), jnp.float32)

    raw1f = init_lstm_dir(keys[1], E, H1)
    raw1b = init_lstm_dir(keys[2], E, H1)
    raw2f = init_lstm_dir(keys[3], 2 * H1, H2)
    raw2b = init_lstm_dir(keys[4], 2 * H1, H2)

    w1 = xavier_uniform(keys[5], (50, 50))
    b1 = jnp.zeros((50,), jnp.float32)
    w2 = xavier_uniform(keys[6], (LABEL_NUMS, 50))
    b2 = jnp.zeros((LABEL_NUMS,), jnp.float32)

    # Fused + lane-padded kernel parameters (built once, outside jit).
    row_map1 = ((0, E, 0, E),)
    row_map2 = ((0, H1, 0, H1), (HP, HP + H1, H1, 2 * H1))   # fwd/bwd halves
    wih1, bg1, whh1f, whh1b = fuse_pad_layer(raw1f, raw1b, din_pad=E,
                                             row_map=row_map1)
    wih2, bg2, whh2f, whh2b = fuse_pad_layer(raw2f, raw2b, din_pad=2 * HP,
                                             row_map=row_map2)
    w1p, b1p, w2p, b2p = pad_head_params(w1, b1, w2, b2, H2, LABEL_NUMS)
    pparams = (wih1, bg1, whh1f, whh1b,
               wih2, bg2, whh2f, whh2b,
               w1p, b1p, w2p, b2p)

    ids = jax.random.randint(keys[7], (B, S), 0, VOCAB, dtype=jnp.int32)

    out = forward(ids, emb_table, pparams, label_nums=LABEL_NUMS)
    out = jax.block_until_ready(out)

    assert out.shape == (B, LABEL_NUMS), out.shape
    assert bool(jnp.all(jnp.isfinite(out)))
    # softmax rows sum to ~1 (approx=True reciprocal -> loose tolerance)
    assert bool(jnp.allclose(jnp.sum(out, axis=1), 1.0, atol=1e-2))

    # Check against a pure-JAX reference of the same forward pass.
    ref = reference_forward(ids, emb_table, raw1f, raw1b, raw2f, raw2b,
                            w1, b1, w2, b2)
    assert bool(jnp.allclose(out, ref, atol=2e-2)), (out, ref)

    print("KERNEL_OK")
</pallas_src>

<mosaic_0001>
module attributes {stable_mosaic.version = 11 : i64} {
  func.func @fused_kernel(%arg0: i32, %arg1: memref<2x8x768xf32, #tpu.memory_space<vmem>>, %arg2: memref<768x1024xf32, #tpu.memory_space<vmem>>, %arg3: memref<1x1024xf32, #tpu.memory_space<vmem>>, %arg4: memref<128x512xf32, #tpu.memory_space<vmem>>, %arg5: memref<128x512xf32, #tpu.memory_space<vmem>>, %arg6: memref<256x1024xf32, #tpu.memory_space<vmem>>, %arg7: memref<1x1024xf32, #tpu.memory_space<vmem>>, %arg8: memref<128x512xf32, #tpu.memory_space<vmem>>, %arg9: memref<128x512xf32, #tpu.memory_space<vmem>>, %arg10: memref<256x128xf32, #tpu.memory_space<vmem>>, %arg11: memref<1x128xf32, #tpu.memory_space<vmem>>, %arg12: memref<128x128xf32, #tpu.memory_space<vmem>>, %arg13: memref<1x128xf32, #tpu.memory_space<vmem>>, %arg14: memref<2x128xf32, #tpu.memory_space<vmem>>, %arg15: memref<2x8x256xf32, #tpu.memory_space<vmem>>, %arg16: memref<2x8x256xf32, #tpu.memory_space<vmem>>) attributes {dimension_semantics = [#tpu.dimension_semantics<arbitrary>], iteration_bounds = array<i64: 1>, scalar_prefetch = 0 : i64, scratch_operands = 2 : i64, tpu.core_type = #tpu.core_type<tc>, window_params = [{pipeline_mode = #tpu.pipeline_mode<synchronous>, transform_indices = @transform_0, window_bounds = array<i64: 2, 8, 768>}, {pipeline_mode = #tpu.pipeline_mode<synchronous>, transform_indices = @transform_1, window_bounds = array<i64: 768, 1024>}, {pipeline_mode = #tpu.pipeline_mode<synchronous>, transform_indices = @transform_2, window_bounds = array<i64: 1, 1024>}, {pipeline_mode = #tpu.pipeline_mode<synchronous>, transform_indices = @transform_3, window_bounds = array<i64: 128, 512>}, {pipeline_mode = #tpu.pipeline_mode<synchronous>, transform_indices = @transform_4, window_bounds = array<i64: 128, 512>}, {pipeline_mode = #tpu.pipeline_mode<synchronous>, transform_indices = @transform_5, window_bounds = array<i64: 256, 1024>}, {pipeline_mode = #tpu.pipeline_mode<synchronous>, transform_indices = @transform_6, window_bounds = array<i64: 1, 1024>}, {pipeline_mode = #tpu.pipeline_mode<synchronous>, transform_indices = @transform_7, window_bounds = array<i64: 128, 512>}, {pipeline_mode = #tpu.pipeline_mode<synchronous>, transform_indices = @transform_8, window_bounds = array<i64: 128, 512>}, {pipeline_mode = #tpu.pipeline_mode<synchronous>, transform_indices = @transform_9, window_bounds = array<i64: 256, 128>}, {pipeline_mode = #tpu.pipeline_mode<synchronous>, transform_indices = @transform_10, window_bounds = array<i64: 1, 128>}, {pipeline_mode = #tpu.pipeline_mode<synchronous>, transform_indices = @transform_11, window_bounds = array<i64: 128, 128>}, {pipeline_mode = #tpu.pipeline_mode<synchronous>, transform_indices = @transform_12, window_bounds = array<i64: 1, 128>}, {pipeline_mode = #tpu.pipeline_mode<synchronous>, transform_indices = @transform_13, window_bounds = array<i64: 2, 128>}]} {
    %c0 = arith.constant 0 : index
    %c0_0 = arith.constant 0 : index
    %c0_1 = arith.constant 0 : index
    %0 = vector.load %arg1[%c0, %c0_0, %c0_1] : memref<2x8x768xf32, #tpu.memory_space<vmem>>, vector<2x8x768xf32>
    %1 = vector.shape_cast %0 : vector<2x8x768xf32> to vector<16x768xf32>
    %c0_2 = arith.constant 0 : index
    %c0_3 = arith.constant 0 : index
    %2 = vector.load %arg2[%c0_2, %c0_3] : memref<768x1024xf32, #tpu.memory_space<vmem>>, vector<768x1024xf32>
    %cst = arith.constant dense<0.000000e+00> : vector<16x1024xf32>
    %3 = tpu.matmul %1, %2, %cst {dimension_numbers = #tpu.dot_dimension_numbers<[1], [0], [0], [1], [0, 0, 1, 1], [], []>} : vector<16x768xf32>, vector<768x1024xf32>, vector<16x1024xf32> -> vector<16x1024xf32>
    %c0_4 = arith.constant 0 : index
    %c0_5 = arith.constant 0 : index
    %4 = vector.load %arg3[%c0_4, %c0_5] : memref<1x1024xf32, #tpu.memory_space<vmem>>, vector<1x1024xf32>
    %5 = vector.broadcast %4 : vector<1x1024xf32> to vector<16x1024xf32>
    %6 = arith.addf %3, %5 : vector<16x1024xf32>
    %c0_6 = arith.constant 0 : index
    %c0_7 = arith.constant 0 : index
    %7 = vector.load %arg4[%c0_6, %c0_7] : memref<128x512xf32, #tpu.memory_space<vmem>>, vector<128x512xf32>
    %cst_8 = arith.constant 0.000000e+00 : f32
    %8 = vector.broadcast %cst_8 : f32 to vector<8x128xf32>
    %cst_9 = arith.constant 0.000000e+00 : f32
    %9 = vector.broadcast %cst_9 : f32 to vector<8x128xf32>
    %10 = vector.extract_strided_slice %6 {offsets = [0, 0], sizes = [8, 512], strides = [1, 1]} : vector<16x1024xf32> to vector<8x512xf32>
    %cst_10 = arith.constant dense<0.000000e+00> : vector<8x512xf32>
    %11 = tpu.matmul %8, %7, %cst_10 {dimension_numbers = #tpu.dot_dimension_numbers<[1], [0], [0], [1], [0, 0, 1, 1], [], []>} : vector<8x128xf32>, vector<128x512xf32>, vector<8x512xf32> -> vector<8x512xf32>
    %12 = arith.addf %10, %11 : vector<8x512xf32>
    %13 = vector.extract_strided_slice %12 {offsets = [0, 0], sizes = [8, 128], strides = [1, 1]} : vector<8x512xf32> to vector<8x128xf32>
    %14 = arith.negf %13 : vector<8x128xf32>
    %15 = math.exp %14 : vector<8x128xf32>
    %cst_11 = arith.constant 1.000000e+00 : f32
    %16 = vector.broadcast %cst_11 : f32 to vector<8x128xf32>
    %17 = arith.addf %16, %15 : vector<8x128xf32>
    %18 = arith.divf %16, %17 : vector<8x128xf32>
    %19 = vector.extract_strided_slice %12 {offsets = [0, 128], sizes = [8, 128], strides = [1, 1]} : vector<8x512xf32> to vector<8x128xf32>
    %20 = arith.negf %19 : vector<8x128xf32>
    %21 = math.exp %20 : vector<8x128xf32>
    %cst_12 = arith.constant 1.000000e+00 : f32
    %22 = vector.broadcast %cst_12 : f32 to vector<8x128xf32>
    %23 = arith.addf %22, %21 : vector<8x128xf32>
    %24 = arith.divf %22, %23 : vector<8x128xf32>
    %25 = vector.extract_strided_slice %12 {offsets = [0, 256], sizes = [8, 128], strides = [1, 1]} : vector<8x512xf32> to vector<8x128xf32>
    %26 = math.tanh %25 : vector<8x128xf32>
    %27 = vector.extract_strided_slice %12 {offsets = [0, 384], sizes = [8, 128], strides = [1, 1]} : vector<8x512xf32> to vector<8x128xf32>
    %28 = arith.negf %27 : vector<8x128xf32>
    %29 = math.exp %28 : vector<8x128xf32>
    %cst_13 = arith.constant 1.000000e+00 : f32
    %30 = vector.broadcast %cst_13 : f32 to vector<8x128xf32>
    %31 = arith.addf %30, %29 : vector<8x128xf32>
    %32 = arith.divf %30, %31 : vector<8x128xf32>
    %33 = arith.mulf %24, %9 : vector<8x128xf32>
    %34 = arith.mulf %18, %26 : vector<8x128xf32>
    %35 = arith.addf %33, %34 : vector<8x128xf32>
    %36 = math.tanh %35 : vector<8x128xf32>
    %37 = arith.mulf %32, %36 : vector<8x128xf32>
    %c0_14 = arith.constant 0 : index
    %c0_15 = arith.constant 0 : index
    %c0_16 = arith.constant 0 : index
    %38 = vector.load %arg15[%c0_14, %c0_15, %c0_16] : memref<2x8x256xf32, #tpu.memory_space<vmem>>, vector<1x8x128xf32>
    %39 = vector.shape_cast %38 : vector<1x8x128xf32> to vector<8x128xf32>
    %40 = vector.shape_cast %37 : vector<8x128xf32> to vector<1x8x128xf32>
    tpu.vector_store %arg15[%c0_14, %c0_15, %c0_16], %40 {strides = array<i32>} : memref<2x8x256xf32, #tpu.memory_space<vmem>>, vector<1x8x128xf32>,
    %41 = vector.extract_strided_slice %6 {offsets = [8, 0], sizes = [8, 512], strides = [1, 1]} : vector<16x1024xf32> to vector<8x512xf32>
    %cst_17 = arith.constant dense<0.000000e+00> : vector<8x512xf32>
    %42 = tpu.matmul %37, %7, %cst_17 {dimension_numbers = #tpu.dot_dimension_numbers<[1], [0], [0], [1], [0, 0, 1, 1], [], []>} : vector<8x128xf32>, vector<128x512xf32>, vector<8x512xf32> -> vector<8x512xf32>
    %43 = arith.addf %41, %42 : vector<8x512xf32>
    %44 = vector.extract_strided_slice %43 {offsets = [0, 0], sizes = [8, 128], strides = [1, 1]} : vector<8x512xf32> to vector<8x128xf32>
    %45 = arith.negf %44 : vector<8x128xf32>
    %46 = math.exp %45 : vector<8x128xf32>
    %cst_18 = arith.constant 1.000000e+00 : f32
    %47 = vector.broadcast %cst_18 : f32 to vector<8x128xf32>
    %48 = arith.addf %47, %46 : vector<8x128xf32>
    %49 = arith.divf %47, %48 : vector<8x128xf32>
    %50 = vector.extract_strided_slice %43 {offsets = [0, 128], sizes = [8, 128], strides = [1, 1]} : vector<8x512xf32> to vector<8x128xf32>
    %51 = arith.negf %50 : vector<8x128xf32>
    %52 = math.exp %51 : vector<8x128xf32>
    %cst_19 = arith.constant 1.000000e+00 : f32
    %53 = vector.broadcast %cst_19 : f32 to vector<8x128xf32>
    %54 = arith.addf %53, %52 : vector<8x128xf32>
    %55 = arith.divf %53, %54 : vector<8x128xf32>
    %56 = vector.extract_strided_slice %43 {offsets = [0, 256], sizes = [8, 128], strides = [1, 1]} : vector<8x512xf32> to vector<8x128xf32>
    %57 = math.tanh %56 : vector<8x128xf32>
    %58 = vector.extract_strided_slice %43 {offsets = [0, 384], sizes = [8, 128], strides = [1, 1]} : vector<8x512xf32> to vector<8x128xf32>
    %59 = arith.negf %58 : vector<8x128xf32>
    %60 = math.exp %59 : vector<8x128xf32>
    %cst_20 = arith.constant 1.000000e+00 : f32
    %61 = vector.broadcast %cst_20 : f32 to vector<8x128xf32>
    %62 = arith.addf %61, %60 : vector<8x128xf32>
    %63 = arith.divf %61, %62 : vector<8x128xf32>
    %64 = arith.mulf %55, %35 : vector<8x128xf32>
    %65 = arith.mulf %49, %57 : vector<8x128xf32>
    %66 = arith.addf %64, %65 : vector<8x128xf32>
    %67 = math.tanh %66 : vector<8x128xf32>
    %68 = arith.mulf %63, %67 : vector<8x128xf32>
    %c1 = arith.constant 1 : index
    %c0_21 = arith.constant 0 : index
    %c0_22 = arith.constant 0 : index
    %69 = vector.load %arg15[%c1, %c0_21, %c0_22] : memref<2x8x256xf32, #tpu.memory_space<vmem>>, vector<1x8x128xf32>
    %70 = vector.shape_cast %69 : vector<1x8x128xf32> to vector<8x128xf32>
    %71 = vector.shape_cast %68 : vector<8x128xf32> to vector<1x8x128xf32>
    tpu.vector_store %arg15[%c1, %c0_21, %c0_22], %71 {strides = array<i32>} : memref<2x8x256xf32, #tpu.memory_space<vmem>>, vector<1x8x128xf32>,
    %c0_23 = arith.constant 0 : index
    %c0_24 = arith.constant 0 : index
    %72 = vector.load %arg5[%c0_23, %c0_24] : memref<128x512xf32, #tpu.memory_space<vmem>>, vector<128x512xf32>
    %cst_25 = arith.constant 0.000000e+00 : f32
    %73 = vector.broadcast %cst_25 : f32 to vector<8x128xf32>
    %cst_26 = arith.constant 0.000000e+00 : f32
    %74 = vector.broadcast %cst_26 : f32 to vector<8x128xf32>
    %75 = vector.extract_strided_slice %6 {offsets = [8, 512], sizes = [8, 512], strides = [1, 1]} : vector<16x1024xf32> to vector<8x512xf32>
    %cst_27 = arith.constant dense<0.000000e+00> : vector<8x512xf32>
    %76 = tpu.matmul %73, %72, %cst_27 {dimension_numbers = #tpu.dot_dimension_numbers<[1], [0], [0], [1], [0, 0, 1, 1], [], []>} : vector<8x128xf32>, vector<128x512xf32>, vector<8x512xf32> -> vector<8x512xf32>
    %77 = arith.addf %75, %76 : vector<8x512xf32>
    %78 = vector.extract_strided_slice %77 {offsets = [0, 0], sizes = [8, 128], strides = [1, 1]} : vector<8x512xf32> to vector<8x128xf32>
    %79 = arith.negf %78 : vector<8x128xf32>
    %80 = math.exp %79 : vector<8x128xf32>
    %cst_28 = arith.constant 1.000000e+00 : f32
    %81 = vector.broadcast %cst_28 : f32 to vector<8x128xf32>
    %82 = arith.addf %81, %80 : vector<8x128xf32>
    %83 = arith.divf %81, %82 : vector<8x128xf32>
    %84 = vector.extract_strided_slice %77 {offsets = [0, 128], sizes = [8, 128], strides = [1, 1]} : vector<8x512xf32> to vector<8x128xf32>
    %85 = arith.negf %84 : vector<8x128xf32>
    %86 = math.exp %85 : vector<8x128xf32>
    %cst_29 = arith.constant 1.000000e+00 : f32
    %87 = vector.broadcast %cst_29 : f32 to vector<8x128xf32>
    %88 = arith.addf %87, %86 : vector<8x128xf32>
    %89 = arith.divf %87, %88 : vector<8x128xf32>
    %90 = vector.extract_strided_slice %77 {offsets = [0, 256], sizes = [8, 128], strides = [1, 1]} : vector<8x512xf32> to vector<8x128xf32>
    %91 = math.tanh %90 : vector<8x128xf32>
    %92 = vector.extract_strided_slice %77 {offsets = [0, 384], sizes = [8, 128], strides = [1, 1]} : vector<8x512xf32> to vector<8x128xf32>
    %93 = arith.negf %92 : vector<8x128xf32>
    %94 = math.exp %93 : vector<8x128xf32>
    %cst_30 = arith.constant 1.000000e+00 : f32
    %95 = vector.broadcast %cst_30 : f32 to vector<8x128xf32>
    %96 = arith.addf %95, %94 : vector<8x128xf32>
    %97 = arith.divf %95, %96 : vector<8x128xf32>
    %98 = arith.mulf %89, %74 : vector<8x128xf32>
    %99 = arith.mulf %83, %91 : vector<8x128xf32>
    %100 = arith.addf %98, %99 : vector<8x128xf32>
    %101 = math.tanh %100 : vector<8x128xf32>
    %102 = arith.mulf %97, %101 : vector<8x128xf32>
    %c1_31 = arith.constant 1 : index
    %c0_32 = arith.constant 0 : index
    %c128 = arith.constant 128 : index
    %103 = vector.load %arg15[%c1_31, %c0_32, %c128] : memref<2x8x256xf32, #tpu.memory_space<vmem>>, vector<1x8x128xf32>
    %104 = vector.shape_cast %103 : vector<1x8x128xf32> to vector<8x128xf32>
    %105 = vector.shape_cast %102 : vector<8x128xf32> to vector<1x8x128xf32>
    tpu.vector_store %arg15[%c1_31, %c0_32, %c128], %105 {strides = array<i32>} : memref<2x8x256xf32, #tpu.memory_space<vmem>>, vector<1x8x128xf32>,
    %106 = vector.extract_strided_slice %6 {offsets = [0, 512], sizes = [8, 512], strides = [1, 1]} : vector<16x1024xf32> to vector<8x512xf32>
    %cst_33 = arith.constant dense<0.000000e+00> : vector<8x512xf32>
    %107 = tpu.matmul %102, %72, %cst_33 {dimension_numbers = #tpu.dot_dimension_numbers<[1], [0], [0], [1], [0, 0, 1, 1], [], []>} : vector<8x128xf32>, vector<128x512xf32>, vector<8x512xf32> -> vector<8x512xf32>
    %108 = arith.addf %106, %107 : vector<8x512xf32>
    %109 = vector.extract_strided_slice %108 {offsets = [0, 0], sizes = [8, 128], strides = [1, 1]} : vector<8x512xf32> to vector<8x128xf32>
    %110 = arith.negf %109 : vector<8x128xf32>
    %111 = math.exp %110 : vector<8x128xf32>
    %cst_34 = arith.constant 1.000000e+00 : f32
    %112 = vector.broadcast %cst_34 : f32 to vector<8x128xf32>
    %113 = arith.addf %112, %111 : vector<8x128xf32>
    %114 = arith.divf %112, %113 : vector<8x128xf32>
    %115 = vector.extract_strided_slice %108 {offsets = [0, 128], sizes = [8, 128], strides = [1, 1]} : vector<8x512xf32> to vector<8x128xf32>
    %116 = arith.negf %115 : vector<8x128xf32>
    %117 = math.exp %116 : vector<8x128xf32>
    %cst_35 = arith.constant 1.000000e+00 : f32
    %118 = vector.broadcast %cst_35 : f32 to vector<8x128xf32>
    %119 = arith.addf %118, %117 : vector<8x128xf32>
    %120 = arith.divf %118, %119 : vector<8x128xf32>
    %121 = vector.extract_strided_slice %108 {offsets = [0, 256], sizes = [8, 128], strides = [1, 1]} : vector<8x512xf32> to vector<8x128xf32>
    %122 = math.tanh %121 : vector<8x128xf32>
    %123 = vector.extract_strided_slice %108 {offsets = [0, 384], sizes = [8, 128], strides = [1, 1]} : vector<8x512xf32> to vector<8x128xf32>
    %124 = arith.negf %123 : vector<8x128xf32>
    %125 = math.exp %124 : vector<8x128xf32>
    %cst_36 = arith.constant 1.000000e+00 : f32
    %126 = vector.broadcast %cst_36 : f32 to vector<8x128xf32>
    %127 = arith.addf %126, %125 : vector<8x128xf32>
    %128 = arith.divf %126, %127 : vector<8x128xf32>
    %129 = arith.mulf %120, %100 : vector<8x128xf32>
    %130 = arith.mulf %114, %122 : vector<8x128xf32>
    %131 = arith.addf %129, %130 : vector<8x128xf32>
    %132 = math.tanh %131 : vector<8x128xf32>
    %133 = arith.mulf %128, %132 : vector<8x128xf32>
    %c0_37 = arith.constant 0 : index
    %c0_38 = arith.constant 0 : index
    %c128_39 = arith.constant 128 : index
    %134 = vector.load %arg15[%c0_37, %c0_38, %c128_39] : memref<2x8x256xf32, #tpu.memory_space<vmem>>, vector<1x8x128xf32>
    %135 = vector.shape_cast %134 : vector<1x8x128xf32> to vector<8x128xf32>
    %136 = vector.shape_cast %133 : vector<8x128xf32> to vector<1x8x128xf32>
    tpu.vector_store %arg15[%c0_37, %c0_38, %c128_39], %136 {strides = array<i32>} : memref<2x8x256xf32, #tpu.memory_space<vmem>>, vector<1x8x128xf32>,
    %c0_40 = arith.constant 0 : index
    %c0_41 = arith.constant 0 : index
    %c0_42 = arith.constant 0 : index
    %137 = vector.load %arg15[%c0_40, %c0_41, %c0_42] : memref<2x8x256xf32, #tpu.memory_space<vmem>>, vector<2x8x256xf32>
    %138 = vector.shape_cast %137 : vector<2x8x256xf32> to vector<16x256xf32>
    %c0_43 = arith.constant 0 : index
    %c0_44 = arith.constant 0 : index
    %139 = vector.load %arg6[%c0_43, %c0_44] : memref<256x1024xf32, #tpu.memory_space<vmem>>, vector<256x1024xf32>
    %cst_45 = arith.constant dense<0.000000e+00> : vector<16x1024xf32>
    %140 = tpu.matmul %138, %139, %cst_45 {dimension_numbers = #tpu.dot_dimension_numbers<[1], [0], [0], [1], [0, 0, 1, 1], [], []>} : vector<16x256xf32>, vector<256x1024xf32>, vector<16x1024xf32> -> vector<16x1024xf32>
    %c0_46 = arith.constant 0 : index
    %c0_47 = arith.constant 0 : index
    %141 = vector.load %arg7[%c0_46, %c0_47] : memref<1x1024xf32, #tpu.memory_space<vmem>>, vector<1x1024xf32>
    %142 = vector.broadcast %141 : vector<1x1024xf32> to vector<16x1024xf32>
    %143 = arith.addf %140, %142 : vector<16x1024xf32>
    %c0_48 = arith.constant 0 : index
    %c0_49 = arith.constant 0 : index
    %144 = vector.load %arg8[%c0_48, %c0_49] : memref<128x512xf32, #tpu.memory_space<vmem>>, vector<128x512xf32>
    %cst_50 = arith.constant 0.000000e+00 : f32
    %145 = vector.broadcast %cst_50 : f32 to vector<8x128xf32>
    %cst_51 = arith.constant 0.000000e+00 : f32
    %146 = vector.broadcast %cst_51 : f32 to vector<8x128xf32>
    %147 = vector.extract_strided_slice %143 {offsets = [0, 0], sizes = [8, 512], strides = [1, 1]} : vector<16x1024xf32> to vector<8x512xf32>
    %cst_52 = arith.constant dense<0.000000e+00> : vector<8x512xf32>
    %148 = tpu.matmul %145, %144, %cst_52 {dimension_numbers = #tpu.dot_dimension_numbers<[1], [0], [0], [1], [0, 0, 1, 1], [], []>} : vector<8x128xf32>, vector<128x512xf32>, vector<8x512xf32> -> vector<8x512xf32>
    %149 = arith.addf %147, %148 : vector<8x512xf32>
    %150 = vector.extract_strided_slice %149 {offsets = [0, 0], sizes = [8, 128], strides = [1, 1]} : vector<8x512xf32> to vector<8x128xf32>
    %151 = arith.negf %150 : vector<8x128xf32>
    %152 = math.exp %151 : vector<8x128xf32>
    %cst_53 = arith.constant 1.000000e+00 : f32
    %153 = vector.broadcast %cst_53 : f32 to vector<8x128xf32>
    %154 = arith.addf %153, %152 : vector<8x128xf32>
    %155 = arith.divf %153, %154 : vector<8x128xf32>
    %156 = vector.extract_strided_slice %149 {offsets = [0, 128], sizes = [8, 128], strides = [1, 1]} : vector<8x512xf32> to vector<8x128xf32>
    %157 = arith.negf %156 : vector<8x128xf32>
    %158 = math.exp %157 : vector<8x128xf32>
    %cst_54 = arith.constant 1.000000e+00 : f32
    %159 = vector.broadcast %cst_54 : f32 to vector<8x128xf32>
    %160 = arith.addf %159, %158 : vector<8x128xf32>
    %161 = arith.divf %159, %160 : vector<8x128xf32>
    %162 = vector.extract_strided_slice %149 {offsets = [0, 256], sizes = [8, 128], strides = [1, 1]} : vector<8x512xf32> to vector<8x128xf32>
    %163 = math.tanh %162 : vector<8x128xf32>
    %164 = vector.extract_strided_slice %149 {offsets = [0, 384], sizes = [8, 128], strides = [1, 1]} : vector<8x512xf32> to vector<8x128xf32>
    %165 = arith.negf %164 : vector<8x128xf32>
    %166 = math.exp %165 : vector<8x128xf32>
    %cst_55 = arith.constant 1.000000e+00 : f32
    %167 = vector.broadcast %cst_55 : f32 to vector<8x128xf32>
    %168 = arith.addf %167, %166 : vector<8x128xf32>
    %169 = arith.divf %167, %168 : vector<8x128xf32>
    %170 = arith.mulf %161, %146 : vector<8x128xf32>
    %171 = arith.mulf %155, %163 : vector<8x128xf32>
    %172 = arith.addf %170, %171 : vector<8x128xf32>
    %173 = math.tanh %172 : vector<8x128xf32>
    %174 = arith.mulf %169, %173 : vector<8x128xf32>
    %c0_56 = arith.constant 0 : index
    %c0_57 = arith.constant 0 : index
    %c0_58 = arith.constant 0 : index
    %175 = vector.load %arg16[%c0_56, %c0_57, %c0_58] : memref<2x8x256xf32, #tpu.memory_space<vmem>>, vector<1x8x128xf32>
    %176 = vector.shape_cast %175 : vector<1x8x128xf32> to vector<8x128xf32>
    %177 = vector.shape_cast %174 : vector<8x128xf32> to vector<1x8x128xf32>
    tpu.vector_store %arg16[%c0_56, %c0_57, %c0_58], %177 {strides = array<i32>} : memref<2x8x256xf32, #tpu.memory_space<vmem>>, vector<1x8x128xf32>,
    %178 = vector.extract_strided_slice %143 {offsets = [8, 0], sizes = [8, 512], strides = [1, 1]} : vector<16x1024xf32> to vector<8x512xf32>
    %cst_59 = arith.constant dense<0.000000e+00> : vector<8x512xf32>
    %179 = tpu.matmul %174, %144, %cst_59 {dimension_numbers = #tpu.dot_dimension_numbers<[1], [0], [0], [1], [0, 0, 1, 1], [], []>} : vector<8x128xf32>, vector<128x512xf32>, vector<8x512xf32> -> vector<8x512xf32>
    %180 = arith.addf %178, %179 : vector<8x512xf32>
    %181 = vector.extract_strided_slice %180 {offsets = [0, 0], sizes = [8, 128], strides = [1, 1]} : vector<8x512xf32> to vector<8x128xf32>
    %182 = arith.negf %181 : vector<8x128xf32>
    %183 = math.exp %182 : vector<8x128xf32>
    %cst_60 = arith.constant 1.000000e+00 : f32
    %184 = vector.broadcast %cst_60 : f32 to vector<8x128xf32>
    %185 = arith.addf %184, %183 : vector<8x128xf32>
    %186 = arith.divf %184, %185 : vector<8x128xf32>
    %187 = vector.extract_strided_slice %180 {offsets = [0, 128], sizes = [8, 128], strides = [1, 1]} : vector<8x512xf32> to vector<8x128xf32>
    %188 = arith.negf %187 : vector<8x128xf32>
    %189 = math.exp %188 : vector<8x128xf32>
    %cst_61 = arith.constant 1.000000e+00 : f32
    %190 = vector.broadcast %cst_61 : f32 to vector<8x128xf32>
    %191 = arith.addf %190, %189 : vector<8x128xf32>
    %192 = arith.divf %190, %191 : vector<8x128xf32>
    %193 = vector.extract_strided_slice %180 {offsets = [0, 256], sizes = [8, 128], strides = [1, 1]} : vector<8x512xf32> to vector<8x128xf32>
    %194 = math.tanh %193 : vector<8x128xf32>
    %195 = vector.extract_strided_slice %180 {offsets = [0, 384], sizes = [8, 128], strides = [1, 1]} : vector<8x512xf32> to vector<8x128xf32>
    %196 = arith.negf %195 : vector<8x128xf32>
    %197 = math.exp %196 : vector<8x128xf32>
    %cst_62 = arith.constant 1.000000e+00 : f32
    %198 = vector.broadcast %cst_62 : f32 to vector<8x128xf32>
    %199 = arith.addf %198, %197 : vector<8x128xf32>
    %200 = arith.divf %198, %199 : vector<8x128xf32>
    %201 = arith.mulf %192, %172 : vector<8x128xf32>
    %202 = arith.mulf %186, %194 : vector<8x128xf32>
    %203 = arith.addf %201, %202 : vector<8x128xf32>
    %204 = math.tanh %203 : vector<8x128xf32>
    %205 = arith.mulf %200, %204 : vector<8x128xf32>
    %c1_63 = arith.constant 1 : index
    %c0_64 = arith.constant 0 : index
    %c0_65 = arith.constant 0 : index
    %206 = vector.load %arg16[%c1_63, %c0_64, %c0_65] : memref<2x8x256xf32, #tpu.memory_space<vmem>>, vector<1x8x128xf32>
    %207 = vector.shape_cast %206 : vector<1x8x128xf32> to vector<8x128xf32>
    %208 = vector.shape_cast %205 : vector<8x128xf32> to vector<1x8x128xf32>
    tpu.vector_store %arg16[%c1_63, %c0_64, %c0_65], %208 {strides = array<i32>} : memref<2x8x256xf32, #tpu.memory_space<vmem>>, vector<1x8x128xf32>,
    %c0_66 = arith.constant 0 : index
    %c0_67 = arith.constant 0 : index
    %209 = vector.load %arg9[%c0_66, %c0_67] : memref<128x512xf32, #tpu.memory_space<vmem>>, vector<128x512xf32>
    %cst_68 = arith.constant 0.000000e+00 : f32
    %210 = vector.broadcast %cst_68 : f32 to vector<8x128xf32>
    %cst_69 = arith.constant 0.000000e+00 : f32
    %211 = vector.broadcast %cst_69 : f32 to vector<8x128xf32>
    %212 = vector.extract_strided_slice %143 {offsets = [8, 512], sizes = [8, 512], strides = [1, 1]} : vector<16x1024xf32> to vector<8x512xf32>
    %cst_70 = arith.constant dense<0.000000e+00> : vector<8x512xf32>
    %213 = tpu.matmul %210, %209, %cst_70 {dimension_numbers = #tpu.dot_dimension_numbers<[1], [0], [0], [1], [0, 0, 1, 1], [], []>} : vector<8x128xf32>, vector<128x512xf32>, vector<8x512xf32> -> vector<8x512xf32>
    %214 = arith.addf %212, %213 : vector<8x512xf32>
    %215 = vector.extract_strided_slice %214 {offsets = [0, 0], sizes = [8, 128], strides = [1, 1]} : vector<8x512xf32> to vector<8x128xf32>
    %216 = arith.negf %215 : vector<8x128xf32>
    %217 = math.exp %216 : vector<8x128xf32>
    %cst_71 = arith.constant 1.000000e+00 : f32
    %218 = vector.broadcast %cst_71 : f32 to vector<8x128xf32>
    %219 = arith.addf %218, %217 : vector<8x128xf32>
    %220 = arith.divf %218, %219 : vector<8x128xf32>
    %221 = vector.extract_strided_slice %214 {offsets = [0, 128], sizes = [8, 128], strides = [1, 1]} : vector<8x512xf32> to vector<8x128xf32>
    %222 = arith.negf %221 : vector<8x128xf32>
    %223 = math.exp %222 : vector<8x128xf32>
    %cst_72 = arith.constant 1.000000e+00 : f32
    %224 = vector.broadcast %cst_72 : f32 to vector<8x128xf32>
    %225 = arith.addf %224, %223 : vector<8x128xf32>
    %226 = arith.divf %224, %225 : vector<8x128xf32>
    %227 = vector.extract_strided_slice %214 {offsets = [0, 256], sizes = [8, 128], strides = [1, 1]} : vector<8x512xf32> to vector<8x128xf32>
    %228 = math.tanh %227 : vector<8x128xf32>
    %229 = vector.extract_strided_slice %214 {offsets = [0, 384], sizes = [8, 128], strides = [1, 1]} : vector<8x512xf32> to vector<8x128xf32>
    %230 = arith.negf %229 : vector<8x128xf32>
    %231 = math.exp %230 : vector<8x128xf32>
    %cst_73 = arith.constant 1.000000e+00 : f32
    %232 = vector.broadcast %cst_73 : f32 to vector<8x128xf32>
    %233 = arith.addf %232, %231 : vector<8x128xf32>
    %234 = arith.divf %232, %233 : vector<8x128xf32>
    %235 = arith.mulf %226, %211 : vector<8x128xf32>
    %236 = arith.mulf %220, %228 : vector<8x128xf32>
    %237 = arith.addf %235, %236 : vector<8x128xf32>
    %238 = math.tanh %237 : vector<8x128xf32>
    %239 = arith.mulf %234, %238 : vector<8x128xf32>
    %c1_74 = arith.constant 1 : index
    %c0_75 = arith.constant 0 : index
    %c128_76 = arith.constant 128 : index
    %240 = vector.load %arg16[%c1_74, %c0_75, %c128_76] : memref<2x8x256xf32, #tpu.memory_space<vmem>>, vector<1x8x128xf32>
    %241 = vector.shape_cast %240 : vector<1x8x128xf32> to vector<8x128xf32>
    %242 = vector.shape_cast %239 : vector<8x128xf32> to vector<1x8x128xf32>
    tpu.vector_store %arg16[%c1_74, %c0_75, %c128_76], %242 {strides = array<i32>} : memref<2x8x256xf32, #tpu.memory_space<vmem>>, vector<1x8x128xf32>,
    %243 = vector.extract_strided_slice %143 {offsets = [0, 512], sizes = [8, 512], strides = [1, 1]} : vector<16x1024xf32> to vector<8x512xf32>
    %cst_77 = arith.constant dense<0.000000e+00> : vector<8x512xf32>
    %244 = tpu.matmul %239, %209, %cst_77 {dimension_numbers = #tpu.dot_dimension_numbers<[1], [0], [0], [1], [0, 0, 1, 1], [], []>} : vector<8x128xf32>, vector<128x512xf32>, vector<8x512xf32> -> vector<8x512xf32>
    %245 = arith.addf %243, %244 : vector<8x512xf32>
    %246 = vector.extract_strided_slice %245 {offsets = [0, 0], sizes = [8, 128], strides = [1, 1]} : vector<8x512xf32> to vector<8x128xf32>
    %247 = arith.negf %246 : vector<8x128xf32>
    %248 = math.exp %247 : vector<8x128xf32>
    %cst_78 = arith.constant 1.000000e+00 : f32
    %249 = vector.broadcast %cst_78 : f32 to vector<8x128xf32>
    %250 = arith.addf %249, %248 : vector<8x128xf32>
    %251 = arith.divf %249, %250 : vector<8x128xf32>
    %252 = vector.extract_strided_slice %245 {offsets = [0, 128], sizes = [8, 128], strides = [1, 1]} : vector<8x512xf32> to vector<8x128xf32>
    %253 = arith.negf %252 : vector<8x128xf32>
    %254 = math.exp %253 : vector<8x128xf32>
    %cst_79 = arith.constant 1.000000e+00 : f32
    %255 = vector.broadcast %cst_79 : f32 to vector<8x128xf32>
    %256 = arith.addf %255, %254 : vector<8x128xf32>
    %257 = arith.divf %255, %256 : vector<8x128xf32>
    %258 = vector.extract_strided_slice %245 {offsets = [0, 256], sizes = [8, 128], strides = [1, 1]} : vector<8x512xf32> to vector<8x128xf32>
    %259 = math.tanh %258 : vector<8x128xf32>
    %260 = vector.extract_strided_slice %245 {offsets = [0, 384], sizes = [8, 128], strides = [1, 1]} : vector<8x512xf32> to vector<8x128xf32>
    %261 = arith.negf %260 : vector<8x128xf32>
    %262 = math.exp %261 : vector<8x128xf32>
    %cst_80 = arith.constant 1.000000e+00 : f32
    %263 = vector.broadcast %cst_80 : f32 to vector<8x128xf32>
    %264 = arith.addf %263, %262 : vector<8x128xf32>
    %265 = arith.divf %263, %264 : vector<8x128xf32>
    %266 = arith.mulf %257, %237 : vector<8x128xf32>
    %267 = arith.mulf %251, %259 : vector<8x128xf32>
    %268 = arith.addf %266, %267 : vector<8x128xf32>
    %269 = math.tanh %268 : vector<8x128xf32>
    %270 = arith.mulf %265, %269 : vector<8x128xf32>
    %c0_81 = arith.constant 0 : index
    %c0_82 = arith.constant 0 : index
    %c128_83 = arith.constant 128 : index
    %271 = vector.load %arg16[%c0_81, %c0_82, %c128_83] : memref<2x8x256xf32, #tpu.memory_space<vmem>>, vector<1x8x128xf32>
    %272 = vector.shape_cast %271 : vector<1x8x128xf32> to vector<8x128xf32>
    %273 = vector.shape_cast %270 : vector<8x128xf32> to vector<1x8x128xf32>
    tpu.vector_store %arg16[%c0_81, %c0_82, %c128_83], %273 {strides = array<i32>} : memref<2x8x256xf32, #tpu.memory_space<vmem>>, vector<1x8x128xf32>,
    %c0_84 = arith.constant 0 : index
    %c0_85 = arith.constant 0 : index
    %c0_86 = arith.constant 0 : index
    %274 = vector.load %arg16[%c0_84, %c0_85, %c0_86] : memref<2x8x256xf32, #tpu.memory_space<vmem>>, vector<2x8x256xf32>
    %cst_87 = arith.constant dense<0xFF800000> : vector<2x256xf32>
    %275 = vector.multi_reduction <maximumf>, %274, %cst_87 [1] : vector<2x8x256xf32> to vector<2x256xf32>
    %c0_88 = arith.constant 0 : index
    %c0_89 = arith.constant 0 : index
    %276 = vector.load %arg10[%c0_88, %c0_89] : memref<256x128xf32, #tpu.memory_space<vmem>>, vector<256x128xf32>
    %cst_90 = arith.constant dense<0.000000e+00> : vector<2x128xf32>
    %277 = tpu.matmul %275, %276, %cst_90 {dimension_numbers = #tpu.dot_dimension_numbers<[1], [0], [0], [1], [0, 0, 1, 1], [], []>} : vector<2x256xf32>, vector<256x128xf32>, vector<2x128xf32> -> vector<2x128xf32>
    %c0_91 = arith.constant 0 : index
    %c0_92 = arith.constant 0 : index
    %278 = vector.load %arg11[%c0_91, %c0_92] : memref<1x128xf32, #tpu.memory_space<vmem>>, vector<1x128xf32>
    %279 = vector.broadcast %278 : vector<1x128xf32> to vector<2x128xf32>
    %280 = arith.addf %277, %279 : vector<2x128xf32>
    %cst_93 = arith.constant 0.000000e+00 : f32
    %281 = vector.broadcast %cst_93 : f32 to vector<2x128xf32>
    %282 = arith.maximumf %280, %281 : vector<2x128xf32>
    %c0_94 = arith.constant 0 : index
    %c0_95 = arith.constant 0 : index
    %283 = vector.load %arg12[%c0_94, %c0_95] : memref<128x128xf32, #tpu.memory_space<vmem>>, vector<128x128xf32>
    %cst_96 = arith.constant dense<0.000000e+00> : vector<2x128xf32>
    %284 = tpu.matmul %282, %283, %cst_96 {dimension_numbers = #tpu.dot_dimension_numbers<[1], [0], [0], [1], [0, 0, 1, 1], [], []>} : vector<2x128xf32>, vector<128x128xf32>, vector<2x128xf32> -> vector<2x128xf32>
    %c0_97 = arith.constant 0 : index
    %c0_98 = arith.constant 0 : index
    %285 = vector.load %arg13[%c0_97, %c0_98] : memref<1x128xf32, #tpu.memory_space<vmem>>, vector<1x128xf32>
    %286 = vector.broadcast %285 : vector<1x128xf32> to vector<2x128xf32>
    %287 = arith.addf %284, %286 : vector<2x128xf32>
    %cst_99 = arith.constant dense<0xFF800000> : vector<2xf32>
    %288 = vector.multi_reduction <maximumf>, %287, %cst_99 [1] : vector<2x128xf32> to vector<2xf32>
    %289 = vector.shape_cast %288 : vector<2xf32> to vector<2x1xf32>
    %290 = vector.broadcast %289 : vector<2x1xf32> to vector<2x128xf32>
    %291 = arith.subf %287, %290 : vector<2x128xf32>
    %292 = math.exp %291 : vector<2x128xf32>
    %cst_100 = arith.constant dense<0.000000e+00> : vector<2xf32>
    %293 = vector.multi_reduction <add>, %292, %cst_100 [1] : vector<2x128xf32> to vector<2xf32>
    %294 = vector.shape_cast %293 : vector<2xf32> to vector<2x1xf32>
    %295 = tpu.reciprocal %294 {approx = true} : vector<2x1xf32> -> vector<2x1xf32>
    %296 = vector.broadcast %295 : vector<2x1xf32> to vector<2x128xf32>
    %297 = arith.mulf %292, %296 : vector<2x128xf32>
    %c0_101 = arith.constant 0 : index
    %c0_102 = arith.constant 0 : index
    %298 = vector.load %arg14[%c0_101, %c0_102] : memref<2x128xf32, #tpu.memory_space<vmem>>, vector<2x128xf32>
    tpu.vector_store %arg14[%c0_101, %c0_102], %297 {strides = array<i32>} : memref<2x128xf32, #tpu.memory_space<vmem>>, vector<2x128xf32>,
    return
  }
  func.func @transform_0(%arg0: i32) -> (i32, i32, i32) {
    %c0_i32 = arith.constant 0 : i32
    %c0_i32_0 = arith.constant 0 : i32
    %c0_i32_1 = arith.constant 0 : i32
    %c0_i32_2 = arith.constant 0 : i32
    return %c0_i32, %c0_i32_0, %c0_i32_1 : i32, i32, i32
  }
  func.func @transform_1(%arg0: i32) -> (i32, i32) {
    %c0_i32 = arith.constant 0 : i32
    %c0_i32_0 = arith.constant 0 : i32
    %c0_i32_1 = arith.constant 0 : i32
    return %c0_i32, %c0_i32_0 : i32, i32
  }
  func.func @transform_2(%arg0: i32) -> (i32, i32) {
    %c0_i32 = arith.constant 0 : i32
    %c0_i32_0 = arith.constant 0 : i32
    %c0_i32_1 = arith.constant 0 : i32
    return %c0_i32, %c0_i32_0 : i32, i32
  }
  func.func @transform_3(%arg0: i32) -> (i32, i32) {
    %c0_i32 = arith.constant 0 : i32
    %c0_i32_0 = arith.constant 0 : i32
    %c0_i32_1 = arith.constant 0 : i32
    return %c0_i32, %c0_i32_0 : i32, i32
  }
  func.func @transform_4(%arg0: i32) -> (i32, i32) {
    %c0_i32 = arith.constant 0 : i32
    %c0_i32_0 = arith.constant 0 : i32
    %c0_i32_1 = arith.constant 0 : i32
    return %c0_i32, %c0_i32_0 : i32, i32
  }
  func.func @transform_5(%arg0: i32) -> (i32, i32) {
    %c0_i32 = arith.constant 0 : i32
    %c0_i32_0 = arith.constant 0 : i32
    %c0_i32_1 = arith.constant 0 : i32
    return %c0_i32, %c0_i32_0 : i32, i32
  }
  func.func @transform_6(%arg0: i32) -> (i32, i32) {
    %c0_i32 = arith.constant 0 : i32
    %c0_i32_0 = arith.constant 0 : i32
    %c0_i32_1 = arith.constant 0 : i32
    return %c0_i32, %c0_i32_0 : i32, i32
  }
  func.func @transform_7(%arg0: i32) -> (i32, i32) {
    %c0_i32 = arith.constant 0 : i32
    %c0_i32_0 = arith.constant 0 : i32
    %c0_i32_1 = arith.constant 0 : i32
    return %c0_i32, %c0_i32_0 : i32, i32
  }
  func.func @transform_8(%arg0: i32) -> (i32, i32) {
    %c0_i32 = arith.constant 0 : i32
    %c0_i32_0 = arith.constant 0 : i32
    %c0_i32_1 = arith.constant 0 : i32
    return %c0_i32, %c0_i32_0 : i32, i32
  }
  func.func @transform_9(%arg0: i32) -> (i32, i32) {
    %c0_i32 = arith.constant 0 : i32
    %c0_i32_0 = arith.constant 0 : i32
    %c0_i32_1 = arith.constant 0 : i32
    return %c0_i32, %c0_i32_0 : i32, i32
  }
  func.func @transform_10(%arg0: i32) -> (i32, i32) {
    %c0_i32 = arith.constant 0 : i32
    %c0_i32_0 = arith.constant 0 : i32
    %c0_i32_1 = arith.constant 0 : i32
    return %c0_i32, %c0_i32_0 : i32, i32
  }
  func.func @transform_11(%arg0: i32) -> (i32, i32) {
    %c0_i32 = arith.constant 0 : i32
    %c0_i32_0 = arith.constant 0 : i32
    %c0_i32_1 = arith.constant 0 : i32
    return %c0_i32, %c0_i32_0 : i32, i32
  }
  func.func @transform_12(%arg0: i32) -> (i32, i32) {
    %c0_i32 = arith.constant 0 : i32
    %c0_i32_0 = arith.constant 0 : i32
    %c0_i32_1 = arith.constant 0 : i32
    return %c0_i32, %c0_i32_0 : i32, i32
  }
  func.func @transform_13(%arg0: i32) -> (i32, i32) {
    %c0_i32 = arith.constant 0 : i32
    %c0_i32_0 = arith.constant 0 : i32
    %c0_i32_1 = arith.constant 0 : i32
    return %c0_i32, %c0_i32_0 : i32, i32
  }
}

</mosaic_0001>

<bundles_post_ra>
// kernel: forward.1
= control target key start
LH: loop header
LB: loop body
LE: loop exit
PB: predicated region body
PF: predicated region fallthrough
CT: control target
= control target key end

     0   :  { %18 = vsyncpa [#allocation5], 0  ;;  %s6635_s0 = inlined_call_operand.vmem [shape: f32[2,8,768], index: 0, kind: input, shape index: {}]   ;;  %s6636_s1 = inlined_call_operand.hbm [shape: f32[768,1024], index: 1, kind: input, shape index: {}]   ;;  %s6637_s2 = inlined_call_operand.hbm [shape: f32[1,1024], index: 2, kind: input, shape index: {}]   ;;  %s6638_s3 = inlined_call_operand.hbm [shape: f32[128,512], index: 3, kind: input, shape index: {}]   ;;  %s6639_s4 = inlined_call_operand.hbm [shape: f32[128,512], index: 4, kind: input, shape index: {}]   ;;  %s6640_s5 = inlined_call_operand.hbm [shape: f32[256,1024], index: 5, kind: input, shape index: {}]   ;;  %s6641_s6 = inlined_call_operand.hbm [shape: f32[1,1024], index: 6, kind: input, shape index: {}]   ;;  %s6642_s7 = inlined_call_operand.hbm [shape: f32[128,512], index: 7, kind: input, shape index: {}]   ;;  %s6643_s8 = inlined_call_operand.hbm [shape: f32[128,512], index: 8, kind: input, shape index: {}]   ;;  %s6644_s9 = inlined_call_operand.hbm [shape: f32[256,128], index: 9, kind: input, shape index: {}]   ;;  %s6645_s10 = inlined_call_operand.hbm [shape: f32[1,128], index: 10, kind: input, shape index: {}]   ;;  %s6646_s11 = inlined_call_operand.hbm [shape: f32[128,128], index: 11, kind: input, shape index: {}]   ;;  %s6647_s12 = inlined_call_operand.hbm [shape: f32[1,128], index: 12, kind: input, shape index: {}]   ;;  %s6648_s13 = inlined_call_operand.hbm [shape: f32[2,128], index: 13, kind: output, shape index: {}]  }
   0x1   :  { %19 = vsyncpa [#allocation8], 0 }
   0x2   :  { %20 = vsyncpa [#allocation11], 0 }
   0x3   :  { %21 = vsyncpa [#allocation14], 0 }
   0x4   :  { %22 = vsyncpa [#allocation17], 0 }
   0x5   :  { %23 = vsyncpa [#allocation20], 0 }
   0x6   :  { %24 = vsyncpa [#allocation23], 0 }
   0x7   :  { %25 = vsyncpa [#allocation6], 0  ;;  %s5013_s25 = smov [#allocation7]  }
   0x8   :  { %s46_s26 = sshll.u32 %s5013_s25, 4  ;;  %s47_s26 = int_to_ptr.vmem [resolvable:$true] %s46_s26 }
   0x9   :  { %s4745_s27 = scalar_lea.vmem %s47_s26, 128  ;;  %p4750_p1 = scmp.lt.s32.totalorder %s47_s26, %s47_s26 }
   0xa   :  { %p4746_p0 = scmp.ne.s32.totalorder %s47_s26, %s4745_s27  ;;  %p4751_p2 = scmp.lt.s32.totalorder %s4745_s27, %s4745_s27 }
   0xc   :  { %p4752_p3 = por %p4751_p2, %p4750_p1 }
   0xe   :  { %p4753_p4 = pnand %p4752_p3, %p4746_p0 }
  0x10   :  { %4756 = shalt.err (!%p4753_p4)
}
  0x11   :  { %49 = dma.hbm_to_vmem [thread:$0]  %s6637_s2, 128, %s47_s26, [#allocation8]  }
  0x12   :  { %s5014_s30 = smov [#allocation10]   ;;  %s5015_s15 = smov [#allocation13]  }
  0x13   :  { %s67_s14 = sshll.u32 %s5014_s30, 4  ;;  %s92_s16 = sshll.u32 %s5015_s15, 4  ;;  %s68_s14 = int_to_ptr.vmem [resolvable:$true] %s67_s14  ;;  %s93_s16 = int_to_ptr.vmem [resolvable:$true] %s92_s16 }
  0x14   :  { %s4765_s17 = scalar_lea.vmem %s68_s14, 8192  ;;  %p4770_p6 = scmp.lt.s32.totalorder %s68_s14, %s68_s14 }
  0x15   :  { %p4766_p5 = scmp.ne.s32.totalorder %s68_s14, %s4765_s17  ;;  %p4771_p7 = scmp.lt.s32.totalorder %s4765_s17, %s4765_s17 }
  0x17   :  { %p4772_p8 = por %p4771_p7, %p4770_p6 }
  0x19   :  { %p4773_p9 = pnand %p4772_p8, %p4766_p5 }
  0x1b   :  { %4776 = shalt.err (!%p4773_p9)
}
  0x1c   :  { %s5016_s18 = smov 512   ;;  %s5017_s19 = smov 32  }
  0x1d   :  { %73 = dma.hbm_to_vmem [thread:$0]  %s6639_s4, 8192, %s68_s14, [#allocation11], %s5016_s18, %s5016_s18, %s5017_s19  }
  0x1e   :  { %s4785_s2 = scalar_lea.vmem %s93_s16, 128  ;;  %p4790_p11 = scmp.lt.s32.totalorder %s93_s16, %s93_s16 }
  0x1f   :  { %p4786_p10 = scmp.ne.s32.totalorder %s93_s16, %s4785_s2  ;;  %p4791_p12 = scmp.lt.s32.totalorder %s4785_s2, %s4785_s2 }
  0x21   :  { %p4792_p13 = por %p4791_p12, %p4790_p11 }
  0x23   :  { %p4793_p0 = pnand %p4792_p13, %p4786_p10 }
  0x25   :  { %4796 = shalt.err (!%p4793_p0)
}
  0x26   :  { %95 = dma.hbm_to_vmem [thread:$0]  %s6641_s6, 128, %s93_s16, [#allocation14]  }
  0x27   :  { %s5018_s24 = smov [#allocation16]   ;;  %s5019_s26 = smov [#allocation19]  }
  0x28   :  { %s113_s25 = sshll.u32 %s5018_s24, 4  ;;  %s138_s27 = sshll.u32 %s5019_s26, 4  ;;  %s114_s25 = int_to_ptr.vmem [resolvable:$true] %s113_s25  ;;  %s139_s27 = int_to_ptr.vmem [resolvable:$true] %s138_s27 }
  0x29   :  { %s4805_s28 = scalar_lea.vmem %s114_s25, 8192  ;;  %p4810_p2 = scmp.lt.s32.totalorder %s114_s25, %s114_s25 }
  0x2a   :  { %p4806_p1 = scmp.ne.s32.totalorder %s114_s25, %s4805_s28  ;;  %p4811_p3 = scmp.lt.s32.totalorder %s4805_s28, %s4805_s28 }
  0x2c   :  { %p4812_p4 = por %p4811_p3, %p4810_p2 }
  0x2e   :  { %p4813_p5 = pnand %p4812_p4, %p4806_p1 }
  0x30   :  { %4816 = shalt.err (!%p4813_p5)
}
  0x31   :  { %119 = dma.hbm_to_vmem [thread:$0]  %s6643_s8, 8192, %s114_s25, [#allocation17], %s5016_s18, %s5016_s18, %s5017_s19  }
  0x32   :  { %s4825_s6 = scalar_lea.vmem %s139_s27, 16  ;;  %s4829_s30 = scalar_lea.vmem %s139_s27, 32 }
  0x33   :  { %p4826_p6 = scmp.ne.s32.totalorder %s139_s27, %s4825_s6  ;;  %p4830_p7 = scmp.lt.s32.totalorder %s139_s27, %s139_s27 }
  0x34   :  { %p4831_p8 = scmp.lt.s32.totalorder %s4829_s30, %s4825_s6 }
  0x36   :  { %p4832_p9 = por %p4831_p8, %p4830_p7 }
  0x38   :  { %p4833_p10 = pnand %p4832_p9, %p4826_p6 }
  0x3a   :  { %4836 = shalt.err (!%p4833_p10)
}
  0x3b   :  { %141 = dma.hbm_to_vmem [thread:$0]  %s6645_s10, 16, %s139_s27, [#allocation20]  }
  0x3c   :  { %s5020_s16 = smov [#allocation4]  }
  0x3d   :  { %s33_s17 = sshll.u32 %s5020_s16, 4  ;;  %s34_s17 = int_to_ptr.vmem [resolvable:$true] %s33_s17 }
  0x3e   :  { %s4845_s20 = scalar_lea.vmem %s34_s17, 98304  ;;  %p4850_p12 = scmp.lt.s32.totalorder %s34_s17, %s34_s17 }
  0x3f   :  { %p4846_p11 = scmp.ne.s32.totalorder %s34_s17, %s4845_s20  ;;  %p4851_p13 = scmp.lt.s32.totalorder %s4845_s20, %s4845_s20 }
  0x41   :  { %p4852_p0 = por %p4851_p13, %p4850_p12 }
  0x43   :  { %p4853_p1 = pnand %p4852_p0, %p4846_p11 }
  0x45   :  { %4856 = shalt.err (!%p4853_p1)
}
  0x46   :  { %s5021_s8 = smov 1024   ;;  %s5022_s21 = smov 64  }
  0x47   :  { %39 = dma.hbm_to_vmem [thread:$0]  %s6636_s1, 98304, %s34_s17, [#allocation5], %s5021_s8, %s5021_s8, %s5022_s21  }
  0x48   :  { %s5023_s23 = smov [#allocation9]   ;;  %s5024_s25 = smov [#allocation12]  }
  0x49   :  { %s55_s24 = sshll.u32 %s5023_s23, 4  ;;  %s79_s10 = sshll.u32 %s5024_s25, 4  ;;  %s56_s24 = int_to_ptr.vmem [resolvable:$true] %s55_s24  ;;  %s80_s10 = int_to_ptr.vmem [resolvable:$true] %s79_s10 }
  0x4a   :  { %s4865_s26 = scalar_lea.vmem %s56_s24, 8192  ;;  %p4870_p3 = scmp.lt.s32.totalorder %s56_s24, %s56_s24 }
  0x4b   :  { %p4866_p2 = scmp.ne.s32.totalorder %s56_s24, %s4865_s26  ;;  %p4871_p4 = scmp.lt.s32.totalorder %s4865_s26, %s4865_s26 }
  0x4d   :  { %p4872_p5 = por %p4871_p4, %p4870_p3 }
  0x4f   :  { %p4873_p6 = pnand %p4872_p5, %p4866_p2 }
  0x51   :  { %4876 = shalt.err (!%p4873_p6)
}
  0x52   :  { %61 = dma.hbm_to_vmem [thread:$0]  %s6638_s3, 8192, %s56_s24, [#allocation8], %s5016_s18, %s5016_s18, %s5017_s19  }
  0x53   :  { %s4885_s1 = scalar_lea.vmem %s80_s10, 32768  ;;  %p4890_p8 = scmp.lt.s32.totalorder %s80_s10, %s80_s10 }
  0x54   :  { %p4886_p7 = scmp.ne.s32.totalorder %s80_s10, %s4885_s1  ;;  %p4891_p9 = scmp.lt.s32.totalorder %s4885_s1, %s4885_s1 }
  0x56   :  { %p4892_p10 = por %p4891_p9, %p4890_p8 }
  0x58   :  { %p4893_p11 = pnand %p4892_p10, %p4886_p7 }
  0x5a   :  { %4896 = shalt.err (!%p4893_p11)
}
  0x5b   :  { %85 = dma.hbm_to_vmem [thread:$0]  %s6640_s5, 32768, %s80_s10, [#allocation11], %s5021_s8, %s5021_s8, %s5022_s21  }
  0x5c   :  { %s5025_s6 = smov [#allocation15]   ;;  %s5026_s14 = smov [#allocation18]  }
  0x5d   :  { %s101_s30 = sshll.u32 %s5025_s6, 4  ;;  %s125_s15 = sshll.u32 %s5026_s14, 4  ;;  %s102_s30 = int_to_ptr.vmem [resolvable:$true] %s101_s30  ;;  %s126_s15 = int_to_ptr.vmem [resolvable:$true] %s125_s15 }
  0x5e   :  { %s4905_s16 = scalar_lea.vmem %s102_s30, 8192  ;;  %p4910_p13 = scmp.lt.s32.totalorder %s102_s30, %s102_s30 }
  0x5f   :  { %p4906_p12 = scmp.ne.s32.totalorder %s102_s30, %s4905_s16  ;;  %p4911_p0 = scmp.lt.s32.totalorder %s4905_s16, %s4905_s16 }
  0x61   :  { %p4912_p1 = por %p4911_p0, %p4910_p13 }
  0x63   :  { %p4913_p2 = pnand %p4912_p1, %p4906_p12 }
  0x65   :  { %4916 = shalt.err (!%p4913_p2)
}
  0x66   :  { %107 = dma.hbm_to_vmem [thread:$0]  %s6642_s7, 8192, %s102_s30, [#allocation14], %s5016_s18, %s5016_s18, %s5017_s19  }
  0x67   :  { %s4925_s5 = scalar_lea.vmem %s126_s15, 4096  ;;  %p4930_p4 = scmp.lt.s32.totalorder %s126_s15, %s126_s15 }
  0x68   :  { %p4926_p3 = scmp.ne.s32.totalorder %s126_s15, %s4925_s5  ;;  %p4931_p5 = scmp.lt.s32.totalorder %s4925_s5, %s4925_s5 }
  0x6a   :  { %p4932_p6 = por %p4931_p5, %p4930_p4 }
  0x6c   :  { %p4933_p7 = pnand %p4932_p6, %p4926_p3 }
  0x6e   :  { %4936 = shalt.err (!%p4933_p7)
}
  0x6f   :  { %s5027_s20 = smov 128   ;;  %s5028_s8 = smov 8  }
  0x70   :  { %131 = dma.hbm_to_vmem [thread:$0]  %s6644_s9, 4096, %s126_s15, [#allocation17], %s5027_s20, %s5027_s20, %s5028_s8  }
  0x71   :  { %s5029_s22 = smov [#allocation21]   ;;  %s5030_s24 = smov [#allocation22]  }
  0x72   :  { %s147_s23 = sshll.u32 %s5029_s22, 4  ;;  %s160_s25 = sshll.u32 %s5030_s24, 4  ;;  %s148_s23 = int_to_ptr.vmem [resolvable:$true] %s147_s23  ;;  %s161_s25 = int_to_ptr.vmem [resolvable:$true] %s160_s25 }
  0x73   :  { %s4945_s7 = scalar_lea.vmem %s148_s23, 2048  ;;  %p4950_p9 = scmp.lt.s32.totalorder %s148_s23, %s148_s23 }
  0x74   :  { %p4946_p8 = scmp.ne.s32.totalorder %s148_s23, %s4945_s7  ;;  %p4951_p10 = scmp.lt.s32.totalorder %s4945_s7, %s4945_s7 }
  0x76   :  { %p4952_p11 = por %p4951_p10, %p4950_p9 }
  0x78   :  { %p4953_p12 = pnand %p4952_p11, %p4946_p8 }
  0x7a   :  { %4956 = shalt.err (!%p4953_p12)
}
  0x7b   :  { %153 = dma.hbm_to_vmem [thread:$0]  %s6646_s11, 2048, %s148_s23, [#allocation20], %s5027_s20, %s5027_s20, %s5028_s8  }
  0x7c   :  { %s4965_s10 = scalar_lea.vmem %s161_s25, 16  ;;  %s4969_s9 = scalar_lea.vmem %s161_s25, 32 }
  0x7d   :  { %p4966_p13 = scmp.ne.s32.totalorder %s161_s25, %s4965_s10  ;;  %p4970_p0 = scmp.lt.s32.totalorder %s161_s25, %s161_s25 }
  0x7e   :  { %p4971_p1 = scmp.lt.s32.totalorder %s4969_s9, %s4965_s10 }
  0x80   :  { %p4972_p2 = por %p4971_p1, %p4970_p0 }
  0x82   :  { %p4973_p3 = pnand %p4972_p2, %p4966_p13 }
  0x84   :  { %4976 = shalt.err (!%p4973_p3)
}
  0x85   :  { %163 = dma.hbm_to_vmem [thread:$0]  %s6647_s12, 16, %s161_s25, [#allocation23]  }
  0x86   :  { %4997 = dma.done.wait [#allocation5], 98304  }
  0x87   :  { %4998 = vsyncadd [#allocation5], 4294868992 }
  0x88   :  { %4999 = dma.done.wait [#allocation8], 8320  }
  0x89   :  { %5000 = vsyncadd [#allocation8], 4294958976 }
  0x8a   :  { %5001 = dma.done.wait [#allocation11], 40960  }
  0x8b   :  { %5002 = vsyncadd [#allocation11], 4294926336 }
  0x8c   :  { %5003 = dma.done.wait [#allocation14], 8320  }
  0x8d   :  { %5004 = vsyncadd [#allocation14], 4294958976 }
  0x8e   :  { %5005 = dma.done.wait [#allocation17], 12288  }
  0x8f   :  { %5006 = vsyncadd [#allocation17], 4294955008 }
  0x90   :  { %5007 = dma.done.wait [#allocation20], 2064  }
  0x91   :  { %5008 = vsyncadd [#allocation20], 4294965232 }
  0x92   :  { %5009 = dma.done.wait [#allocation23], 16  }
  0x93   :  { %5010 = vsyncadd [#allocation23], 4294967280  ;;  %v333_v0 = vld [vmem:[#allocation4 + $0x3c8] sm:$0xff]  ;;  %v332_v2 = vld [vmem:[#allocation4 + $0x3c0] sm:$0xff]  ;;  %vm4253_vm0 = vcmask 1041409   ;;  %vm5032_vm1 = vmmov 0  }
  0x94   :  { %v589_v1 = vld [vmem:[#allocation4 + $0xbc8] sm:$0xff]  ;;  %1022 = vmatprep.subr.mxu0 %v333_v0  ;;  %v588_v3 = vld [vmem:[#allocation4 + $0xbc0] sm:$0xff]  ;;  %vm4422_vm2 = vcmask 1041408  }
  0x95   :  { %1099 = vmatprep.subr.mxu1 %v589_v1  ;;  %v325_v4 = vld [vmem:[#allocation4 + $0x388] sm:$0xff]  ;;  %1023 = vmatpush1.msra.mxu0 %v332_v2  ;;  %v324_v6 = vld [vmem:[#allocation4 + $0x380] sm:$0xff] }
  0x96   :  { %v581_v5 = vld [vmem:[#allocation4 + $0xb88] sm:$0xff]  ;;  %1100 = vmatpush1.msra.mxu1 %v588_v3  ;;  %v580_v7 = vld [vmem:[#allocation4 + $0xb80] sm:$0xff]  ;;  %1024 = vmatprep.subr.mxu0 %v325_v4 }
  0x97   :  { %v317_v8 = vld [vmem:[#allocation4 + $0x348] sm:$0xff]  ;;  %1101 = vmatprep.subr.mxu1 %v581_v5  ;;  %v316_v10 = vld [vmem:[#allocation4 + $0x340] sm:$0xff]  ;;  %1025 = vmatpush1.msra.mxu0 %v324_v6 }
  0x98   :  { %v573_v9 = vld [vmem:[#allocation4 + $0xb48] sm:$0xff]  ;;  %v572_v11 = vld [vmem:[#allocation4 + $0xb40] sm:$0xff]  ;;  %1102 = vmatpush1.msra.mxu1 %v580_v7  ;;  %1026 = vmatprep.subr.mxu0 %v317_v8 }
  0x99   :  { %v309_v12 = vld [vmem:[#allocation4 + $0x308] sm:$0xff]  ;;  %1103 = vmatprep.subr.mxu1 %v573_v9  ;;  %v308_v14 = vld [vmem:[#allocation4 + $0x300] sm:$0xff]  ;;  %1027 = vmatpush1.msra.mxu0 %v316_v10 }
  0x9a   :  { %v565_v13 = vld [vmem:[#allocation4 + $0xb08] sm:$0xff]  ;;  %v564_v15 = vld [vmem:[#allocation4 + $0xb00] sm:$0xff]  ;;  %1104 = vmatpush1.msra.mxu1 %v572_v11  ;;  %1028 = vmatprep.subr.mxu0 %v309_v12 }
  0x9b   :  { %v301_v16 = vld [vmem:[#allocation4 + $0x2c8] sm:$0xff]  ;;  %1105 = vmatprep.subr.mxu1 %v565_v13  ;;  %v300_v18 = vld [vmem:[#allocation4 + $0x2c0] sm:$0xff]  ;;  %1029 = vmatpush1.msra.mxu0 %v308_v14 }
  0x9c   :  { %v557_v17 = vld [vmem:[#allocation4 + $0xac8] sm:$0xff]  ;;  %v556_v19 = vld [vmem:[#allocation4 + $0xac0] sm:$0xff]  ;;  %1106 = vmatpush1.msra.mxu1 %v564_v15  ;;  %1030 = vmatprep.subr.mxu0 %v301_v16 }
  0x9d   :  { %v293_v20 = vld [vmem:[#allocation4 + $0x288] sm:$0xff]  ;;  %1107 = vmatprep.subr.mxu1 %v557_v17  ;;  %v292_v22 = vld [vmem:[#allocation4 + $0x280] sm:$0xff]  ;;  %1031 = vmatpush1.msra.mxu0 %v300_v18 }
  0x9e   :  { %v549_v21 = vld [vmem:[#allocation4 + $0xa88] sm:$0xff]  ;;  %v548_v23 = vld [vmem:[#allocation4 + $0xa80] sm:$0xff]  ;;  %1108 = vmatpush1.msra.mxu1 %v556_v19  ;;  %1032 = vmatprep.subr.mxu0 %v293_v20 }
  0x9f   :  { %v285_v24 = vld [vmem:[#allocation4 + $0x248] sm:$0xff]  ;;  %1109 = vmatprep.subr.mxu1 %v549_v21  ;;  %v284_v26 = vld [vmem:[#allocation4 + $0x240] sm:$0xff]  ;;  %1033 = vmatpush1.msra.mxu0 %v292_v22 }
  0xa0   :  { %v541_v25 = vld [vmem:[#allocation4 + $0xa48] sm:$0xff]  ;;  %v540_v27 = vld [vmem:[#allocation4 + $0xa40] sm:$0xff]  ;;  %1110 = vmatpush1.msra.mxu1 %v548_v23  ;;  %1034 = vmatprep.subr.mxu0 %v285_v24 }
  0xa1   :  { %v277_v28 = vld [vmem:[#allocation4 + $0x208] sm:$0xff]  ;;  %1111 = vmatprep.subr.mxu1 %v541_v25  ;;  %v276_v30 = vld [vmem:[#allocation4 + $0x200] sm:$0xff]  ;;  %1035 = vmatpush1.msra.mxu0 %v284_v26 }
  0xa2   :  { %v533_v29 = vld [vmem:[#allocation4 + $0xa08] sm:$0xff]  ;;  %v532_v31 = vld [vmem:[#allocation4 + $0xa00] sm:$0xff]  ;;  %1112 = vmatpush1.msra.mxu1 %v540_v27  ;;  %1036 = vmatprep.subr.mxu0 %v277_v28 }
  0xa3   :  { %v269_v32 = vld [vmem:[#allocation4 + $0x1c8] sm:$0xff]  ;;  %1113 = vmatprep.subr.mxu1 %v533_v29  ;;  %v268_v34 = vld [vmem:[#allocation4 + $0x1c0] sm:$0xff]  ;;  %1037 = vmatpush1.msra.mxu0 %v276_v30 }
  0xa4   :  { %v525_v33 = vld [vmem:[#allocation4 + $0x9c8] sm:$0xff]  ;;  %v524_v35 = vld [vmem:[#allocation4 + $0x9c0] sm:$0xff]  ;;  %1114 = vmatpush1.msra.mxu1 %v532_v31  ;;  %1038 = vmatprep.subr.mxu0 %v269_v32 }
  0xa5   :  { %v261_v36 = vld [vmem:[#allocation4 + $0x188] sm:$0xff]  ;;  %1115 = vmatprep.subr.mxu1 %v525_v33  ;;  %v260_v38 = vld [vmem:[#allocation4 + $0x180] sm:$0xff]  ;;  %1039 = vmatpush1.msra.mxu0 %v268_v34 }
  0xa6   :  { %v517_v37 = vld [vmem:[#allocation4 + $0x988] sm:$0xff]  ;;  %v516_v39 = vld [vmem:[#allocation4 + $0x980] sm:$0xff]  ;;  %1116 = vmatpush1.msra.mxu1 %v524_v35  ;;  %1040 = vmatprep.subr.mxu0 %v261_v36 }
  0xa7   :  { %v253_v40 = vld [vmem:[#allocation4 + $0x148] sm:$0xff]  ;;  %1117 = vmatprep.subr.mxu1 %v517_v37  ;;  %v252_v42 = vld [vmem:[#allocation4 + $0x140] sm:$0xff]  ;;  %1041 = vmatpush1.msra.mxu0 %v260_v38 }
  0xa8   :  { %v509_v41 = vld [vmem:[#allocation4 + $0x948] sm:$0xff]  ;;  %v508_v43 = vld [vmem:[#allocation4 + $0x940] sm:$0xff]  ;;  %1118 = vmatpush1.msra.mxu1 %v516_v39  ;;  %1042 = vmatprep.subr.mxu0 %v253_v40 }
  0xa9   :  { %v245_v44 = vld [vmem:[#allocation4 + $0x108] sm:$0xff]  ;;  %1119 = vmatprep.subr.mxu1 %v509_v41  ;;  %v244_v46 = vld [vmem:[#allocation4 + $0x100] sm:$0xff]  ;;  %1043 = vmatpush1.msra.mxu0 %v252_v42 }
  0xaa   :  { %v501_v45 = vld [vmem:[#allocation4 + $0x908] sm:$0xff]  ;;  %v500_v47 = vld [vmem:[#allocation4 + $0x900] sm:$0xff]  ;;  %1120 = vmatpush1.msra.mxu1 %v508_v43  ;;  %1044 = vmatprep.subr.mxu0 %v245_v44 }
  0xab   :  { %v237_v48 = vld [vmem:[#allocation4 + $0xc8] sm:$0xff]  ;;  %1121 = vmatprep.subr.mxu1 %v501_v45  ;;  %v236_v50 = vld [vmem:[#allocation4 + $0xc0] sm:$0xff]  ;;  %1045 = vmatpush1.msra.mxu0 %v244_v46 }
  0xac   :  { %v493_v49 = vld [vmem:[#allocation4 + $0x8c8] sm:$0xff]  ;;  %v492_v51 = vld [vmem:[#allocation4 + $0x8c0] sm:$0xff]  ;;  %1122 = vmatpush1.msra.mxu1 %v500_v47  ;;  %1046 = vmatprep.subr.mxu0 %v237_v48 }
  0xad   :  { %v229_v52 = vld [vmem:[#allocation4 + $0x88] sm:$0xff]  ;;  %1123 = vmatprep.subr.mxu1 %v493_v49  ;;  %v228_v54 = vld [vmem:[#allocation4 + $0x80] sm:$0xff]  ;;  %1047 = vmatpush1.msra.mxu0 %v236_v50 }
  0xae   :  { %v485_v53 = vld [vmem:[#allocation4 + $0x888] sm:$0xff]  ;;  %v484_v55 = vld [vmem:[#allocation4 + $0x880] sm:$0xff]  ;;  %1124 = vmatpush1.msra.mxu1 %v492_v51  ;;  %1048 = vmatprep.subr.mxu0 %v229_v52 }
  0xaf   :  { %v221_v56 = vld [vmem:[#allocation4 + $0x48] sm:$0xff]  ;;  %1125 = vmatprep.subr.mxu1 %v485_v53  ;;  %v220_v58 = vld [vmem:[#allocation4 + $0x40] sm:$0xff]  ;;  %1049 = vmatpush1.msra.mxu0 %v228_v54 }
  0xb0   :  { %v477_v57 = vld [vmem:[#allocation4 + $0x848] sm:$0xff]  ;;  %v476_v59 = vld [vmem:[#allocation4 + $0x840] sm:$0xff]  ;;  %1126 = vmatpush1.msra.mxu1 %v484_v55  ;;  %1050 = vmatprep.subr.mxu0 %v221_v56 }
  0xb1   :  { %v213_v60 = vld [vmem:[#allocation4 + $0x8] sm:$0xff]  ;;  %1127 = vmatprep.subr.mxu1 %v477_v57  ;;  %v212_v62 = vld [vmem:[#allocation4] sm:$0xff]  ;;  %1051 = vmatpush1.msra.mxu0 %v220_v58 }
  0xb2   :  { %v469_v61 = vld [vmem:[#allocation4 + $0x808] sm:$0xff]  ;;  %v468_v63 = vld [vmem:[#allocation4 + $0x800] sm:$0xff]  ;;  %1128 = vmatpush1.msra.mxu1 %v476_v59  ;;  %1052 = vmatprep.subr.mxu0 %v213_v60 }
  0xb3   :  { %v461_v0 = vld [vmem:[#allocation4 + $0x7c8] sm:$0xff]  ;;  %1129 = vmatprep.subr.mxu1 %v469_v61  ;;  %v460_v2 = vld [vmem:[#allocation4 + $0x7c0] sm:$0xff]  ;;  %1053 = vmatpush1.msra.mxu0 %v212_v62 }
  0xb4   :  { %v717_v1 = vld [vmem:[#allocation4 + $0xfc8] sm:$0xff]  ;;  %v716_v3 = vld [vmem:[#allocation4 + $0xfc0] sm:$0xff]  ;;  %1130 = vmatpush1.msra.mxu1 %v468_v63  ;;  %1054 = vmatprep.subr.mxu0 %v461_v0 }
  0xb5   :  { %v453_v4 = vld [vmem:[#allocation4 + $0x788] sm:$0xff]  ;;  %1131 = vmatprep.subr.mxu1 %v717_v1  ;;  %v452_v6 = vld [vmem:[#allocation4 + $0x780] sm:$0xff]  ;;  %1055 = vmatpush2.msra.mxu0 %v460_v2  ;;  %v203_v2 = vld [vmem:[%s6635_s0 + $0x18] sm:$0xff] }
  0xb6   :  { %v709_v5 = vld [vmem:[#allocation4 + $0xf88] sm:$0xff]  ;;  %v708_v7 = vld [vmem:[#allocation4 + $0xf80] sm:$0xff]  ;;  %1132 = vmatpush2.msra.mxu1 %v716_v3  ;;  %1056 = vmatprep.subr.mxu0 %v453_v4  ;;  %v335_v4 = vld [vmem:[#allocation4 + $0x3d8] sm:$0xff] }
  0xb7   :  { %v445_v8 = vld [vmem:[#allocation4 + $0x748] sm:$0xff]  ;;  %1133 = vmatprep.subr.mxu1 %v709_v5  ;;  %v444_v10 = vld [vmem:[#allocation4 + $0x740] sm:$0xff]  ;;  %1057 = vmatpush2.msra.mxu0 %v452_v6  ;;  %v202_v5 = vld [vmem:[%s6635_s0 + $0x10] sm:$0xff] }
  0xb8   :  { %v701_v9 = vld [vmem:[#allocation4 + $0xf48] sm:$0xff]  ;;  %v700_v11 = vld [vmem:[#allocation4 + $0xf40] sm:$0xff]  ;;  %1134 = vmatpush2.msra.mxu1 %v708_v7  ;;  %1058 = vmatprep.subr.mxu0 %v445_v8  ;;  %v334_v7 = vld [vmem:[#allocation4 + $0x3d0] sm:$0xff] }
  0xb9   :  { %v437_v12 = vld [vmem:[#allocation4 + $0x708] sm:$0xff]  ;;  %1135 = vmatprep.subr.mxu1 %v701_v9  ;;  %v436_v14 = vld [vmem:[#allocation4 + $0x700] sm:$0xff]  ;;  %1059 = vmatpush2.msra.mxu0 %v444_v10  ;;  %v327_v9 = vld [vmem:[#allocation4 + $0x398] sm:$0xff] }
  0xba   :  { %v693_v13 = vld [vmem:[#allocation4 + $0xf08] sm:$0xff]  ;;  %v692_v15 = vld [vmem:[#allocation4 + $0xf00] sm:$0xff]  ;;  %1136 = vmatpush2.msra.mxu1 %v700_v11  ;;  %1060 = vmatprep.subr.mxu0 %v437_v12  ;;  %v326_v11 = vld [vmem:[#allocation4 + $0x390] sm:$0xff] }
  0xbb   :  { %v429_v16 = vld [vmem:[#allocation4 + $0x6c8] sm:$0xff]  ;;  %1137 = vmatprep.subr.mxu1 %v693_v13  ;;  %v428_v18 = vld [vmem:[#allocation4 + $0x6c0] sm:$0xff]  ;;  %1061 = vmatpush2.msra.mxu0 %v436_v14  ;;  %v319_v13 = vld [vmem:[#allocation4 + $0x358] sm:$0xff] }
  0xbc   :  { %v685_v17 = vld [vmem:[#allocation4 + $0xec8] sm:$0xff]  ;;  %v684_v19 = vld [vmem:[#allocation4 + $0xec0] sm:$0xff]  ;;  %1138 = vmatpush2.msra.mxu1 %v692_v15  ;;  %1062 = vmatprep.subr.mxu0 %v429_v16  ;;  %v318_v15 = vld [vmem:[#allocation4 + $0x350] sm:$0xff] }
  0xbd   :  { %v421_v20 = vld [vmem:[#allocation4 + $0x688] sm:$0xff]  ;;  %1139 = vmatprep.subr.mxu1 %v685_v17  ;;  %v420_v22 = vld [vmem:[#allocation4 + $0x680] sm:$0xff]  ;;  %1063 = vmatpush2.msra.mxu0 %v428_v18  ;;  %v311_v17 = vld [vmem:[#allocation4 + $0x318] sm:$0xff] }
  0xbe   :  { %v677_v21 = vld [vmem:[#allocation4 + $0xe88] sm:$0xff]  ;;  %v676_v23 = vld [vmem:[#allocation4 + $0xe80] sm:$0xff]  ;;  %1140 = vmatpush2.msra.mxu1 %v684_v19  ;;  %1064 = vmatprep.subr.mxu0 %v421_v20  ;;  %v310_v19 = vld [vmem:[#allocation4 + $0x310] sm:$0xff] }
  0xbf   :  { %v413_v24 = vld [vmem:[#allocation4 + $0x648] sm:$0xff]  ;;  %1141 = vmatprep.subr.mxu1 %v677_v21  ;;  %v412_v26 = vld [vmem:[#allocation4 + $0x640] sm:$0xff]  ;;  %1065 = vmatpush2.msra.mxu0 %v420_v22  ;;  %v303_v21 = vld [vmem:[#allocation4 + $0x2d8] sm:$0xff] }
  0xc0   :  { %v669_v25 = vld [vmem:[#allocation4 + $0xe48] sm:$0xff]  ;;  %v668_v27 = vld [vmem:[#allocation4 + $0xe40] sm:$0xff]  ;;  %1142 = vmatpush2.msra.mxu1 %v676_v23  ;;  %1066 = vmatprep.subr.mxu0 %v413_v24  ;;  %v302_v23 = vld [vmem:[#allocation4 + $0x2d0] sm:$0xff] }
  0xc1   :  { %v405_v28 = vld [vmem:[#allocation4 + $0x608] sm:$0xff]  ;;  %1143 = vmatprep.subr.mxu1 %v669_v25  ;;  %v404_v30 = vld [vmem:[#allocation4 + $0x600] sm:$0xff]  ;;  %1067 = vmatpush2.msra.mxu0 %v412_v26  ;;  %v295_v25 = vld [vmem:[#allocation4 + $0x298] sm:$0xff] }
  0xc2   :  { %v661_v29 = vld [vmem:[#allocation4 + $0xe08] sm:$0xff]  ;;  %v660_v31 = vld [vmem:[#allocation4 + $0xe00] sm:$0xff]  ;;  %1144 = vmatpush2.msra.mxu1 %v668_v27  ;;  %1068 = vmatprep.subr.mxu0 %v405_v28  ;;  %v294_v27 = vld [vmem:[#allocation4 + $0x290] sm:$0xff] }
  0xc3   :  { %v397_v32 = vld [vmem:[#allocation4 + $0x5c8] sm:$0xff]  ;;  %1145 = vmatprep.subr.mxu1 %v661_v29  ;;  %v396_v34 = vld [vmem:[#allocation4 + $0x5c0] sm:$0xff]  ;;  %1069 = vmatpush2.msra.mxu0 %v404_v30  ;;  %v287_v29 = vld [vmem:[#allocation4 + $0x258] sm:$0xff] }
  0xc4   :  { %v653_v33 = vld [vmem:[#allocation4 + $0xdc8] sm:$0xff]  ;;  %v652_v35 = vld [vmem:[#allocation4 + $0xdc0] sm:$0xff]  ;;  %1146 = vmatpush2.msra.mxu1 %v660_v31  ;;  %1070 = vmatprep.subr.mxu0 %v397_v32  ;;  %v286_v31 = vld [vmem:[#allocation4 + $0x250] sm:$0xff] }
  0xc5   :  { %v389_v36 = vld [vmem:[#allocation4 + $0x588] sm:$0xff]  ;;  %1147 = vmatprep.subr.mxu1 %v653_v33  ;;  %v388_v38 = vld [vmem:[#allocation4 + $0x580] sm:$0xff]  ;;  %1071 = vmatpush2.msra.mxu0 %v396_v34  ;;  %v279_v33 = vld [vmem:[#allocation4 + $0x218] sm:$0xff] }
  0xc6   :  { %v645_v37 = vld [vmem:[#allocation4 + $0xd88] sm:$0xff]  ;;  %v644_v39 = vld [vmem:[#allocation4 + $0xd80] sm:$0xff]  ;;  %1148 = vmatpush2.msra.mxu1 %v652_v35  ;;  %1072 = vmatprep.subr.mxu0 %v389_v36  ;;  %v278_v35 = vld [vmem:[#allocation4 + $0x210] sm:$0xff] }
  0xc7   :  { %v381_v40 = vld [vmem:[#allocation4 + $0x548] sm:$0xff]  ;;  %1149 = vmatprep.subr.mxu1 %v645_v37  ;;  %v380_v42 = vld [vmem:[#allocation4 + $0x540] sm:$0xff]  ;;  %1073 = vmatpush2.msra.mxu0 %v388_v38  ;;  %v271_v37 = vld [vmem:[#allocation4 + $0x1d8] sm:$0xff] }
  0xc8   :  { %v637_v41 = vld [vmem:[#allocation4 + $0xd48] sm:$0xff]  ;;  %v636_v43 = vld [vmem:[#allocation4 + $0xd40] sm:$0xff]  ;;  %1150 = vmatpush2.msra.mxu1 %v644_v39  ;;  %1074 = vmatprep.subr.mxu0 %v381_v40  ;;  %v270_v39 = vld [vmem:[#allocation4 + $0x1d0] sm:$0xff] }
  0xc9   :  { %v373_v44 = vld [vmem:[#allocation4 + $0x508] sm:$0xff]  ;;  %1151 = vmatprep.subr.mxu1 %v637_v41  ;;  %v372_v46 = vld [vmem:[#allocation4 + $0x500] sm:$0xff]  ;;  %1075 = vmatpush2.msra.mxu0 %v380_v42  ;;  %v263_v41 = vld [vmem:[#allocation4 + $0x198] sm:$0xff] }
  0xca   :  { %v629_v45 = vld [vmem:[#allocation4 + $0xd08] sm:$0xff]  ;;  %v628_v47 = vld [vmem:[#allocation4 + $0xd00] sm:$0xff]  ;;  %1152 = vmatpush2.msra.mxu1 %v636_v43  ;;  %1076 = vmatprep.subr.mxu0 %v373_v44  ;;  %v262_v43 = vld [vmem:[#allocation4 + $0x190] sm:$0xff] }
  0xcb   :  { %v365_v48 = vld [vmem:[#allocation4 + $0x4c8] sm:$0xff]  ;;  %1153 = vmatprep.subr.mxu1 %v629_v45  ;;  %v364_v50 = vld [vmem:[#allocation4 + $0x4c0] sm:$0xff]  ;;  %1077 = vmatpush2.msra.mxu0 %v372_v46  ;;  %v255_v45 = vld [vmem:[#allocation4 + $0x158] sm:$0xff] }
  0xcc   :  { %v621_v49 = vld [vmem:[#allocation4 + $0xcc8] sm:$0xff]  ;;  %v620_v51 = vld [vmem:[#allocation4 + $0xcc0] sm:$0xff]  ;;  %1154 = vmatpush2.msra.mxu1 %v628_v47  ;;  %1078 = vmatprep.subr.mxu0 %v365_v48  ;;  %v254_v47 = vld [vmem:[#allocation4 + $0x150] sm:$0xff] }
  0xcd   :  { %v357_v52 = vld [vmem:[#allocation4 + $0x488] sm:$0xff]  ;;  %1155 = vmatprep.subr.mxu1 %v621_v49  ;;  %v356_v54 = vld [vmem:[#allocation4 + $0x480] sm:$0xff]  ;;  %1079 = vmatpush2.msra.mxu0 %v364_v50  ;;  %v247_v49 = vld [vmem:[#allocation4 + $0x118] sm:$0xff] }
  0xce   :  { %v613_v53 = vld [vmem:[#allocation4 + $0xc88] sm:$0xff]  ;;  %v612_v55 = vld [vmem:[#allocation4 + $0xc80] sm:$0xff]  ;;  %1156 = vmatpush2.msra.mxu1 %v620_v51  ;;  %1080 = vmatprep.subr.mxu0 %v357_v52  ;;  %v246_v51 = vld [vmem:[#allocation4 + $0x110] sm:$0xff] }
  0xcf   :  { %v349_v56 = vld [vmem:[#allocation4 + $0x448] sm:$0xff]  ;;  %1157 = vmatprep.subr.mxu1 %v613_v53  ;;  %v348_v58 = vld [vmem:[#allocation4 + $0x440] sm:$0xff]  ;;  %1081 = vmatpush2.msra.mxu0 %v356_v54  ;;  %v239_v53 = vld [vmem:[#allocation4 + $0xd8] sm:$0xff] }
  0xd0   :  { %v605_v57 = vld [vmem:[#allocation4 + $0xc48] sm:$0xff]  ;;  %v604_v59 = vld [vmem:[#allocation4 + $0xc40] sm:$0xff]  ;;  %1158 = vmatpush2.msra.mxu1 %v612_v55  ;;  %1082 = vmatprep.subr.mxu0 %v349_v56  ;;  %v238_v55 = vld [vmem:[#allocation4 + $0xd0] sm:$0xff] }
  0xd1   :  { %v341_v60 = vld [vmem:[#allocation4 + $0x408] sm:$0xff]  ;;  %1159 = vmatprep.subr.mxu1 %v605_v57  ;;  %v340_v62 = vld [vmem:[#allocation4 + $0x400] sm:$0xff]  ;;  %1083 = vmatpush2.msra.mxu0 %v348_v58  ;;  %v231_v57 = vld [vmem:[#allocation4 + $0x98] sm:$0xff] }
  0xd2   :  { %v597_v61 = vld [vmem:[#allocation4 + $0xc08] sm:$0xff]  ;;  %1160 = vmatpush2.msra.mxu1 %v604_v59  ;;  %v596_v0 = vld [vmem:[#allocation4 + $0xc00] sm:$0xff]  ;;  %1084 = vmatprep.subr.mxu0 %v341_v60  ;;  %v230_v59 = vld [vmem:[#allocation4 + $0x90] sm:$0xff] }
  0xd3   :  { %v5155_v63 = vld [vmem:[%s6635_s0 + $0x8] sm:$0xff]  ;;  %v5160_v1 = vld [vmem:[%s6635_s0] sm:$0xff]  ;;  %1161 = vmatprep.subr.mxu1 %v597_v61  ;;  %1085 = vmatpush2.msra.mxu0 %v340_v62  ;;  %v223_v61 = vld [vmem:[#allocation4 + $0x58] sm:$0xff] }
  0xd4   :  { %v845_v3 = vld [vmem:[#allocation4 + $0x13c8] sm:$0xff]  ;;  %1086 = vmatprep.mubr.f32.mxu0 %v5155_v63  ;;  %1162 = vmatpush2.msra.mxu1 %v596_v0  ;;  %v844_v6 = vld [vmem:[#allocation4 + $0x13c0] sm:$0xff]  ;;  %v222_v0 = vld [vmem:[#allocation4 + $0x50] sm:$0xff] }
  0xd5   :  { %1087 = vmatmul.mubr.f32.vlgmr.msra.gmra.mxu0 %v5160_v1  ;;  %1163 = vmatprep.mubr.f32.mxu1 %v203_v2  ;;  %v837_v8 = vld [vmem:[#allocation4 + $0x1388] sm:$0xff]  ;;  %v836_v10 = vld [vmem:[#allocation4 + $0x1380] sm:$0xff] }
  0xd6   :  { %1176 = vmatprep.subr.mxu0 %v845_v3  ;;  %1253 = vmatprep.subr.mxu1 %v335_v4  ;;  %v829_v12 = vld [vmem:[#allocation4 + $0x1348] sm:$0xff]  ;;  %v828_v14 = vld [vmem:[#allocation4 + $0x1340] sm:$0xff]  ;;  %v215_v3 = vld [vmem:[#allocation4 + $0x18] sm:$0xff] }
  0xd7   :  { %1164 = vmatmul.mubr.f32.vlgmr.msra.gmra.mxu1 %v202_v5  ;;  %1177 = vmatpush1.msra.mxu0 %v844_v6  ;;  %v821_v16 = vld [vmem:[#allocation4 + $0x1308] sm:$0xff]  ;;  %v820_v18 = vld [vmem:[#allocation4 + $0x1300] sm:$0xff]  ;;  %v214_v5 = vld [vmem:[#allocation4 + $0x10] sm:$0xff] }
  0xd8   :  { %1254 = vmatpush1.msra.mxu1 %v334_v7  ;;  %1178 = vmatprep.subr.mxu0 %v837_v8  ;;  %v813_v20 = vld [vmem:[#allocation4 + $0x12c8] sm:$0xff]  ;;  %v812_v22 = vld [vmem:[#allocation4 + $0x12c0] sm:$0xff]  ;;  %v463_v7 = vld [vmem:[#allocation4 + $0x7d8] sm:$0xff] }
  0xd9   :  { %1255 = vmatprep.subr.mxu1 %v327_v9  ;;  %1179 = vmatpush1.msra.mxu0 %v836_v10  ;;  %v805_v24 = vld [vmem:[#allocation4 + $0x1288] sm:$0xff]  ;;  %v804_v26 = vld [vmem:[#allocation4 + $0x1280] sm:$0xff]  ;;  %v462_v9 = vld [vmem:[#allocation4 + $0x7d0] sm:$0xff] }
  0xda   :  { %1256 = vmatpush1.msra.mxu1 %v326_v11  ;;  %1180 = vmatprep.subr.mxu0 %v829_v12  ;;  %v797_v28 = vld [vmem:[#allocation4 + $0x1248] sm:$0xff]  ;;  %v796_v30 = vld [vmem:[#allocation4 + $0x1240] sm:$0xff]  ;;  %v455_v11 = vld [vmem:[#allocation4 + $0x798] sm:$0xff] }
  0xdb   :  { %1257 = vmatprep.subr.mxu1 %v319_v13  ;;  %1181 = vmatpush1.msra.mxu0 %v828_v14  ;;  %v789_v32 = vld [vmem:[#allocation4 + $0x1208] sm:$0xff]  ;;  %v788_v34 = vld [vmem:[#allocation4 + $0x1200] sm:$0xff]  ;;  %v454_v13 = vld [vmem:[#allocation4 + $0x790] sm:$0xff] }
  0xdc   :  { %1258 = vmatpush1.msra.mxu1 %v318_v15  ;;  %1182 = vmatprep.subr.mxu0 %v821_v16  ;;  %v781_v36 = vld [vmem:[#allocation4 + $0x11c8] sm:$0xff]  ;;  %v780_v38 = vld [vmem:[#allocation4 + $0x11c0] sm:$0xff]  ;;  %v447_v15 = vld [vmem:[#allocation4 + $0x758] sm:$0xff] }
  0xdd   :  { %1259 = vmatprep.subr.mxu1 %v311_v17  ;;  %1183 = vmatpush1.msra.mxu0 %v820_v18  ;;  %v773_v40 = vld [vmem:[#allocation4 + $0x1188] sm:$0xff]  ;;  %v772_v42 = vld [vmem:[#allocation4 + $0x1180] sm:$0xff]  ;;  %v446_v17 = vld [vmem:[#allocation4 + $0x750] sm:$0xff] }
  0xde   :  { %1260 = vmatpush1.msra.mxu1 %v310_v19  ;;  %1184 = vmatprep.subr.mxu0 %v813_v20  ;;  %v765_v44 = vld [vmem:[#allocation4 + $0x1148] sm:$0xff]  ;;  %v764_v46 = vld [vmem:[#allocation4 + $0x1140] sm:$0xff]  ;;  %v439_v19 = vld [vmem:[#allocation4 + $0x718] sm:$0xff] }
  0xdf   :  { %1261 = vmatprep.subr.mxu1 %v303_v21  ;;  %1185 = vmatpush1.msra.mxu0 %v812_v22  ;;  %v757_v48 = vld [vmem:[#allocation4 + $0x1108] sm:$0xff]  ;;  %v756_v50 = vld [vmem:[#allocation4 + $0x1100] sm:$0xff]  ;;  %v438_v21 = vld [vmem:[#allocation4 + $0x710] sm:$0xff] }
  0xe0   :  { %1262 = vmatpush1.msra.mxu1 %v302_v23  ;;  %1186 = vmatprep.subr.mxu0 %v805_v24  ;;  %v749_v52 = vld [vmem:[#allocation4 + $0x10c8] sm:$0xff]  ;;  %v748_v54 = vld [vmem:[#allocation4 + $0x10c0] sm:$0xff]  ;;  %v431_v23 = vld [vmem:[#allocation4 + $0x6d8] sm:$0xff] }
  0xe1   :  { %1263 = vmatprep.subr.mxu1 %v295_v25  ;;  %1187 = vmatpush1.msra.mxu0 %v804_v26  ;;  %v741_v56 = vld [vmem:[#allocation4 + $0x1088] sm:$0xff]  ;;  %v740_v58 = vld [vmem:[#allocation4 + $0x1080] sm:$0xff]  ;;  %v430_v25 = vld [vmem:[#allocation4 + $0x6d0] sm:$0xff] }
  0xe2   :  { %1264 = vmatpush1.msra.mxu1 %v294_v27  ;;  %1188 = vmatprep.subr.mxu0 %v797_v28  ;;  %v733_v60 = vld [vmem:[#allocation4 + $0x1048] sm:$0xff]  ;;  %v732_v62 = vld [vmem:[#allocation4 + $0x1040] sm:$0xff]  ;;  %v423_v27 = vld [vmem:[#allocation4 + $0x698] sm:$0xff] }
  0xe3   :  { %1265 = vmatprep.subr.mxu1 %v287_v29  ;;  %1189 = vmatpush1.msra.mxu0 %v796_v30  ;;  %v725_v2 = vld [vmem:[#allocation4 + $0x1008] sm:$0xff]  ;;  %v724_v4 = vld [vmem:[#allocation4 + $0x1000] sm:$0xff]  ;;  %v422_v29 = vld [vmem:[#allocation4 + $0x690] sm:$0xff] }
  0xe4   :  { %1266 = vmatpush1.msra.mxu1 %v286_v31  ;;  %1190 = vmatprep.subr.mxu0 %v789_v32  ;;  %v973_v6 = vld [vmem:[#allocation4 + $0x17c8] sm:$0xff]  ;;  %v972_v8 = vld [vmem:[#allocation4 + $0x17c0] sm:$0xff]  ;;  %v415_v31 = vld [vmem:[#allocation4 + $0x658] sm:$0xff] }
  0xe5   :  { %1267 = vmatprep.subr.mxu1 %v279_v33  ;;  %1191 = vmatpush1.msra.mxu0 %v788_v34  ;;  %v965_v10 = vld [vmem:[#allocation4 + $0x1788] sm:$0xff]  ;;  %v964_v12 = vld [vmem:[#allocation4 + $0x1780] sm:$0xff]  ;;  %v414_v33 = vld [vmem:[#allocation4 + $0x650] sm:$0xff] }
  0xe6   :  { %1268 = vmatpush1.msra.mxu1 %v278_v35  ;;  %1192 = vmatprep.subr.mxu0 %v781_v36  ;;  %v957_v14 = vld [vmem:[#allocation4 + $0x1748] sm:$0xff]  ;;  %v956_v16 = vld [vmem:[#allocation4 + $0x1740] sm:$0xff]  ;;  %v407_v35 = vld [vmem:[#allocation4 + $0x618] sm:$0xff] }
  0xe7   :  { %1269 = vmatprep.subr.mxu1 %v271_v37  ;;  %1193 = vmatpush1.msra.mxu0 %v780_v38  ;;  %v949_v18 = vld [vmem:[#allocation4 + $0x1708] sm:$0xff]  ;;  %v948_v20 = vld [vmem:[#allocation4 + $0x1700] sm:$0xff]  ;;  %v406_v37 = vld [vmem:[#allocation4 + $0x610] sm:$0xff] }
  0xe8   :  { %1270 = vmatpush1.msra.mxu1 %v270_v39  ;;  %1194 = vmatprep.subr.mxu0 %v773_v40  ;;  %v941_v22 = vld [vmem:[#allocation4 + $0x16c8] sm:$0xff]  ;;  %v940_v24 = vld [vmem:[#allocation4 + $0x16c0] sm:$0xff]  ;;  %v399_v39 = vld [vmem:[#allocation4 + $0x5d8] sm:$0xff] }
  0xe9   :  { %1271 = vmatprep.subr.mxu1 %v263_v41  ;;  %1195 = vmatpush1.msra.mxu0 %v772_v42  ;;  %v933_v26 = vld [vmem:[#allocation4 + $0x1688] sm:$0xff]  ;;  %v932_v28 = vld [vmem:[#allocation4 + $0x1680] sm:$0xff]  ;;  %v398_v41 = vld [vmem:[#allocation4 + $0x5d0] sm:$0xff] }
  0xea   :  { %1272 = vmatpush1.msra.mxu1 %v262_v43  ;;  %1196 = vmatprep.subr.mxu0 %v765_v44  ;;  %v925_v30 = vld [vmem:[#allocation4 + $0x1648] sm:$0xff]  ;;  %v924_v32 = vld [vmem:[#allocation4 + $0x1640] sm:$0xff]  ;;  %v391_v43 = vld [vmem:[#allocation4 + $0x598] sm:$0xff] }
  0xeb   :  { %1273 = vmatprep.subr.mxu1 %v255_v45  ;;  %1197 = vmatpush1.msra.mxu0 %v764_v46  ;;  %v917_v34 = vld [vmem:[#allocation4 + $0x1608] sm:$0xff]  ;;  %v916_v36 = vld [vmem:[#allocation4 + $0x1600] sm:$0xff]  ;;  %v390_v45 = vld [vmem:[#allocation4 + $0x590] sm:$0xff] }
  0xec   :  { %1274 = vmatpush1.msra.mxu1 %v254_v47  ;;  %1198 = vmatprep.subr.mxu0 %v757_v48  ;;  %v909_v38 = vld [vmem:[#allocation4 + $0x15c8] sm:$0xff]  ;;  %v908_v40 = vld [vmem:[#allocation4 + $0x15c0] sm:$0xff]  ;;  %v383_v47 = vld [vmem:[#allocation4 + $0x558] sm:$0xff] }
  0xed   :  { %1275 = vmatprep.subr.mxu1 %v247_v49  ;;  %1199 = vmatpush1.msra.mxu0 %v756_v50  ;;  %v901_v42 = vld [vmem:[#allocation4 + $0x1588] sm:$0xff]  ;;  %v900_v44 = vld [vmem:[#allocation4 + $0x1580] sm:$0xff]  ;;  %v382_v49 = vld [vmem:[#allocation4 + $0x550] sm:$0xff] }
  0xee   :  { %1276 = vmatpush1.msra.mxu1 %v246_v51  ;;  %1200 = vmatprep.subr.mxu0 %v749_v52  ;;  %v893_v46 = vld [vmem:[#allocation4 + $0x1548] sm:$0xff]  ;;  %v892_v48 = vld [vmem:[#allocation4 + $0x1540] sm:$0xff]  ;;  %v375_v51 = vld [vmem:[#allocation4 + $0x518] sm:$0xff] }
  0xef   :  { %1277 = vmatprep.subr.mxu1 %v239_v53  ;;  %1201 = vmatpush1.msra.mxu0 %v748_v54  ;;  %v885_v50 = vld [vmem:[#allocation4 + $0x1508] sm:$0xff]  ;;  %v884_v52 = vld [vmem:[#allocation4 + $0x1500] sm:$0xff]  ;;  %v374_v53 = vld [vmem:[#allocation4 + $0x510] sm:$0xff] }
  0xf0   :  { %1278 = vmatpush1.msra.mxu1 %v238_v55  ;;  %1202 = vmatprep.subr.mxu0 %v741_v56  ;;  %v877_v54 = vld [vmem:[#allocation4 + $0x14c8] sm:$0xff]  ;;  %v367_v55 = vld [vmem:[#allocation4 + $0x4d8] sm:$0xff]  ;;  %v876_v56 = vld [vmem:[#allocation4 + $0x14c0] sm:$0xff] }
  0xf1   :  { %1279 = vmatprep.subr.mxu1 %v231_v57  ;;  %1203 = vmatpush1.msra.mxu0 %v740_v58  ;;  %v366_v57 = vld [vmem:[#allocation4 + $0x4d0] sm:$0xff]  ;;  %v5173_v58 = vld [vmem:[%s6635_s0 + $0x38] sm:$0xff] }
  0xf2   :  { %1280 = vmatpush1.msra.mxu1 %v230_v59  ;;  %1204 = vmatprep.subr.mxu0 %v733_v60  ;;  %v869_v59 = vld [vmem:[#allocation4 + $0x1488] sm:$0xff]  ;;  %v359_v60 = vld [vmem:[#allocation4 + $0x498] sm:$0xff] }
  0xf3   :  { %1281 = vmatprep.subr.mxu1 %v223_v61  ;;  %1205 = vmatpush1.msra.mxu0 %v732_v62  ;;  %v5178_v61 = vld [vmem:[%s6635_s0 + $0x30] sm:$0xff]  ;;  %v868_v62 = vld [vmem:[#allocation4 + $0x1480] sm:$0xff] }
  0xf4   :  { %1282 = vmatpush1.msra.mxu1 %v222_v0  ;;  %1206 = vmatprep.subr.mxu0 %v725_v2  ;;  %v358_v0 = vld [vmem:[#allocation4 + $0x490] sm:$0xff]  ;;  %v5184_v2 = vld [vmem:[%s6635_s0 + $0x48] sm:$0xff] }
  0xf5   :  { %1283 = vmatprep.subr.mxu1 %v215_v3  ;;  %1207 = vmatpush1.msra.mxu0 %v724_v4  ;;  %v861_v3 = vld [vmem:[#allocation4 + $0x1448] sm:$0xff]  ;;  %v351_v4 = vld [vmem:[#allocation4 + $0x458] sm:$0xff] }
  0xf6   :  { %1284 = vmatpush1.msra.mxu1 %v214_v5  ;;  %1208 = vmatprep.subr.mxu0 %v973_v6  ;;  %v5190_v5 = vld [vmem:[%s6635_s0 + $0x40] sm:$0xff] }
  0xf7   :  { %1285 = vmatprep.subr.mxu1 %v463_v7  ;;  %1209 = vmatpush2.msra.mxu0 %v972_v8  ;;  %v860_v6 = vld [vmem:[#allocation4 + $0x1440] sm:$0xff]  ;;  %v350_v7 = vld [vmem:[#allocation4 + $0x450] sm:$0xff]  ;;  %v853_v8 = vld [vmem:[#allocation4 + $0x1408] sm:$0xff] }
  0xf8   :  { %1286 = vmatpush2.msra.mxu1 %v462_v9  ;;  %1210 = vmatprep.subr.mxu0 %v965_v10  ;;  %v343_v9 = vld [vmem:[#allocation4 + $0x418] sm:$0xff]  ;;  %v852_v10 = vld [vmem:[#allocation4 + $0x1400] sm:$0xff] }
  0xf9   :  { %1287 = vmatprep.subr.mxu1 %v455_v11  ;;  %1211 = vmatpush2.msra.mxu0 %v964_v12  ;;  %v5197_v11 = vld [vmem:[%s6635_s0 + $0x28] sm:$0xff]  ;;  %v342_v12 = vld [vmem:[#allocation4 + $0x410] sm:$0xff] }
  0xfa   :  { %1288 = vmatpush2.msra.mxu1 %v454_v13  ;;  %1212 = vmatprep.subr.mxu0 %v957_v14  ;;  %v5202_v13 = vld [vmem:[%s6635_s0 + $0x20] sm:$0xff]  ;;  %v591_v14 = vld [vmem:[#allocation4 + $0xbd8] sm:$0xff] }
  0xfb   :  { %1289 = vmatprep.subr.mxu1 %v447_v15  ;;  %1213 = vmatpush2.msra.mxu0 %v956_v16  ;;  %v847_v15 = vld [vmem:[#allocation4 + $0x13d8] sm:$0xff]  ;;  %v590_v16 = vld [vmem:[#allocation4 + $0xbd0] sm:$0xff] }
  0xfc   :  { %1290 = vmatpush2.msra.mxu1 %v446_v17  ;;  %1214 = vmatprep.subr.mxu0 %v949_v18  ;;  %v846_v17 = vld [vmem:[#allocation4 + $0x13d0] sm:$0xff]  ;;  %v583_v18 = vld [vmem:[#allocation4 + $0xb98] sm:$0xff] }
  0xfd   :  { %1291 = vmatprep.subr.mxu1 %v439_v19  ;;  %1215 = vmatpush2.msra.mxu0 %v948_v20  ;;  %v839_v19 = vld [vmem:[#allocation4 + $0x1398] sm:$0xff] }
  0xfe   :  { %1292 = vmatpush2.msra.mxu1 %v438_v21  ;;  %1216 = vmatprep.subr.mxu0 %v941_v22  ;;  %v5211_v20 = vld [vmem:[%s6635_s0 + $0x58] sm:$0xff]  ;;  %v582_v21 = vld [vmem:[#allocation4 + $0xb90] sm:$0xff] }
  0xff   :  { %1293 = vmatprep.subr.mxu1 %v431_v23  ;;  %1217 = vmatpush2.msra.mxu0 %v940_v24  ;;  %v838_v22 = vld [vmem:[#allocation4 + $0x1390] sm:$0xff]  ;;  %v831_v24 = vld [vmem:[#allocation4 + $0x1358] sm:$0xff] }
 0x100   :  { %1294 = vmatpush2.msra.mxu1 %v430_v25  ;;  %1218 = vmatprep.subr.mxu0 %v933_v26  ;;  %v5216_v23 = vld [vmem:[%s6635_s0 + $0x50] sm:$0xff]  ;;  %v567_v26 = vld [vmem:[#allocation4 + $0xb18] sm:$0xff] }
 0x101   :  { %1295 = vmatprep.subr.mxu1 %v423_v27  ;;  %1219 = vmatpush2.msra.mxu0 %v932_v28  ;;  %v830_v25 = vld [vmem:[#allocation4 + $0x1350] sm:$0xff]  ;;  %v823_v27 = vld [vmem:[#allocation4 + $0x1318] sm:$0xff] }
 0x102   :  { %1296 = vmatpush2.msra.mxu1 %v422_v29  ;;  %1220 = vmatprep.subr.mxu0 %v925_v30  ;;  %v566_v28 = vld [vmem:[#allocation4 + $0xb10] sm:$0xff]  ;;  %v559_v30 = vld [vmem:[#allocation4 + $0xad8] sm:$0xff] }
 0x103   :  { %1297 = vmatprep.subr.mxu1 %v415_v31  ;;  %1221 = vmatpush2.msra.mxu0 %v924_v32  ;;  %v822_v29 = vld [vmem:[#allocation4 + $0x1310] sm:$0xff]  ;;  %v815_v31 = vld [vmem:[#allocation4 + $0x12d8] sm:$0xff] }
 0x104   :  { %1298 = vmatpush2.msra.mxu1 %v414_v33  ;;  %1222 = vmatprep.subr.mxu0 %v917_v34  ;;  %v558_v32 = vld [vmem:[#allocation4 + $0xad0] sm:$0xff]  ;;  %v551_v34 = vld [vmem:[#allocation4 + $0xa98] sm:$0xff] }
 0x105   :  { %1299 = vmatprep.subr.mxu1 %v407_v35  ;;  %1223 = vmatpush2.msra.mxu0 %v916_v36  ;;  %v814_v33 = vld [vmem:[#allocation4 + $0x12d0] sm:$0xff]  ;;  %v807_v35 = vld [vmem:[#allocation4 + $0x1298] sm:$0xff] }
 0x106   :  { %1300 = vmatpush2.msra.mxu1 %v406_v37  ;;  %1224 = vmatprep.subr.mxu0 %v909_v38  ;;  %v550_v36 = vld [vmem:[#allocation4 + $0xa90] sm:$0xff]  ;;  %v543_v38 = vld [vmem:[#allocation4 + $0xa58] sm:$0xff] }
 0x107   :  { %1301 = vmatprep.subr.mxu1 %v399_v39  ;;  %1225 = vmatpush2.msra.mxu0 %v908_v40  ;;  %v806_v37 = vld [vmem:[#allocation4 + $0x1290] sm:$0xff]  ;;  %v799_v39 = vld [vmem:[#allocation4 + $0x1258] sm:$0xff] }
 0x108   :  { %1302 = vmatpush2.msra.mxu1 %v398_v41  ;;  %1226 = vmatprep.subr.mxu0 %v901_v42  ;;  %v542_v40 = vld [vmem:[#allocation4 + $0xa50] sm:$0xff]  ;;  %v535_v42 = vld [vmem:[#allocation4 + $0xa18] sm:$0xff] }
 0x109   :  { %1303 = vmatprep.subr.mxu1 %v391_v43  ;;  %1227 = vmatpush2.msra.mxu0 %v900_v44  ;;  %v798_v41 = vld [vmem:[#allocation4 + $0x1250] sm:$0xff]  ;;  %v791_v43 = vld [vmem:[#allocation4 + $0x1218] sm:$0xff] }
 0x10a   :  { %1304 = vmatpush2.msra.mxu1 %v390_v45  ;;  %1228 = vmatprep.subr.mxu0 %v893_v46  ;;  %v534_v44 = vld [vmem:[#allocation4 + $0xa10] sm:$0xff]  ;;  %v527_v46 = vld [vmem:[#allocation4 + $0x9d8] sm:$0xff] }
 0x10b   :  { %1305 = vmatprep.subr.mxu1 %v383_v47  ;;  %1229 = vmatpush2.msra.mxu0 %v892_v48  ;;  %v790_v45 = vld [vmem:[#allocation4 + $0x1210] sm:$0xff]  ;;  %v783_v47 = vld [vmem:[#allocation4 + $0x11d8] sm:$0xff] }
 0x10c   :  { %1306 = vmatpush2.msra.mxu1 %v382_v49  ;;  %1230 = vmatprep.subr.mxu0 %v885_v50  ;;  %v526_v48 = vld [vmem:[#allocation4 + $0x9d0] sm:$0xff]  ;;  %v519_v50 = vld [vmem:[#allocation4 + $0x998] sm:$0xff] }
 0x10d   :  { %1307 = vmatprep.subr.mxu1 %v375_v51  ;;  %1231 = vmatpush2.msra.mxu0 %v884_v52  ;;  %v782_v49 = vld [vmem:[#allocation4 + $0x11d0] sm:$0xff]  ;;  %v775_v51 = vld [vmem:[#allocation4 + $0x1198] sm:$0xff] }
 0x10e   :  { %1308 = vmatpush2.msra.mxu1 %v374_v53  ;;  %1232 = vmatprep.subr.mxu0 %v877_v54  ;;  %v518_v52 = vld [vmem:[#allocation4 + $0x990] sm:$0xff]  ;;  %v511_v54 = vld [vmem:[#allocation4 + $0x958] sm:$0xff] }
 0x10f   :  { %1309 = vmatprep.subr.mxu1 %v367_v55  ;;  %1233 = vmatpush2.msra.mxu0 %v876_v56  ;;  %v774_v53 = vld [vmem:[#allocation4 + $0x1190] sm:$0xff]  ;;  %v767_v55 = vld [vmem:[#allocation4 + $0x1158] sm:$0xff] }
 0x110   :  { %1310 = vmatpush2.msra.mxu1 %v366_v57  ;;  %1092 = vmatprep.mubr.f32.mxu0 %v5173_v58  ;;  %v510_v56 = vld [vmem:[#allocation4 + $0x950] sm:$0xff] }
 0x111   :  { %1234 = vmatprep.subr.mxu0 %v869_v59  ;;  %1311 = vmatprep.subr.mxu1 %v359_v60  ;;  %v766_v57 = vld [vmem:[#allocation4 + $0x1150] sm:$0xff]  ;;  %v503_v59 = vld [vmem:[#allocation4 + $0x918] sm:$0xff] }
 0x112   :  { %1093 = vmatmul.mubr.f32.gmra.mxu0 %v5178_v61  ;;  %1312 = vmatpush2.msra.mxu1 %v358_v0  ;;  %v759_v60 = vld [vmem:[#allocation4 + $0x1118] sm:$0xff]  ;;  %v758_v0 = vld [vmem:[#allocation4 + $0x1110] sm:$0xff] }
 0x113   :  { %1235 = vmatpush2.msra.mxu0 %v868_v62  ;;  %1169 = vmatprep.mubr.f32.mxu1 %v5184_v2  ;;  %v502_v62 = vld [vmem:[#allocation4 + $0x910] sm:$0xff] }
 0x114   :  { %1236 = vmatprep.subr.mxu0 %v861_v3  ;;  %1313 = vmatprep.subr.mxu1 %v351_v4  ;;  %v495_v3 = vld [vmem:[#allocation4 + $0x8d8] sm:$0xff] }
 0x115   :  { %1170 = vmatmul.mubr.f32.gmra.mxu1 %v5190_v5  ;;  %1237 = vmatpush2.msra.mxu0 %v860_v6  ;;  %v751_v4 = vld [vmem:[#allocation4 + $0x10d8] sm:$0xff]  ;;  %v494_v6 = vld [vmem:[#allocation4 + $0x8d0] sm:$0xff] }
 0x116   :  { %1314 = vmatpush2.msra.mxu1 %v350_v7  ;;  %1238 = vmatprep.subr.mxu0 %v853_v8  ;;  %v750_v7 = vld [vmem:[#allocation4 + $0x10d0] sm:$0xff]  ;;  %v487_v8 = vld [vmem:[#allocation4 + $0x898] sm:$0xff] }
 0x117   :  { %1315 = vmatprep.subr.mxu1 %v343_v9  ;;  %1239 = vmatpush2.msra.mxu0 %v852_v10  ;;  %v743_v9 = vld [vmem:[#allocation4 + $0x1098] sm:$0xff]  ;;  %v486_v10 = vld [vmem:[#allocation4 + $0x890] sm:$0xff] }
 0x118   :  { %1240 = vmatprep.mubr.f32.mxu0 %v5197_v11  ;;  %1316 = vmatpush2.msra.mxu1 %v342_v12  ;;  %v742_v12 = vld [vmem:[#allocation4 + $0x1090] sm:$0xff] }
 0x119   :  { %1241 = vmatmul.mubr.f32.vlgmr.msra.gmra.mxu0 %v5202_v13  ;;  %1317 = vmatprep.mubr.f32.mxu1 %v5155_v63  ;;  %v575_v63 = vld [vmem:[#allocation4 + $0xb58] sm:$0xff] }
 0x11a   :  { %1330 = vmatprep.subr.mxu0 %v591_v14  ;;  %1407 = vmatprep.subr.mxu1 %v847_v15  ;;  %v479_v14 = vld [vmem:[#allocation4 + $0x858] sm:$0xff] }
 0x11b   :  { %1318 = vmatmul.mubr.f32.vlgmr.msra.gmra.mxu1 %v5160_v1  ;;  %1331 = vmatpush1.msra.mxu0 %v590_v16  ;;  %v574_v1 = vld [vmem:[#allocation4 + $0xb50] sm:$0xff]  ;;  %v735_v15 = vld [vmem:[#allocation4 + $0x1058] sm:$0xff] }
 0x11c   :  { %1408 = vmatpush1.msra.mxu1 %v846_v17  ;;  %1332 = vmatprep.subr.mxu0 %v583_v18  ;;  %v478_v16 = vld [vmem:[#allocation4 + $0x850] sm:$0xff]  ;;  %v471_v18 = vld [vmem:[#allocation4 + $0x818] sm:$0xff] }
 0x11d   :  { %1409 = vmatprep.subr.mxu1 %v839_v19  ;;  %1246 = vmatprep.mubr.f32.mxu0 %v5211_v20  ;;  %v734_v17 = vld [vmem:[#allocation4 + $0x1050] sm:$0xff]  ;;  %v727_v19 = vld [vmem:[#allocation4 + $0x1018] sm:$0xff] }
 0x11e   :  { %1333 = vmatpush1.msra.mxu0 %v582_v21  ;;  %1410 = vmatpush1.msra.mxu1 %v838_v22  ;;  %v470_v21 = vld [vmem:[#allocation4 + $0x810] sm:$0xff] }
 0x11f   :  { %1247 = vmatmul.mubr.f32.gmra.mxu0 %v5216_v23  ;;  %1334 = vmatprep.subr.mxu0 %v575_v63  ;;  %v726_v22 = vld [vmem:[#allocation4 + $0x1010] sm:$0xff]  ;;  %v719_v63 = vld [vmem:[#allocation4 + $0xfd8] sm:$0xff] }
 0x120   :  { %1411 = vmatprep.subr.mxu1 %v831_v24  ;;  %1335 = vmatpush1.msra.mxu0 %v574_v1  ;;  %v975_v24 = vld [vmem:[#allocation4 + $0x17d8] sm:$0xff]  ;;  %v718_v1 = vld [vmem:[#allocation4 + $0xfd0] sm:$0xff] }
 0x121   :  { %1412 = vmatpush1.msra.mxu1 %v830_v25  ;;  %1336 = vmatprep.subr.mxu0 %v567_v26  ;;  %v974_v25 = vld [vmem:[#allocation4 + $0x17d0] sm:$0xff]  ;;  %v711_v26 = vld [vmem:[#allocation4 + $0xf98] sm:$0xff] }
 0x122   :  { %1413 = vmatprep.subr.mxu1 %v823_v27  ;;  %1337 = vmatpush1.msra.mxu0 %v566_v28  ;;  %v967_v27 = vld [vmem:[#allocation4 + $0x1798] sm:$0xff]  ;;  %v710_v28 = vld [vmem:[#allocation4 + $0xf90] sm:$0xff] }
 0x123   :  { %1414 = vmatpush1.msra.mxu1 %v822_v29  ;;  %1338 = vmatprep.subr.mxu0 %v559_v30  ;;  %v966_v29 = vld [vmem:[#allocation4 + $0x1790] sm:$0xff]  ;;  %v703_v30 = vld [vmem:[#allocation4 + $0xf58] sm:$0xff] }
 0x124   :  { %1415 = vmatprep.subr.mxu1 %v815_v31  ;;  %1339 = vmatpush1.msra.mxu0 %v558_v32  ;;  %v959_v31 = vld [vmem:[#allocation4 + $0x1758] sm:$0xff]  ;;  %v702_v32 = vld [vmem:[#allocation4 + $0xf50] sm:$0xff] }
 0x125   :  { %1416 = vmatpush1.msra.mxu1 %v814_v33  ;;  %1340 = vmatprep.subr.mxu0 %v551_v34  ;;  %v958_v33 = vld [vmem:[#allocation4 + $0x1750] sm:$0xff]  ;;  %v695_v34 = vld [vmem:[#allocation4 + $0xf18] sm:$0xff] }
 0x126   :  { %1417 = vmatprep.subr.mxu1 %v807_v35  ;;  %1341 = vmatpush1.msra.mxu0 %v550_v36  ;;  %v951_v35 = vld [vmem:[#allocation4 + $0x1718] sm:$0xff]  ;;  %v694_v36 = vld [vmem:[#allocation4 + $0xf10] sm:$0xff] }
 0x127   :  { %1418 = vmatpush1.msra.mxu1 %v806_v37  ;;  %1342 = vmatprep.subr.mxu0 %v543_v38  ;;  %v950_v37 = vld [vmem:[#allocation4 + $0x1710] sm:$0xff]  ;;  %v687_v38 = vld [vmem:[#allocation4 + $0xed8] sm:$0xff] }
 0x128   :  { %1419 = vmatprep.subr.mxu1 %v799_v39  ;;  %1343 = vmatpush1.msra.mxu0 %v542_v40  ;;  %v943_v39 = vld [vmem:[#allocation4 + $0x16d8] sm:$0xff]  ;;  %v686_v40 = vld [vmem:[#allocation4 + $0xed0] sm:$0xff] }
 0x129   :  { %1420 = vmatpush1.msra.mxu1 %v798_v41  ;;  %1344 = vmatprep.subr.mxu0 %v535_v42  ;;  %v942_v41 = vld [vmem:[#allocation4 + $0x16d0] sm:$0xff]  ;;  %v679_v42 = vld [vmem:[#allocation4 + $0xe98] sm:$0xff] }
 0x12a   :  { %1421 = vmatprep.subr.mxu1 %v791_v43  ;;  %1345 = vmatpush1.msra.mxu0 %v534_v44  ;;  %v935_v43 = vld [vmem:[#allocation4 + $0x1698] sm:$0xff]  ;;  %v678_v44 = vld [vmem:[#allocation4 + $0xe90] sm:$0xff] }
 0x12b   :  { %1422 = vmatpush1.msra.mxu1 %v790_v45  ;;  %1346 = vmatprep.subr.mxu0 %v527_v46  ;;  %v934_v45 = vld [vmem:[#allocation4 + $0x1690] sm:$0xff]  ;;  %v671_v46 = vld [vmem:[#allocation4 + $0xe58] sm:$0xff] }
 0x12c   :  { %1423 = vmatprep.subr.mxu1 %v783_v47  ;;  %1347 = vmatpush1.msra.mxu0 %v526_v48  ;;  %v927_v47 = vld [vmem:[#allocation4 + $0x1658] sm:$0xff]  ;;  %v670_v48 = vld [vmem:[#allocation4 + $0xe50] sm:$0xff] }
 0x12d   :  { %1424 = vmatpush1.msra.mxu1 %v782_v49  ;;  %1348 = vmatprep.subr.mxu0 %v519_v50  ;;  %v926_v49 = vld [vmem:[#allocation4 + $0x1650] sm:$0xff]  ;;  %v663_v50 = vld [vmem:[#allocation4 + $0xe18] sm:$0xff] }
 0x12e   :  { %1425 = vmatprep.subr.mxu1 %v775_v51  ;;  %1349 = vmatpush1.msra.mxu0 %v518_v52  ;;  %v919_v51 = vld [vmem:[#allocation4 + $0x1618] sm:$0xff]  ;;  %v662_v52 = vld [vmem:[#allocation4 + $0xe10] sm:$0xff] }
 0x12f   :  { %1426 = vmatpush1.msra.mxu1 %v774_v53  ;;  %1350 = vmatprep.subr.mxu0 %v511_v54  ;;  %v918_v53 = vld [vmem:[#allocation4 + $0x1610] sm:$0xff]  ;;  %v655_v54 = vld [vmem:[#allocation4 + $0xdd8] sm:$0xff] }
 0x130   :  { %1427 = vmatprep.subr.mxu1 %v767_v55  ;;  %1351 = vmatpush1.msra.mxu0 %v510_v56  ;;  %v911_v55 = vld [vmem:[#allocation4 + $0x15d8] sm:$0xff]  ;;  %v654_v56 = vld [vmem:[#allocation4 + $0xdd0] sm:$0xff] }
 0x131   :  { %1428 = vmatpush1.msra.mxu1 %v766_v57  ;;  %1352 = vmatprep.subr.mxu0 %v503_v59  ;;  %v910_v57 = vld [vmem:[#allocation4 + $0x15d0] sm:$0xff]  ;;  %v647_v59 = vld [vmem:[#allocation4 + $0xd98] sm:$0xff] }
 0x132   :  { %1429 = vmatprep.subr.mxu1 %v759_v60  ;;  %1353 = vmatpush1.msra.mxu0 %v502_v62  ;;  %v903_v60 = vld [vmem:[#allocation4 + $0x1598] sm:$0xff]  ;;  %v646_v62 = vld [vmem:[#allocation4 + $0xd90] sm:$0xff] }
 0x133   :  { %1430 = vmatpush1.msra.mxu1 %v758_v0  ;;  %1354 = vmatprep.subr.mxu0 %v495_v3  ;;  %v902_v0 = vld [vmem:[#allocation4 + $0x1590] sm:$0xff]  ;;  %v639_v3 = vld [vmem:[#allocation4 + $0xd58] sm:$0xff] }
 0x134   :  { %1431 = vmatprep.subr.mxu1 %v751_v4  ;;  %1355 = vmatpush1.msra.mxu0 %v494_v6  ;;  %v895_v4 = vld [vmem:[#allocation4 + $0x1558] sm:$0xff]  ;;  %v638_v6 = vld [vmem:[#allocation4 + $0xd50] sm:$0xff] }
 0x135   :  { %1432 = vmatpush1.msra.mxu1 %v750_v7  ;;  %1356 = vmatprep.subr.mxu0 %v487_v8  ;;  %v894_v7 = vld [vmem:[#allocation4 + $0x1550] sm:$0xff]  ;;  %v631_v8 = vld [vmem:[#allocation4 + $0xd18] sm:$0xff] }
 0x136   :  { %1433 = vmatprep.subr.mxu1 %v743_v9  ;;  %1357 = vmatpush1.msra.mxu0 %v486_v10  ;;  %v887_v9 = vld [vmem:[#allocation4 + $0x1518] sm:$0xff]  ;;  %v630_v10 = vld [vmem:[#allocation4 + $0xd10] sm:$0xff] }
 0x137   :  { %1434 = vmatpush1.msra.mxu1 %v742_v12  ;;  %1358 = vmatprep.subr.mxu0 %v479_v14  ;;  %v886_v12 = vld [vmem:[#allocation4 + $0x1510] sm:$0xff]  ;;  %v623_v14 = vld [vmem:[#allocation4 + $0xcd8] sm:$0xff] }
 0x138   :  { %1435 = vmatprep.subr.mxu1 %v735_v15  ;;  %1359 = vmatpush1.msra.mxu0 %v478_v16  ;;  %v879_v15 = vld [vmem:[#allocation4 + $0x14d8] sm:$0xff]  ;;  %v622_v16 = vld [vmem:[#allocation4 + $0xcd0] sm:$0xff] }
 0x139   :  { %1436 = vmatpush1.msra.mxu1 %v734_v17  ;;  %1360 = vmatprep.subr.mxu0 %v471_v18  ;;  %v878_v17 = vld [vmem:[#allocation4 + $0x14d0] sm:$0xff]  ;;  %v615_v18 = vld [vmem:[#allocation4 + $0xc98] sm:$0xff] }
 0x13a   :  { %1437 = vmatprep.subr.mxu1 %v727_v19  ;;  %1361 = vmatpush1.msra.mxu0 %v470_v21  ;;  %v871_v19 = vld [vmem:[#allocation4 + $0x1498] sm:$0xff]  ;;  %v614_v21 = vld [vmem:[#allocation4 + $0xc90] sm:$0xff] }
 0x13b   :  { %1438 = vmatpush1.msra.mxu1 %v726_v22  ;;  %1362 = vmatprep.subr.mxu0 %v719_v63  ;;  %v870_v22 = vld [vmem:[#allocation4 + $0x1490] sm:$0xff]  ;;  %v607_v63 = vld [vmem:[#allocation4 + $0xc58] sm:$0xff] }
 0x13c   :  { %1439 = vmatprep.subr.mxu1 %v975_v24  ;;  %1363 = vmatpush2.msra.mxu0 %v718_v1  ;;  %v863_v24 = vld [vmem:[#allocation4 + $0x1458] sm:$0xff]  ;;  %v606_v1 = vld [vmem:[#allocation4 + $0xc50] sm:$0xff] }
 0x13d   :  { %1440 = vmatpush2.msra.mxu1 %v974_v25  ;;  %1364 = vmatprep.subr.mxu0 %v711_v26  ;;  %v862_v25 = vld [vmem:[#allocation4 + $0x1450] sm:$0xff]  ;;  %v599_v26 = vld [vmem:[#allocation4 + $0xc18] sm:$0xff] }
 0x13e   :  { %1441 = vmatprep.subr.mxu1 %v967_v27  ;;  %1365 = vmatpush2.msra.mxu0 %v710_v28  ;;  %v855_v27 = vld [vmem:[#allocation4 + $0x1418] sm:$0xff]  ;;  %v598_v28 = vld [vmem:[#allocation4 + $0xc10] sm:$0xff] }
 0x13f   :  { %1442 = vmatpush2.msra.mxu1 %v966_v29  ;;  %1366 = vmatprep.subr.mxu0 %v703_v30  ;;  %v854_v29 = vld [vmem:[#allocation4 + $0x1410] sm:$0xff]  ;;  %v337_v30 = vld [vmem:[#allocation4 + $0x3e8] sm:$0xff] }
 0x140   :  { %1443 = vmatprep.subr.mxu1 %v959_v31  ;;  %1367 = vmatpush2.msra.mxu0 %v702_v32  ;;  %v5225_v31 = vld [vmem:[%s6635_s0 + $0x18] sm:$0xff]  ;;  %v336_v32 = vld [vmem:[#allocation4 + $0x3e0] sm:$0xff] }
 0x141   :  { %1444 = vmatpush2.msra.mxu1 %v958_v33  ;;  %1368 = vmatprep.subr.mxu0 %v695_v34  ;;  %v592_v33 = vld [vmem:[#allocation4 + $0xbe0] sm:$0xff]  ;;  %v329_v34 = vld [vmem:[#allocation4 + $0x3a8] sm:$0xff] }
 0x142   :  { %1445 = vmatprep.subr.mxu1 %v951_v35  ;;  %1369 = vmatpush2.msra.mxu0 %v694_v36  ;;  %v585_v35 = vld [vmem:[#allocation4 + $0xba8] sm:$0xff]  ;;  %v328_v36 = vld [vmem:[#allocation4 + $0x3a0] sm:$0xff] }
 0x143   :  { %1446 = vmatpush2.msra.mxu1 %v950_v37  ;;  %1370 = vmatprep.subr.mxu0 %v687_v38  ;;  %v584_v37 = vld [vmem:[#allocation4 + $0xba0] sm:$0xff]  ;;  %v321_v38 = vld [vmem:[#allocation4 + $0x368] sm:$0xff] }
 0x144   :  { %1447 = vmatprep.subr.mxu1 %v943_v39  ;;  %1371 = vmatpush2.msra.mxu0 %v686_v40  ;;  %v577_v39 = vld [vmem:[#allocation4 + $0xb68] sm:$0xff]  ;;  %v320_v40 = vld [vmem:[#allocation4 + $0x360] sm:$0xff] }
 0x145   :  { %1448 = vmatpush2.msra.mxu1 %v942_v41  ;;  %1372 = vmatprep.subr.mxu0 %v679_v42  ;;  %v576_v41 = vld [vmem:[#allocation4 + $0xb60] sm:$0xff]  ;;  %v313_v42 = vld [vmem:[#allocation4 + $0x328] sm:$0xff] }
 0x146   :  { %1449 = vmatprep.subr.mxu1 %v935_v43  ;;  %1373 = vmatpush2.msra.mxu0 %v678_v44  ;;  %v312_v43 = vld [vmem:[#allocation4 + $0x320] sm:$0xff] }
 0x147   :  { %1450 = vmatpush2.msra.mxu1 %v934_v45  ;;  %1374 = vmatprep.subr.mxu0 %v671_v46  ;;  %v568_v44 = vld [vmem:[#allocation4 + $0xb20] sm:$0xff]  ;;  %v561_v45 = vld [vmem:[#allocation4 + $0xae8] sm:$0xff] }
 0x148   :  { %1451 = vmatprep.subr.mxu1 %v927_v47  ;;  %1375 = vmatpush2.msra.mxu0 %v670_v48  ;;  %v304_v46 = vld [vmem:[#allocation4 + $0x2e0] sm:$0xff]  ;;  %v297_v48 = vld [vmem:[#allocation4 + $0x2a8] sm:$0xff] }
 0x149   :  { %1452 = vmatpush2.msra.mxu1 %v926_v49  ;;  %1376 = vmatprep.subr.mxu0 %v663_v50  ;;  %v560_v47 = vld [vmem:[#allocation4 + $0xae0] sm:$0xff]  ;;  %v553_v49 = vld [vmem:[#allocation4 + $0xaa8] sm:$0xff] }
 0x14a   :  { %1453 = vmatprep.subr.mxu1 %v919_v51  ;;  %1377 = vmatpush2.msra.mxu0 %v662_v52  ;;  %v296_v50 = vld [vmem:[#allocation4 + $0x2a0] sm:$0xff]  ;;  %v289_v52 = vld [vmem:[#allocation4 + $0x268] sm:$0xff] }
 0x14b   :  { %1454 = vmatpush2.msra.mxu1 %v918_v53  ;;  %1378 = vmatprep.subr.mxu0 %v655_v54  ;;  %v552_v51 = vld [vmem:[#allocation4 + $0xaa0] sm:$0xff]  ;;  %v545_v53 = vld [vmem:[#allocation4 + $0xa68] sm:$0xff] }
 0x14c   :  { %1455 = vmatprep.subr.mxu1 %v911_v55  ;;  %1379 = vmatpush2.msra.mxu0 %v654_v56  ;;  %v288_v54 = vld [vmem:[#allocation4 + $0x260] sm:$0xff]  ;;  %v281_v56 = vld [vmem:[#allocation4 + $0x228] sm:$0xff] }
 0x14d   :  { %1456 = vmatpush2.msra.mxu1 %v910_v57  ;;  %1380 = vmatprep.subr.mxu0 %v647_v59  ;;  %v544_v55 = vld [vmem:[#allocation4 + $0xa60] sm:$0xff]  ;;  %v537_v57 = vld [vmem:[#allocation4 + $0xa28] sm:$0xff] }
 0x14e   :  { %1457 = vmatprep.subr.mxu1 %v903_v60  ;;  %1381 = vmatpush2.msra.mxu0 %v646_v62  ;;  %v280_v59 = vld [vmem:[#allocation4 + $0x220] sm:$0xff]  ;;  %v273_v62 = vld [vmem:[#allocation4 + $0x1e8] sm:$0xff] }
 0x14f   :  { %1458 = vmatpush2.msra.mxu1 %v902_v0  ;;  %1382 = vmatprep.subr.mxu0 %v639_v3  ;;  %v536_v60 = vld [vmem:[#allocation4 + $0xa20] sm:$0xff]  ;;  %v529_v0 = vld [vmem:[#allocation4 + $0x9e8] sm:$0xff] }
 0x150   :  { %1459 = vmatprep.subr.mxu1 %v895_v4  ;;  %1383 = vmatpush2.msra.mxu0 %v638_v6  ;;  %v272_v3 = vld [vmem:[#allocation4 + $0x1e0] sm:$0xff]  ;;  %v265_v6 = vld [vmem:[#allocation4 + $0x1a8] sm:$0xff] }
 0x151   :  { %1460 = vmatpush2.msra.mxu1 %v894_v7  ;;  %1384 = vmatprep.subr.mxu0 %v631_v8  ;;  %v528_v4 = vld [vmem:[#allocation4 + $0x9e0] sm:$0xff]  ;;  %v521_v7 = vld [vmem:[#allocation4 + $0x9a8] sm:$0xff] }
 0x152   :  { %1461 = vmatprep.subr.mxu1 %v887_v9  ;;  %1385 = vmatpush2.msra.mxu0 %v630_v10  ;;  %v264_v8 = vld [vmem:[#allocation4 + $0x1a0] sm:$0xff]  ;;  %v257_v9 = vld [vmem:[#allocation4 + $0x168] sm:$0xff] }
 0x153   :  { %1462 = vmatpush2.msra.mxu1 %v886_v12  ;;  %1386 = vmatprep.subr.mxu0 %v623_v14  ;;  %v513_v10 = vld [vmem:[#allocation4 + $0x968] sm:$0xff]  ;;  %v512_v12 = vld [vmem:[#allocation4 + $0x960] sm:$0xff] }
 0x154   :  { %1463 = vmatprep.subr.mxu1 %v879_v15  ;;  %1387 = vmatpush2.msra.mxu0 %v622_v16  ;;  %v249_v14 = vld [vmem:[#allocation4 + $0x128] sm:$0xff]  ;;  %v248_v15 = vld [vmem:[#allocation4 + $0x120] sm:$0xff] }
 0x155   :  { %1464 = vmatpush2.msra.mxu1 %v878_v17  ;;  %1388 = vmatprep.subr.mxu0 %v615_v18  ;;  %v504_v16 = vld [vmem:[#allocation4 + $0x920] sm:$0xff]  ;;  %v497_v17 = vld [vmem:[#allocation4 + $0x8e8] sm:$0xff] }
 0x156   :  { %1465 = vmatprep.subr.mxu1 %v871_v19  ;;  %1389 = vmatpush2.msra.mxu0 %v614_v21  ;;  %v240_v18 = vld [vmem:[#allocation4 + $0xe0] sm:$0xff]  ;;  %v233_v21 = vld [vmem:[#allocation4 + $0xa8] sm:$0xff] }
 0x157   :  { %1466 = vmatpush2.msra.mxu1 %v870_v22  ;;  %1323 = vmatprep.mubr.f32.mxu1 %v5173_v58  ;;  %v593_v58 = vld [vmem:[#allocation4 + $0xbe8] sm:$0xff]  ;;  %v496_v19 = vld [vmem:[#allocation4 + $0x8e0] sm:$0xff] }
 0x158   :  { %1390 = vmatprep.subr.mxu0 %v607_v63  ;;  %1467 = vmatprep.subr.mxu1 %v863_v24  ;;  %v489_v22 = vld [vmem:[#allocation4 + $0x8a8] sm:$0xff]  ;;  %v232_v63 = vld [vmem:[#allocation4 + $0xa0] sm:$0xff] }
 0x159   :  { %1324 = vmatmul.mubr.f32.gmra.mxu1 %v5178_v61  ;;  %1391 = vmatpush2.msra.mxu0 %v606_v1  ;;  %v5231_v61 = vld [vmem:[%s6635_s0 + $0x10] sm:$0xff]  ;;  %v488_v24 = vld [vmem:[#allocation4 + $0x8a0] sm:$0xff]  ;;  %v225_v1 = vld [vmem:[#allocation4 + $0x68] sm:$0xff] }
 0x15a   :  { %1468 = vmatpush2.msra.mxu1 %v862_v25  ;;  %1392 = vmatprep.subr.mxu0 %v599_v26  ;;  %v481_v25 = vld [vmem:[#allocation4 + $0x868] sm:$0xff]  ;;  %v224_v26 = vld [vmem:[#allocation4 + $0x60] sm:$0xff] }
 0x15b   :  { %1469 = vmatprep.subr.mxu1 %v855_v27  ;;  %1393 = vmatpush2.msra.mxu0 %v598_v28  ;;  %v480_v27 = vld [vmem:[#allocation4 + $0x860] sm:$0xff]  ;;  %v217_v28 = vld [vmem:[#allocation4 + $0x28] sm:$0xff] }
 0x15c   :  { %1394 = vmatprep.mubr.f32.mxu0 %v5225_v31  ;;  %1470 = vmatpush2.msra.mxu1 %v854_v29  ;;  %v473_v29 = vld [vmem:[#allocation4 + $0x828] sm:$0xff] }
 0x15d   :  { %1395 = vmatmul.mubr.f32.vlgmr.msra.gmra.mxu0 %v5231_v61  ;;  %1471 = vmatprep.mubr.f32.mxu1 %v5197_v11  ;;  %v569_v11 = vld [vmem:[#allocation4 + $0xb28] sm:$0xff] }
 0x15e   :  { %1484 = vmatprep.subr.mxu0 %v337_v30  ;;  %1561 = vmatprep.subr.mxu1 %v593_v58  ;;  %v216_v30 = vld [vmem:[#allocation4 + $0x20] sm:$0xff] }
 0x15f   :  { %1472 = vmatmul.mubr.f32.vlgmr.msra.gmra.mxu1 %v5202_v13  ;;  %1485 = vmatpush1.msra.mxu0 %v336_v32  ;;  %v305_v13 = vld [vmem:[#allocation4 + $0x2e8] sm:$0xff]  ;;  %v472_v58 = vld [vmem:[#allocation4 + $0x820] sm:$0xff] }
 0x160   :  { %1562 = vmatpush1.msra.mxu1 %v592_v33  ;;  %1486 = vmatprep.subr.mxu0 %v329_v34  ;;  %v465_v32 = vld [vmem:[#allocation4 + $0x7e8] sm:$0xff]  ;;  %v464_v34 = vld [vmem:[#allocation4 + $0x7e0] sm:$0xff] }
 0x161   :  { %1563 = vmatprep.subr.mxu1 %v585_v35  ;;  %1487 = vmatpush1.msra.mxu0 %v328_v36  ;;  %v721_v33 = vld [vmem:[#allocation4 + $0xfe8] sm:$0xff]  ;;  %v720_v35 = vld [vmem:[#allocation4 + $0xfe0] sm:$0xff] }
 0x162   :  { %1564 = vmatpush1.msra.mxu1 %v584_v37  ;;  %1488 = vmatprep.subr.mxu0 %v321_v38  ;;  %v457_v36 = vld [vmem:[#allocation4 + $0x7a8] sm:$0xff]  ;;  %v456_v38 = vld [vmem:[#allocation4 + $0x7a0] sm:$0xff] }
 0x163   :  { %1565 = vmatprep.subr.mxu1 %v577_v39  ;;  %1489 = vmatpush1.msra.mxu0 %v320_v40  ;;  %v713_v37 = vld [vmem:[#allocation4 + $0xfa8] sm:$0xff]  ;;  %v712_v39 = vld [vmem:[#allocation4 + $0xfa0] sm:$0xff] }
 0x164   :  { %1566 = vmatpush1.msra.mxu1 %v576_v41  ;;  %1490 = vmatprep.subr.mxu0 %v313_v42  ;;  %v449_v40 = vld [vmem:[#allocation4 + $0x768] sm:$0xff]  ;;  %v448_v42 = vld [vmem:[#allocation4 + $0x760] sm:$0xff] }
 0x165   :  { %1567 = vmatprep.subr.mxu1 %v569_v11  ;;  %1491 = vmatpush1.msra.mxu0 %v312_v43  ;;  %v705_v41 = vld [vmem:[#allocation4 + $0xf68] sm:$0xff]  ;;  %v704_v11 = vld [vmem:[#allocation4 + $0xf60] sm:$0xff] }
 0x166   :  { %1568 = vmatpush1.msra.mxu1 %v568_v44  ;;  %1492 = vmatprep.subr.mxu0 %v305_v13  ;;  %v441_v43 = vld [vmem:[#allocation4 + $0x728] sm:$0xff]  ;;  %v440_v13 = vld [vmem:[#allocation4 + $0x720] sm:$0xff] }
 0x167   :  { %1569 = vmatprep.subr.mxu1 %v561_v45  ;;  %1493 = vmatpush1.msra.mxu0 %v304_v46  ;;  %v697_v44 = vld [vmem:[#allocation4 + $0xf28] sm:$0xff]  ;;  %v696_v45 = vld [vmem:[#allocation4 + $0xf20] sm:$0xff] }
 0x168   :  { %1570 = vmatpush1.msra.mxu1 %v560_v47  ;;  %1494 = vmatprep.subr.mxu0 %v297_v48  ;;  %v433_v46 = vld [vmem:[#allocation4 + $0x6e8] sm:$0xff]  ;;  %v432_v48 = vld [vmem:[#allocation4 + $0x6e0] sm:$0xff] }
 0x169   :  { %1571 = vmatprep.subr.mxu1 %v553_v49  ;;  %1495 = vmatpush1.msra.mxu0 %v296_v50  ;;  %v689_v47 = vld [vmem:[#allocation4 + $0xee8] sm:$0xff]  ;;  %v688_v49 = vld [vmem:[#allocation4 + $0xee0] sm:$0xff] }
 0x16a   :  { %1572 = vmatpush1.msra.mxu1 %v552_v51  ;;  %1496 = vmatprep.subr.mxu0 %v289_v52  ;;  %v425_v50 = vld [vmem:[#allocation4 + $0x6a8] sm:$0xff]  ;;  %v424_v52 = vld [vmem:[#allocation4 + $0x6a0] sm:$0xff] }
 0x16b   :  { %1573 = vmatprep.subr.mxu1 %v545_v53  ;;  %1497 = vmatpush1.msra.mxu0 %v288_v54  ;;  %v681_v51 = vld [vmem:[#allocation4 + $0xea8] sm:$0xff]  ;;  %v680_v53 = vld [vmem:[#allocation4 + $0xea0] sm:$0xff] }
 0x16c   :  { %1574 = vmatpush1.msra.mxu1 %v544_v55  ;;  %1400 = vmatprep.mubr.f32.mxu0 %v5184_v2  ;;  %v520_v2 = vld [vmem:[#allocation4 + $0x9a0] sm:$0xff]  ;;  %v417_v54 = vld [vmem:[#allocation4 + $0x668] sm:$0xff] }
 0x16d   :  { %1498 = vmatprep.subr.mxu0 %v281_v56  ;;  %1575 = vmatprep.subr.mxu1 %v537_v57  ;;  %v673_v55 = vld [vmem:[#allocation4 + $0xe68] sm:$0xff]  ;;  %v416_v56 = vld [vmem:[#allocation4 + $0x660] sm:$0xff] }
 0x16e   :  { %1401 = vmatmul.mubr.f32.gmra.mxu0 %v5190_v5  ;;  %1576 = vmatpush1.msra.mxu1 %v536_v60  ;;  %v256_v5 = vld [vmem:[#allocation4 + $0x160] sm:$0xff]  ;;  %v665_v60 = vld [vmem:[#allocation4 + $0xe28] sm:$0xff] }
 0x16f   :  { %1499 = vmatpush1.msra.mxu0 %v280_v59  ;;  %1477 = vmatprep.mubr.f32.mxu1 %v5211_v20  ;;  %v505_v20 = vld [vmem:[#allocation4 + $0x928] sm:$0xff]  ;;  %v672_v57 = vld [vmem:[#allocation4 + $0xe60] sm:$0xff] }
 0x170   :  { %1500 = vmatprep.subr.mxu0 %v273_v62  ;;  %1577 = vmatprep.subr.mxu1 %v529_v0  ;;  %v409_v59 = vld [vmem:[#allocation4 + $0x628] sm:$0xff]  ;;  %v408_v62 = vld [vmem:[#allocation4 + $0x620] sm:$0xff] }
 0x171   :  { %1478 = vmatmul.mubr.f32.gmra.mxu1 %v5216_v23  ;;  %1501 = vmatpush1.msra.mxu0 %v272_v3  ;;  %v241_v23 = vld [vmem:[#allocation4 + $0xe8] sm:$0xff]  ;;  %v664_v0 = vld [vmem:[#allocation4 + $0xe20] sm:$0xff] }
 0x172   :  { %1578 = vmatpush1.msra.mxu1 %v528_v4  ;;  %1502 = vmatprep.subr.mxu0 %v265_v6  ;;  %v401_v3 = vld [vmem:[#allocation4 + $0x5e8] sm:$0xff]  ;;  %v400_v6 = vld [vmem:[#allocation4 + $0x5e0] sm:$0xff] }
 0x173   :  { %1579 = vmatprep.subr.mxu1 %v521_v7  ;;  %1503 = vmatpush1.msra.mxu0 %v264_v8  ;;  %v657_v4 = vld [vmem:[#allocation4 + $0xde8] sm:$0xff]  ;;  %v656_v7 = vld [vmem:[#allocation4 + $0xde0] sm:$0xff] }
 0x174   :  { %1580 = vmatpush1.msra.mxu1 %v520_v2  ;;  %1504 = vmatprep.subr.mxu0 %v257_v9  ;;  %v393_v8 = vld [vmem:[#allocation4 + $0x5a8] sm:$0xff]  ;;  %v392_v9 = vld [vmem:[#allocation4 + $0x5a0] sm:$0xff] }
 0x175   :  { %1581 = vmatprep.subr.mxu1 %v513_v10  ;;  %1505 = vmatpush1.msra.mxu0 %v256_v5  ;;  %v649_v2 = vld [vmem:[#allocation4 + $0xda8] sm:$0xff]  ;;  %v648_v10 = vld [vmem:[#allocation4 + $0xda0] sm:$0xff] }
 0x176   :  { %1582 = vmatpush1.msra.mxu1 %v512_v12  ;;  %1506 = vmatprep.subr.mxu0 %v249_v14  ;;  %v385_v5 = vld [vmem:[#allocation4 + $0x568] sm:$0xff]  ;;  %v384_v14 = vld [vmem:[#allocation4 + $0x560] sm:$0xff] }
 0x177   :  { %1583 = vmatprep.subr.mxu1 %v505_v20  ;;  %1507 = vmatpush1.msra.mxu0 %v248_v15  ;;  %v641_v12 = vld [vmem:[#allocation4 + $0xd68] sm:$0xff]  ;;  %v640_v20 = vld [vmem:[#allocation4 + $0xd60] sm:$0xff] }
 0x178   :  { %1584 = vmatpush1.msra.mxu1 %v504_v16  ;;  %1508 = vmatprep.subr.mxu0 %v241_v23  ;;  %v377_v15 = vld [vmem:[#allocation4 + $0x528] sm:$0xff]  ;;  %v376_v23 = vld [vmem:[#allocation4 + $0x520] sm:$0xff] }
 0x179   :  { %1585 = vmatprep.subr.mxu1 %v497_v17  ;;  %1509 = vmatpush1.msra.mxu0 %v240_v18  ;;  %v633_v16 = vld [vmem:[#allocation4 + $0xd28] sm:$0xff]  ;;  %v632_v17 = vld [vmem:[#allocation4 + $0xd20] sm:$0xff] }
 0x17a   :  { %1586 = vmatpush1.msra.mxu1 %v496_v19  ;;  %1510 = vmatprep.subr.mxu0 %v233_v21  ;;  %v369_v18 = vld [vmem:[#allocation4 + $0x4e8] sm:$0xff]  ;;  %v368_v21 = vld [vmem:[#allocation4 + $0x4e0] sm:$0xff] }
 0x17b   :  { %1587 = vmatprep.subr.mxu1 %v489_v22  ;;  %1511 = vmatpush1.msra.mxu0 %v232_v63  ;;  %v625_v19 = vld [vmem:[#allocation4 + $0xce8] sm:$0xff]  ;;  %v624_v22 = vld [vmem:[#allocation4 + $0xce0] sm:$0xff] }
 0x17c   :  { %1588 = vmatpush1.msra.mxu1 %v488_v24  ;;  %1512 = vmatprep.subr.mxu0 %v225_v1  ;;  %v361_v63 = vld [vmem:[#allocation4 + $0x4a8] sm:$0xff]  ;;  %v360_v1 = vld [vmem:[#allocation4 + $0x4a0] sm:$0xff] }
 0x17d   :  { %1589 = vmatprep.subr.mxu1 %v481_v25  ;;  %1513 = vmatpush1.msra.mxu0 %v224_v26  ;;  %v617_v24 = vld [vmem:[#allocation4 + $0xca8] sm:$0xff]  ;;  %v616_v25 = vld [vmem:[#allocation4 + $0xca0] sm:$0xff] }
 0x17e   :  { %1590 = vmatpush1.msra.mxu1 %v480_v27  ;;  %1514 = vmatprep.subr.mxu0 %v217_v28  ;;  %v353_v26 = vld [vmem:[#allocation4 + $0x468] sm:$0xff]  ;;  %v352_v28 = vld [vmem:[#allocation4 + $0x460] sm:$0xff] }
 0x17f   :  { %1591 = vmatprep.subr.mxu1 %v473_v29  ;;  %1515 = vmatpush1.msra.mxu0 %v216_v30  ;;  %v609_v27 = vld [vmem:[#allocation4 + $0xc68] sm:$0xff]  ;;  %v608_v29 = vld [vmem:[#allocation4 + $0xc60] sm:$0xff] }
 0x180   :  { %1592 = vmatpush1.msra.mxu1 %v472_v58  ;;  %1516 = vmatprep.subr.mxu0 %v465_v32  ;;  %v345_v30 = vld [vmem:[#allocation4 + $0x428] sm:$0xff]  ;;  %v344_v32 = vld [vmem:[#allocation4 + $0x420] sm:$0xff] }
 0x181   :  { %1593 = vmatprep.subr.mxu1 %v721_v33  ;;  %1517 = vmatpush2.msra.mxu0 %v464_v34  ;;  %v601_v58 = vld [vmem:[#allocation4 + $0xc28] sm:$0xff]  ;;  %v600_v33 = vld [vmem:[#allocation4 + $0xc20] sm:$0xff] }
 0x182   :  { %1594 = vmatpush2.msra.mxu1 %v720_v35  ;;  %1518 = vmatprep.subr.mxu0 %v457_v36  ;;  %v849_v34 = vld [vmem:[#allocation4 + $0x13e8] sm:$0xff]  ;;  %v339_v36 = vld [vmem:[#allocation4 + $0x3f8] sm:$0xff] }
 0x183   :  { %1595 = vmatprep.subr.mxu1 %v713_v37  ;;  %1519 = vmatpush2.msra.mxu0 %v456_v38  ;;  %v5243_v35 = vld [vmem:[%s6635_s0 + $0x8] sm:$0xff]  ;;  %v5249_v37 = vld [vmem:[%s6635_s0] sm:$0xff] }
 0x184   :  { %1596 = vmatpush2.msra.mxu1 %v712_v39  ;;  %1520 = vmatprep.subr.mxu0 %v449_v40  ;;  %v848_v38 = vld [vmem:[#allocation4 + $0x13e0] sm:$0xff]  ;;  %v338_v39 = vld [vmem:[#allocation4 + $0x3f0] sm:$0xff]  ;;  %v841_v40 = vld [vmem:[#allocation4 + $0x13a8] sm:$0xff] }
 0x185   :  { %1597 = vmatprep.subr.mxu1 %v705_v41  ;;  %1521 = vmatpush2.msra.mxu0 %v448_v42  ;;  %v331_v41 = vld [vmem:[#allocation4 + $0x3b8] sm:$0xff]  ;;  %v840_v42 = vld [vmem:[#allocation4 + $0x13a0] sm:$0xff] }
 0x186   :  { %1598 = vmatpush2.msra.mxu1 %v704_v11  ;;  %1522 = vmatprep.subr.mxu0 %v441_v43  ;;  %v330_v11 = vld [vmem:[#allocation4 + $0x3b0] sm:$0xff]  ;;  %v833_v43 = vld [vmem:[#allocation4 + $0x1368] sm:$0xff] }
 0x187   :  { %1599 = vmatprep.subr.mxu1 %v697_v44  ;;  %1523 = vmatpush2.msra.mxu0 %v440_v13  ;;  %v323_v44 = vld [vmem:[#allocation4 + $0x378] sm:$0xff]  ;;  %v832_v13 = vld [vmem:[#allocation4 + $0x1360] sm:$0xff] }
 0x188   :  { %1600 = vmatpush2.msra.mxu1 %v696_v45  ;;  %1524 = vmatprep.subr.mxu0 %v433_v46  ;;  %v322_v45 = vld [vmem:[#allocation4 + $0x370] sm:$0xff]  ;;  %v825_v46 = vld [vmem:[#allocation4 + $0x1328] sm:$0xff] }
 0x189   :  { %1601 = vmatprep.subr.mxu1 %v689_v47  ;;  %1525 = vmatpush2.msra.mxu0 %v432_v48  ;;  %v824_v47 = vld [vmem:[#allocation4 + $0x1320] sm:$0xff]  ;;  %v314_v48 = vld [vmem:[#allocation4 + $0x330] sm:$0xff] }
 0x18a   :  { %1602 = vmatpush2.msra.mxu1 %v688_v49  ;;  %1526 = vmatprep.subr.mxu0 %v425_v50  ;;  %v307_v49 = vld [vmem:[#allocation4 + $0x2f8] sm:$0xff]  ;;  %v816_v50 = vld [vmem:[#allocation4 + $0x12e0] sm:$0xff] }
 0x18b   :  { %1603 = vmatprep.subr.mxu1 %v681_v51  ;;  %1527 = vmatpush2.msra.mxu0 %v424_v52  ;;  %v306_v51 = vld [vmem:[#allocation4 + $0x2f0] sm:$0xff]  ;;  %v809_v52 = vld [vmem:[#allocation4 + $0x12a8] sm:$0xff] }
 0x18c   :  { %1604 = vmatpush2.msra.mxu1 %v680_v53  ;;  %1528 = vmatprep.subr.mxu0 %v417_v54  ;;  %v299_v53 = vld [vmem:[#allocation4 + $0x2b8] sm:$0xff]  ;;  %v808_v54 = vld [vmem:[#allocation4 + $0x12a0] sm:$0xff] }
 0x18d   :  { %1605 = vmatprep.subr.mxu1 %v673_v55  ;;  %1529 = vmatpush2.msra.mxu0 %v416_v56  ;;  %v298_v55 = vld [vmem:[#allocation4 + $0x2b0] sm:$0xff]  ;;  %v801_v56 = vld [vmem:[#allocation4 + $0x1268] sm:$0xff] }
 0x18e   :  { %1606 = vmatpush2.msra.mxu1 %v672_v57  ;;  %1530 = vmatprep.subr.mxu0 %v409_v59  ;;  %v291_v57 = vld [vmem:[#allocation4 + $0x278] sm:$0xff]  ;;  %v800_v59 = vld [vmem:[#allocation4 + $0x1260] sm:$0xff] }
 0x18f   :  { %1607 = vmatprep.subr.mxu1 %v665_v60  ;;  %1531 = vmatpush2.msra.mxu0 %v408_v62  ;;  %v290_v60 = vld [vmem:[#allocation4 + $0x270] sm:$0xff]  ;;  %v793_v62 = vld [vmem:[#allocation4 + $0x1228] sm:$0xff] }
 0x190   :  { %1608 = vmatpush2.msra.mxu1 %v664_v0  ;;  %1532 = vmatprep.subr.mxu0 %v401_v3  ;;  %v283_v0 = vld [vmem:[#allocation4 + $0x238] sm:$0xff]  ;;  %v792_v3 = vld [vmem:[#allocation4 + $0x1220] sm:$0xff] }
 0x191   :  { %1609 = vmatprep.subr.mxu1 %v657_v4  ;;  %1533 = vmatpush2.msra.mxu0 %v400_v6  ;;  %v282_v4 = vld [vmem:[#allocation4 + $0x230] sm:$0xff]  ;;  %v785_v6 = vld [vmem:[#allocation4 + $0x11e8] sm:$0xff] }
 0x192   :  { %1610 = vmatpush2.msra.mxu1 %v656_v7  ;;  %1534 = vmatprep.subr.mxu0 %v393_v8  ;;  %v275_v7 = vld [vmem:[#allocation4 + $0x1f8] sm:$0xff]  ;;  %v784_v8 = vld [vmem:[#allocation4 + $0x11e0] sm:$0xff] }
 0x193   :  { %1611 = vmatprep.subr.mxu1 %v649_v2  ;;  %1535 = vmatpush2.msra.mxu0 %v392_v9  ;;  %v274_v2 = vld [vmem:[#allocation4 + $0x1f0] sm:$0xff]  ;;  %v777_v9 = vld [vmem:[#allocation4 + $0x11a8] sm:$0xff] }
 0x194   :  { %1612 = vmatpush2.msra.mxu1 %v648_v10  ;;  %1536 = vmatprep.subr.mxu0 %v385_v5  ;;  %v267_v10 = vld [vmem:[#allocation4 + $0x1b8] sm:$0xff]  ;;  %v776_v5 = vld [vmem:[#allocation4 + $0x11a0] sm:$0xff] }
 0x195   :  { %1613 = vmatprep.subr.mxu1 %v641_v12  ;;  %1537 = vmatpush2.msra.mxu0 %v384_v14  ;;  %v266_v12 = vld [vmem:[#allocation4 + $0x1b0] sm:$0xff]  ;;  %v769_v14 = vld [vmem:[#allocation4 + $0x1168] sm:$0xff] }
 0x196   :  { %1614 = vmatpush2.msra.mxu1 %v640_v20  ;;  %1538 = vmatprep.subr.mxu0 %v377_v15  ;;  %v259_v20 = vld [vmem:[#allocation4 + $0x178] sm:$0xff]  ;;  %v768_v15 = vld [vmem:[#allocation4 + $0x1160] sm:$0xff] }
 0x197   :  { %1615 = vmatprep.subr.mxu1 %v633_v16  ;;  %1539 = vmatpush2.msra.mxu0 %v376_v23  ;;  %v258_v16 = vld [vmem:[#allocation4 + $0x170] sm:$0xff]  ;;  %v761_v23 = vld [vmem:[#allocation4 + $0x1128] sm:$0xff] }
 0x198   :  { %1616 = vmatpush2.msra.mxu1 %v632_v17  ;;  %1540 = vmatprep.subr.mxu0 %v369_v18  ;;  %v251_v17 = vld [vmem:[#allocation4 + $0x138] sm:$0xff]  ;;  %v760_v18 = vld [vmem:[#allocation4 + $0x1120] sm:$0xff] }
 0x199   :  { %1617 = vmatprep.subr.mxu1 %v625_v19  ;;  %1541 = vmatpush2.msra.mxu0 %v368_v21  ;;  %v250_v19 = vld [vmem:[#allocation4 + $0x130] sm:$0xff]  ;;  %v753_v21 = vld [vmem:[#allocation4 + $0x10e8] sm:$0xff] }
 0x19a   :  { %1618 = vmatpush2.msra.mxu1 %v624_v22  ;;  %1542 = vmatprep.subr.mxu0 %v361_v63  ;;  %v243_v22 = vld [vmem:[#allocation4 + $0xf8] sm:$0xff]  ;;  %v752_v63 = vld [vmem:[#allocation4 + $0x10e0] sm:$0xff] }
 0x19b   :  { %1619 = vmatprep.subr.mxu1 %v617_v24  ;;  %1543 = vmatpush2.msra.mxu0 %v360_v1  ;;  %v242_v24 = vld [vmem:[#allocation4 + $0xf0] sm:$0xff]  ;;  %v745_v1 = vld [vmem:[#allocation4 + $0x10a8] sm:$0xff] }
 0x19c   :  { %1620 = vmatpush2.msra.mxu1 %v616_v25  ;;  %1544 = vmatprep.subr.mxu0 %v353_v26  ;;  %v235_v25 = vld [vmem:[#allocation4 + $0xb8] sm:$0xff]  ;;  %v744_v26 = vld [vmem:[#allocation4 + $0x10a0] sm:$0xff] }
 0x19d   :  { %1621 = vmatprep.subr.mxu1 %v609_v27  ;;  %1545 = vmatpush2.msra.mxu0 %v352_v28  ;;  %v234_v27 = vld [vmem:[#allocation4 + $0xb0] sm:$0xff]  ;;  %v737_v28 = vld [vmem:[#allocation4 + $0x1068] sm:$0xff] }
 0x19e   :  { %1622 = vmatpush2.msra.mxu1 %v608_v29  ;;  %1546 = vmatprep.subr.mxu0 %v345_v30  ;;  %v227_v29 = vld [vmem:[#allocation4 + $0x78] sm:$0xff]  ;;  %v736_v30 = vld [vmem:[#allocation4 + $0x1060] sm:$0xff] }
 0x19f   :  { %1623 = vmatprep.subr.mxu1 %v601_v58  ;;  %1547 = vmatpush2.msra.mxu0 %v344_v32  ;;  %v226_v58 = vld [vmem:[#allocation4 + $0x70] sm:$0xff]  ;;  %v729_v32 = vld [vmem:[#allocation4 + $0x1028] sm:$0xff] }
 0x1a0   :  { %1548 = vmatprep.mubr.f32.mxu0 %v5243_v35  ;;  %1624 = vmatpush2.msra.mxu1 %v600_v33  ;;  %v219_v33 = vld [vmem:[#allocation4 + $0x38] sm:$0xff] }
 0x1a1   :  { %1549 = vmatmul.mubr.f32.vlgmr.msra.gmra.mxu0 %v5249_v37  ;;  %1625 = vmatprep.mubr.f32.mxu1 %v5225_v31  ;;  %v315_v31 = vld [vmem:[#allocation4 + $0x338] sm:$0xff] }
 0x1a2   :  { %1638 = vmatprep.subr.mxu0 %v849_v34  ;;  %1715 = vmatprep.subr.mxu1 %v339_v36  ;;  %v728_v34 = vld [vmem:[#allocation4 + $0x1020] sm:$0xff]  ;;  %v218_v36 = vld [vmem:[#allocation4 + $0x30] sm:$0xff] }
 0x1a3   :  { %1626 = vmatmul.mubr.f32.vlgmr.msra.gmra.mxu1 %v5231_v61  ;;  %1639 = vmatpush1.msra.mxu0 %v848_v38  ;;  %v817_v61 = vld [vmem:[#allocation4 + $0x12e8] sm:$0xff] }
 0x1a4   :  { %1716 = vmatpush1.msra.mxu1 %v338_v39  ;;  %1640 = vmatprep.subr.mxu0 %v841_v40  ;;  %v977_v38 = vld [vmem:[#allocation4 + $0x17e8] sm:$0xff]  ;;  %v467_v39 = vld [vmem:[#allocation4 + $0x7f8] sm:$0xff]  ;;  %v976_v40 = vld [vmem:[#allocation4 + $0x17e0] sm:$0xff] }
 0x1a5   :  { %1717 = vmatprep.subr.mxu1 %v331_v41  ;;  %1641 = vmatpush1.msra.mxu0 %v840_v42  ;;  %v466_v41 = vld [vmem:[#allocation4 + $0x7f0] sm:$0xff]  ;;  %v969_v42 = vld [vmem:[#allocation4 + $0x17a8] sm:$0xff] }
 0x1a6   :  { %1718 = vmatpush1.msra.mxu1 %v330_v11  ;;  %1642 = vmatprep.subr.mxu0 %v833_v43  ;;  %v459_v11 = vld [vmem:[#allocation4 + $0x7b8] sm:$0xff]  ;;  %v968_v43 = vld [vmem:[#allocation4 + $0x17a0] sm:$0xff] }
 0x1a7   :  { %1719 = vmatprep.subr.mxu1 %v323_v44  ;;  %1643 = vmatpush1.msra.mxu0 %v832_v13  ;;  %v458_v44 = vld [vmem:[#allocation4 + $0x7b0] sm:$0xff]  ;;  %v961_v13 = vld [vmem:[#allocation4 + $0x1768] sm:$0xff] }
 0x1a8   :  { %1720 = vmatpush1.msra.mxu1 %v322_v45  ;;  %1644 = vmatprep.subr.mxu0 %v825_v46  ;;  %v451_v45 = vld [vmem:[#allocation4 + $0x778] sm:$0xff]  ;;  %v982_v46 = vlaneseq }
 0x1a9   :  { %1721 = vmatprep.subr.mxu1 %v315_v31  ;;  %1645 = vmatpush1.msra.mxu0 %v824_v47  ;;  %v960_v31 = vld [vmem:[#allocation4 + $0x1760] sm:$0xff]  ;;  %v450_v47 = vld [vmem:[#allocation4 + $0x770] sm:$0xff] }
 0x1aa   :  { %1722 = vmatpush1.msra.mxu1 %v314_v48  ;;  %1646 = vmatprep.subr.mxu0 %v817_v61  ;;  %v953_v48 = vld [vmem:[#allocation4 + $0x1728] sm:$0xff]  ;;  %v443_v61 = vld [vmem:[#allocation4 + $0x738] sm:$0xff] }
 0x1ab   :  { %1723 = vmatprep.subr.mxu1 %v307_v49  ;;  %1647 = vmatpush1.msra.mxu0 %v816_v50  ;;  %v952_v49 = vld [vmem:[#allocation4 + $0x1720] sm:$0xff]  ;;  %v442_v50 = vld [vmem:[#allocation4 + $0x730] sm:$0xff] }
 0x1ac   :  { %1724 = vmatpush1.msra.mxu1 %v306_v51  ;;  %1648 = vmatprep.subr.mxu0 %v809_v52  ;;  %v945_v51 = vld [vmem:[#allocation4 + $0x16e8] sm:$0xff]  ;;  %v435_v52 = vld [vmem:[#allocation4 + $0x6f8] sm:$0xff] }
 0x1ad   :  { %1725 = vmatprep.subr.mxu1 %v299_v53  ;;  %1649 = vmatpush1.msra.mxu0 %v808_v54  ;;  %v5254_v53 = vshrl.u32 %v982_v46, 7  ;;  %v944_v54 = vld [vmem:[#allocation4 + $0x16e0] sm:$0xff]  ;;  %v873_v46 = vld [vmem:[#allocation4 + $0x14a8] sm:$0xff] }
 0x1ae   :  { %1726 = vmatpush1.msra.mxu1 %v298_v55  ;;  %1650 = vmatprep.subr.mxu0 %v801_v56  ;;  %v434_v55 = vld [vmem:[#allocation4 + $0x6f0] sm:$0xff]  ;;  %v937_v56 = vld [vmem:[#allocation4 + $0x16a8] sm:$0xff] }
 0x1af   :  { %1727 = vmatprep.subr.mxu1 %v291_v57  ;;  %1651 = vmatpush1.msra.mxu0 %v800_v59  ;;  %6680 = vst [vmem:[#allocation33_spill] sm:$0xff] %v5254_v53  ;;  %v427_v57 = vld [vmem:[#allocation4 + $0x6b8] sm:$0xff]  ;;  %v936_v59 = vld [vmem:[#allocation4 + $0x16a0] sm:$0xff] }
 0x1b0   :  { %1728 = vmatpush1.msra.mxu1 %v290_v60  ;;  %1652 = vmatprep.subr.mxu0 %v793_v62  ;;  %v426_v60 = vld [vmem:[#allocation4 + $0x6b0] sm:$0xff]  ;;  %v5256_v62 = vpop.f32.mrf.mxu0 }
 0x1b1   :  { %1729 = vmatprep.subr.mxu1 %v283_v0  ;;  %1653 = vmatpush1.msra.mxu0 %v792_v3  ;;  %6681 = vst [vmem:[#allocation34_spill] sm:$0xff] %v5256_v62  ;;  %v929_v0 = vld [vmem:[#allocation4 + $0x1668] sm:$0xff]  ;;  %v419_v3 = vld [vmem:[#allocation4 + $0x678] sm:$0xff]  ;;  %v5566_v62 = vld [vmem:[#allocation9 + $0x18] sm:$0xff] }
 0x1b2   :  { %1730 = vmatpush1.msra.mxu1 %v282_v4  ;;  %1654 = vmatprep.subr.mxu0 %v785_v6  ;;  %v6652_v4 = vsub.s32 0, %v5254_v53  ;;  %v928_v6 = vld [vmem:[#allocation4 + $0x1660] sm:$0xff] }
 0x1b3   :  { %1731 = vmatprep.subr.mxu1 %v275_v7  ;;  %1655 = vmatpush1.msra.mxu0 %v784_v8  ;;  %v418_v7 = vld [vmem:[#allocation4 + $0x670] sm:$0xff]  ;;  %v5259_v8 = vld [vmem:[#allocation7] sm:$0xff] }
 0x1b4   :  { %1732 = vmatpush1.msra.mxu1 %v274_v2  ;;  %1656 = vmatprep.subr.mxu0 %v777_v9  ;;  %v921_v2 = vld [vmem:[#allocation4 + $0x1628] sm:$0xff]  ;;  %v411_v9 = vld [vmem:[#allocation4 + $0x638] sm:$0xff] }
 0x1b5   :  { %1733 = vmatprep.subr.mxu1 %v267_v10  ;;  %1657 = vmatpush1.msra.mxu0 %v776_v5  ;;  %v6650_v10 = vsub.s32 1, %v5254_v53  ;;  %v5262_v5 = vpop.f32.mrf.mxu1 }
 0x1b6   :  { %1734 = vmatpush1.msra.mxu1 %v266_v12  ;;  %1658 = vmatprep.subr.mxu0 %v769_v14  ;;  %6682 = vst [vmem:[#allocation35_spill] sm:$0xff] %v5262_v5  ;;  %v920_v12 = vld [vmem:[#allocation4 + $0x1620] sm:$0xff]  ;;  %v410_v14 = vld [vmem:[#allocation4 + $0x630] sm:$0xff]  ;;  %v5558_v5 = vld [vmem:[#allocation9 + $0x20] sm:$0xff] }
 0x1b7   :  { %1735 = vmatprep.subr.mxu1 %v259_v20  ;;  %1659 = vmatpush1.msra.mxu0 %v768_v15  ;;  %v5264_v20 = vpop.f32.mrf.mxu0  ;;  %v913_v15 = vld [vmem:[#allocation4 + $0x15e8] sm:$0xff] }
 0x1b8   :  { %1736 = vmatpush1.msra.mxu1 %v258_v16  ;;  %1660 = vmatprep.subr.mxu0 %v761_v23  ;;  %6683 = vst [vmem:[#allocation36_spill] sm:$0xff] %v5264_v20  ;;  %v403_v16 = vld [vmem:[#allocation4 + $0x5f8] sm:$0xff]  ;;  %v5269_v23 = vrot.slane %v5259_v8, %v6652_v4  ;;  %v5504_v4 = vld [vmem:[#allocation9 + $0xa8] sm:$0xff] }
 0x1b9   :  { %1737 = vmatprep.subr.mxu1 %v251_v17  ;;  %1661 = vmatpush1.msra.mxu0 %v760_v18  ;;  %v912_v17 = vld [vmem:[#allocation4 + $0x15e0] sm:$0xff]  ;;  %v402_v18 = vld [vmem:[#allocation4 + $0x5f0] sm:$0xff]  ;;  %v5560_v20 = vld [vmem:[#allocation9 + $0x30] sm:$0xff] }
 0x1ba   :  { %1738 = vmatpush1.msra.mxu1 %v250_v19  ;;  %1662 = vmatprep.subr.mxu0 %v753_v21  ;;  %6684 = vst [vmem:[#allocation37_spill] sm:$0xff] %v5269_v23  ;;  %v905_v19 = vld [vmem:[#allocation4 + $0x15a8] sm:$0xff]  ;;  %v395_v21 = vld [vmem:[#allocation4 + $0x5b8] sm:$0xff] }
 0x1bb   :  { %1739 = vmatprep.subr.mxu1 %v243_v22  ;;  %1663 = vmatpush1.msra.mxu0 %v752_v63  ;;  %v5274_v63 = vrot.slane %v5259_v8, %v6650_v10  ;;  %v5494_v10 = vld [vmem:[#allocation9 + $0xd8] sm:$0xff] }
 0x1bc   :  { %1740 = vmatpush1.msra.mxu1 %v242_v24  ;;  %1664 = vmatprep.subr.mxu0 %v745_v1  ;;  %v5276_v24 = vpop.f32.mrf.mxu1  ;;  %v904_v1 = vld [vmem:[#allocation4 + $0x15a0] sm:$0xff] }
 0x1bd   :  { %1741 = vmatprep.subr.mxu1 %v235_v25  ;;  %1665 = vmatpush1.msra.mxu0 %v744_v26  ;;  %6685 = vst [vmem:[#allocation38_spill] sm:$0xff] %v5274_v63  ;;  %6686 = vst [vmem:[#allocation39_spill] sm:$0xff] %v5276_v24  ;;  %v394_v25 = vld [vmem:[#allocation4 + $0x5b0] sm:$0xff]  ;;  %v5554_v24 = vld [vmem:[#allocation9 + $0x38] sm:$0xff] }
 0x1be   :  { %1742 = vmatpush1.msra.mxu1 %v234_v27  ;;  %1666 = vmatprep.subr.mxu0 %v737_v28  ;;  %v897_v27 = vld [vmem:[#allocation4 + $0x1568] sm:$0xff]  ;;  %v387_v28 = vld [vmem:[#allocation4 + $0x578] sm:$0xff] }
 0x1bf   :  { %1743 = vmatprep.subr.mxu1 %v227_v29  ;;  %1667 = vmatpush1.msra.mxu0 %v736_v30  ;;  %v896_v30 = vld [vmem:[#allocation4 + $0x1560] sm:$0xff] }
 0x1c0   :  { %1744 = vmatpush1.msra.mxu1 %v226_v58  ;;  %1668 = vmatprep.subr.mxu0 %v729_v32  ;;  %v386_v58 = vld [vmem:[#allocation4 + $0x570] sm:$0xff] }
 0x1c1   :  { %1745 = vmatprep.subr.mxu1 %v219_v33  ;;  %1669 = vmatpush1.msra.mxu0 %v728_v34  ;;  %v889_v34 = vld [vmem:[#allocation4 + $0x1528] sm:$0xff] }
 0x1c2   :  { %1746 = vmatpush1.msra.mxu1 %v218_v36  ;;  %1670 = vmatprep.subr.mxu0 %v977_v38  ;;  %v379_v36 = vld [vmem:[#allocation4 + $0x538] sm:$0xff] }
 0x1c3   :  { %1747 = vmatprep.subr.mxu1 %v467_v39  ;;  %1671 = vmatpush2.msra.mxu0 %v976_v40  ;;  %v888_v39 = vld [vmem:[#allocation4 + $0x1520] sm:$0xff]  ;;  %v378_v40 = vld [vmem:[#allocation4 + $0x530] sm:$0xff] }
 0x1c4   :  { %1748 = vmatpush2.msra.mxu1 %v466_v41  ;;  %1672 = vmatprep.subr.mxu0 %v969_v42  ;;  %v881_v42 = vld [vmem:[#allocation4 + $0x14e8] sm:$0xff] }
 0x1c5   :  { %1749 = vmatprep.subr.mxu1 %v459_v11  ;;  %1673 = vmatpush2.msra.mxu0 %v968_v43  ;;  %v371_v11 = vld [vmem:[#allocation4 + $0x4f8] sm:$0xff] }
 0x1c6   :  { %1750 = vmatpush2.msra.mxu1 %v458_v44  ;;  %1674 = vmatprep.subr.mxu0 %v961_v13  ;;  %v880_v44 = vld [vmem:[#allocation4 + $0x14e0] sm:$0xff]  ;;  %v370_v13 = vld [vmem:[#allocation4 + $0x4f0] sm:$0xff] }
 0x1c7   :  { %1751 = vmatprep.subr.mxu1 %v451_v45  ;;  %1675 = vmatpush2.msra.mxu0 %v960_v31  ;;  %v363_v31 = vld [vmem:[#allocation4 + $0x4b8] sm:$0xff] }
 0x1c8   :  { %1752 = vmatpush2.msra.mxu1 %v450_v47  ;;  %1676 = vmatprep.subr.mxu0 %v953_v48  ;;  %v872_v48 = vld [vmem:[#allocation4 + $0x14a0] sm:$0xff] }
 0x1c9   :  { %1753 = vmatprep.subr.mxu1 %v443_v61  ;;  %1677 = vmatpush2.msra.mxu0 %v952_v49  ;;  %v362_v61 = vld [vmem:[#allocation4 + $0x4b0] sm:$0xff]  ;;  %v5287_v49 = vld [vmem:[%s6635_s0 + $0x38] sm:$0xff] }
 0x1ca   :  { %1754 = vmatpush2.msra.mxu1 %v442_v50  ;;  %1678 = vmatprep.subr.mxu0 %v945_v51  ;;  %v865_v50 = vld [vmem:[#allocation4 + $0x1468] sm:$0xff]  ;;  %v5293_v51 = vld [vmem:[%s6635_s0 + $0x30] sm:$0xff] }
 0x1cb   :  { %1755 = vmatprep.subr.mxu1 %v435_v52  ;;  %1679 = vmatpush2.msra.mxu0 %v944_v54  ;;  %v355_v52 = vld [vmem:[#allocation4 + $0x478] sm:$0xff]  ;;  %v864_v54 = vld [vmem:[#allocation4 + $0x1460] sm:$0xff] }
 0x1cc   :  { %1756 = vmatpush2.msra.mxu1 %v434_v55  ;;  %1680 = vmatprep.subr.mxu0 %v937_v56  ;;  %v354_v55 = vld [vmem:[#allocation4 + $0x470] sm:$0xff] }
 0x1cd   :  { %1757 = vmatprep.subr.mxu1 %v427_v57  ;;  %1681 = vmatpush2.msra.mxu0 %v936_v59  ;;  %v5299_v57 = vld [vmem:[%s6635_s0 + $0x48] sm:$0xff] }
 0x1ce   :  { %1758 = vmatpush2.msra.mxu1 %v426_v60  ;;  %1682 = vmatprep.subr.mxu0 %v929_v0  ;;  %v857_v59 = vld [vmem:[#allocation4 + $0x1428] sm:$0xff]  ;;  %v347_v60 = vld [vmem:[#allocation4 + $0x438] sm:$0xff] }
 0x1cf   :  { %1759 = vmatprep.subr.mxu1 %v419_v3  ;;  %1683 = vmatpush2.msra.mxu0 %v928_v6  ;;  %v5307_v3 = vld [vmem:[%s6635_s0 + $0x40] sm:$0xff] }
 0x1d0   :  { %1760 = vmatpush2.msra.mxu1 %v418_v7  ;;  %1684 = vmatprep.subr.mxu0 %v921_v2  ;;  %v856_v6 = vld [vmem:[#allocation4 + $0x1420] sm:$0xff]  ;;  %v346_v2 = vld [vmem:[#allocation4 + $0x430] sm:$0xff] }
 0x1d1   :  { %1761 = vmatprep.subr.mxu1 %v411_v9  ;;  %1685 = vmatpush2.msra.mxu0 %v920_v12  ;;  %v595_v12 = vld [vmem:[#allocation4 + $0xbf8] sm:$0xff] }
 0x1d2   :  { %1762 = vmatpush2.msra.mxu1 %v410_v14  ;;  %v1094_v22 = vpop.f32.mrf.mxu0  ;;  %1686 = vmatprep.subr.mxu0 %v913_v15  ;;  %v5315_v14 = vld [vmem:[%s6635_s0 + $0x28] sm:$0xff]  ;;  %v851_v15 = vld [vmem:[#allocation4 + $0x13f8] sm:$0xff] }
 0x1d3   :  { %1763 = vmatprep.subr.mxu1 %v403_v16  ;;  %v1095_v26 = vadd.f32 %v1094_v22, %v5269_v23  ;;  %1687 = vmatpush2.msra.mxu0 %v912_v17  ;;  %v5321_v16 = vld [vmem:[%s6635_s0 + $0x20] sm:$0xff]  ;;  %v594_v17 = vld [vmem:[#allocation4 + $0xbf0] sm:$0xff]  ;;  %v5570_v23 = vld [vmem:[#allocation9] sm:$0xff] }
 0x1d4   :  { %1764 = vmatpush2.msra.mxu1 %v402_v18  ;;  %v1096_v29 = vpop.f32.mrf.mxu0  ;;  %1688 = vmatprep.subr.mxu0 %v905_v19  ;;  %v850_v18 = vld [vmem:[#allocation4 + $0x13f0] sm:$0xff]  ;;  %v587_v19 = vld [vmem:[#allocation4 + $0xbb8] sm:$0xff] }
 0x1d5   :  { %1765 = vmatprep.subr.mxu1 %v395_v21  ;;  %v1097_v32 = vadd.f32 %v1096_v29, %v5274_v63  ;;  %v1171_v33 = vpop.f32.mrf.mxu1  ;;  %1689 = vmatpush2.msra.mxu0 %v904_v1  ;;  %v843_v21 = vld [vmem:[#allocation4 + $0x13b8] sm:$0xff]  ;;  %v586_v22 = vld [vmem:[#allocation4 + $0xbb0] sm:$0xff] }
 0x1d6   :  { %1766 = vmatpush2.msra.mxu1 %v394_v25  ;;  %v1172_v38 = vadd.f32 %v1171_v33, %v1095_v26  ;;  %1690 = vmatprep.subr.mxu0 %v897_v27  ;;  %v842_v1 = vld [vmem:[#allocation4 + $0x13b0] sm:$0xff]  ;;  %v579_v25 = vld [vmem:[#allocation4 + $0xb78] sm:$0xff] }
 0x1d7   :  { %1767 = vmatprep.subr.mxu1 %v387_v28  ;;  %v1173_v41 = vpop.f32.mrf.mxu1  ;;  %1691 = vmatpush2.msra.mxu0 %v896_v30  ;;  %v835_v26 = vld [vmem:[#allocation4 + $0x1378] sm:$0xff]  ;;  %v834_v28 = vld [vmem:[#allocation4 + $0x1370] sm:$0xff] }
 0x1d8   :  { %1768 = vmatpush2.msra.mxu1 %v386_v58  ;;  %v1174_v43 = vadd.f32 %v1173_v41, %v1097_v32  ;;  %1692 = vmatprep.subr.mxu0 %v889_v34  ;;  %v5329_v27 = vld [vmem:[%s6635_s0 + $0x58] sm:$0xff]  ;;  %v570_v58 = vld [vmem:[#allocation4 + $0xb30] sm:$0xff] }
 0x1d9   :  { %1769 = vmatprep.subr.mxu1 %v379_v36  ;;  %v5280_v45 = vpop.f32.mrf.mxu0  ;;  %1693 = vmatpush2.msra.mxu0 %v888_v39  ;;  %v571_v29 = vld [vmem:[#allocation4 + $0xb38] sm:$0xff]  ;;  %v826_v32 = vld [vmem:[#allocation4 + $0x1330] sm:$0xff] }
 0x1da   :  { %6687 = vst [vmem:[#allocation40_spill] sm:$0xff] %v5280_v45  ;;  %1770 = vmatpush2.msra.mxu1 %v378_v40  ;;  %1694 = vmatprep.subr.mxu0 %v881_v42  ;;  %v827_v30 = vld [vmem:[#allocation4 + $0x1338] sm:$0xff]  ;;  %v562_v36 = vld [vmem:[#allocation4 + $0xaf0] sm:$0xff] }
 0x1db   :  { %1771 = vmatprep.subr.mxu1 %v371_v11  ;;  %v5282_v47 = vpop.f32.mrf.mxu0  ;;  %1695 = vmatpush2.msra.mxu0 %v880_v44  ;;  %v563_v33 = vld [vmem:[#allocation4 + $0xaf8] sm:$0xff]  ;;  %v554_v41 = vld [vmem:[#allocation4 + $0xab0] sm:$0xff] }
 0x1dc   :  { %6688 = vst [vmem:[#allocation41_spill] sm:$0xff] %v5282_v47  ;;  %1772 = vmatpush2.msra.mxu1 %v370_v13  ;;  %1554 = vmatprep.mubr.f32.mxu0 %v5287_v49  ;;  %v819_v34 = vld [vmem:[#allocation4 + $0x12f8] sm:$0xff]  ;;  %v810_v42 = vld [vmem:[#allocation4 + $0x12b0] sm:$0xff] }
 0x1dd   :  { %1696 = vmatprep.subr.mxu0 %v873_v46  ;;  %1773 = vmatprep.subr.mxu1 %v363_v31  ;;  %v555_v39 = vld [vmem:[#allocation4 + $0xab8] sm:$0xff]  ;;  %v546_v44 = vld [vmem:[#allocation4 + $0xa70] sm:$0xff] }
 0x1de   :  { %1555 = vmatmul.mubr.f32.gmra.mxu0 %v5293_v51  ;;  %1774 = vmatpush2.msra.mxu1 %v362_v61  ;;  %v811_v40 = vld [vmem:[#allocation4 + $0x12b8] sm:$0xff]  ;;  %v802_v13 = vld [vmem:[#allocation4 + $0x1270] sm:$0xff] }
 0x1df   :  { %1697 = vmatpush2.msra.mxu0 %v872_v48  ;;  %v1248_v56 = vpop.f32.mrf.mxu0  ;;  %1631 = vmatprep.mubr.f32.mxu1 %v5299_v57  ;;  %v547_v11 = vld [vmem:[#allocation4 + $0xa78] sm:$0xff]  ;;  %v538_v48 = vld [vmem:[#allocation4 + $0xa30] sm:$0xff] }
 0x1e0   :  { %1698 = vmatprep.subr.mxu0 %v865_v50  ;;  %v5302_v0 = vadd.f32 %v1248_v56, %v1172_v38  ;;  %1775 = vmatprep.subr.mxu1 %v355_v52  ;;  %v818_v38 = vld [vmem:[#allocation4 + $0x12f0] sm:$0xff]  ;;  %v539_v46 = vld [vmem:[#allocation4 + $0xa38] sm:$0xff] }
 0x1e1   :  { %1632 = vmatmul.mubr.f32.gmra.mxu1 %v5307_v3  ;;  %v1250_v7 = vpop.f32.mrf.mxu0  ;;  %1699 = vmatpush2.msra.mxu0 %v864_v54  ;;  %v795_v31 = vld [vmem:[#allocation4 + $0x1238] sm:$0xff]  ;;  %v794_v61 = vld [vmem:[#allocation4 + $0x1230] sm:$0xff] }
 0x1e2   :  { %6689 = vst [vmem:[#allocation42_spill] sm:$0xff] %v5302_v0  ;;  %1776 = vmatpush2.msra.mxu1 %v354_v55  ;;  %v5310_v9 = vadd.f32 %v1250_v7, %v1174_v43  ;;  %1700 = vmatprep.subr.mxu0 %v857_v59  ;;  %v803_v43 = vld [vmem:[#allocation4 + $0x1278] sm:$0xff]  ;;  %v530_v54 = vld [vmem:[#allocation4 + $0x9f0] sm:$0xff]  ;;  %v5522_v0 = vld [vmem:[#allocation9 + $0x80] sm:$0xff] }
 0x1e3   :  { %1777 = vmatprep.subr.mxu1 %v347_v60  ;;  %1701 = vmatpush2.msra.mxu0 %v856_v6  ;;  %v531_v50 = vld [vmem:[#allocation4 + $0x9f8] sm:$0xff]  ;;  %v786_v55 = vld [vmem:[#allocation4 + $0x11f0] sm:$0xff] }
 0x1e4   :  { %6690 = vst [vmem:[#allocation43_spill] sm:$0xff] %v5310_v9  ;;  %1702 = vmatprep.mubr.f32.mxu0 %v5315_v14  ;;  %1778 = vmatpush2.msra.mxu1 %v346_v2  ;;  %v787_v52 = vld [vmem:[#allocation4 + $0x11f8] sm:$0xff]  ;;  %v522_v60 = vld [vmem:[#allocation4 + $0x9b0] sm:$0xff] }
 0x1e5   :  { %1703 = vmatmul.mubr.f32.vlgmr.msra.gmra.mxu0 %v5321_v16  ;;  %1779 = vmatprep.mubr.f32.mxu1 %v5243_v35  ;;  %v578_v35 = vld [vmem:[#allocation4 + $0xb70] sm:$0xff]  ;;  %v523_v56 = vld [vmem:[#allocation4 + $0x9b8] sm:$0xff] }
 0x1e6   :  { %1792 = vmatprep.subr.mxu0 %v595_v12  ;;  %1869 = vmatprep.subr.mxu1 %v851_v15  ;;  %v779_v59 = vld [vmem:[#allocation4 + $0x11b8] sm:$0xff]  ;;  %v778_v6 = vld [vmem:[#allocation4 + $0x11b0] sm:$0xff] }
 0x1e7   :  { %1780 = vmatmul.mubr.f32.vlgmr.msra.gmra.mxu1 %v5249_v37  ;;  %1793 = vmatpush1.msra.mxu0 %v594_v17  ;;  %v5335_v37 = vld [vmem:[%s6635_s0 + $0x50] sm:$0xff]  ;;  %v515_v7 = vld [vmem:[#allocation4 + $0x978] sm:$0xff] }
 0x1e8   :  { %1870 = vmatpush1.msra.mxu1 %v850_v18  ;;  %1794 = vmatprep.subr.mxu0 %v587_v19  ;;  %v771_v2 = vld [vmem:[#allocation4 + $0x1178] sm:$0xff]  ;;  %v514_v12 = vld [vmem:[#allocation4 + $0x970] sm:$0xff] }
 0x1e9   :  { %1871 = vmatprep.subr.mxu1 %v843_v21  ;;  %1708 = vmatprep.mubr.f32.mxu0 %v5329_v27  ;;  %v770_v15 = vld [vmem:[#allocation4 + $0x1170] sm:$0xff]  ;;  %v507_v17 = vld [vmem:[#allocation4 + $0x938] sm:$0xff] }
 0x1ea   :  { %1795 = vmatpush1.msra.mxu0 %v586_v22  ;;  %1872 = vmatpush1.msra.mxu1 %v842_v1  ;;  %v763_v18 = vld [vmem:[#allocation4 + $0x1138] sm:$0xff]  ;;  %v506_v19 = vld [vmem:[#allocation4 + $0x930] sm:$0xff] }
 0x1eb   :  { %1709 = vmatmul.mubr.f32.gmra.mxu0 %v5335_v37  ;;  %1796 = vmatprep.subr.mxu0 %v579_v25  ;;  %v762_v21 = vld [vmem:[#allocation4 + $0x1130] sm:$0xff]  ;;  %v499_v22 = vld [vmem:[#allocation4 + $0x8f8] sm:$0xff] }
 0x1ec   :  { %1873 = vmatprep.subr.mxu1 %v835_v26  ;;  %1797 = vmatpush1.msra.mxu0 %v578_v35  ;;  %v755_v1 = vld [vmem:[#allocation4 + $0x10f8] sm:$0xff]  ;;  %v498_v25 = vld [vmem:[#allocation4 + $0x8f0] sm:$0xff] }
 0x1ed   :  { %1874 = vmatpush1.msra.mxu1 %v834_v28  ;;  %1798 = vmatprep.subr.mxu0 %v571_v29  ;;  %v754_v26 = vld [vmem:[#allocation4 + $0x10f0] sm:$0xff]  ;;  %v491_v35 = vld [vmem:[#allocation4 + $0x8b8] sm:$0xff] }
 0x1ee   :  { %1875 = vmatprep.subr.mxu1 %v827_v30  ;;  %1799 = vmatpush1.msra.mxu0 %v570_v58  ;;  %v747_v28 = vld [vmem:[#allocation4 + $0x10b8] sm:$0xff]  ;;  %v490_v29 = vld [vmem:[#allocation4 + $0x8b0] sm:$0xff] }
 0x1ef   :  { %1876 = vmatpush1.msra.mxu1 %v826_v32  ;;  %1800 = vmatprep.subr.mxu0 %v563_v33  ;;  %v746_v30 = vld [vmem:[#allocation4 + $0x10b0] sm:$0xff]  ;;  %v483_v58 = vld [vmem:[#allocation4 + $0x878] sm:$0xff] }
 0x1f0   :  { %1877 = vmatprep.subr.mxu1 %v819_v34  ;;  %1801 = vmatpush1.msra.mxu0 %v562_v36  ;;  %v739_v32 = vld [vmem:[#allocation4 + $0x1078] sm:$0xff]  ;;  %v482_v33 = vld [vmem:[#allocation4 + $0x870] sm:$0xff] }
 0x1f1   :  { %1878 = vmatpush1.msra.mxu1 %v818_v38  ;;  %1802 = vmatprep.subr.mxu0 %v555_v39  ;;  %v738_v34 = vld [vmem:[#allocation4 + $0x1070] sm:$0xff]  ;;  %v475_v36 = vld [vmem:[#allocation4 + $0x838] sm:$0xff] }
 0x1f2   :  { %1879 = vmatprep.subr.mxu1 %v811_v40  ;;  %1803 = vmatpush1.msra.mxu0 %v554_v41  ;;  %v731_v38 = vld [vmem:[#allocation4 + $0x1038] sm:$0xff]  ;;  %v474_v39 = vld [vmem:[#allocation4 + $0x830] sm:$0xff] }
 0x1f3   :  { %1880 = vmatpush1.msra.mxu1 %v810_v42  ;;  %1804 = vmatprep.subr.mxu0 %v547_v11  ;;  %v730_v40 = vld [vmem:[#allocation4 + $0x1030] sm:$0xff]  ;;  %v723_v41 = vld [vmem:[#allocation4 + $0xff8] sm:$0xff] }
 0x1f4   :  { %1881 = vmatprep.subr.mxu1 %v803_v43  ;;  %1805 = vmatpush1.msra.mxu0 %v546_v44  ;;  %v979_v42 = vld [vmem:[#allocation4 + $0x17f8] sm:$0xff]  ;;  %v722_v11 = vld [vmem:[#allocation4 + $0xff0] sm:$0xff] }
 0x1f5   :  { %1882 = vmatpush1.msra.mxu1 %v802_v13  ;;  %1806 = vmatprep.subr.mxu0 %v539_v46  ;;  %v978_v43 = vld [vmem:[#allocation4 + $0x17f0] sm:$0xff]  ;;  %v715_v44 = vld [vmem:[#allocation4 + $0xfb8] sm:$0xff] }
 0x1f6   :  { %1883 = vmatprep.subr.mxu1 %v795_v31  ;;  %1807 = vmatpush1.msra.mxu0 %v538_v48  ;;  %v971_v13 = vld [vmem:[#allocation4 + $0x17b8] sm:$0xff]  ;;  %v714_v46 = vld [vmem:[#allocation4 + $0xfb0] sm:$0xff] }
 0x1f7   :  { %1884 = vmatpush1.msra.mxu1 %v794_v61  ;;  %1808 = vmatprep.subr.mxu0 %v531_v50  ;;  %v970_v31 = vld [vmem:[#allocation4 + $0x17b0] sm:$0xff]  ;;  %v707_v48 = vld [vmem:[#allocation4 + $0xf78] sm:$0xff] }
 0x1f8   :  { %1885 = vmatprep.subr.mxu1 %v787_v52  ;;  %1809 = vmatpush1.msra.mxu0 %v530_v54  ;;  %v963_v61 = vld [vmem:[#allocation4 + $0x1778] sm:$0xff]  ;;  %v706_v50 = vld [vmem:[#allocation4 + $0xf70] sm:$0xff] }
 0x1f9   :  { %1886 = vmatpush1.msra.mxu1 %v786_v55  ;;  %1810 = vmatprep.subr.mxu0 %v523_v56  ;;  %v962_v52 = vld [vmem:[#allocation4 + $0x1770] sm:$0xff]  ;;  %v699_v54 = vld [vmem:[#allocation4 + $0xf38] sm:$0xff] }
 0x1fa   :  { %1887 = vmatprep.subr.mxu1 %v779_v59  ;;  %1811 = vmatpush1.msra.mxu0 %v522_v60  ;;  %v955_v55 = vld [vmem:[#allocation4 + $0x1738] sm:$0xff]  ;;  %v698_v56 = vld [vmem:[#allocation4 + $0xf30] sm:$0xff] }
 0x1fb   :  { %1888 = vmatpush1.msra.mxu1 %v778_v6  ;;  %1812 = vmatprep.subr.mxu0 %v515_v7  ;;  %v954_v59 = vld [vmem:[#allocation4 + $0x1730] sm:$0xff]  ;;  %v691_v60 = vld [vmem:[#allocation4 + $0xef8] sm:$0xff] }
 0x1fc   :  { %1889 = vmatprep.subr.mxu1 %v771_v2  ;;  %1813 = vmatpush1.msra.mxu0 %v514_v12  ;;  %v947_v6 = vld [vmem:[#allocation4 + $0x16f8] sm:$0xff]  ;;  %v690_v7 = vld [vmem:[#allocation4 + $0xef0] sm:$0xff] }
 0x1fd   :  { %1890 = vmatpush1.msra.mxu1 %v770_v15  ;;  %1814 = vmatprep.subr.mxu0 %v507_v17  ;;  %v946_v2 = vld [vmem:[#allocation4 + $0x16f0] sm:$0xff]  ;;  %v683_v12 = vld [vmem:[#allocation4 + $0xeb8] sm:$0xff] }
 0x1fe   :  { %1891 = vmatprep.subr.mxu1 %v763_v18  ;;  %1815 = vmatpush1.msra.mxu0 %v506_v19  ;;  %v939_v15 = vld [vmem:[#allocation4 + $0x16b8] sm:$0xff]  ;;  %v682_v17 = vld [vmem:[#allocation4 + $0xeb0] sm:$0xff] }
 0x1ff   :  { %1892 = vmatpush1.msra.mxu1 %v762_v21  ;;  %1816 = vmatprep.subr.mxu0 %v499_v22  ;;  %v938_v18 = vld [vmem:[#allocation4 + $0x16b0] sm:$0xff]  ;;  %v675_v19 = vld [vmem:[#allocation4 + $0xe78] sm:$0xff] }
 0x200   :  { %1893 = vmatprep.subr.mxu1 %v755_v1  ;;  %1817 = vmatpush1.msra.mxu0 %v498_v25  ;;  %v931_v21 = vld [vmem:[#allocation4 + $0x1678] sm:$0xff]  ;;  %v674_v22 = vld [vmem:[#allocation4 + $0xe70] sm:$0xff]  ;;  %v5338_v25 = vpop.f32.mrf.mxu1 }
 0x201   :  { %1894 = vmatpush1.msra.mxu1 %v754_v26  ;;  %1818 = vmatprep.subr.mxu0 %v491_v35  ;;  %v930_v1 = vld [vmem:[#allocation4 + $0x1670] sm:$0xff]  ;;  %6691 = vst [vmem:[#allocation44_spill] sm:$0xff] %v5338_v25  ;;  %v667_v26 = vld [vmem:[#allocation4 + $0xe38] sm:$0xff]  ;;  %v5534_v25 = vld [vmem:[#allocation9 + $0x60] sm:$0xff] }
 0x202   :  { %1895 = vmatprep.subr.mxu1 %v747_v28  ;;  %1819 = vmatpush1.msra.mxu0 %v490_v29  ;;  %v923_v35 = vld [vmem:[#allocation4 + $0x1638] sm:$0xff]  ;;  %v6651_v28 = vsub.s32 2, %v5254_v53  ;;  %v666_v29 = vld [vmem:[#allocation4 + $0xe30] sm:$0xff] }
 0x203   :  { %1896 = vmatpush1.msra.mxu1 %v746_v30  ;;  %1820 = vmatprep.subr.mxu0 %v483_v58  ;;  %v922_v30 = vld [vmem:[#allocation4 + $0x1630] sm:$0xff]  ;;  %v659_v58 = vld [vmem:[#allocation4 + $0xdf8] sm:$0xff] }
 0x204   :  { %1897 = vmatprep.subr.mxu1 %v739_v32  ;;  %1821 = vmatpush1.msra.mxu0 %v482_v33  ;;  %v915_v32 = vld [vmem:[#allocation4 + $0x15f8] sm:$0xff]  ;;  %v6649_v33 = vsub.s32 3, %v5254_v53  ;;  %v5552_v45 = vld [vmem:[#allocation9 + $0x28] sm:$0xff] }
 0x205   :  { %1898 = vmatpush1.msra.mxu1 %v738_v34  ;;  %1822 = vmatprep.subr.mxu0 %v475_v36  ;;  %v658_v34 = vld [vmem:[#allocation4 + $0xdf0] sm:$0xff]  ;;  %v5512_v9 = vld [vmem:[#allocation9 + $0xb0] sm:$0xff] }
 0x206   :  { %1899 = vmatprep.subr.mxu1 %v731_v38  ;;  %1823 = vmatpush1.msra.mxu0 %v474_v39  ;;  %v914_v36 = vld [vmem:[#allocation4 + $0x15f0] sm:$0xff]  ;;  %v5342_v38 = vpop.f32.mrf.mxu1  ;;  %v651_v39 = vld [vmem:[#allocation4 + $0xdb8] sm:$0xff] }
 0x207   :  { %1900 = vmatpush1.msra.mxu1 %v730_v40  ;;  %1824 = vmatprep.subr.mxu0 %v723_v41  ;;  %6692 = vst [vmem:[#allocation45_spill] sm:$0xff] %v5342_v38  ;;  %v907_v40 = vld [vmem:[#allocation4 + $0x15b8] sm:$0xff]  ;;  %v5347_v41 = vrot.slane %v5259_v8, %v6651_v28  ;;  %v5542_v38 = vld [vmem:[#allocation9 + $0x58] sm:$0xff]  ;;  %v5564_v63 = vld [vmem:[#allocation9 + $0x8] sm:$0xff] }
 0x208   :  { %1901 = vmatprep.subr.mxu1 %v979_v42  ;;  %1825 = vmatpush2.msra.mxu0 %v722_v11  ;;  %v650_v42 = vld [vmem:[#allocation4 + $0xdb0] sm:$0xff]  ;;  %v5500_v28 = vld [vmem:[#allocation9 + $0xd0] sm:$0xff]  ;;  %6701 = vst [vmem:[#allocation54_spill] sm:$0xff] %v5542_v38 }
 0x209   :  { %1902 = vmatpush2.msra.mxu1 %v978_v43  ;;  %1826 = vmatprep.subr.mxu0 %v715_v44  ;;  %6693 = vst [vmem:[#allocation46_spill] sm:$0xff] %v5347_v41  ;;  %v906_v11 = vld [vmem:[#allocation4 + $0x15b0] sm:$0xff]  ;;  %v643_v43 = vld [vmem:[#allocation4 + $0xd78] sm:$0xff] }
 0x20a   :  { %1903 = vmatprep.subr.mxu1 %v971_v13  ;;  %1827 = vmatpush2.msra.mxu0 %v714_v46  ;;  %v899_v44 = vld [vmem:[#allocation4 + $0x1578] sm:$0xff]  ;;  %v5352_v46 = vrot.slane %v5259_v8, %v6649_v33 }
 0x20b   :  { %1904 = vmatpush2.msra.mxu1 %v970_v31  ;;  %1828 = vmatprep.subr.mxu0 %v707_v48  ;;  %v642_v31 = vld [vmem:[#allocation4 + $0xd70] sm:$0xff]  ;;  %v627_v8 = vld [vmem:[#allocation4 + $0xcf8] sm:$0xff] }
 0x20c   :  { %1905 = vmatprep.subr.mxu1 %v963_v61  ;;  %1829 = vmatpush2.msra.mxu0 %v706_v50  ;;  %6694 = vst [vmem:[#allocation47_spill] sm:$0xff] %v5352_v46  ;;  %v898_v48 = vld [vmem:[#allocation4 + $0x1570] sm:$0xff]  ;;  %v635_v50 = vld [vmem:[#allocation4 + $0xd38] sm:$0xff] }
 0x20d   :  { %1906 = vmatpush2.msra.mxu1 %v962_v52  ;;  %1830 = vmatprep.subr.mxu0 %v699_v54  ;;  %v891_v52 = vld [vmem:[#allocation4 + $0x1538] sm:$0xff] }
 0x20e   :  { %1907 = vmatprep.subr.mxu1 %v955_v55  ;;  %1831 = vmatpush2.msra.mxu0 %v698_v56  ;;  %v634_v55 = vld [vmem:[#allocation4 + $0xd30] sm:$0xff]  ;;  %v5488_v33 = vld [vmem:[#allocation9 + $0xf0] sm:$0xff] }
 0x20f   :  { %1908 = vmatpush2.msra.mxu1 %v954_v59  ;;  %1832 = vmatprep.subr.mxu0 %v691_v60  ;;  %v890_v56 = vld [vmem:[#allocation4 + $0x1530] sm:$0xff]  ;;  %v883_v60 = vld [vmem:[#allocation4 + $0x14f8] sm:$0xff] }
 0x210   :  { %1909 = vmatprep.subr.mxu1 %v947_v6  ;;  %1833 = vmatpush2.msra.mxu0 %v690_v7  ;;  %v626_v6 = vld [vmem:[#allocation4 + $0xcf0] sm:$0xff]  ;;  %v5548_v47 = vld [vmem:[#allocation9 + $0x50] sm:$0xff] }
 0x211   :  { %1910 = vmatpush2.msra.mxu1 %v946_v2  ;;  %1834 = vmatprep.subr.mxu0 %v683_v12  ;;  %v882_v7 = vld [vmem:[#allocation4 + $0x14f0] sm:$0xff]  ;;  %v619_v2 = vld [vmem:[#allocation4 + $0xcb8] sm:$0xff]  ;;  %6702 = vst [vmem:[#allocation55_spill] sm:$0xff] %v5548_v47 }
 0x212   :  { %1911 = vmatprep.subr.mxu1 %v939_v15  ;;  %1835 = vmatpush2.msra.mxu0 %v682_v17  ;;  %v875_v12 = vld [vmem:[#allocation4 + $0x14b8] sm:$0xff]  ;;  %v618_v15 = vld [vmem:[#allocation4 + $0xcb0] sm:$0xff] }
 0x213   :  { %1912 = vmatpush2.msra.mxu1 %v938_v18  ;;  %1836 = vmatprep.subr.mxu0 %v675_v19  ;;  %v874_v17 = vld [vmem:[#allocation4 + $0x14b0] sm:$0xff]  ;;  %v611_v18 = vld [vmem:[#allocation4 + $0xc78] sm:$0xff] }
 0x214   :  { %1913 = vmatprep.subr.mxu1 %v931_v21  ;;  %1837 = vmatpush2.msra.mxu0 %v674_v22  ;;  %v867_v19 = vld [vmem:[#allocation4 + $0x1478] sm:$0xff]  ;;  %v610_v21 = vld [vmem:[#allocation4 + $0xc70] sm:$0xff] }
 0x215   :  { %1914 = vmatpush2.msra.mxu1 %v930_v1  ;;  %1838 = vmatprep.subr.mxu0 %v667_v26  ;;  %v866_v22 = vld [vmem:[#allocation4 + $0x1470] sm:$0xff]  ;;  %v603_v1 = vld [vmem:[#allocation4 + $0xc38] sm:$0xff] }
 0x216   :  { %1915 = vmatprep.subr.mxu1 %v923_v35  ;;  %1839 = vmatpush2.msra.mxu0 %v666_v29  ;;  %v859_v26 = vld [vmem:[#allocation4 + $0x1438] sm:$0xff]  ;;  %v602_v35 = vld [vmem:[#allocation4 + $0xc30] sm:$0xff] }
 0x217   :  { %1916 = vmatpush2.msra.mxu1 %v922_v30  ;;  %1840 = vmatprep.subr.mxu0 %v659_v58  ;;  %v858_v29 = vld [vmem:[#allocation4 + $0x1430] sm:$0xff]  ;;  %v4734_v58 = vld [vmem:[%s6635_s0 + $0x18] sm:$0xff] }
 0x218   :  { %1917 = vmatprep.subr.mxu1 %v915_v32  ;;  %1841 = vmatpush2.msra.mxu0 %v658_v34  ;;  %v5362_v30 = vld [vmem:[#allocation9 + $0x1e8] sm:$0xff]  ;;  %v5369_v32 = vld [vmem:[#allocation9 + $0x1f8] sm:$0xff]  ;;  %v5374_v34 = vld [vmem:[#allocation9 + $0x1e0] sm:$0xff] }
 0x219   :  { %1918 = vmatpush2.msra.mxu1 %v914_v36  ;;  %v1325_v13 = vpop.f32.mrf.mxu1  ;;  %1842 = vmatprep.subr.mxu0 %v651_v39  ;;  %v5376_v36 = vld [vmem:[#allocation9 + $0x1f0] sm:$0xff]  ;;  %v5380_v39 = vld [vmem:[#allocation9 + $0x1c8] sm:$0xff] }
 0x21a   :  { %1919 = vmatprep.subr.mxu1 %v907_v40  ;;  %v5355_v61 = vadd.f32 %v1325_v13, %v5347_v41  ;;  %1843 = vmatpush2.msra.mxu0 %v650_v42  ;;  %v5382_v40 = vld [vmem:[#allocation9 + $0x1d8] sm:$0xff]  ;;  %v5536_v41 = vld [vmem:[#allocation9 + $0x70] sm:$0xff] }
 0x21b   :  { %1920 = vmatpush2.msra.mxu1 %v906_v11  ;;  %v1327_v54 = vpop.f32.mrf.mxu1  ;;  %1844 = vmatprep.subr.mxu0 %v643_v43  ;;  %v5388_v11 = vld [vmem:[#allocation9 + $0x1c0] sm:$0xff]  ;;  %v5390_v43 = vld [vmem:[#allocation9 + $0x1d0] sm:$0xff]  ;;  %v5398_v13 = vld [vmem:[#allocation9 + $0x1b8] sm:$0xff] }
 0x21c   :  { %1921 = vmatprep.subr.mxu1 %v899_v44  ;;  %v5358_v59 = vadd.f32 %v1327_v54, %v5352_v46  ;;  %1845 = vmatpush2.msra.mxu0 %v642_v31  ;;  %v5396_v44 = vld [vmem:[#allocation9 + $0x1a8] sm:$0xff]  ;;  %v5404_v31 = vld [vmem:[#allocation9 + $0x1b0] sm:$0xff]  ;;  %v5546_v46 = vld [vmem:[#allocation9 + $0x40] sm:$0xff] }
 0x21d   :  { %1922 = vmatpush2.msra.mxu1 %v898_v48  ;;  %1846 = vmatprep.subr.mxu0 %v635_v50  ;;  %v5408_v48 = vld [vmem:[#allocation9 + $0x188] sm:$0xff]  ;;  %v5410_v50 = vld [vmem:[#allocation9 + $0x198] sm:$0xff] }
 0x21e   :  { %1923 = vmatprep.subr.mxu1 %v891_v52  ;;  %1847 = vmatpush2.msra.mxu0 %v634_v55  ;;  %v5416_v55 = vld [vmem:[#allocation9 + $0x180] sm:$0xff] }
 0x21f   :  { %1924 = vmatpush2.msra.mxu1 %v890_v56  ;;  %1848 = vmatprep.subr.mxu0 %v627_v8  ;;  %v5386_v42 = vpop.f32.mrf.mxu1  ;;  %v5418_v56 = vld [vmem:[#allocation9 + $0x190] sm:$0xff] }
 0x220   :  { %1925 = vmatprep.subr.mxu1 %v883_v60  ;;  %1849 = vmatpush2.msra.mxu0 %v626_v6  ;;  %6696 = vst [vmem:[#allocation49_spill] sm:$0xff] %v5386_v42  ;;  %v5423_v60 = vld [vmem:[#allocation9 + $0x168] sm:$0xff]  ;;  %v5425_v6 = vld [vmem:[#allocation9 + $0x178] sm:$0xff]  ;;  %v5524_v42 = vld [vmem:[#allocation9 + $0x90] sm:$0xff] }
 0x221   :  { %1926 = vmatpush2.msra.mxu1 %v882_v7  ;;  %1850 = vmatprep.subr.mxu0 %v619_v2  ;;  %v5412_v54 = vpop.f32.mrf.mxu1  ;;  %v5429_v2 = vld [vmem:[#allocation9 + $0x160] sm:$0xff] }
 0x222   :  { %1927 = vmatprep.subr.mxu1 %v875_v12  ;;  %1851 = vmatpush2.msra.mxu0 %v618_v15  ;;  %6698 = vst [vmem:[#allocation51_spill] sm:$0xff] %v5412_v54  ;;  %v5431_v12 = vld [vmem:[#allocation9 + $0x170] sm:$0xff]  ;;  %v5530_v54 = vld [vmem:[#allocation9 + $0x78] sm:$0xff] }
 0x223   :  { %1928 = vmatpush2.msra.mxu1 %v874_v17  ;;  %1785 = vmatprep.mubr.f32.mxu1 %v5287_v49  ;;  %v5367_v49 = vpop.f32.mrf.mxu0  ;;  %v5436_v17 = vld [vmem:[#allocation9 + $0x148] sm:$0xff] }
 0x224   :  { %1852 = vmatprep.subr.mxu0 %v611_v18  ;;  %1929 = vmatprep.subr.mxu1 %v867_v19  ;;  %6695 = vst [vmem:[#allocation48_spill] sm:$0xff] %v5367_v49  ;;  %v5438_v18 = vld [vmem:[#allocation9 + $0x158] sm:$0xff]  ;;  %v5528_v49 = vld [vmem:[#allocation9 + $0x68] sm:$0xff] }
 0x225   :  { %1786 = vmatmul.mubr.f32.gmra.mxu1 %v5293_v51  ;;  %1853 = vmatpush2.msra.mxu0 %v610_v21  ;;  %v4735_v51 = vld [vmem:[%s6635_s0 + $0x10] sm:$0xff]  ;;  %v5444_v21 = vld [vmem:[#allocation9 + $0x140] sm:$0xff]  ;;  %s5033_s0 = smov [#allocation24]  }
 0x226   :  { %1930 = vmatpush2.msra.mxu1 %v866_v22  ;;  %1854 = vmatprep.subr.mxu0 %v603_v1  ;;  %v5446_v22 = vld [vmem:[#allocation9 + $0x150] sm:$0xff]  ;;  %v5450_v1 = vld [vmem:[#allocation9 + $0x128] sm:$0xff]  ;;  %s4441_s18 = sshll.u32 %s5033_s0, 4  ;;  %s4442_s18 = int_to_ptr.vmem [resolvable:$true] %s4441_s18 }
 0x227   :  { %1931 = vmatprep.subr.mxu1 %v859_v26  ;;  %1855 = vmatpush2.msra.mxu0 %v602_v35  ;;  %v5452_v26 = vld [vmem:[#allocation9 + $0x138] sm:$0xff]  ;;  %s4977_s19 = scalar_lea.vmem %s4442_s18, 32  ;;  %p4982_p5 = scmp.lt.s32.totalorder %s4442_s18, %s4442_s18 }
 0x228   :  { %1856 = vmatprep.mubr.f32.mxu0 %v4734_v58  ;;  %1932 = vmatpush2.msra.mxu1 %v858_v29  ;;  %v5458_v29 = vld [vmem:[#allocation9 + $0x120] sm:$0xff]  ;;  %v5460_v58 = vld [vmem:[#allocation9 + $0x130] sm:$0xff]  ;;  %p4978_p4 = scmp.ne.s32.totalorder %s4442_s18, %s4977_s19  ;;  %p4983_p6 = scmp.lt.s32.totalorder %s4977_s19, %s4977_s19 }
 0x229   :  { %1857 = vmatmul.mubr.f32.vlgmr.msra.gmra.mxu0 %v4735_v51  ;;  %1933 = vmatprep.mubr.f32.mxu1 %v5315_v14  ;;  %v5394_v14 = vpop.f32.mrf.mxu0  ;;  %v5464_v51 = vld [vmem:[#allocation9 + $0x108] sm:$0xff] }
 0x22a   :  { %2010 = vmatprep.subr.mxu0 %v5362_v30  ;;  %2081 = vmatprep.subr.mxu1 %v5369_v32  ;;  %6697 = vst [vmem:[#allocation50_spill] sm:$0xff] %v5394_v14  ;;  %v5540_v14 = vld [vmem:[#allocation9 + $0x48] sm:$0xff]  ;;  %p4984_p7 = por %p4983_p6, %p4982_p5 }
 0x22b   :  { %1934 = vmatmul.mubr.f32.vlgmr.msra.gmra.mxu1 %v5321_v16  ;;  %2011 = vmatpush1.msra.mxu0 %v5374_v34  ;;  %v5402_v16 = vld [vmem:[#allocation9 + $0x1a0] sm:$0xff] }
 0x22c   :  { %2082 = vmatpush1.msra.mxu1 %v5376_v36  ;;  %2012 = vmatprep.subr.mxu0 %v5380_v39  ;;  %p4985_p8 = pnand %p4984_p7, %p4978_p4 }
 0x22d   :  { %2083 = vmatprep.subr.mxu1 %v5382_v40  ;;  %2013 = vmatpush1.msra.mxu0 %v5388_v11 }
 0x22e   :  { %2084 = vmatpush1.msra.mxu1 %v5390_v43  ;;  %v1402_v52 = vpop.f32.mrf.mxu0  ;;  %2014 = vmatprep.subr.mxu0 %v5396_v44 }
 0x22f   :  { %2085 = vmatprep.subr.mxu1 %v5398_v13  ;;  %v1403_v8 = vadd.f32 %v1402_v52, %v5355_v61  ;;  %2015 = vmatpush1.msra.mxu0 %v5402_v16  ;;  %v5468_v52 = vld [vmem:[#allocation9 + $0x118] sm:$0xff] }
 0x230   :  { %2086 = vmatpush1.msra.mxu1 %v5404_v31  ;;  %v1404_v7 = vpop.f32.mrf.mxu0  ;;  %2016 = vmatprep.subr.mxu0 %v5408_v48 }
 0x231   :  { %2087 = vmatprep.subr.mxu1 %v5410_v50  ;;  %v1405_v15 = vadd.f32 %v1404_v7, %v5358_v59  ;;  %v1479_v61 = vpop.f32.mrf.mxu1  ;;  %2017 = vmatpush1.msra.mxu0 %v5416_v55  ;;  %v5474_v7 = vld [vmem:[#allocation9 + $0x110] sm:$0xff] }
 0x232   :  { %2088 = vmatpush1.msra.mxu1 %v5418_v56  ;;  %v5440_v19 = vadd.f32 %v1479_v61, %v1403_v8  ;;  %2018 = vmatprep.subr.mxu0 %v5423_v60  ;;  %v5472_v8 = vld [vmem:[#allocation9 + $0x100] sm:$0xff]  ;;  %v5482_v61 = vld [vmem:[#allocation9 + $0xf8] sm:$0xff] }
 0x233   :  { %2089 = vmatprep.subr.mxu1 %v5425_v6  ;;  %v1481_v59 = vpop.f32.mrf.mxu1  ;;  %2019 = vmatpush1.msra.mxu0 %v5429_v2 }
 0x234   :  { %6699 = vst [vmem:[#allocation52_spill] sm:$0xff] %v5440_v19  ;;  %2090 = vmatpush1.msra.mxu1 %v5431_v12  ;;  %v5454_v35 = vadd.f32 %v1481_v59, %v1405_v15  ;;  %2020 = vmatprep.subr.mxu0 %v5436_v17  ;;  %v5478_v15 = vld [vmem:[#allocation9 + $0xe8] sm:$0xff]  ;;  %v5486_v59 = vld [vmem:[#allocation9 + $0xe0] sm:$0xff]  ;;  %v5518_v19 = vld [vmem:[#allocation9 + $0x98] sm:$0xff] }
 0x235   :  { %2091 = vmatprep.subr.mxu1 %v5438_v18  ;;  %2021 = vmatpush1.msra.mxu0 %v5444_v21 }
 0x236   :  { %6700 = vst [vmem:[#allocation53_spill] sm:$0xff] %v5454_v35  ;;  %2092 = vmatpush1.msra.mxu1 %v5446_v22  ;;  %2022 = vmatprep.subr.mxu0 %v5450_v1  ;;  %v5510_v35 = vld [vmem:[#allocation9 + $0xa0] sm:$0xff] }
 0x237   :  { %2093 = vmatprep.subr.mxu1 %v5452_v26  ;;  %2023 = vmatpush1.msra.mxu0 %v5458_v29 }
 0x238   :  { %2094 = vmatpush1.msra.mxu1 %v5460_v58  ;;  %1862 = vmatprep.mubr.f32.mxu0 %v5299_v57  ;;  %v5492_v57 = vld [vmem:[#allocation9 + $0xc8] sm:$0xff] }
 0x239   :  { %2024 = vmatprep.subr.mxu0 %v5464_v51  ;;  %2095 = vmatprep.subr.mxu1 %v5468_v52 }
 0x23a   :  { %1863 = vmatmul.mubr.f32.gmra.mxu0 %v5307_v3  ;;  %2096 = vmatpush1.msra.mxu1 %v5474_v7  ;;  %v5498_v3 = vld [vmem:[#allocation9 + $0xc0] sm:$0xff] }
 0x23b   :  { %2025 = vmatpush1.msra.mxu0 %v5472_v8  ;;  %1939 = vmatprep.mubr.f32.mxu1 %v5329_v27  ;;  %v5506_v27 = vld [vmem:[#allocation9 + $0xb8] sm:$0xff] }
 0x23c   :  { %2026 = vmatprep.subr.mxu0 %v5478_v15  ;;  %2097 = vmatprep.subr.mxu1 %v5482_v61 }
 0x23d   :  { %1940 = vmatmul.mubr.f32.gmra.mxu1 %v5335_v37  ;;  %2027 = vmatpush1.msra.mxu0 %v5486_v59  ;;  %v5516_v37 = vld [vmem:[#allocation9 + $0x88] sm:$0xff] }
 0x23e   :  { %2098 = vmatpush1.msra.mxu1 %v5488_v33  ;;  %2028 = vmatprep.subr.mxu0 %v5492_v57 }
 0x23f   :  { %2099 = vmatprep.subr.mxu1 %v5494_v10  ;;  %2029 = vmatpush1.msra.mxu0 %v5498_v3 }
 0x240   :  { %2100 = vmatpush1.msra.mxu1 %v5500_v28  ;;  %2030 = vmatprep.subr.mxu0 %v5504_v4 }
 0x241   :  { %2101 = vmatprep.subr.mxu1 %v5506_v27  ;;  %2031 = vmatpush1.msra.mxu0 %v5510_v35 }
 0x242   :  { %2102 = vmatpush1.msra.mxu1 %v5512_v9  ;;  %2032 = vmatprep.subr.mxu0 %v5516_v37 }
 0x243   :  { %2103 = vmatprep.subr.mxu1 %v5518_v19  ;;  %2033 = vmatpush1.msra.mxu0 %v5522_v0 }
 0x244   :  { %2104 = vmatpush1.msra.mxu1 %v5524_v42  ;;  %2034 = vmatprep.subr.mxu0 %v5528_v49 }
 0x245   :  { %2105 = vmatprep.subr.mxu1 %v5530_v54  ;;  %2035 = vmatpush1.msra.mxu0 %v5534_v25 }
 0x246   :  { %2106 = vmatpush1.msra.mxu1 %v5536_v41  ;;  %2036 = vmatprep.subr.mxu0 %v5540_v14 }
 0x247   :  { %2107 = vmatprep.subr.mxu1 %v5542_v38  ;;  %2037 = vmatpush1.msra.mxu0 %v5546_v46  ;;  %v5574_v38 = vld [vmem:[#allocation9 + $0x10] sm:$0xff] }
 0x248   :  { %2108 = vmatpush1.msra.mxu1 %v5548_v47  ;;  %2038 = vmatprep.subr.mxu0 %v5552_v45  ;;  %v6663_v47 = vmov 0.0  }
 0x249   :  { %2109 = vmatprep.subr.mxu1 %v5554_v24  ;;  %2039 = vmatpush1.msra.mxu0 %v5558_v5 }
 0x24a   :  { %2110 = vmatpush1.msra.mxu1 %v5560_v20  ;;  %2040 = vmatprep.subr.mxu0 %v5564_v63 }
 0x24b   :  { %2111 = vmatprep.subr.mxu1 %v5566_v62  ;;  %2041 = vmatpush1.msra.mxu0 %v5570_v23 }
 0x24c   :  { %2074 = vmatprep.mubr.f32.mxu0 %v6663_v47  ;;  %2112 = vmatpush1.msra.mxu1 %v5574_v38 }
 0x24d   :  { %2145 = vmatprep.mubr.f32.mxu1 %v6663_v47  ;;  %2075 = vmatmul.mubr.f32.vlgmr.msra.gmra.mxu0 %v6663_v47 }
 0x24e   :  { %2146 = vmatmul.mubr.f32.vlgmr.msra.gmra.mxu1 %v6663_v47  ;;  %2181 = vmatprep.subr.mxu0 %v5362_v30  ;;  %v6662_v30 = vsub.s32 4, %v5254_v53 }
 0x24f   :  { %2252 = vmatprep.subr.mxu1 %v5369_v32  ;;  %2182 = vmatpush1.msra.mxu0 %v5374_v34  ;;  %v6660_v32 = vsub.s32 5, %v5254_v53  ;;  %v4736_v34 = vld [vmem:[#allocation7] sm:$0xff] }
 0x250   :  { %2253 = vmatpush1.msra.mxu1 %v5376_v36  ;;  %2183 = vmatprep.subr.mxu0 %v5380_v39  ;;  %v1001_v36 = vrot.slane %v4736_v34, %v6662_v30  ;;  %v5849_v30 = vld [vmem:[#allocation10 + $0x70] sm:$0xff] }
 0x251   :  { %2254 = vmatprep.subr.mxu1 %v5382_v40  ;;  %2184 = vmatpush1.msra.mxu0 %v5388_v11  ;;  %v1005_v39 = vrot.slane %v4736_v34, %v6660_v32  ;;  %v5843_v32 = vld [vmem:[#allocation10 + $0x78] sm:$0xff] }
 0x252   :  { %2255 = vmatpush1.msra.mxu1 %v5390_v43  ;;  %2185 = vmatprep.subr.mxu0 %v5396_v44 }
 0x253   :  { %2256 = vmatprep.subr.mxu1 %v5398_v13  ;;  %2186 = vmatpush1.msra.mxu0 %v5402_v16 }
 0x254   :  { %2257 = vmatpush1.msra.mxu1 %v5404_v31  ;;  %2187 = vmatprep.subr.mxu0 %v5408_v48 }
 0x255   :  { %2258 = vmatprep.subr.mxu1 %v5410_v50  ;;  %2188 = vmatpush1.msra.mxu0 %v5416_v55 }
 0x256   :  { %2259 = vmatpush1.msra.mxu1 %v5418_v56  ;;  %2189 = vmatprep.subr.mxu0 %v5423_v60 }
 0x257   :  { %2260 = vmatprep.subr.mxu1 %v5425_v6  ;;  %2190 = vmatpush1.msra.mxu0 %v5429_v2  ;;  %v5670_v2 = vld [vmem:[#allocation10 + $0x1e8] sm:$0xff] }
 0x258   :  { %2261 = vmatpush1.msra.mxu1 %v5431_v12  ;;  %2191 = vmatprep.subr.mxu0 %v5436_v17  ;;  %v5672_v12 = vld [vmem:[#allocation10 + $0x1f8] sm:$0xff] }
 0x259   :  { %2262 = vmatprep.subr.mxu1 %v5438_v18  ;;  %2192 = vmatpush1.msra.mxu0 %v5444_v21 }
 0x25a   :  { %2263 = vmatpush1.msra.mxu1 %v5446_v22  ;;  %2193 = vmatprep.subr.mxu0 %v5450_v1 }
 0x25b   :  { %2264 = vmatprep.subr.mxu1 %v5452_v26  ;;  %2194 = vmatpush1.msra.mxu0 %v5458_v29 }
 0x25c   :  { %2265 = vmatpush1.msra.mxu1 %v5460_v58  ;;  %2195 = vmatprep.subr.mxu0 %v5464_v51 }
 0x25d   :  { %2266 = vmatprep.subr.mxu1 %v5468_v52  ;;  %2196 = vmatpush1.msra.mxu0 %v5472_v8 }
 0x25e   :  { %2267 = vmatpush1.msra.mxu1 %v5474_v7  ;;  %2197 = vmatprep.subr.mxu0 %v5478_v15 }
 0x25f   :  { %2268 = vmatprep.subr.mxu1 %v5482_v61  ;;  %2198 = vmatpush1.msra.mxu0 %v5486_v59 }
 0x260   :  { %2269 = vmatpush1.msra.mxu1 %v5488_v33  ;;  %2199 = vmatprep.subr.mxu0 %v5492_v57 }
 0x261   :  { %v1550_v40 = vpop.f32.mrf.mxu0  ;;  %2270 = vmatprep.subr.mxu1 %v5494_v10  ;;  %2200 = vmatpush1.msra.mxu0 %v5498_v3 }
 0x262   :  { %v1551_v11 = vadd.f32 %v1550_v40, %v1001_v36  ;;  %2271 = vmatpush1.msra.mxu1 %v5500_v28  ;;  %2201 = vmatprep.subr.mxu0 %v5504_v4  ;;  %v6703_v4 = vld [vmem:[#allocation54_spill] sm:$0xff]  ;;  %v6716_v40 = vld [vmem:[#allocation36_spill] sm:$0xff] }
 0x263   :  { %v1552_v43 = vpop.f32.mrf.mxu0  ;;  %v1627_v44 = vpop.f32.mrf.mxu1  ;;  %2272 = vmatprep.subr.mxu1 %v5506_v27  ;;  %2202 = vmatpush1.msra.mxu0 %v5510_v35 }
 0x264   :  { %v1553_v13 = vadd.f32 %v1552_v43, %v1005_v39  ;;  %v1628_v16 = vadd.f32 %v1627_v44, %v1551_v11  ;;  %2273 = vmatpush1.msra.mxu1 %v5512_v9  ;;  %2203 = vmatprep.subr.mxu0 %v5516_v37  ;;  %v6704_v9 = vld [vmem:[#allocation55_spill] sm:$0xff]  ;;  %v6713_v37 = vld [vmem:[#allocation37_spill] sm:$0xff] }
 0x265   :  { %v1629_v33 = vpop.f32.mrf.mxu1  ;;  %2274 = vmatprep.subr.mxu1 %v5518_v19  ;;  %2204 = vmatpush1.msra.mxu0 %v5522_v0  ;;  %v6717_v43 = vld [vmem:[#allocation35_spill] sm:$0xff] }
 0x266   :  { %v1630_v10 = vadd.f32 %v1629_v33, %v1553_v13  ;;  %2275 = vmatpush1.msra.mxu1 %v5524_v42  ;;  %2205 = vmatprep.subr.mxu0 %v5528_v49  ;;  %v6718_v13 = vld [vmem:[#allocation39_spill] sm:$0xff]  ;;  %v6719_v33 = vld [vmem:[#allocation40_spill] sm:$0xff] }
 0x267   :  { %2276 = vmatprep.subr.mxu1 %v5530_v54  ;;  %2206 = vmatpush1.msra.mxu0 %v5534_v25 }
 0x268   :  { %2277 = vmatpush1.msra.mxu1 %v5536_v41  ;;  %2207 = vmatprep.subr.mxu0 %v5540_v14 }
 0x269   :  { %2278 = vmatprep.subr.mxu1 %v6703_v4  ;;  %2208 = vmatpush1.msra.mxu0 %v5546_v46 }
 0x26a   :  { %2279 = vmatpush1.msra.mxu1 %v6704_v9  ;;  %2209 = vmatprep.subr.mxu0 %v5552_v45  ;;  %v6720_v9 = vld [vmem:[#allocation41_spill] sm:$0xff] }
 0x26b   :  { %2280 = vmatprep.subr.mxu1 %v5554_v24  ;;  %2210 = vmatpush1.msra.mxu0 %v5558_v5  ;;  %v6661_v24 = vsub.s32 6, %v5254_v53 }
 0x26c   :  { %2281 = vmatpush1.msra.mxu1 %v5560_v20  ;;  %2211 = vmatprep.subr.mxu0 %v5564_v63  ;;  %v6659_v63 = vsub.s32 7, %v5254_v53  ;;  %v5855_v53 = vld [vmem:[#allocation10 + $0x58] sm:$0xff] }
 0x26d   :  { %2282 = vmatprep.subr.mxu1 %v5566_v62  ;;  %2212 = vmatpush1.msra.mxu0 %v5570_v23  ;;  %v1009_v23 = vrot.slane %v4736_v34, %v6661_v24  ;;  %v5847_v24 = vld [vmem:[#allocation10 + $0x60] sm:$0xff] }
 0x26e   :  { %2283 = vmatpush1.msra.mxu1 %v5574_v38  ;;  %2245 = vmatprep.mubr.f32.mxu0 %v6663_v47  ;;  %v1013_v49 = vrot.slane %v4736_v34, %v6659_v63  ;;  %v6714_v34 = vld [vmem:[#allocation34_spill] sm:$0xff]  ;;  %v5841_v63 = vld [vmem:[#allocation10 + $0x68] sm:$0xff] }
 0x26f   :  { %2316 = vmatprep.mubr.f32.mxu1 %v6663_v47  ;;  %2417 = vmatprep.subr.mxu0 %v5670_v2  ;;  %v5853_v47 = vld [vmem:[#allocation10 + $0x48] sm:$0xff] }
 0x270   :  { %2488 = vmatprep.subr.mxu1 %v5672_v12 }
 0x29e   :  { %v1556_v0 = vpop.f32.mrf.mxu0 }
 0x29f   :  { %v1557_v45 = vadd.f32 %v1556_v0, %v1001_v36  ;;  %v1089_v36 = vadd.f32 %v6714_v34, %v6713_v37 }
 0x2a0   :  { %v1558_v25 = vpop.f32.mrf.mxu0 }
 0x2a1   :  { %v1559_v5 = vadd.f32 %v1558_v25, %v1005_v39  ;;  %v1633_v28 = vpop.f32.mrf.mxu1  ;;  %v6715_v39 = vld [vmem:[#allocation38_spill] sm:$0xff]  ;;  %v1166_v44 = vadd.f32 %v6717_v43, %v1089_v36  ;;  %v5705_v43 = vld [vmem:[#allocation10 + $0x1e0] sm:$0xff] }
 0x2a2   :  { %v1634_v20 = vadd.f32 %v1633_v28, %v1557_v45  ;;  %v1091_v11 = vadd.f32 %v6716_v40, %v6715_v39 }
 0x2a3   :  { %v1635_v41 = vpop.f32.mrf.mxu1 }
 0x2a4   :  { %v1636_v62 = vadd.f32 %v1635_v41, %v1559_v5  ;;  %v6722_v41 = vld [vmem:[#allocation45_spill] sm:$0xff] }
 0x2a5   :  { %v1704_v38 = vpop.f32.mrf.mxu0 }
 0x2a6   :  { %v5660_v46 = vadd.f32 %v1704_v38, %v1628_v16  ;;  %v1168_v16 = vadd.f32 %v6718_v13, %v1091_v11  ;;  %v5709_v13 = vld [vmem:[#allocation10 + $0x1c8] sm:$0xff] }
 0x2a7   :  { %v1706_v42 = vpop.f32.mrf.mxu0  ;;  %v1781_v14 = vpop.f32.mrf.mxu1 }
 0x2a8   :  { %6705 = vst [vmem:[#allocation54_spill] sm:$0xff] %v5660_v46  ;;  %v5664_v31 = vadd.f32 %v1706_v42, %v1630_v10  ;;  %v1782_v48 = vadd.f32 %v1781_v14, %v1009_v23  ;;  %v1243_v10 = vadd.f32 %v6719_v33, %v1166_v44  ;;  %v1245_v0 = vadd.f32 %v6720_v9, %v1168_v16  ;;  %v5707_v44 = vld [vmem:[#allocation10 + $0x1f0] sm:$0xff]  ;;  %v5711_v16 = vld [vmem:[#allocation10 + $0x1d8] sm:$0xff]  ;;  %v5715_v33 = vld [vmem:[#allocation10 + $0x1c0] sm:$0xff] }
 0x2a9   :  { %v1783_v50 = vpop.f32.mrf.mxu1  ;;  %v5723_v9 = vld [vmem:[#allocation10 + $0x1b8] sm:$0xff]  ;;  %v5871_v46 = vld [vmem:[#allocation10 + $0x20] sm:$0xff] }
 0x2aa   :  { %6706 = vst [vmem:[#allocation55_spill] sm:$0xff] %v5664_v31  ;;  %v1784_v54 = vadd.f32 %v1783_v50, %v1013_v49  ;;  %v6725_v50 = vld [vmem:[#allocation44_spill] sm:$0xff]  ;;  %v5867_v31 = vld [vmem:[#allocation10 + $0x38] sm:$0xff] }
 0x2ab   :  { %v1710_v55 = vpop.f32.mrf.mxu0 }
 0x2ac   :  { %v5666_v56 = vadd.f32 %v1710_v55, %v1634_v20  ;;  %v6721_v20 = vld [vmem:[#allocation47_spill] sm:$0xff] }
 0x2ad   :  { %v1712_v60 = vpop.f32.mrf.mxu0  ;;  %v6726_v55 = vld [vmem:[#allocation51_spill] sm:$0xff] }
 0x2ae   :  { %6707 = vst [vmem:[#allocation56_spill] sm:$0xff] %v5666_v56  ;;  %v5668_v6 = vadd.f32 %v1712_v60, %v1636_v62  ;;  %v1322_v62 = vadd.f32 %v6722_v41, %v6721_v20  ;;  %v5741_v20 = vld [vmem:[#allocation10 + $0x190] sm:$0xff]  ;;  %v5745_v41 = vld [vmem:[#allocation10 + $0x168] sm:$0xff] }
 0x2af   :  { %v5887_v56 = vld [vmem:[#allocation10 + $0x10] sm:$0xff] }
 0x2b0   :  { %6708 = vst [vmem:[#allocation57_spill] sm:$0xff] %v5668_v6  ;;  %v5883_v6 = vld [vmem:[#allocation10] sm:$0xff] }
 0x2e5   :  { %v1787_v17 = vpop.f32.mrf.mxu1 }
 0x2e6   :  { %v1788_v51 = vadd.f32 %v1787_v17, %v1009_v23  ;;  %v6727_v17 = vld [vmem:[#allocation48_spill] sm:$0xff] }
 0x2e7   :  { %v1789_v18 = vpop.f32.mrf.mxu1 }
 0x2e8   :  { %v1790_v52 = vadd.f32 %v1789_v18, %v1013_v49  ;;  %v6723_v49 = vld [vmem:[#allocation50_spill] sm:$0xff] }
 0x2e9   :  { %v1858_v19 = vpop.f32.mrf.mxu0  ;;  %v1399_v42 = vadd.f32 %v6723_v49, %v1322_v62  ;;  %v5747_v62 = vld [vmem:[#allocation10 + $0x178] sm:$0xff]  ;;  %v5757_v49 = vld [vmem:[#allocation10 + $0x148] sm:$0xff] }
 0x2ea   :  { %v1859_v21 = vadd.f32 %v1858_v19, %v1782_v48  ;;  %v6724_v48 = vld [vmem:[#allocation46_spill] sm:$0xff] }
 0x2eb   :  { %v1860_v22 = vpop.f32.mrf.mxu0  ;;  %v1935_v1 = vpop.f32.mrf.mxu1  ;;  %v1476_v60 = vadd.f32 %v6726_v55, %v1399_v42  ;;  %v5759_v42 = vld [vmem:[#allocation10 + $0x158] sm:$0xff]  ;;  %v5775_v55 = vld [vmem:[#allocation10 + $0x120] sm:$0xff] }
 0x2ec   :  { %v1861_v26 = vadd.f32 %v1860_v22, %v1784_v54  ;;  %v5676_v35 = vadd.f32 %v1935_v1, %v1859_v21  ;;  %v1320_v54 = vadd.f32 %v6725_v50, %v6724_v48  ;;  %v6728_v21 = vld [vmem:[#allocation49_spill] sm:$0xff] }
 0x2ed   :  { %v1937_v29 = vpop.f32.mrf.mxu1  ;;  %v5765_v48 = vld [vmem:[#allocation10 + $0x150] sm:$0xff]  ;;  %v5769_v50 = vld [vmem:[#allocation10 + $0x128] sm:$0xff] }
 0x2ee   :  { %6709 = vst [vmem:[#allocation58_spill] sm:$0xff] %v5676_v35  ;;  %v5678_v58 = vadd.f32 %v1937_v29, %v1861_v26  ;;  %v1397_v18 = vadd.f32 %v6727_v17, %v1320_v54  ;;  %v5771_v54 = vld [vmem:[#allocation10 + $0x138] sm:$0xff]  ;;  %v5781_v17 = vld [vmem:[#allocation10 + $0x108] sm:$0xff]  ;;  %v5861_v35 = vld [vmem:[#allocation10 + $0x50] sm:$0xff] }
 0x2ef   :  { %6731 = vst [vmem:[#allocation38_spill] sm:$0xff] %v5861_v35 }
 0x2f0   :  { %6710 = vst [vmem:[#allocation59_spill] sm:$0xff] %v5678_v58  ;;  %v1474_v22 = vadd.f32 %v6728_v21, %v1397_v18  ;;  %v5783_v18 = vld [vmem:[#allocation10 + $0x118] sm:$0xff]  ;;  %v5789_v21 = vld [vmem:[#allocation10 + $0x110] sm:$0xff]  ;;  %v5865_v58 = vld [vmem:[#allocation10 + $0x28] sm:$0xff] }
 0x2fa   :  { %v1864_v8 = vpop.f32.mrf.mxu0 }
 0x2fb   :  { %v1865_v7 = vadd.f32 %v1864_v8, %v1788_v51 }
 0x2fc   :  { %v1866_v15 = vpop.f32.mrf.mxu0 }
 0x2fd   :  { %v1867_v61 = vadd.f32 %v1866_v15, %v1790_v52  ;;  %v1941_v59 = vpop.f32.mrf.mxu1 }
 0x2fe   :  { %v5680_v57 = vadd.f32 %v1941_v59, %v1865_v7 }
 0x2ff   :  { %v1943_v3 = vpop.f32.mrf.mxu1 }
 0x300   :  { %6711 = vst [vmem:[#allocation60_spill] sm:$0xff] %v5680_v57  ;;  %v5682_v27 = vadd.f32 %v1943_v3, %v1867_v61  ;;  %v5873_v57 = vld [vmem:[#allocation10 + $0x30] sm:$0xff] }
 0x302   :  { %6712 = vst [vmem:[#allocation61_spill] sm:$0xff] %v5682_v27  ;;  %v5877_v27 = vld [vmem:[#allocation10 + $0x8] sm:$0xff] }
 0x30d   :  { %v2076_v4 = vpop.f32.mrf.mxu0 }
 0x30e   :  { %v2152_v45 = vadd.f32 %v2076_v4, %v1243_v10  ;;  %v2147_v23 = vpop.f32.mrf.mxu1  ;;  %v5717_v10 = vld [vmem:[#allocation10 + $0x1d0] sm:$0xff]  ;;  %v5721_v4 = vld [vmem:[#allocation10 + $0x1a8] sm:$0xff] }
 0x30f   :  { %v2078_v25 = vpop.f32.mrf.mxu0  ;;  %v2154_v29 = vadd.f32 %v2147_v23, %v1474_v22  ;;  %v5751_v23 = vld [vmem:[#allocation10 + $0x160] sm:$0xff]  ;;  %v5793_v22 = vld [vmem:[#allocation10 + $0xe8] sm:$0xff] }
 0x310   :  { %v4456_v5 = vmul.f32 -1.442695, %v2152_v45  ;;  %v2153_v28 = vadd.f32 %v2078_v25, %v1245_v0  ;;  %v2149_v14 = vpop.f32.mrf.mxu1  ;;  %v5727_v0 = vld [vmem:[#allocation10 + $0x1a0] sm:$0xff]  ;;  %v5729_v45 = vld [vmem:[#allocation10 + $0x1b0] sm:$0xff]  ;;  %v5733_v25 = vld [vmem:[#allocation10 + $0x188] sm:$0xff] }
 0x311   :  { %v2155_v19 = vadd.f32 %v2149_v14, %v1476_v60  ;;  %v5763_v14 = vld [vmem:[#allocation10 + $0x140] sm:$0xff]  ;;  %v5777_v60 = vld [vmem:[#allocation10 + $0x130] sm:$0xff] }
 0x312   :  { %4590 = vpow2.f32 %v4456_v5  ;;  %v4457_v38 = vmul.f32 -1.442695, %v2153_v28  ;;  %v5735_v5 = vld [vmem:[#allocation10 + $0x198] sm:$0xff]  ;;  %v5739_v28 = vld [vmem:[#allocation10 + $0x180] sm:$0xff] }
 0x313   :  { %v4458_v1 = vmul.f32 -1.442695, %v2155_v19  ;;  %v5787_v19 = vld [vmem:[#allocation10 + $0x100] sm:$0xff] }
 0x314   :  { %4592 = vpow2.f32 %v4457_v38  ;;  %v5753_v38 = vld [vmem:[#allocation10 + $0x170] sm:$0xff] }
 0x315   :  { %4594 = vpow2.f32 %v4458_v1  ;;  %v5795_v1 = vld [vmem:[#allocation10 + $0xf8] sm:$0xff] }
 0x31f   :  { %v4591_v26 = vpop.eup %4590 }
 0x320   :  { %v2159_v51 = vadd.f32 1.0, %v4591_v26  ;;  %v5799_v26 = vld [vmem:[#allocation10 + $0xe0] sm:$0xff] }
 0x321   :  { %v4593_v52 = vpop.eup %4592 }
 0x322   :  { %4596 = vrcp.f32 %v2159_v51  ;;  %v2165_v8 = vadd.f32 1.0, %v4593_v52  ;;  %v4595_v7 = vpop.eup %4594  ;;  %v5805_v51 = vld [vmem:[#allocation10 + $0xc8] sm:$0xff]  ;;  %v5807_v52 = vld [vmem:[#allocation10 + $0xd8] sm:$0xff] }
 0x323   :  { %4598 = vtanh.f32 %v2154_v29  ;;  %v2172_v3 = vadd.f32 1.0, %v4595_v7  ;;  %v5801_v29 = vld [vmem:[#allocation10 + $0xf0] sm:$0xff] }
 0x324   :  { %4600 = vrcp.f32 %v2165_v8  ;;  %v5811_v8 = vld [vmem:[#allocation10 + $0xc0] sm:$0xff]  ;;  %v5813_v7 = vld [vmem:[#allocation10 + $0xd0] sm:$0xff] }
 0x325   :  { %4602 = vrcp.f32 %v2172_v3  ;;  %v5825_v3 = vld [vmem:[#allocation10 + $0xb0] sm:$0xff] }
 0x32f   :  { %v4597_v15 = vpop.eup %4596 }
 0x330   :  { %v4599_v61 = vpop.eup %4598 }
 0x331   :  { %v4601_v59 = vpop.eup %4600  ;;  %v2176_v34 = vmul.f32 %v4599_v61, %v4597_v15  ;;  %v5817_v15 = vld [vmem:[#allocation10 + $0xa8] sm:$0xff]  ;;  %v5819_v61 = vld [vmem:[#allocation10 + $0xb8] sm:$0xff] }
 0x332   :  { %v2175_v37 = vmul.f32 0.0, %v4601_v59  ;;  %v4603_v39 = vpop.eup %4602  ;;  %v5823_v59 = vld [vmem:[#allocation10 + $0xa0] sm:$0xff] }
 0x334   :  { %v5700_v36 = vadd.f32 %v2176_v34, %v2175_v37  ;;  %v5829_v37 = vld [vmem:[#allocation10 + $0x88] sm:$0xff]  ;;  %v5831_v34 = vld [vmem:[#allocation10 + $0x98] sm:$0xff] }
 0x336   :  { %6729 = vst [vmem:[#allocation37_spill] sm:$0xff] %v5700_v36  ;;  %4604 = vtanh.f32 %v5700_v36  ;;  %v5879_v36 = vld [vmem:[#allocation10 + $0x18] sm:$0xff] }
 0x343   :  { %v4605_v40 = vpop.eup %4604 }
 0x344   :  { %v5703_v11 = vmul.f32 %v4605_v40, %v4603_v39  ;;  %v5835_v39 = vld [vmem:[#allocation10 + $0x80] sm:$0xff]  ;;  %v5837_v40 = vld [vmem:[#allocation10 + $0x90] sm:$0xff] }
 0x346   :  { %6730 = vst [vmem:[#allocation34_spill] sm:$0xff] %v5703_v11  ;;  %2246 = vmatmul.mubr.f32.vlgmr.msra.gmra.mxu0 %v5703_v11  ;;  %2317 = vmatmul.mubr.f32.vlgmr.msra.gmra.mxu1 %v5703_v11  ;;  %v5859_v11 = vld [vmem:[#allocation10 + $0x40] sm:$0xff] }
 0x347   :  { %2418 = vmatpush1.msra.mxu0 %v5705_v43  ;;  %2489 = vmatpush1.msra.mxu1 %v5707_v44 }
 0x348   :  { %2419 = vmatprep.subr.mxu0 %v5709_v13  ;;  %2490 = vmatprep.subr.mxu1 %v5711_v16 }
 0x349   :  { %2420 = vmatpush1.msra.mxu0 %v5715_v33  ;;  %2491 = vmatpush1.msra.mxu1 %v5717_v10 }
 0x34a   :  { %2421 = vmatprep.subr.mxu0 %v5721_v4  ;;  %2492 = vmatprep.subr.mxu1 %v5723_v9 }
 0x34b   :  { %2422 = vmatpush1.msra.mxu0 %v5727_v0  ;;  %2493 = vmatpush1.msra.mxu1 %v5729_v45 }
 0x34c   :  { %2423 = vmatprep.subr.mxu0 %v5733_v25  ;;  %2494 = vmatprep.subr.mxu1 %v5735_v5 }
 0x34d   :  { %2424 = vmatpush1.msra.mxu0 %v5739_v28  ;;  %2495 = vmatpush1.msra.mxu1 %v5741_v20 }
 0x34e   :  { %2425 = vmatprep.subr.mxu0 %v5745_v41  ;;  %2496 = vmatprep.subr.mxu1 %v5747_v62 }
 0x34f   :  { %2426 = vmatpush1.msra.mxu0 %v5751_v23  ;;  %2497 = vmatpush1.msra.mxu1 %v5753_v38 }
 0x350   :  { %2427 = vmatprep.subr.mxu0 %v5757_v49  ;;  %2498 = vmatprep.subr.mxu1 %v5759_v42 }
 0x351   :  { %2428 = vmatpush1.msra.mxu0 %v5763_v14  ;;  %2499 = vmatpush1.msra.mxu1 %v5765_v48 }
 0x352   :  { %2429 = vmatprep.subr.mxu0 %v5769_v50  ;;  %2500 = vmatprep.subr.mxu1 %v5771_v54 }
 0x353   :  { %2430 = vmatpush1.msra.mxu0 %v5775_v55  ;;  %2501 = vmatpush1.msra.mxu1 %v5777_v60 }
 0x354   :  { %2431 = vmatprep.subr.mxu0 %v5781_v17  ;;  %2502 = vmatprep.subr.mxu1 %v5783_v18 }
 0x355   :  { %2432 = vmatpush1.msra.mxu0 %v5787_v19  ;;  %2503 = vmatpush1.msra.mxu1 %v5789_v21 }
 0x356   :  { %2433 = vmatprep.subr.mxu0 %v5793_v22  ;;  %2504 = vmatprep.subr.mxu1 %v5795_v1 }
 0x357   :  { %2434 = vmatpush1.msra.mxu0 %v5799_v26  ;;  %2505 = vmatpush1.msra.mxu1 %v5801_v29 }
 0x358   :  { %2435 = vmatprep.subr.mxu0 %v5805_v51  ;;  %2506 = vmatprep.subr.mxu1 %v5807_v52 }
 0x359   :  { %2436 = vmatpush1.msra.mxu0 %v5811_v8  ;;  %2507 = vmatpush1.msra.mxu1 %v5813_v7 }
 0x35a   :  { %2437 = vmatprep.subr.mxu0 %v5817_v15  ;;  %2508 = vmatprep.subr.mxu1 %v5819_v61 }
 0x35b   :  { %2438 = vmatpush1.msra.mxu0 %v5823_v59  ;;  %2509 = vmatpush1.msra.mxu1 %v5825_v3 }
 0x35c   :  { %2439 = vmatprep.subr.mxu0 %v5829_v37  ;;  %2510 = vmatprep.subr.mxu1 %v5831_v34 }
 0x35d   :  { %2440 = vmatpush1.msra.mxu0 %v5835_v39  ;;  %2511 = vmatpush1.msra.mxu1 %v5837_v40 }
 0x35e   :  { %2441 = vmatprep.subr.mxu0 %v5841_v63  ;;  %2512 = vmatprep.subr.mxu1 %v5843_v32 }
 0x35f   :  { %2442 = vmatpush1.msra.mxu0 %v5847_v24  ;;  %2513 = vmatpush1.msra.mxu1 %v5849_v30 }
 0x360   :  { %2443 = vmatprep.subr.mxu0 %v5853_v47  ;;  %2514 = vmatprep.subr.mxu1 %v5855_v53 }
 0x361   :  { %2444 = vmatpush1.msra.mxu0 %v5859_v11  ;;  %2515 = vmatpush1.msra.mxu1 %v5861_v35  ;;  %v6732_v35 = vmov 0.0  }
 0x362   :  { %2445 = vmatprep.subr.mxu0 %v5865_v58  ;;  %2516 = vmatprep.subr.mxu1 %v5867_v31 }
 0x363   :  { %2446 = vmatpush1.msra.mxu0 %v5871_v46  ;;  %2517 = vmatpush1.msra.mxu1 %v5873_v57 }
 0x364   :  { %2447 = vmatprep.subr.mxu0 %v5877_v27  ;;  %2518 = vmatprep.subr.mxu1 %v5879_v36 }
 0x365   :  { %2448 = vmatpush1.msra.mxu0 %v5883_v6  ;;  %2481 = vmatprep.mubr.f32.mxu0 %v6732_v35 }
 0x366   :  { %2519 = vmatpush1.msra.mxu1 %v5887_v56  ;;  %2552 = vmatprep.mubr.f32.mxu1 %v6732_v35 }
 0x367   :  { %2482 = vmatmul.mubr.f32.vlgmr.msra.gmra.mxu0 %v6732_v35  ;;  %2553 = vmatmul.mubr.f32.vlgmr.msra.gmra.mxu1 %v6732_v35 }
 0x368   :  { %2588 = vmatprep.subr.mxu0 %v5670_v2  ;;  %2659 = vmatprep.subr.mxu1 %v5672_v12  ;;  %v6733_v2 = vld [vmem:[#allocation38_spill] sm:$0xff] }
 0x369   :  { %2589 = vmatpush1.msra.mxu0 %v5705_v43  ;;  %2660 = vmatpush1.msra.mxu1 %v5707_v44 }
 0x36a   :  { %2590 = vmatprep.subr.mxu0 %v5709_v13  ;;  %2661 = vmatprep.subr.mxu1 %v5711_v16 }
 0x36b   :  { %2591 = vmatpush1.msra.mxu0 %v5715_v33  ;;  %2662 = vmatpush1.msra.mxu1 %v5717_v10 }
 0x36c   :  { %2592 = vmatprep.subr.mxu0 %v5721_v4  ;;  %2663 = vmatprep.subr.mxu1 %v5723_v9 }
 0x36d   :  { %2593 = vmatpush1.msra.mxu0 %v5727_v0  ;;  %2664 = vmatpush1.msra.mxu1 %v5729_v45  ;;  %v6738_v45 = vld [vmem:[#allocation56_spill] sm:$0xff] }
 0x36e   :  { %2594 = vmatprep.subr.mxu0 %v5733_v25  ;;  %2665 = vmatprep.subr.mxu1 %v5735_v5 }
 0x36f   :  { %2595 = vmatpush1.msra.mxu0 %v5739_v28  ;;  %2666 = vmatpush1.msra.mxu1 %v5741_v20 }
 0x370   :  { %2596 = vmatprep.subr.mxu0 %v5745_v41  ;;  %2667 = vmatprep.subr.mxu1 %v5747_v62  ;;  %v6739_v62 = vld [vmem:[#allocation57_spill] sm:$0xff] }
 0x371   :  { %2597 = vmatpush1.msra.mxu0 %v5751_v23  ;;  %2668 = vmatpush1.msra.mxu1 %v5753_v38  ;;  %v6740_v38 = vld [vmem:[#allocation37_spill] sm:$0xff] }
 0x372   :  { %2598 = vmatprep.subr.mxu0 %v5757_v49  ;;  %2669 = vmatprep.subr.mxu1 %v5759_v42 }
 0x373   :  { %2599 = vmatpush1.msra.mxu0 %v5763_v14  ;;  %2670 = vmatpush1.msra.mxu1 %v5765_v48 }
 0x374   :  { %2600 = vmatprep.subr.mxu0 %v5769_v50  ;;  %2671 = vmatprep.subr.mxu1 %v5771_v54 }
 0x375   :  { %2601 = vmatpush1.msra.mxu0 %v5775_v55  ;;  %2672 = vmatpush1.msra.mxu1 %v5777_v60  ;;  %v6741_v55 = vld [vmem:[#allocation61_spill] sm:$0xff] }
 0x376   :  { %2602 = vmatprep.subr.mxu0 %v5781_v17  ;;  %2673 = vmatprep.subr.mxu1 %v5783_v18  ;;  %v6742_v17 = vld [vmem:[#allocation60_spill] sm:$0xff] }
 0x377   :  { %2603 = vmatpush1.msra.mxu0 %v5787_v19  ;;  %2674 = vmatpush1.msra.mxu1 %v5789_v21 }
 0x378   :  { %2604 = vmatprep.subr.mxu0 %v5793_v22  ;;  %2675 = vmatprep.subr.mxu1 %v5795_v1 }
 0x379   :  { %2605 = vmatpush1.msra.mxu0 %v5799_v26  ;;  %2676 = vmatpush1.msra.mxu1 %v5801_v29 }
 0x37a   :  { %2606 = vmatprep.subr.mxu0 %v5805_v51  ;;  %2677 = vmatprep.subr.mxu1 %v5807_v52 }
 0x37b   :  { %2607 = vmatpush1.msra.mxu0 %v5811_v8  ;;  %2678 = vmatpush1.msra.mxu1 %v5813_v7 }
 0x37c   :  { %2608 = vmatprep.subr.mxu0 %v5817_v15  ;;  %2679 = vmatprep.subr.mxu1 %v5819_v61 }
 0x37d   :  { %2609 = vmatpush1.msra.mxu0 %v5823_v59  ;;  %2680 = vmatpush1.msra.mxu1 %v5825_v3 }
 0x37e   :  { %2610 = vmatprep.subr.mxu0 %v5829_v37  ;;  %2681 = vmatprep.subr.mxu1 %v5831_v34 }
 0x37f   :  { %2611 = vmatpush1.msra.mxu0 %v5835_v39  ;;  %2682 = vmatpush1.msra.mxu1 %v5837_v40 }
 0x380   :  { %2612 = vmatprep.subr.mxu0 %v5841_v63  ;;  %2683 = vmatprep.subr.mxu1 %v5843_v32 }
 0x381   :  { %2613 = vmatpush1.msra.mxu0 %v5847_v24  ;;  %2684 = vmatpush1.msra.mxu1 %v5849_v30  ;;  %v6734_v24 = vld [vmem:[#allocation42_spill] sm:$0xff] }
 0x382   :  { %2614 = vmatprep.subr.mxu0 %v5853_v47  ;;  %2685 = vmatprep.subr.mxu1 %v5855_v53  ;;  %v2884_v53 = vld [vmem:[#allocation12 + $0x3c8] sm:$0xff]  ;;  %v2886_v47 = vld [vmem:[#allocation12 + $0x3d8] sm:$0xff] }
 0x383   :  { %2615 = vmatpush1.msra.mxu0 %v5859_v11  ;;  %2686 = vmatpush1.msra.mxu1 %v6733_v2 }
 0x384   :  { %2616 = vmatprep.subr.mxu0 %v5865_v58  ;;  %2687 = vmatprep.subr.mxu1 %v5867_v31 }
 0x385   :  { %2617 = vmatpush1.msra.mxu0 %v5871_v46  ;;  %2688 = vmatpush1.msra.mxu1 %v5873_v57  ;;  %v6735_v46 = vld [vmem:[#allocation52_spill] sm:$0xff] }
 0x386   :  { %2618 = vmatprep.subr.mxu0 %v5877_v27  ;;  %2689 = vmatprep.subr.mxu1 %v5879_v36  ;;  %v6737_v36 = vld [vmem:[#allocation53_spill] sm:$0xff] }
 0x387   :  { %2619 = vmatpush1.msra.mxu0 %v5883_v6  ;;  %2652 = vmatprep.mubr.f32.mxu0 %v6732_v35  ;;  %v6736_v6 = vld [vmem:[#allocation43_spill] sm:$0xff] }
 0x388   :  { %2690 = vmatpush1.msra.mxu1 %v5887_v56  ;;  %2723 = vmatprep.mubr.f32.mxu1 %v6732_v35 }
 0x389   :  { %3061 = vmatprep.subr.mxu0 %v2884_v53  ;;  %3138 = vmatprep.subr.mxu1 %v2886_v47  ;;  %v2883_v53 = vld [vmem:[#allocation12 + $0x3c0] sm:$0xff]  ;;  %v2885_v47 = vld [vmem:[#allocation12 + $0x3d0] sm:$0xff] }
 0x406   :  { %v2247_v30 = vpop.f32.mrf.mxu0  ;;  %v2318_v32 = vpop.f32.mrf.mxu1 }
 0x407   :  { %v2323_v63 = vadd.f32 %v2247_v30, %v6734_v24  ;;  %v2325_v31 = vadd.f32 %v2318_v32, %v6735_v46  ;;  %v2876_v30 = vld [vmem:[#allocation12 + $0x388] sm:$0xff]  ;;  %v2878_v32 = vld [vmem:[#allocation12 + $0x398] sm:$0xff]  ;;  %v2875_v24 = vld [vmem:[#allocation12 + $0x380] sm:$0xff] }
 0x408   :  { %v2249_v12 = vpop.f32.mrf.mxu0  ;;  %v2320_v58 = vpop.f32.mrf.mxu1  ;;  %v2868_v46 = vld [vmem:[#allocation12 + $0x348] sm:$0xff] }
 0x409   :  { %v4459_v57 = vmul.f32 -1.442695, %v2323_v63  ;;  %v2324_v27 = vadd.f32 %v2249_v12, %v6736_v6  ;;  %v2326_v11 = vadd.f32 %v2320_v58, %v6737_v36  ;;  %v2877_v63 = vld [vmem:[#allocation12 + $0x390] sm:$0xff]  ;;  %v2867_v12 = vld [vmem:[#allocation12 + $0x340] sm:$0xff]  ;;  %v2862_v6 = vld [vmem:[#allocation12 + $0x318] sm:$0xff] }
 0x40a   :  { %v2869_v58 = vld [vmem:[#allocation12 + $0x350] sm:$0xff] }
 0x40b   :  { %4606 = vpow2.f32 %v4459_v57  ;;  %v4460_v56 = vmul.f32 -1.442695, %v2324_v27  ;;  %v4461_v43 = vmul.f32 -1.442695, %v2326_v11  ;;  %v2860_v57 = vld [vmem:[#allocation12 + $0x308] sm:$0xff]  ;;  %v2859_v27 = vld [vmem:[#allocation12 + $0x300] sm:$0xff] }
 0x40c   :  { %v2861_v36 = vld [vmem:[#allocation12 + $0x310] sm:$0xff]  ;;  %v2852_v11 = vld [vmem:[#allocation12 + $0x2c8] sm:$0xff] }
 0x40d   :  { %4608 = vpow2.f32 %v4460_v56  ;;  %v2854_v56 = vld [vmem:[#allocation12 + $0x2d8] sm:$0xff] }
 0x40e   :  { %4610 = vtanh.f32 %v2325_v31  ;;  %v2870_v31 = vld [vmem:[#allocation12 + $0x358] sm:$0xff] }
 0x40f   :  { %4612 = vpow2.f32 %v4461_v43  ;;  %v2851_v43 = vld [vmem:[#allocation12 + $0x2c0] sm:$0xff] }
 0x418   :  { %v4607_v44 = vpop.eup %4606 }
 0x419   :  { %v2330_v13 = vadd.f32 1.0, %v4607_v44  ;;  %v2853_v44 = vld [vmem:[#allocation12 + $0x2d0] sm:$0xff] }
 0x41a   :  { %v4609_v16 = vpop.eup %4608 }
 0x41b   :  { %4614 = vrcp.f32 %v2330_v13  ;;  %v2336_v33 = vadd.f32 1.0, %v4609_v16  ;;  %v4611_v10 = vpop.eup %4610  ;;  %v2844_v13 = vld [vmem:[#allocation12 + $0x288] sm:$0xff]  ;;  %v2846_v16 = vld [vmem:[#allocation12 + $0x298] sm:$0xff] }
 0x41c   :  { %v4613_v4 = vpop.eup %4612 }
 0x41d   :  { %4616 = vrcp.f32 %v2336_v33  ;;  %v2343_v42 = vadd.f32 1.0, %v4613_v4  ;;  %v2843_v33 = vld [vmem:[#allocation12 + $0x280] sm:$0xff]  ;;  %v2836_v4 = vld [vmem:[#allocation12 + $0x248] sm:$0xff] }
 0x427   :  { %v2483_v9 = vpop.f32.mrf.mxu0  ;;  %v2554_v14 = vpop.f32.mrf.mxu1 }
 0x428   :  { %v4615_v0 = vpop.eup %4614  ;;  %v2559_v25 = vadd.f32 %v2483_v9, %v6738_v45  ;;  %v2561_v18 = vadd.f32 %v2554_v14, %v6742_v17  ;;  %v2838_v9 = vld [vmem:[#allocation12 + $0x258] sm:$0xff]  ;;  %v2837_v45 = vld [vmem:[#allocation12 + $0x250] sm:$0xff]  ;;  %v2811_v14 = vld [vmem:[#allocation12 + $0x180] sm:$0xff] }
 0x429   :  { %v2347_v5 = vmul.f32 %v4615_v0, %v4611_v10  ;;  %v2485_v28 = vpop.f32.mrf.mxu0  ;;  %v2556_v54 = vpop.f32.mrf.mxu1  ;;  %v2845_v10 = vld [vmem:[#allocation12 + $0x290] sm:$0xff]  ;;  %v2835_v0 = vld [vmem:[#allocation12 + $0x240] sm:$0xff]  ;;  %v2796_v17 = vld [vmem:[#allocation12 + $0x108] sm:$0xff] }
 0x42a   :  { %v4617_v20 = vpop.eup %4616  ;;  %v4462_v41 = vmul.f32 -1.442695, %v2559_v25  ;;  %v2560_v23 = vadd.f32 %v2485_v28, %v6739_v62  ;;  %v2562_v60 = vadd.f32 %v2556_v54, %v6741_v55  ;;  %v2828_v25 = vld [vmem:[#allocation12 + $0x208] sm:$0xff]  ;;  %v2827_v28 = vld [vmem:[#allocation12 + $0x200] sm:$0xff]  ;;  %v2822_v62 = vld [vmem:[#allocation12 + $0x1d8] sm:$0xff] }
 0x42b   :  { %v2346_v49 = vmul.f32 %v4617_v20, %v6740_v38  ;;  %v2829_v20 = vld [vmem:[#allocation12 + $0x210] sm:$0xff]  ;;  %v2806_v54 = vld [vmem:[#allocation12 + $0x158] sm:$0xff]  ;;  %v2803_v55 = vld [vmem:[#allocation12 + $0x140] sm:$0xff] }
 0x42c   :  { %4618 = vpow2.f32 %v4462_v41  ;;  %v4463_v48 = vmul.f32 -1.442695, %v2560_v23  ;;  %v4464_v19 = vmul.f32 -1.442695, %v2562_v60  ;;  %v2820_v41 = vld [vmem:[#allocation12 + $0x1c8] sm:$0xff]  ;;  %v2819_v23 = vld [vmem:[#allocation12 + $0x1c0] sm:$0xff] }
 0x42d   :  { %v2348_v50 = vadd.f32 %v2347_v5, %v2346_v49  ;;  %v2830_v5 = vld [vmem:[#allocation12 + $0x218] sm:$0xff]  ;;  %v2821_v38 = vld [vmem:[#allocation12 + $0x1d0] sm:$0xff]  ;;  %v2812_v49 = vld [vmem:[#allocation12 + $0x188] sm:$0xff] }
 0x42e   :  { %4620 = vpow2.f32 %v4463_v48  ;;  %v2813_v48 = vld [vmem:[#allocation12 + $0x190] sm:$0xff] }
 0x42f   :  { %4622 = vrcp.f32 %v2343_v42  ;;  %v2814_v42 = vld [vmem:[#allocation12 + $0x198] sm:$0xff]  ;;  %v2805_v60 = vld [vmem:[#allocation12 + $0x150] sm:$0xff] }
 0x430   :  { %4624 = vtanh.f32 %v2348_v50  ;;  %v2804_v50 = vld [vmem:[#allocation12 + $0x148] sm:$0xff] }
 0x431   :  { %4626 = vtanh.f32 %v2561_v18  ;;  %v2798_v18 = vld [vmem:[#allocation12 + $0x118] sm:$0xff] }
 0x432   :  { %4628 = vpow2.f32 %v4464_v19  ;;  %v2795_v19 = vld [vmem:[#allocation12 + $0x100] sm:$0xff] }
 0x439   :  { %v4619_v21 = vpop.eup %4618 }
 0x43a   :  { %v2566_v22 = vadd.f32 1.0, %v4619_v21  ;;  %v2797_v21 = vld [vmem:[#allocation12 + $0x110] sm:$0xff] }
 0x43b   :  { %v4621_v1 = vpop.eup %4620 }
 0x43c   :  { %v4623_v26 = vpop.eup %4622  ;;  %4630 = vrcp.f32 %v2566_v22  ;;  %v2572_v29 = vadd.f32 1.0, %v4621_v1  ;;  %v2788_v22 = vld [vmem:[#allocation12 + $0xc8] sm:$0xff]  ;;  %v2790_v1 = vld [vmem:[#allocation12 + $0xd8] sm:$0xff] }
 0x43d   :  { %v4625_v51 = vpop.eup %4624 }
 0x43e   :  { %4632 = vrcp.f32 %v2572_v29  ;;  %v5972_v52 = vmul.f32 %v4625_v51, %v4623_v26  ;;  %v4627_v8 = vpop.eup %4626  ;;  %v2787_v26 = vld [vmem:[#allocation12 + $0xc0] sm:$0xff]  ;;  %v2789_v29 = vld [vmem:[#allocation12 + $0xd0] sm:$0xff]  ;;  %v2780_v51 = vld [vmem:[#allocation12 + $0x88] sm:$0xff] }
 0x43f   :  { %v4629_v7 = vpop.eup %4628 }
 0x440   :  { %v2579_v3 = vadd.f32 1.0, %v4629_v7  ;;  %v2779_v7 = vld [vmem:[#allocation12 + $0x80] sm:$0xff] }
 0x442   :  { %4634 = vrcp.f32 %v2579_v3  ;;  %v2771_v3 = vld [vmem:[#allocation12 + $0x40] sm:$0xff] }
 0x449   :  { %v4631_v15 = vpop.eup %4630 }
 0x44a   :  { %v2583_v61 = vmul.f32 %v4631_v15, %v4627_v8  ;;  %v2782_v8 = vld [vmem:[#allocation12 + $0x98] sm:$0xff]  ;;  %v2781_v15 = vld [vmem:[#allocation12 + $0x90] sm:$0xff] }
 0x44b   :  { %v4633_v59 = vpop.eup %4632 }
 0x44c   :  { %v2582_v37 = vmul.f32 0.0, %v4633_v59  ;;  %v2774_v59 = vld [vmem:[#allocation12 + $0x58] sm:$0xff] }
 0x44e   :  { %v5974_v34 = vadd.f32 %v2583_v61, %v2582_v37  ;;  %v2772_v61 = vld [vmem:[#allocation12 + $0x48] sm:$0xff]  ;;  %v2773_v37 = vld [vmem:[#allocation12 + $0x50] sm:$0xff] }
 0x44f   :  { %v4635_v39 = vpop.eup %4634 }
 0x450   :  { %4636 = vtanh.f32 %v5974_v34 }
 0x45d   :  { %v4637_v40 = vpop.eup %4636 }
 0x45e   :  { %v5977_v2 = vmul.f32 %v4637_v40, %v4635_v39  ;;  %v2764_v39 = vld [vmem:[#allocation12 + $0x8] sm:$0xff]  ;;  %v2766_v40 = vld [vmem:[#allocation12 + $0x18] sm:$0xff] }
 0x460   :  { %2653 = vmatmul.mubr.f32.vlgmr.msra.gmra.mxu0 %v5977_v2  ;;  %2724 = vmatmul.mubr.f32.vlgmr.msra.gmra.mxu1 %v5977_v2 }
 0x461   :  { %3062 = vmatpush1.msra.mxu0 %v2883_v53  ;;  %3139 = vmatpush1.msra.mxu1 %v2885_v47  ;;  %v2763_v53 = vld [vmem:[#allocation12] sm:$0xff]  ;;  %v2765_v47 = vld [vmem:[#allocation12 + $0x10] sm:$0xff] }
 0x462   :  { %3063 = vmatprep.subr.mxu0 %v2876_v30  ;;  %3140 = vmatprep.subr.mxu1 %v2878_v32  ;;  %v3012_v30 = vld [vmem:[#allocation12 + $0x7c8] sm:$0xff]  ;;  %v3014_v32 = vld [vmem:[#allocation12 + $0x7d8] sm:$0xff] }
 0x463   :  { %3064 = vmatpush1.msra.mxu0 %v2875_v24  ;;  %3141 = vmatpush1.msra.mxu1 %v2877_v63  ;;  %v3011_v24 = vld [vmem:[#allocation12 + $0x7c0] sm:$0xff]  ;;  %v3013_v63 = vld [vmem:[#allocation12 + $0x7d0] sm:$0xff] }
 0x464   :  { %3065 = vmatprep.subr.mxu0 %v2868_v46  ;;  %3142 = vmatprep.subr.mxu1 %v2870_v31  ;;  %v3004_v46 = vld [vmem:[#allocation12 + $0x788] sm:$0xff]  ;;  %v3006_v31 = vld [vmem:[#allocation12 + $0x798] sm:$0xff] }
 0x465   :  { %3066 = vmatpush1.msra.mxu0 %v2867_v12  ;;  %3143 = vmatpush1.msra.mxu1 %v2869_v58  ;;  %v3003_v12 = vld [vmem:[#allocation12 + $0x780] sm:$0xff]  ;;  %v3005_v58 = vld [vmem:[#allocation12 + $0x790] sm:$0xff] }
 0x466   :  { %3067 = vmatprep.subr.mxu0 %v2860_v57  ;;  %3144 = vmatprep.subr.mxu1 %v2862_v6  ;;  %v2996_v57 = vld [vmem:[#allocation12 + $0x748] sm:$0xff]  ;;  %v2998_v6 = vld [vmem:[#allocation12 + $0x758] sm:$0xff] }
 0x467   :  { %3068 = vmatpush1.msra.mxu0 %v2859_v27  ;;  %3145 = vmatpush1.msra.mxu1 %v2861_v36  ;;  %v2995_v27 = vld [vmem:[#allocation12 + $0x740] sm:$0xff]  ;;  %v2997_v36 = vld [vmem:[#allocation12 + $0x750] sm:$0xff] }
 0x468   :  { %3069 = vmatprep.subr.mxu0 %v2852_v11  ;;  %3146 = vmatprep.subr.mxu1 %v2854_v56  ;;  %v2988_v11 = vld [vmem:[#allocation12 + $0x708] sm:$0xff]  ;;  %v2990_v56 = vld [vmem:[#allocation12 + $0x718] sm:$0xff] }
 0x469   :  { %3070 = vmatpush1.msra.mxu0 %v2851_v43  ;;  %3147 = vmatpush1.msra.mxu1 %v2853_v44  ;;  %v2987_v43 = vld [vmem:[#allocation12 + $0x700] sm:$0xff]  ;;  %v2989_v44 = vld [vmem:[#allocation12 + $0x710] sm:$0xff] }
 0x46a   :  { %3071 = vmatprep.subr.mxu0 %v2844_v13  ;;  %3148 = vmatprep.subr.mxu1 %v2846_v16  ;;  %v2980_v13 = vld [vmem:[#allocation12 + $0x6c8] sm:$0xff]  ;;  %v2982_v16 = vld [vmem:[#allocation12 + $0x6d8] sm:$0xff] }
 0x46b   :  { %3072 = vmatpush1.msra.mxu0 %v2843_v33  ;;  %3149 = vmatpush1.msra.mxu1 %v2845_v10  ;;  %v2979_v33 = vld [vmem:[#allocation12 + $0x6c0] sm:$0xff]  ;;  %v2981_v10 = vld [vmem:[#allocation12 + $0x6d0] sm:$0xff] }
 0x46c   :  { %3073 = vmatprep.subr.mxu0 %v2836_v4  ;;  %3150 = vmatprep.subr.mxu1 %v2838_v9  ;;  %v2972_v4 = vld [vmem:[#allocation12 + $0x688] sm:$0xff]  ;;  %v2974_v9 = vld [vmem:[#allocation12 + $0x698] sm:$0xff] }
 0x46d   :  { %3074 = vmatpush1.msra.mxu0 %v2835_v0  ;;  %3151 = vmatpush1.msra.mxu1 %v2837_v45  ;;  %v2971_v0 = vld [vmem:[#allocation12 + $0x680] sm:$0xff]  ;;  %v2973_v45 = vld [vmem:[#allocation12 + $0x690] sm:$0xff] }
 0x46e   :  { %3075 = vmatprep.subr.mxu0 %v2828_v25  ;;  %3152 = vmatprep.subr.mxu1 %v2830_v5  ;;  %v2964_v25 = vld [vmem:[#allocation12 + $0x648] sm:$0xff]  ;;  %v2966_v5 = vld [vmem:[#allocation12 + $0x658] sm:$0xff] }
 0x46f   :  { %3076 = vmatpush1.msra.mxu0 %v2827_v28  ;;  %3153 = vmatpush1.msra.mxu1 %v2829_v20  ;;  %v2963_v28 = vld [vmem:[#allocation12 + $0x640] sm:$0xff]  ;;  %v2965_v20 = vld [vmem:[#allocation12 + $0x650] sm:$0xff] }
 0x470   :  { %3077 = vmatprep.subr.mxu0 %v2820_v41  ;;  %3154 = vmatprep.subr.mxu1 %v2822_v62  ;;  %v2956_v41 = vld [vmem:[#allocation12 + $0x608] sm:$0xff]  ;;  %v2958_v62 = vld [vmem:[#allocation12 + $0x618] sm:$0xff] }
 0x471   :  { %3078 = vmatpush1.msra.mxu0 %v2819_v23  ;;  %3155 = vmatpush1.msra.mxu1 %v2821_v38  ;;  %v2955_v23 = vld [vmem:[#allocation12 + $0x600] sm:$0xff]  ;;  %v2957_v38 = vld [vmem:[#allocation12 + $0x610] sm:$0xff] }
 0x472   :  { %3079 = vmatprep.subr.mxu0 %v2812_v49  ;;  %3156 = vmatprep.subr.mxu1 %v2814_v42  ;;  %v2948_v49 = vld [vmem:[#allocation12 + $0x5c8] sm:$0xff]  ;;  %v2950_v42 = vld [vmem:[#allocation12 + $0x5d8] sm:$0xff] }
 0x473   :  { %3080 = vmatpush1.msra.mxu0 %v2811_v14  ;;  %3157 = vmatpush1.msra.mxu1 %v2813_v48  ;;  %v2947_v14 = vld [vmem:[#allocation12 + $0x5c0] sm:$0xff]  ;;  %v2949_v48 = vld [vmem:[#allocation12 + $0x5d0] sm:$0xff] }
 0x474   :  { %3081 = vmatprep.subr.mxu0 %v2804_v50  ;;  %3158 = vmatprep.subr.mxu1 %v2806_v54  ;;  %v2940_v50 = vld [vmem:[#allocation12 + $0x588] sm:$0xff]  ;;  %v2942_v54 = vld [vmem:[#allocation12 + $0x598] sm:$0xff] }
 0x475   :  { %3082 = vmatpush1.msra.mxu0 %v2803_v55  ;;  %3159 = vmatpush1.msra.mxu1 %v2805_v60  ;;  %v2939_v55 = vld [vmem:[#allocation12 + $0x580] sm:$0xff]  ;;  %v2941_v60 = vld [vmem:[#allocation12 + $0x590] sm:$0xff] }
 0x476   :  { %3083 = vmatprep.subr.mxu0 %v2796_v17  ;;  %3160 = vmatprep.subr.mxu1 %v2798_v18  ;;  %v2932_v17 = vld [vmem:[#allocation12 + $0x548] sm:$0xff]  ;;  %v2934_v18 = vld [vmem:[#allocation12 + $0x558] sm:$0xff] }
 0x477   :  { %3084 = vmatpush1.msra.mxu0 %v2795_v19  ;;  %3161 = vmatpush1.msra.mxu1 %v2797_v21  ;;  %v2931_v19 = vld [vmem:[#allocation12 + $0x540] sm:$0xff]  ;;  %v2933_v21 = vld [vmem:[#allocation12 + $0x550] sm:$0xff] }
 0x478   :  { %3085 = vmatprep.subr.mxu0 %v2788_v22  ;;  %3162 = vmatprep.subr.mxu1 %v2790_v1  ;;  %v2924_v22 = vld [vmem:[#allocation12 + $0x508] sm:$0xff]  ;;  %v2926_v1 = vld [vmem:[#allocation12 + $0x518] sm:$0xff] }
 0x479   :  { %3086 = vmatpush1.msra.mxu0 %v2787_v26  ;;  %3163 = vmatpush1.msra.mxu1 %v2789_v29  ;;  %v2923_v26 = vld [vmem:[#allocation12 + $0x500] sm:$0xff]  ;;  %v2925_v29 = vld [vmem:[#allocation12 + $0x510] sm:$0xff] }
 0x47a   :  { %3087 = vmatprep.subr.mxu0 %v2780_v51  ;;  %3164 = vmatprep.subr.mxu1 %v2782_v8  ;;  %v2916_v51 = vld [vmem:[#allocation12 + $0x4c8] sm:$0xff]  ;;  %v2918_v8 = vld [vmem:[#allocation12 + $0x4d8] sm:$0xff] }
 0x47b   :  { %3088 = vmatpush1.msra.mxu0 %v2779_v7  ;;  %3165 = vmatpush1.msra.mxu1 %v2781_v15  ;;  %v2915_v7 = vld [vmem:[#allocation12 + $0x4c0] sm:$0xff]  ;;  %v2917_v15 = vld [vmem:[#allocation12 + $0x4d0] sm:$0xff] }
 0x47c   :  { %3089 = vmatprep.subr.mxu0 %v2772_v61  ;;  %3166 = vmatprep.subr.mxu1 %v2774_v59  ;;  %v2908_v61 = vld [vmem:[#allocation12 + $0x488] sm:$0xff]  ;;  %v2910_v59 = vld [vmem:[#allocation12 + $0x498] sm:$0xff] }
 0x47d   :  { %3090 = vmatpush1.msra.mxu0 %v2771_v3  ;;  %3167 = vmatpush1.msra.mxu1 %v2773_v37  ;;  %v2907_v3 = vld [vmem:[#allocation12 + $0x480] sm:$0xff]  ;;  %v2909_v37 = vld [vmem:[#allocation12 + $0x490] sm:$0xff] }
 0x47e   :  { %3091 = vmatprep.subr.mxu0 %v2764_v39  ;;  %3168 = vmatprep.subr.mxu1 %v2766_v40  ;;  %v2900_v39 = vld [vmem:[#allocation12 + $0x448] sm:$0xff]  ;;  %v2902_v40 = vld [vmem:[#allocation12 + $0x458] sm:$0xff] }
 0x47f   :  { %3092 = vmatpush1.msra.mxu0 %v2763_v53  ;;  %3169 = vmatpush1.msra.mxu1 %v2765_v47  ;;  %v2899_v53 = vld [vmem:[#allocation12 + $0x440] sm:$0xff]  ;;  %v2901_v47 = vld [vmem:[#allocation12 + $0x450] sm:$0xff] }
 0x480   :  { %3093 = vmatprep.subr.mxu0 %v3012_v30  ;;  %3170 = vmatprep.subr.mxu1 %v3014_v32  ;;  %v2892_v30 = vld [vmem:[#allocation12 + $0x408] sm:$0xff]  ;;  %v2894_v32 = vld [vmem:[#allocation12 + $0x418] sm:$0xff] }
 0x481   :  { %3094 = vmatpush2.msra.mxu0 %v3011_v24  ;;  %3171 = vmatpush2.msra.mxu1 %v3013_v63  ;;  %v2891_v24 = vld [vmem:[#allocation12 + $0x400] sm:$0xff]  ;;  %v2893_v63 = vld [vmem:[#allocation12 + $0x410] sm:$0xff] }
 0x482   :  { %3095 = vmatprep.subr.mxu0 %v3004_v46  ;;  %3172 = vmatprep.subr.mxu1 %v3006_v31  ;;  %v2888_v46 = vld [vmem:[#allocation12 + $0x3e8] sm:$0xff]  ;;  %v2890_v31 = vld [vmem:[#allocation12 + $0x3f8] sm:$0xff] }
 0x483   :  { %3096 = vmatpush2.msra.mxu0 %v3003_v12  ;;  %3173 = vmatpush2.msra.mxu1 %v3005_v58  ;;  %v6743_v58 = vld [vmem:[#allocation54_spill] sm:$0xff] }
 0x484   :  { %3097 = vmatprep.subr.mxu0 %v2996_v57  ;;  %3174 = vmatprep.subr.mxu1 %v2998_v6 }
 0x485   :  { %3098 = vmatpush2.msra.mxu0 %v2995_v27  ;;  %3175 = vmatpush2.msra.mxu1 %v2997_v36  ;;  %v6744_v36 = vld [vmem:[#allocation55_spill] sm:$0xff] }
 0x486   :  { %3099 = vmatprep.subr.mxu0 %v2988_v11  ;;  %3176 = vmatprep.subr.mxu1 %v2990_v56 }
 0x487   :  { %3100 = vmatpush2.msra.mxu0 %v2987_v43  ;;  %3177 = vmatpush2.msra.mxu1 %v2989_v44 }
 0x488   :  { %3101 = vmatprep.subr.mxu0 %v2980_v13  ;;  %3178 = vmatprep.subr.mxu1 %v2982_v16  ;;  %v6745_v13 = vld [vmem:[#allocation59_spill] sm:$0xff] }
 0x489   :  { %3102 = vmatpush2.msra.mxu0 %v2979_v33  ;;  %3179 = vmatpush2.msra.mxu1 %v2981_v10  ;;  %v6746_v33 = vld [vmem:[#allocation58_spill] sm:$0xff] }
 0x48a   :  { %3103 = vmatprep.subr.mxu0 %v2972_v4  ;;  %3180 = vmatprep.subr.mxu1 %v2974_v9 }
 0x48b   :  { %3104 = vmatpush2.msra.mxu0 %v2971_v0  ;;  %3181 = vmatpush2.msra.mxu1 %v2973_v45 }
 0x48c   :  { %3105 = vmatprep.subr.mxu0 %v2964_v25  ;;  %3182 = vmatprep.subr.mxu1 %v2966_v5 }
 0x48d   :  { %3106 = vmatpush2.msra.mxu0 %v2963_v28  ;;  %3183 = vmatpush2.msra.mxu1 %v2965_v20 }
 0x48e   :  { %3107 = vmatprep.subr.mxu0 %v2956_v41  ;;  %3184 = vmatprep.subr.mxu1 %v2958_v62 }
 0x48f   :  { %3108 = vmatpush2.msra.mxu0 %v2955_v23  ;;  %3185 = vmatpush2.msra.mxu1 %v2957_v38 }
 0x490   :  { %3109 = vmatprep.subr.mxu0 %v2948_v49  ;;  %3186 = vmatprep.subr.mxu1 %v2950_v42 }
 0x491   :  { %3110 = vmatpush2.msra.mxu0 %v2947_v14  ;;  %3187 = vmatpush2.msra.mxu1 %v2949_v48 }
 0x492   :  { %3111 = vmatprep.subr.mxu0 %v2940_v50  ;;  %3188 = vmatprep.subr.mxu1 %v2942_v54  ;;  %v2887_v50 = vld [vmem:[#allocation12 + $0x3e0] sm:$0xff]  ;;  %v2889_v54 = vld [vmem:[#allocation12 + $0x3f0] sm:$0xff] }
 0x493   :  { %3112 = vmatpush2.msra.mxu0 %v2939_v55  ;;  %3189 = vmatpush2.msra.mxu1 %v2941_v60  ;;  %v6747_v55 = vld [vmem:[#allocation34_spill] sm:$0xff]  ;;  %v2880_v60 = vld [vmem:[#allocation12 + $0x3a8] sm:$0xff] }
 0x494   :  { %3113 = vmatprep.subr.mxu0 %v2932_v17  ;;  %3190 = vmatprep.subr.mxu1 %v2934_v18  ;;  %v2882_v17 = vld [vmem:[#allocation12 + $0x3b8] sm:$0xff]  ;;  %v2879_v18 = vld [vmem:[#allocation12 + $0x3a0] sm:$0xff] }
 0x495   :  { %3114 = vmatpush2.msra.mxu0 %v2931_v19  ;;  %3191 = vmatpush2.msra.mxu1 %v2933_v21  ;;  %v2872_v19 = vld [vmem:[#allocation12 + $0x368] sm:$0xff]  ;;  %v2874_v21 = vld [vmem:[#allocation12 + $0x378] sm:$0xff] }
 0x496   :  { %3115 = vmatprep.subr.mxu0 %v2924_v22  ;;  %3192 = vmatprep.subr.mxu1 %v2926_v1  ;;  %v2871_v22 = vld [vmem:[#allocation12 + $0x360] sm:$0xff]  ;;  %v2873_v1 = vld [vmem:[#allocation12 + $0x370] sm:$0xff] }
 0x497   :  { %3116 = vmatpush2.msra.mxu0 %v2923_v26  ;;  %3193 = vmatpush2.msra.mxu1 %v2925_v29  ;;  %v2864_v26 = vld [vmem:[#allocation12 + $0x328] sm:$0xff]  ;;  %v2866_v29 = vld [vmem:[#allocation12 + $0x338] sm:$0xff] }
 0x498   :  { %3117 = vmatprep.subr.mxu0 %v2916_v51  ;;  %3194 = vmatprep.subr.mxu1 %v2918_v8  ;;  %v2863_v51 = vld [vmem:[#allocation12 + $0x320] sm:$0xff]  ;;  %v2865_v8 = vld [vmem:[#allocation12 + $0x330] sm:$0xff] }
 0x499   :  { %3118 = vmatpush2.msra.mxu0 %v2915_v7  ;;  %3195 = vmatpush2.msra.mxu1 %v2917_v15  ;;  %v2856_v7 = vld [vmem:[#allocation12 + $0x2e8] sm:$0xff]  ;;  %v2858_v15 = vld [vmem:[#allocation12 + $0x2f8] sm:$0xff] }
 0x49a   :  { %3119 = vmatprep.subr.mxu0 %v2908_v61  ;;  %3196 = vmatprep.subr.mxu1 %v2910_v59  ;;  %v2855_v61 = vld [vmem:[#allocation12 + $0x2e0] sm:$0xff]  ;;  %v2857_v59 = vld [vmem:[#allocation12 + $0x2f0] sm:$0xff] }
 0x49b   :  { %3120 = vmatpush2.msra.mxu0 %v2907_v3  ;;  %3197 = vmatpush2.msra.mxu1 %v2909_v37  ;;  %v2848_v3 = vld [vmem:[#allocation12 + $0x2a8] sm:$0xff]  ;;  %v2850_v37 = vld [vmem:[#allocation12 + $0x2b8] sm:$0xff] }
 0x49c   :  { %3121 = vmatprep.subr.mxu0 %v2900_v39  ;;  %3198 = vmatprep.subr.mxu1 %v2902_v40  ;;  %v2847_v39 = vld [vmem:[#allocation12 + $0x2a0] sm:$0xff]  ;;  %v2849_v40 = vld [vmem:[#allocation12 + $0x2b0] sm:$0xff] }
 0x49d   :  { %3122 = vmatpush2.msra.mxu0 %v2899_v53  ;;  %3199 = vmatpush2.msra.mxu1 %v2901_v47  ;;  %v2840_v53 = vld [vmem:[#allocation12 + $0x268] sm:$0xff]  ;;  %v2842_v47 = vld [vmem:[#allocation12 + $0x278] sm:$0xff] }
 0x49e   :  { %3123 = vmatprep.subr.mxu0 %v2892_v30  ;;  %3200 = vmatprep.subr.mxu1 %v2894_v32  ;;  %v2839_v30 = vld [vmem:[#allocation12 + $0x260] sm:$0xff]  ;;  %v2841_v32 = vld [vmem:[#allocation12 + $0x270] sm:$0xff] }
 0x49f   :  { %3124 = vmatpush2.msra.mxu0 %v2891_v24  ;;  %3201 = vmatpush2.msra.mxu1 %v2893_v63  ;;  %v2832_v24 = vld [vmem:[#allocation12 + $0x228] sm:$0xff]  ;;  %v2834_v63 = vld [vmem:[#allocation12 + $0x238] sm:$0xff] }
 0x4a0   :  { %3215 = vmatprep.subr.mxu0 %v2888_v46  ;;  %3292 = vmatprep.subr.mxu1 %v2890_v31  ;;  %v2831_v46 = vld [vmem:[#allocation12 + $0x220] sm:$0xff]  ;;  %v2833_v31 = vld [vmem:[#allocation12 + $0x230] sm:$0xff] }
 0x520   :  { %v2654_v12 = vpop.f32.mrf.mxu0  ;;  %v2725_v56 = vpop.f32.mrf.mxu1 }
 0x521   :  { %v2730_v57 = vadd.f32 %v2654_v12, %v6743_v58  ;;  %v2732_v10 = vadd.f32 %v2725_v56, %v6746_v33  ;;  %v2824_v12 = vld [vmem:[#allocation12 + $0x1e8] sm:$0xff]  ;;  %v2826_v58 = vld [vmem:[#allocation12 + $0x1f8] sm:$0xff]  ;;  %v2817_v56 = vld [vmem:[#allocation12 + $0x1b0] sm:$0xff] }
 0x522   :  { %v2656_v6 = vpop.f32.mrf.mxu0  ;;  %v2727_v44 = vpop.f32.mrf.mxu1  ;;  %v2800_v33 = vld [vmem:[#allocation12 + $0x128] sm:$0xff] }
 0x523   :  { %v4465_v27 = vmul.f32 -1.442695, %v2730_v57  ;;  %v2731_v11 = vadd.f32 %v2656_v6, %v6744_v36  ;;  %v2733_v16 = vadd.f32 %v2727_v44, %v6745_v13  ;;  %v2823_v57 = vld [vmem:[#allocation12 + $0x1e0] sm:$0xff]  ;;  %v2825_v6 = vld [vmem:[#allocation12 + $0x1f0] sm:$0xff]  ;;  %v2818_v36 = vld [vmem:[#allocation12 + $0x1b8] sm:$0xff] }
 0x524   :  { %v2810_v44 = vld [vmem:[#allocation12 + $0x178] sm:$0xff]  ;;  %v2807_v13 = vld [vmem:[#allocation12 + $0x160] sm:$0xff] }
 0x525   :  { %4638 = vpow2.f32 %v4465_v27  ;;  %v4466_v43 = vmul.f32 -1.442695, %v2731_v11  ;;  %v4467_v4 = vmul.f32 -1.442695, %v2733_v16  ;;  %v2816_v27 = vld [vmem:[#allocation12 + $0x1a8] sm:$0xff]  ;;  %v2815_v11 = vld [vmem:[#allocation12 + $0x1a0] sm:$0xff] }
 0x526   :  { %v2809_v16 = vld [vmem:[#allocation12 + $0x170] sm:$0xff] }
 0x527   :  { %4640 = vpow2.f32 %v4466_v43  ;;  %v2808_v43 = vld [vmem:[#allocation12 + $0x168] sm:$0xff] }
 0x528   :  { %4642 = vtanh.f32 %v2732_v10  ;;  %v2802_v10 = vld [vmem:[#allocation12 + $0x138] sm:$0xff] }
 0x529   :  { %4644 = vpow2.f32 %v4467_v4  ;;  %v2799_v4 = vld [vmem:[#allocation12 + $0x120] sm:$0xff] }
 0x532   :  { %v4639_v9 = vpop.eup %4638 }
 0x533   :  { %v2737_v0 = vadd.f32 1.0, %v4639_v9  ;;  %v2801_v9 = vld [vmem:[#allocation12 + $0x130] sm:$0xff] }
 0x534   :  { %v4641_v45 = vpop.eup %4640 }
 0x535   :  { %4646 = vrcp.f32 %v2737_v0  ;;  %v2743_v25 = vadd.f32 1.0, %v4641_v45  ;;  %v4643_v5 = vpop.eup %4642  ;;  %v2792_v0 = vld [vmem:[#allocation12 + $0xe8] sm:$0xff]  ;;  %v2794_v45 = vld [vmem:[#allocation12 + $0xf8] sm:$0xff] }
 0x536   :  { %v4645_v28 = vpop.eup %4644 }
 0x537   :  { %4648 = vrcp.f32 %v2743_v25  ;;  %v2750_v23 = vadd.f32 1.0, %v4645_v28  ;;  %v2791_v25 = vld [vmem:[#allocation12 + $0xe0] sm:$0xff]  ;;  %v2784_v28 = vld [vmem:[#allocation12 + $0xa8] sm:$0xff] }
 0x539   :  { %4650 = vrcp.f32 %v2750_v23  ;;  %v2776_v23 = vld [vmem:[#allocation12 + $0x68] sm:$0xff] }
 0x542   :  { %v4647_v20 = vpop.eup %4646 }
 0x543   :  { %v2754_v41 = vmul.f32 %v4647_v20, %v4643_v5  ;;  %v2793_v5 = vld [vmem:[#allocation12 + $0xf0] sm:$0xff]  ;;  %v2786_v20 = vld [vmem:[#allocation12 + $0xb8] sm:$0xff] }
 0x544   :  { %v4649_v62 = vpop.eup %4648 }
 0x545   :  { %v2753_v38 = vmul.f32 %v4649_v62, %v5974_v34  ;;  %v2881_v34 = vld [vmem:[#allocation12 + $0x3b0] sm:$0xff] }
 0x546   :  { %v4651_v42 = vpop.eup %4650  ;;  %v2785_v62 = vld [vmem:[#allocation12 + $0xb0] sm:$0xff] }
 0x547   :  { %v2755_v49 = vadd.f32 %v2754_v41, %v2753_v38  ;;  %v2783_v41 = vld [vmem:[#allocation12 + $0xa0] sm:$0xff]  ;;  %v2778_v38 = vld [vmem:[#allocation12 + $0x78] sm:$0xff] }
 0x549   :  { %4652 = vtanh.f32 %v2755_v49  ;;  %v2775_v49 = vld [vmem:[#allocation12 + $0x60] sm:$0xff] }
 0x556   :  { %v4653_v14 = vpop.eup %4652 }
 0x557   :  { %v2757_v48 = vmul.f32 %v4653_v14, %v4651_v42  ;;  %v2777_v42 = vld [vmem:[#allocation12 + $0x70] sm:$0xff]  ;;  %v2768_v14 = vld [vmem:[#allocation12 + $0x28] sm:$0xff] }
 0x559   :  { %3125 = vmatprep.mubr.f32.mxu0 %v2757_v48  ;;  %3202 = vmatprep.mubr.f32.mxu1 %v2757_v48 }
 0x55a   :  { %3126 = vmatmul.mubr.f32.vlgmr.msra.gmra.mxu0 %v6747_v55  ;;  %3203 = vmatmul.mubr.f32.vlgmr.msra.gmra.mxu1 %v6747_v55 }
 0x55b   :  { %3216 = vmatpush1.msra.mxu0 %v2887_v50  ;;  %3293 = vmatpush1.msra.mxu1 %v2889_v54  ;;  %v2767_v50 = vld [vmem:[#allocation12 + $0x20] sm:$0xff]  ;;  %v2769_v54 = vld [vmem:[#allocation12 + $0x30] sm:$0xff] }
 0x55c   :  { %3131 = vmatprep.mubr.f32.mxu0 %v5977_v2  ;;  %3208 = vmatprep.mubr.f32.mxu1 %v5977_v2 }
 0x55d   :  { %3217 = vmatprep.subr.mxu0 %v2880_v60  ;;  %3294 = vmatprep.subr.mxu1 %v2882_v17  ;;  %v3016_v60 = vld [vmem:[#allocation12 + $0x7e8] sm:$0xff]  ;;  %v3018_v17 = vld [vmem:[#allocation12 + $0x7f8] sm:$0xff] }
 0x55e   :  { %3218 = vmatpush1.msra.mxu0 %v2879_v18  ;;  %3295 = vmatpush1.msra.mxu1 %v2881_v34  ;;  %v3015_v18 = vld [vmem:[#allocation12 + $0x7e0] sm:$0xff]  ;;  %v3017_v34 = vld [vmem:[#allocation12 + $0x7f0] sm:$0xff] }
 0x55f   :  { %3219 = vmatprep.subr.mxu0 %v2872_v19  ;;  %3296 = vmatprep.subr.mxu1 %v2874_v21  ;;  %v3008_v19 = vld [vmem:[#allocation12 + $0x7a8] sm:$0xff]  ;;  %v3010_v21 = vld [vmem:[#allocation12 + $0x7b8] sm:$0xff] }
 0x560   :  { %3132 = vmatmul.mubr.f32.gmra.mxu0 %v5972_v52  ;;  %3209 = vmatmul.mubr.f32.gmra.mxu1 %v5972_v52 }
 0x561   :  { %3220 = vmatpush1.msra.mxu0 %v2871_v22  ;;  %3297 = vmatpush1.msra.mxu1 %v2873_v1  ;;  %v3007_v22 = vld [vmem:[#allocation12 + $0x7a0] sm:$0xff]  ;;  %v3009_v1 = vld [vmem:[#allocation12 + $0x7b0] sm:$0xff] }
 0x562   :  { %3221 = vmatprep.subr.mxu0 %v2864_v26  ;;  %3279 = vmatprep.mubr.f32.mxu0 %v2757_v48  ;;  %v3000_v26 = vld [vmem:[#allocation12 + $0x768] sm:$0xff] }
 0x563   :  { %3298 = vmatprep.subr.mxu1 %v2866_v29  ;;  %3356 = vmatprep.mubr.f32.mxu1 %v2757_v48  ;;  %v2770_v48 = vld [vmem:[#allocation12 + $0x38] sm:$0xff] }
 0x564   :  { %3222 = vmatpush1.msra.mxu0 %v2863_v51  ;;  %3299 = vmatpush1.msra.mxu1 %v2865_v8  ;;  %v3002_v29 = vld [vmem:[#allocation12 + $0x778] sm:$0xff]  ;;  %v2999_v51 = vld [vmem:[#allocation12 + $0x760] sm:$0xff]  ;;  %v3001_v8 = vld [vmem:[#allocation12 + $0x770] sm:$0xff] }
 0x565   :  { %3223 = vmatprep.subr.mxu0 %v2856_v7  ;;  %3300 = vmatprep.subr.mxu1 %v2858_v15  ;;  %v2992_v7 = vld [vmem:[#allocation12 + $0x728] sm:$0xff]  ;;  %v2994_v15 = vld [vmem:[#allocation12 + $0x738] sm:$0xff] }
 0x566   :  { %3224 = vmatpush1.msra.mxu0 %v2855_v61  ;;  %3301 = vmatpush1.msra.mxu1 %v2857_v59  ;;  %v2991_v61 = vld [vmem:[#allocation12 + $0x720] sm:$0xff]  ;;  %v2993_v59 = vld [vmem:[#allocation12 + $0x730] sm:$0xff] }
 0x567   :  { %3225 = vmatprep.subr.mxu0 %v2848_v3  ;;  %3302 = vmatprep.subr.mxu1 %v2850_v37  ;;  %v2984_v3 = vld [vmem:[#allocation12 + $0x6e8] sm:$0xff]  ;;  %v2986_v37 = vld [vmem:[#allocation12 + $0x6f8] sm:$0xff] }
 0x568   :  { %3226 = vmatpush1.msra.mxu0 %v2847_v39  ;;  %3303 = vmatpush1.msra.mxu1 %v2849_v40  ;;  %v2983_v39 = vld [vmem:[#allocation12 + $0x6e0] sm:$0xff]  ;;  %v2985_v40 = vld [vmem:[#allocation12 + $0x6f0] sm:$0xff] }
 0x569   :  { %3227 = vmatprep.subr.mxu0 %v2840_v53  ;;  %3304 = vmatprep.subr.mxu1 %v2842_v47  ;;  %v2976_v53 = vld [vmem:[#allocation12 + $0x6a8] sm:$0xff]  ;;  %v2978_v47 = vld [vmem:[#allocation12 + $0x6b8] sm:$0xff] }
 0x56a   :  { %3228 = vmatpush1.msra.mxu0 %v2839_v30  ;;  %3305 = vmatpush1.msra.mxu1 %v2841_v32  ;;  %v2975_v30 = vld [vmem:[#allocation12 + $0x6a0] sm:$0xff]  ;;  %v2977_v32 = vld [vmem:[#allocation12 + $0x6b0] sm:$0xff] }
 0x56b   :  { %3229 = vmatprep.subr.mxu0 %v2832_v24  ;;  %3306 = vmatprep.subr.mxu1 %v2834_v63  ;;  %v2968_v24 = vld [vmem:[#allocation12 + $0x668] sm:$0xff]  ;;  %v2970_v63 = vld [vmem:[#allocation12 + $0x678] sm:$0xff] }
 0x56c   :  { %3230 = vmatpush1.msra.mxu0 %v2831_v46  ;;  %3307 = vmatpush1.msra.mxu1 %v2833_v31  ;;  %v2967_v46 = vld [vmem:[#allocation12 + $0x660] sm:$0xff]  ;;  %v2969_v31 = vld [vmem:[#allocation12 + $0x670] sm:$0xff] }
 0x56d   :  { %3231 = vmatprep.subr.mxu0 %v2824_v12  ;;  %3308 = vmatprep.subr.mxu1 %v2826_v58  ;;  %v2960_v12 = vld [vmem:[#allocation12 + $0x628] sm:$0xff]  ;;  %v2962_v58 = vld [vmem:[#allocation12 + $0x638] sm:$0xff] }
 0x56e   :  { %3232 = vmatpush1.msra.mxu0 %v2823_v57  ;;  %3309 = vmatpush1.msra.mxu1 %v2825_v6  ;;  %v2959_v57 = vld [vmem:[#allocation12 + $0x620] sm:$0xff]  ;;  %v2961_v6 = vld [vmem:[#allocation12 + $0x630] sm:$0xff] }
 0x56f   :  { %3233 = vmatprep.subr.mxu0 %v2816_v27  ;;  %3310 = vmatprep.subr.mxu1 %v2818_v36  ;;  %v2952_v27 = vld [vmem:[#allocation12 + $0x5e8] sm:$0xff]  ;;  %v2954_v36 = vld [vmem:[#allocation12 + $0x5f8] sm:$0xff] }
 0x570   :  { %3234 = vmatpush1.msra.mxu0 %v2815_v11  ;;  %3311 = vmatpush1.msra.mxu1 %v2817_v56  ;;  %v2951_v11 = vld [vmem:[#allocation12 + $0x5e0] sm:$0xff]  ;;  %v2953_v56 = vld [vmem:[#allocation12 + $0x5f0] sm:$0xff] }
 0x571   :  { %3235 = vmatprep.subr.mxu0 %v2808_v43  ;;  %3312 = vmatprep.subr.mxu1 %v2810_v44  ;;  %v2944_v43 = vld [vmem:[#allocation12 + $0x5a8] sm:$0xff]  ;;  %v2946_v44 = vld [vmem:[#allocation12 + $0x5b8] sm:$0xff] }
 0x572   :  { %3236 = vmatpush1.msra.mxu0 %v2807_v13  ;;  %3313 = vmatpush1.msra.mxu1 %v2809_v16  ;;  %v2943_v13 = vld [vmem:[#allocation12 + $0x5a0] sm:$0xff]  ;;  %v2945_v16 = vld [vmem:[#allocation12 + $0x5b0] sm:$0xff] }
 0x573   :  { %3237 = vmatprep.subr.mxu0 %v2800_v33  ;;  %3314 = vmatprep.subr.mxu1 %v2802_v10  ;;  %v2936_v33 = vld [vmem:[#allocation12 + $0x568] sm:$0xff]  ;;  %v2938_v10 = vld [vmem:[#allocation12 + $0x578] sm:$0xff] }
 0x574   :  { %3238 = vmatpush1.msra.mxu0 %v2799_v4  ;;  %3315 = vmatpush1.msra.mxu1 %v2801_v9  ;;  %v2935_v4 = vld [vmem:[#allocation12 + $0x560] sm:$0xff]  ;;  %v2937_v9 = vld [vmem:[#allocation12 + $0x570] sm:$0xff] }
 0x575   :  { %3239 = vmatprep.subr.mxu0 %v2792_v0  ;;  %3316 = vmatprep.subr.mxu1 %v2794_v45  ;;  %v2928_v0 = vld [vmem:[#allocation12 + $0x528] sm:$0xff]  ;;  %v2930_v45 = vld [vmem:[#allocation12 + $0x538] sm:$0xff] }
 0x576   :  { %3240 = vmatpush1.msra.mxu0 %v2791_v25  ;;  %3317 = vmatpush1.msra.mxu1 %v2793_v5  ;;  %v2927_v25 = vld [vmem:[#allocation12 + $0x520] sm:$0xff]  ;;  %v2929_v5 = vld [vmem:[#allocation12 + $0x530] sm:$0xff] }
 0x577   :  { %3241 = vmatprep.subr.mxu0 %v2784_v28  ;;  %3318 = vmatprep.subr.mxu1 %v2786_v20  ;;  %v2920_v28 = vld [vmem:[#allocation12 + $0x4e8] sm:$0xff]  ;;  %v2922_v20 = vld [vmem:[#allocation12 + $0x4f8] sm:$0xff] }
 0x578   :  { %3242 = vmatpush1.msra.mxu0 %v2783_v41  ;;  %3319 = vmatpush1.msra.mxu1 %v2785_v62  ;;  %v2919_v41 = vld [vmem:[#allocation12 + $0x4e0] sm:$0xff]  ;;  %v2921_v62 = vld [vmem:[#allocation12 + $0x4f0] sm:$0xff] }
 0x579   :  { %3243 = vmatprep.subr.mxu0 %v2776_v23  ;;  %3320 = vmatprep.subr.mxu1 %v2778_v38  ;;  %v2912_v23 = vld [vmem:[#allocation12 + $0x4a8] sm:$0xff]  ;;  %v2914_v38 = vld [vmem:[#allocation12 + $0x4b8] sm:$0xff] }
 0x57a   :  { %3244 = vmatpush1.msra.mxu0 %v2775_v49  ;;  %3321 = vmatpush1.msra.mxu1 %v2777_v42  ;;  %v2911_v49 = vld [vmem:[#allocation12 + $0x4a0] sm:$0xff]  ;;  %v2913_v42 = vld [vmem:[#allocation12 + $0x4b0] sm:$0xff] }
 0x57b   :  { %3245 = vmatprep.subr.mxu0 %v2768_v14  ;;  %3322 = vmatprep.subr.mxu1 %v2770_v48  ;;  %v2904_v14 = vld [vmem:[#allocation12 + $0x468] sm:$0xff]  ;;  %v2906_v48 = vld [vmem:[#allocation12 + $0x478] sm:$0xff] }
 0x57c   :  { %3246 = vmatpush1.msra.mxu0 %v2767_v50  ;;  %3323 = vmatpush1.msra.mxu1 %v2769_v54  ;;  %v2903_v50 = vld [vmem:[#allocation12 + $0x460] sm:$0xff]  ;;  %v2905_v54 = vld [vmem:[#allocation12 + $0x470] sm:$0xff] }
 0x57d   :  { %3247 = vmatprep.subr.mxu0 %v3016_v60  ;;  %3324 = vmatprep.subr.mxu1 %v3018_v17  ;;  %v2896_v60 = vld [vmem:[#allocation12 + $0x428] sm:$0xff]  ;;  %v2898_v17 = vld [vmem:[#allocation12 + $0x438] sm:$0xff] }
 0x57e   :  { %3248 = vmatpush2.msra.mxu0 %v3015_v18  ;;  %3325 = vmatpush2.msra.mxu1 %v3017_v34  ;;  %v2895_v18 = vld [vmem:[#allocation12 + $0x420] sm:$0xff]  ;;  %v2897_v34 = vld [vmem:[#allocation12 + $0x430] sm:$0xff] }
 0x57f   :  { %3249 = vmatprep.subr.mxu0 %v3008_v19  ;;  %3326 = vmatprep.subr.mxu1 %v3010_v21  ;;  %v5992_v19 = vld [vmem:[#allocation15 + $0x1e8] sm:$0xff]  ;;  %v5994_v21 = vld [vmem:[#allocation15 + $0x1f8] sm:$0xff] }
 0x580   :  { %3250 = vmatpush2.msra.mxu0 %v3007_v22  ;;  %3327 = vmatpush2.msra.mxu1 %v3009_v1  ;;  %v5998_v22 = vld [vmem:[#allocation15 + $0x1e0] sm:$0xff]  ;;  %v6000_v1 = vld [vmem:[#allocation15 + $0x1f0] sm:$0xff] }
 0x581   :  { %3251 = vmatprep.subr.mxu0 %v3000_v26  ;;  %3328 = vmatprep.subr.mxu1 %v3002_v29  ;;  %v6004_v26 = vld [vmem:[#allocation15 + $0x1c8] sm:$0xff]  ;;  %v6006_v29 = vld [vmem:[#allocation15 + $0x1d8] sm:$0xff] }
 0x582   :  { %3252 = vmatpush2.msra.mxu0 %v2999_v51  ;;  %3329 = vmatpush2.msra.mxu1 %v3001_v8  ;;  %v6010_v51 = vld [vmem:[#allocation15 + $0x1c0] sm:$0xff]  ;;  %v6012_v8 = vld [vmem:[#allocation15 + $0x1d0] sm:$0xff] }
 0x583   :  { %3253 = vmatprep.subr.mxu0 %v2992_v7  ;;  %3330 = vmatprep.subr.mxu1 %v2994_v15  ;;  %v6020_v7 = vld [vmem:[#allocation15 + $0x1b8] sm:$0xff]  ;;  %v6026_v15 = vld [vmem:[#allocation15 + $0x1b0] sm:$0xff] }
 0x584   :  { %3254 = vmatpush2.msra.mxu0 %v2991_v61  ;;  %3331 = vmatpush2.msra.mxu1 %v2993_v59  ;;  %v6030_v61 = vld [vmem:[#allocation15 + $0x188] sm:$0xff]  ;;  %v6032_v59 = vld [vmem:[#allocation15 + $0x198] sm:$0xff] }
 0x585   :  { %3255 = vmatprep.subr.mxu0 %v2984_v3  ;;  %3332 = vmatprep.subr.mxu1 %v2986_v37  ;;  %v6036_v3 = vld [vmem:[#allocation15 + $0x180] sm:$0xff]  ;;  %v6038_v37 = vld [vmem:[#allocation15 + $0x190] sm:$0xff] }
 0x586   :  { %3256 = vmatpush2.msra.mxu0 %v2983_v39  ;;  %3333 = vmatpush2.msra.mxu1 %v2985_v40  ;;  %v6042_v39 = vld [vmem:[#allocation15 + $0x168] sm:$0xff]  ;;  %v6044_v40 = vld [vmem:[#allocation15 + $0x178] sm:$0xff] }
 0x587   :  { %3257 = vmatprep.subr.mxu0 %v2976_v53  ;;  %3334 = vmatprep.subr.mxu1 %v2978_v47  ;;  %v6050_v53 = vld [vmem:[#allocation15 + $0x170] sm:$0xff]  ;;  %v6054_v47 = vld [vmem:[#allocation15 + $0x148] sm:$0xff] }
 0x588   :  { %3258 = vmatpush2.msra.mxu0 %v2975_v30  ;;  %3335 = vmatpush2.msra.mxu1 %v2977_v32  ;;  %v6056_v30 = vld [vmem:[#allocation15 + $0x158] sm:$0xff]  ;;  %v6060_v32 = vld [vmem:[#allocation15 + $0x140] sm:$0xff] }
 0x589   :  { %3259 = vmatprep.subr.mxu0 %v2968_v24  ;;  %3336 = vmatprep.subr.mxu1 %v2970_v63  ;;  %v6062_v24 = vld [vmem:[#allocation15 + $0x150] sm:$0xff]  ;;  %v6066_v63 = vld [vmem:[#allocation15 + $0x128] sm:$0xff] }
 0x58a   :  { %3260 = vmatpush2.msra.mxu0 %v2967_v46  ;;  %3337 = vmatpush2.msra.mxu1 %v2969_v31  ;;  %v6068_v46 = vld [vmem:[#allocation15 + $0x138] sm:$0xff]  ;;  %v6072_v31 = vld [vmem:[#allocation15 + $0x120] sm:$0xff] }
 0x58b   :  { %3261 = vmatprep.subr.mxu0 %v2960_v12  ;;  %3338 = vmatprep.subr.mxu1 %v2962_v58  ;;  %v6074_v12 = vld [vmem:[#allocation15 + $0x130] sm:$0xff]  ;;  %v6078_v58 = vld [vmem:[#allocation15 + $0x108] sm:$0xff] }
 0x58c   :  { %3262 = vmatpush2.msra.mxu0 %v2959_v57  ;;  %3339 = vmatpush2.msra.mxu1 %v2961_v6  ;;  %v6080_v57 = vld [vmem:[#allocation15 + $0x118] sm:$0xff]  ;;  %v6084_v6 = vld [vmem:[#allocation15 + $0x100] sm:$0xff] }
 0x58d   :  { %3263 = vmatprep.subr.mxu0 %v2952_v27  ;;  %3340 = vmatprep.subr.mxu1 %v2954_v36  ;;  %v6086_v27 = vld [vmem:[#allocation15 + $0x110] sm:$0xff]  ;;  %v6090_v36 = vld [vmem:[#allocation15 + $0xe8] sm:$0xff] }
 0x58e   :  { %3264 = vmatpush2.msra.mxu0 %v2951_v11  ;;  %3341 = vmatpush2.msra.mxu1 %v2953_v56  ;;  %v6092_v11 = vld [vmem:[#allocation15 + $0xf8] sm:$0xff]  ;;  %v6096_v56 = vld [vmem:[#allocation15 + $0xe0] sm:$0xff] }
 0x58f   :  { %3265 = vmatprep.subr.mxu0 %v2944_v43  ;;  %3342 = vmatprep.subr.mxu1 %v2946_v44  ;;  %v6098_v43 = vld [vmem:[#allocation15 + $0xf0] sm:$0xff]  ;;  %v6102_v44 = vld [vmem:[#allocation15 + $0xc8] sm:$0xff] }
 0x590   :  { %3266 = vmatpush2.msra.mxu0 %v2943_v13  ;;  %3343 = vmatpush2.msra.mxu1 %v2945_v16  ;;  %v6104_v13 = vld [vmem:[#allocation15 + $0xd8] sm:$0xff]  ;;  %v6108_v16 = vld [vmem:[#allocation15 + $0xc0] sm:$0xff] }
 0x591   :  { %3267 = vmatprep.subr.mxu0 %v2936_v33  ;;  %3344 = vmatprep.subr.mxu1 %v2938_v10  ;;  %v6110_v33 = vld [vmem:[#allocation15 + $0xd0] sm:$0xff]  ;;  %v6114_v10 = vld [vmem:[#allocation15 + $0xa8] sm:$0xff] }
 0x592   :  { %3268 = vmatpush2.msra.mxu0 %v2935_v4  ;;  %3345 = vmatpush2.msra.mxu1 %v2937_v9  ;;  %v6116_v4 = vld [vmem:[#allocation15 + $0xb8] sm:$0xff]  ;;  %v6120_v9 = vld [vmem:[#allocation15 + $0xa0] sm:$0xff] }
 0x593   :  { %3269 = vmatprep.subr.mxu0 %v2928_v0  ;;  %3346 = vmatprep.subr.mxu1 %v2930_v45  ;;  %v6122_v0 = vld [vmem:[#allocation15 + $0xb0] sm:$0xff]  ;;  %v6126_v45 = vld [vmem:[#allocation15 + $0x88] sm:$0xff] }
 0x594   :  { %3270 = vmatpush2.msra.mxu0 %v2927_v25  ;;  %3347 = vmatpush2.msra.mxu1 %v2929_v5  ;;  %v6128_v25 = vld [vmem:[#allocation15 + $0x98] sm:$0xff]  ;;  %v6132_v5 = vld [vmem:[#allocation15 + $0x80] sm:$0xff] }
 0x595   :  { %3271 = vmatprep.subr.mxu0 %v2920_v28  ;;  %3348 = vmatprep.subr.mxu1 %v2922_v20  ;;  %v6134_v28 = vld [vmem:[#allocation15 + $0x90] sm:$0xff]  ;;  %v6138_v20 = vld [vmem:[#allocation15 + $0x68] sm:$0xff] }
 0x596   :  { %3272 = vmatpush2.msra.mxu0 %v2919_v41  ;;  %3349 = vmatpush2.msra.mxu1 %v2921_v62  ;;  %v6140_v41 = vld [vmem:[#allocation15 + $0x78] sm:$0xff]  ;;  %v6144_v62 = vld [vmem:[#allocation15 + $0x60] sm:$0xff] }
 0x597   :  { %3273 = vmatprep.subr.mxu0 %v2912_v23  ;;  %3350 = vmatprep.subr.mxu1 %v2914_v38  ;;  %v6146_v23 = vld [vmem:[#allocation15 + $0x70] sm:$0xff]  ;;  %v6150_v38 = vld [vmem:[#allocation15 + $0x48] sm:$0xff] }
 0x598   :  { %3274 = vmatpush2.msra.mxu0 %v2911_v49  ;;  %3351 = vmatpush2.msra.mxu1 %v2913_v42  ;;  %v6152_v49 = vld [vmem:[#allocation15 + $0x58] sm:$0xff]  ;;  %v6156_v42 = vld [vmem:[#allocation15 + $0x40] sm:$0xff] }
 0x599   :  { %3275 = vmatprep.subr.mxu0 %v2904_v14  ;;  %3352 = vmatprep.subr.mxu1 %v2906_v48  ;;  %6748 = vst [vmem:[#allocation36_spill] sm:$0xff] %v6152_v49  ;;  %v6158_v14 = vld [vmem:[#allocation15 + $0x50] sm:$0xff]  ;;  %v6162_v48 = vld [vmem:[#allocation15 + $0x28] sm:$0xff] }
 0x59a   :  { %3276 = vmatpush2.msra.mxu0 %v2903_v50  ;;  %3353 = vmatpush2.msra.mxu1 %v2905_v54  ;;  %v6164_v50 = vld [vmem:[#allocation15 + $0x38] sm:$0xff]  ;;  %v6168_v54 = vld [vmem:[#allocation15 + $0x20] sm:$0xff] }
 0x59b   :  { %3277 = vmatprep.subr.mxu0 %v2896_v60  ;;  %3354 = vmatprep.subr.mxu1 %v2898_v17  ;;  %v6170_v60 = vld [vmem:[#allocation15 + $0x30] sm:$0xff]  ;;  %v6174_v17 = vld [vmem:[#allocation15 + $0x8] sm:$0xff] }
 0x59c   :  { %3278 = vmatpush2.msra.mxu0 %v2895_v18  ;;  %3355 = vmatpush2.msra.mxu1 %v2897_v34  ;;  %v6176_v18 = vld [vmem:[#allocation15 + $0x18] sm:$0xff]  ;;  %v6180_v34 = vld [vmem:[#allocation15] sm:$0xff] }
 0x59d   :  { %3280 = vmatmul.mubr.f32.vlgmr.msra.gmra.mxu0 %v6747_v55  ;;  %3357 = vmatmul.mubr.f32.vlgmr.msra.gmra.mxu1 %v6747_v55  ;;  %v6018_v55 = vld [vmem:[#allocation15 + $0x1a8] sm:$0xff] }
 0x59e   :  { %3433 = vmatprep.subr.mxu0 %v5992_v19  ;;  %3504 = vmatprep.subr.mxu1 %v5994_v21 }
 0x59f   :  { %3285 = vmatprep.mubr.f32.mxu0 %v5977_v2  ;;  %3362 = vmatprep.mubr.f32.mxu1 %v5977_v2  ;;  %v6024_v2 = vld [vmem:[#allocation15 + $0x1a0] sm:$0xff] }
 0x5a0   :  { %3434 = vmatpush1.msra.mxu0 %v5998_v22  ;;  %3505 = vmatpush1.msra.mxu1 %v6000_v1 }
 0x5a1   :  { %3435 = vmatprep.subr.mxu0 %v6004_v26  ;;  %3506 = vmatprep.subr.mxu1 %v6006_v29 }
 0x5a2   :  { %3436 = vmatpush1.msra.mxu0 %v6010_v51  ;;  %3507 = vmatpush1.msra.mxu1 %v6012_v8 }
 0x5a3   :  { %3286 = vmatmul.mubr.f32.gmra.mxu0 %v5972_v52  ;;  %3363 = vmatmul.mubr.f32.gmra.mxu1 %v5972_v52  ;;  %v6048_v52 = vld [vmem:[#allocation15 + $0x160] sm:$0xff] }
 0x5a4   :  { %3437 = vmatprep.subr.mxu0 %v6018_v55  ;;  %3508 = vmatprep.subr.mxu1 %v6020_v7 }
 0x5a5   :  { %3438 = vmatpush1.msra.mxu0 %v6024_v2  ;;  %3509 = vmatpush1.msra.mxu1 %v6026_v15 }
 0x5a6   :  { %3439 = vmatprep.subr.mxu0 %v6030_v61  ;;  %3510 = vmatprep.subr.mxu1 %v6032_v59 }
 0x5a7   :  { %3440 = vmatpush1.msra.mxu0 %v6036_v3  ;;  %3511 = vmatpush1.msra.mxu1 %v6038_v37 }
 0x5a8   :  { %3441 = vmatprep.subr.mxu0 %v6042_v39  ;;  %3512 = vmatprep.subr.mxu1 %v6044_v40 }
 0x5a9   :  { %3442 = vmatpush1.msra.mxu0 %v6048_v52  ;;  %3513 = vmatpush1.msra.mxu1 %v6050_v53 }
 0x5aa   :  { %3443 = vmatprep.subr.mxu0 %v6054_v47  ;;  %3514 = vmatprep.subr.mxu1 %v6056_v30 }
 0x5ab   :  { %3444 = vmatpush1.msra.mxu0 %v6060_v32  ;;  %3515 = vmatpush1.msra.mxu1 %v6062_v24 }
 0x5ac   :  { %3445 = vmatprep.subr.mxu0 %v6066_v63  ;;  %3516 = vmatprep.subr.mxu1 %v6068_v46 }
 0x5ad   :  { %3446 = vmatpush1.msra.mxu0 %v6072_v31  ;;  %3517 = vmatpush1.msra.mxu1 %v6074_v12 }
 0x5ae   :  { %3447 = vmatprep.subr.mxu0 %v6078_v58  ;;  %3518 = vmatprep.subr.mxu1 %v6080_v57 }
 0x5af   :  { %3448 = vmatpush1.msra.mxu0 %v6084_v6  ;;  %3519 = vmatpush1.msra.mxu1 %v6086_v27 }
 0x5b0   :  { %3449 = vmatprep.subr.mxu0 %v6090_v36  ;;  %3520 = vmatprep.subr.mxu1 %v6092_v11 }
 0x5b1   :  { %3450 = vmatpush1.msra.mxu0 %v6096_v56  ;;  %3521 = vmatpush1.msra.mxu1 %v6098_v43 }
 0x5b2   :  { %3451 = vmatprep.subr.mxu0 %v6102_v44  ;;  %3522 = vmatprep.subr.mxu1 %v6104_v13 }
 0x5b3   :  { %3452 = vmatpush1.msra.mxu0 %v6108_v16  ;;  %3523 = vmatpush1.msra.mxu1 %v6110_v33 }
 0x5b4   :  { %3453 = vmatprep.subr.mxu0 %v6114_v10  ;;  %3524 = vmatprep.subr.mxu1 %v6116_v4 }
 0x5b5   :  { %3454 = vmatpush1.msra.mxu0 %v6120_v9  ;;  %3525 = vmatpush1.msra.mxu1 %v6122_v0 }
 0x5b6   :  { %3455 = vmatprep.subr.mxu0 %v6126_v45  ;;  %3526 = vmatprep.subr.mxu1 %v6128_v25 }
 0x5b7   :  { %3456 = vmatpush1.msra.mxu0 %v6132_v5  ;;  %3527 = vmatpush1.msra.mxu1 %v6134_v28 }
 0x5b8   :  { %3457 = vmatprep.subr.mxu0 %v6138_v20  ;;  %3528 = vmatprep.subr.mxu1 %v6140_v41 }
 0x5b9   :  { %3458 = vmatpush1.msra.mxu0 %v6144_v62  ;;  %3529 = vmatpush1.msra.mxu1 %v6146_v23 }
 0x5ba   :  { %3459 = vmatprep.subr.mxu0 %v6150_v38  ;;  %3530 = vmatprep.subr.mxu1 %v6152_v49  ;;  %v6184_v49 = vld [vmem:[#allocation15 + $0x10] sm:$0xff] }
 0x5bb   :  { %3460 = vmatpush1.msra.mxu0 %v6156_v42  ;;  %3531 = vmatpush1.msra.mxu1 %v6158_v14 }
 0x5bc   :  { %3461 = vmatprep.subr.mxu0 %v6162_v48  ;;  %3532 = vmatprep.subr.mxu1 %v6164_v50 }
 0x5bd   :  { %3462 = vmatpush1.msra.mxu0 %v6168_v54  ;;  %3533 = vmatpush1.msra.mxu1 %v6170_v60 }
 0x5be   :  { %3463 = vmatprep.subr.mxu0 %v6174_v17  ;;  %3534 = vmatprep.subr.mxu1 %v6176_v18 }
 0x5bf   :  { %3464 = vmatpush1.msra.mxu0 %v6180_v34  ;;  %3497 = vmatprep.mubr.f32.mxu0 %v6732_v35 }
 0x5c0   :  { %3535 = vmatpush1.msra.mxu1 %v6184_v49  ;;  %3568 = vmatprep.mubr.f32.mxu1 %v6732_v35 }
 0x5c1   :  { %3498 = vmatmul.mubr.f32.vlgmr.msra.gmra.mxu0 %v6732_v35  ;;  %3569 = vmatmul.mubr.f32.vlgmr.msra.gmra.mxu1 %v6732_v35 }
 0x5c2   :  { %3604 = vmatprep.subr.mxu0 %v5992_v19  ;;  %3675 = vmatprep.subr.mxu1 %v5994_v21  ;;  %v6749_v19 = vld [vmem:[#allocation36_spill] sm:$0xff] }
 0x5c3   :  { %3605 = vmatpush1.msra.mxu0 %v5998_v22  ;;  %3676 = vmatpush1.msra.mxu1 %v6000_v1  ;;  %v3019_v1 = vld [vmem:[#allocation13] sm:$0xff] }
 0x5c4   :  { %3606 = vmatprep.subr.mxu0 %v6004_v26  ;;  %3677 = vmatprep.subr.mxu1 %v6006_v29 }
 0x5c5   :  { %3607 = vmatpush1.msra.mxu0 %v6010_v51  ;;  %3678 = vmatpush1.msra.mxu1 %v6012_v8  ;;  %v6750_v51 = vld [vmem:[#allocation33_spill] sm:$0xff] }
 0x5c6   :  { %3608 = vmatprep.subr.mxu0 %v6018_v55  ;;  %3679 = vmatprep.subr.mxu1 %v6020_v7  ;;  %v6751_v8 = vsub.s32 0, %v6750_v51  ;;  %v6752_v7 = vsub.s32 2, %v6750_v51 }
 0x5c7   :  { %3609 = vmatpush1.msra.mxu0 %v6024_v2  ;;  %3680 = vmatpush1.msra.mxu1 %v6026_v15 }
 0x5c8   :  { %3610 = vmatprep.subr.mxu0 %v6030_v61  ;;  %3681 = vmatprep.subr.mxu1 %v6032_v59  ;;  %v3024_v55 = vrot.slane %v3019_v1, %v6751_v8  ;;  %v3032_v2 = vrot.slane %v3019_v1, %v6752_v7  ;;  %v6753_v59 = vsub.s32 1, %v6750_v51 }
 0x5c9   :  { %3611 = vmatpush1.msra.mxu0 %v6036_v3  ;;  %3682 = vmatpush1.msra.mxu1 %v6038_v37  ;;  %v6754_v37 = vsub.s32 3, %v6750_v51 }
 0x5ca   :  { %3612 = vmatprep.subr.mxu0 %v6042_v39  ;;  %3683 = vmatprep.subr.mxu1 %v6044_v40  ;;  %v3028_v3 = vrot.slane %v3019_v1, %v6753_v59  ;;  %v6325_v59 = vld [vmem:[#allocation16 + $0x1f0] sm:$0xff] }
 0x5cb   :  { %3613 = vmatpush1.msra.mxu0 %v6048_v52  ;;  %3684 = vmatpush1.msra.mxu1 %v6050_v53  ;;  %v3036_v39 = vrot.slane %v3019_v1, %v6754_v37  ;;  %v6329_v37 = vld [vmem:[#allocation16 + $0x1d8] sm:$0xff] }
 0x5cc   :  { %3614 = vmatprep.subr.mxu0 %v6054_v47  ;;  %3685 = vmatprep.subr.mxu1 %v6056_v30 }
 0x5cd   :  { %3615 = vmatpush1.msra.mxu0 %v6060_v32  ;;  %3686 = vmatpush1.msra.mxu1 %v6062_v24  ;;  %v6276_v24 = vld [vmem:[#allocation16 + $0x1e8] sm:$0xff] }
 0x5ce   :  { %3616 = vmatprep.subr.mxu0 %v6066_v63  ;;  %3687 = vmatprep.subr.mxu1 %v6068_v46  ;;  %v6278_v63 = vld [vmem:[#allocation16 + $0x1f8] sm:$0xff]  ;;  %v6759_v46 = vsub.s32 4, %v6750_v51 }
 0x5cf   :  { %3617 = vmatpush1.msra.mxu0 %v6072_v31  ;;  %3688 = vmatpush1.msra.mxu1 %v6074_v12  ;;  %v6761_v12 = vsub.s32 6, %v6750_v51 }
 0x5d0   :  { %3618 = vmatprep.subr.mxu0 %v6078_v58  ;;  %3689 = vmatprep.subr.mxu1 %v6080_v57  ;;  %v6284_v31 = vrot.slane %v3019_v1, %v6759_v46  ;;  %v6763_v57 = vsub.s32 5, %v6750_v51  ;;  %v6341_v46 = vld [vmem:[#allocation16 + $0x1b8] sm:$0xff] }
 0x5d1   :  { %3619 = vmatpush1.msra.mxu0 %v6084_v6  ;;  %3690 = vmatpush1.msra.mxu1 %v6086_v27  ;;  %v6288_v58 = vrot.slane %v3019_v1, %v6761_v12  ;;  %v6765_v27 = vsub.s32 7, %v6750_v51  ;;  %v6345_v12 = vld [vmem:[#allocation16 + $0x1a0] sm:$0xff] }
 0x5d2   :  { %3620 = vmatprep.subr.mxu0 %v6090_v36  ;;  %3691 = vmatprep.subr.mxu1 %v6092_v11  ;;  %6760 = vst [vmem:[#allocation47_spill] sm:$0xff] %v6284_v31  ;;  %v6292_v6 = vrot.slane %v3019_v1, %v6763_v57  ;;  %v6347_v57 = vld [vmem:[#allocation16 + $0x1b0] sm:$0xff] }
 0x5d3   :  { %3621 = vmatpush1.msra.mxu0 %v6096_v56  ;;  %3692 = vmatpush1.msra.mxu1 %v6098_v43  ;;  %6762 = vst [vmem:[#allocation45_spill] sm:$0xff] %v6288_v58  ;;  %v6296_v36 = vrot.slane %v3019_v1, %v6765_v27  ;;  %v6351_v27 = vld [vmem:[#allocation16 + $0x188] sm:$0xff] }
 0x5d4   :  { %3622 = vmatprep.subr.mxu0 %v6102_v44  ;;  %3693 = vmatprep.subr.mxu1 %v6104_v13  ;;  %6764 = vst [vmem:[#allocation50_spill] sm:$0xff] %v6292_v6 }
 0x5d5   :  { %3623 = vmatpush1.msra.mxu0 %v6108_v16  ;;  %3694 = vmatpush1.msra.mxu1 %v6110_v33  ;;  %6766 = vst [vmem:[#allocation46_spill] sm:$0xff] %v6296_v36 }
 0x5d6   :  { %3624 = vmatprep.subr.mxu0 %v6114_v10  ;;  %3695 = vmatprep.subr.mxu1 %v6116_v4 }
 0x5d7   :  { %3625 = vmatpush1.msra.mxu0 %v6120_v9  ;;  %3696 = vmatpush1.msra.mxu1 %v6122_v0 }
 0x5d8   :  { %3626 = vmatprep.subr.mxu0 %v6126_v45  ;;  %3697 = vmatprep.subr.mxu1 %v6128_v25 }
 0x5d9   :  { %3627 = vmatpush1.msra.mxu0 %v6132_v5  ;;  %3698 = vmatpush1.msra.mxu1 %v6134_v28 }
 0x5da   :  { %3628 = vmatprep.subr.mxu0 %v6138_v20  ;;  %3699 = vmatprep.subr.mxu1 %v6140_v41 }
 0x5db   :  { %3629 = vmatpush1.msra.mxu0 %v6144_v62  ;;  %3700 = vmatpush1.msra.mxu1 %v6146_v23 }
 0x5dc   :  { %3630 = vmatprep.subr.mxu0 %v6150_v38  ;;  %3701 = vmatprep.subr.mxu1 %v6749_v19 }
 0x5dd   :  { %3631 = vmatpush1.msra.mxu0 %v6156_v42  ;;  %3702 = vmatpush1.msra.mxu1 %v6158_v14 }
 0x5de   :  { %3632 = vmatprep.subr.mxu0 %v6162_v48  ;;  %3703 = vmatprep.subr.mxu1 %v6164_v50 }
 0x5df   :  { %3633 = vmatpush1.msra.mxu0 %v6168_v54  ;;  %3704 = vmatpush1.msra.mxu1 %v6170_v60 }
 0x5e0   :  { %3634 = vmatprep.subr.mxu0 %v6174_v17  ;;  %3705 = vmatprep.subr.mxu1 %v6176_v18 }
 0x5e1   :  { %3635 = vmatpush1.msra.mxu0 %v6180_v34  ;;  %3706 = vmatpush1.msra.mxu1 %v6184_v49 }
 0x5e2   :  { %3668 = vmatprep.mubr.f32.mxu0 %v6732_v35  ;;  %3739 = vmatprep.mubr.f32.mxu1 %v6732_v35 }
 0x5e3   :  { %3840 = vmatprep.subr.mxu0 %v6276_v24  ;;  %3911 = vmatprep.subr.mxu1 %v6278_v63 }
 0x61a   :  { %v3127_v21 = vpop.f32.mrf.mxu0  ;;  %v3204_v22 = vpop.f32.mrf.mxu1 }
 0x61b   :  { %v3128_v0 = vadd.f32 %v3127_v21, %v3024_v55  ;;  %v3205_v50 = vadd.f32 %v3204_v22, %v3032_v2 }
 0x61c   :  { %v3129_v26 = vpop.f32.mrf.mxu0  ;;  %v3206_v29 = vpop.f32.mrf.mxu1 }
 0x61d   :  { %v3130_v5 = vadd.f32 %v3129_v26, %v3028_v3  ;;  %v3207_v14 = vadd.f32 %v3206_v29, %v3036_v39 }
 0x620   :  { %v3133_v15 = vpop.f32.mrf.mxu0  ;;  %v3210_v61 = vpop.f32.mrf.mxu1 }
 0x621   :  { %v6268_v40 = vadd.f32 %v3133_v15, %v3024_v55  ;;  %v6270_v52 = vadd.f32 %v3210_v61, %v3032_v2  ;;  %v6323_v61 = vld [vmem:[#allocation16 + $0x1e0] sm:$0xff] }
 0x622   :  { %v3135_v53 = vpop.f32.mrf.mxu0  ;;  %v3212_v47 = vpop.f32.mrf.mxu1 }
 0x623   :  { %6755 = vst [vmem:[#allocation35_spill] sm:$0xff] %v6268_v40  ;;  %6756 = vst [vmem:[#allocation39_spill] sm:$0xff] %v6270_v52  ;;  %v6272_v30 = vadd.f32 %v3135_v53, %v3028_v3  ;;  %v6274_v32 = vadd.f32 %v3212_v47, %v3036_v39  ;;  %v6327_v3 = vld [vmem:[#allocation16 + $0x1c8] sm:$0xff]  ;;  %v6333_v39 = vld [vmem:[#allocation16 + $0x1c0] sm:$0xff] }
 0x624   :  { %v6335_v53 = vld [vmem:[#allocation16 + $0x1d0] sm:$0xff]  ;;  %v6339_v47 = vld [vmem:[#allocation16 + $0x1a8] sm:$0xff]  ;;  %v6497_v52 = vld [vmem:[#allocation16 + $0x18] sm:$0xff] }
 0x625   :  { %6757 = vst [vmem:[#allocation40_spill] sm:$0xff] %v6272_v30  ;;  %6758 = vst [vmem:[#allocation41_spill] sm:$0xff] %v6274_v32  ;;  %v6491_v32 = vld [vmem:[#allocation16 + $0x30] sm:$0xff]  ;;  %v6495_v30 = vld [vmem:[#allocation16 + $0x8] sm:$0xff] }
 0x626   :  { %v6501_v40 = vld [vmem:[#allocation16] sm:$0xff] }
 0x65d   :  { %v3281_v11 = vpop.f32.mrf.mxu0  ;;  %v3358_v56 = vpop.f32.mrf.mxu1 }
 0x65e   :  { %v6299_v43 = vadd.f32 %v3281_v11, %v6284_v31  ;;  %v6302_v44 = vadd.f32 %v3358_v56, %v6288_v58  ;;  %v6353_v11 = vld [vmem:[#allocation16 + $0x198] sm:$0xff]  ;;  %v6357_v56 = vld [vmem:[#allocation16 + $0x180] sm:$0xff]  ;;  %v6467_v58 = vld [vmem:[#allocation16 + $0x70] sm:$0xff] }
 0x65f   :  { %v3283_v13 = vpop.f32.mrf.mxu0  ;;  %v3360_v16 = vpop.f32.mrf.mxu1  ;;  %v6489_v31 = vld [vmem:[#allocation16 + $0x20] sm:$0xff] }
 0x660   :  { %6767 = vst [vmem:[#allocation44_spill] sm:$0xff] %v6299_v43  ;;  %6768 = vst [vmem:[#allocation51_spill] sm:$0xff] %v6302_v44  ;;  %v6305_v33 = vadd.f32 %v3283_v13, %v6292_v6  ;;  %v6308_v10 = vadd.f32 %v3360_v16, %v6296_v36  ;;  %v6359_v13 = vld [vmem:[#allocation16 + $0x190] sm:$0xff]  ;;  %v6363_v16 = vld [vmem:[#allocation16 + $0x168] sm:$0xff] }
 0x661   :  { %v6449_v44 = vld [vmem:[#allocation16 + $0x98] sm:$0xff]  ;;  %v6459_v43 = vld [vmem:[#allocation16 + $0x68] sm:$0xff] }
 0x662   :  { %6769 = vst [vmem:[#allocation48_spill] sm:$0xff] %v6305_v33  ;;  %6770 = vst [vmem:[#allocation49_spill] sm:$0xff] %v6308_v10  ;;  %v6453_v10 = vld [vmem:[#allocation16 + $0x80] sm:$0xff]  ;;  %v6455_v33 = vld [vmem:[#allocation16 + $0x90] sm:$0xff] }
 0x663   :  { %v6310_v4 = vpop.f32.mrf.mxu0  ;;  %v6314_v45 = vpop.f32.mrf.mxu1  ;;  %v6473_v36 = vld [vmem:[#allocation16 + $0x58] sm:$0xff]  ;;  %v6483_v6 = vld [vmem:[#allocation16 + $0x28] sm:$0xff] }
 0x664   :  { %6771 = vst [vmem:[#allocation38_spill] sm:$0xff] %v6310_v4  ;;  %6773 = vst [vmem:[#allocation52_spill] sm:$0xff] %v6314_v45  ;;  %v6465_v45 = vld [vmem:[#allocation16 + $0x60] sm:$0xff]  ;;  %v6485_v4 = vld [vmem:[#allocation16 + $0x38] sm:$0xff] }
 0x665   :  { %v6312_v9 = vpop.f32.mrf.mxu0  ;;  %v6316_v41 = vpop.f32.mrf.mxu1  ;;  %6777 = vst [vmem:[#allocation57_spill] sm:$0xff] %v6473_v36 }
 0x666   :  { %6772 = vst [vmem:[#allocation42_spill] sm:$0xff] %v6312_v9  ;;  %6774 = vst [vmem:[#allocation43_spill] sm:$0xff] %v6316_v41  ;;  %v6471_v41 = vld [vmem:[#allocation16 + $0x48] sm:$0xff]  ;;  %v6479_v9 = vld [vmem:[#allocation16 + $0x50] sm:$0xff] }
 0x681   :  { %v3499_v25 = vpop.f32.mrf.mxu0  ;;  %v3570_v38 = vpop.f32.mrf.mxu1 }
 0x682   :  { %v3575_v28 = vadd.f32 %v3499_v25, %v3128_v0  ;;  %v3577_v17 = vadd.f32 %v3570_v38, %v3205_v50  ;;  %v6365_v0 = vld [vmem:[#allocation16 + $0x178] sm:$0xff]  ;;  %v6369_v25 = vld [vmem:[#allocation16 + $0x160] sm:$0xff]  ;;  %v6387_v38 = vld [vmem:[#allocation16 + $0x128] sm:$0xff] }
 0x683   :  { %v3501_v20 = vpop.f32.mrf.mxu0  ;;  %v3572_v42 = vpop.f32.mrf.mxu1  ;;  %v6401_v50 = vld [vmem:[#allocation16 + $0x118] sm:$0xff] }
 0x684   :  { %v4468_v62 = vmul.f32 -1.442695, %v3575_v28  ;;  %v3576_v23 = vadd.f32 %v3501_v20, %v3130_v5  ;;  %v3578_v48 = vadd.f32 %v3572_v42, %v3207_v14  ;;  %v6371_v5 = vld [vmem:[#allocation16 + $0x170] sm:$0xff]  ;;  %v6375_v28 = vld [vmem:[#allocation16 + $0x148] sm:$0xff]  ;;  %v6377_v20 = vld [vmem:[#allocation16 + $0x158] sm:$0xff] }
 0x685   :  { %v6393_v42 = vld [vmem:[#allocation16 + $0x120] sm:$0xff]  ;;  %v6395_v14 = vld [vmem:[#allocation16 + $0x130] sm:$0xff] }
 0x686   :  { %4654 = vpow2.f32 %v4468_v62  ;;  %v4469_v49 = vmul.f32 -1.442695, %v3576_v23  ;;  %v4470_v54 = vmul.f32 -1.442695, %v3578_v48  ;;  %v6381_v62 = vld [vmem:[#allocation16 + $0x140] sm:$0xff]  ;;  %v6383_v23 = vld [vmem:[#allocation16 + $0x150] sm:$0xff] }
 0x687   :  { %v6399_v48 = vld [vmem:[#allocation16 + $0x108] sm:$0xff] }
 0x688   :  { %4656 = vpow2.f32 %v4469_v49  ;;  %v6389_v49 = vld [vmem:[#allocation16 + $0x138] sm:$0xff] }
 0x689   :  { %4658 = vpow2.f32 %v4470_v54  ;;  %v6405_v54 = vld [vmem:[#allocation16 + $0x100] sm:$0xff] }
 0x693   :  { %v4655_v60 = vpop.eup %4654 }
 0x694   :  { %v3582_v18 = vadd.f32 1.0, %v4655_v60  ;;  %v6407_v60 = vld [vmem:[#allocation16 + $0x110] sm:$0xff] }
 0x695   :  { %v4657_v34 = vpop.eup %4656 }
 0x696   :  { %4660 = vrcp.f32 %v3582_v18  ;;  %v3588_v19 = vadd.f32 1.0, %v4657_v34  ;;  %v4659_v21 = vpop.eup %4658  ;;  %v6413_v18 = vld [vmem:[#allocation16 + $0xf8] sm:$0xff]  ;;  %v6417_v34 = vld [vmem:[#allocation16 + $0xe0] sm:$0xff] }
 0x697   :  { %4662 = vtanh.f32 %v3577_v17  ;;  %v3595_v8 = vadd.f32 1.0, %v4659_v21  ;;  %v6411_v17 = vld [vmem:[#allocation16 + $0xe8] sm:$0xff] }
 0x698   :  { %4664 = vrcp.f32 %v3588_v19  ;;  %v6419_v19 = vld [vmem:[#allocation16 + $0xf0] sm:$0xff]  ;;  %v6423_v21 = vld [vmem:[#allocation16 + $0xc8] sm:$0xff] }
 0x699   :  { %4666 = vrcp.f32 %v3595_v8  ;;  %v6435_v8 = vld [vmem:[#allocation16 + $0xa8] sm:$0xff] }
 0x6a3   :  { %v4661_v1 = vpop.eup %4660 }
 0x6a4   :  { %v4663_v26 = vpop.eup %4662 }
 0x6a5   :  { %v4665_v51 = vpop.eup %4664  ;;  %v3599_v7 = vmul.f32 %v4663_v26, %v4661_v1  ;;  %v6425_v1 = vld [vmem:[#allocation16 + $0xd8] sm:$0xff]  ;;  %v6429_v26 = vld [vmem:[#allocation16 + $0xc0] sm:$0xff] }
 0x6a6   :  { %v3598_v55 = vmul.f32 0.0, %v4665_v51  ;;  %v4667_v22 = vpop.eup %4666  ;;  %v6431_v51 = vld [vmem:[#allocation16 + $0xd0] sm:$0xff] }
 0x6a8   :  { %v6318_v29 = vadd.f32 %v3599_v7, %v3598_v55  ;;  %v6437_v55 = vld [vmem:[#allocation16 + $0xb8] sm:$0xff]  ;;  %v6441_v7 = vld [vmem:[#allocation16 + $0xa0] sm:$0xff] }
 0x6aa   :  { %6775 = vst [vmem:[#allocation53_spill] sm:$0xff] %v6318_v29  ;;  %4668 = vtanh.f32 %v6318_v29  ;;  %v6477_v29 = vld [vmem:[#allocation16 + $0x40] sm:$0xff] }
 0x6b7   :  { %v4669_v2 = vpop.eup %4668 }
 0x6b8   :  { %v6321_v15 = vmul.f32 %v4669_v2, %v4667_v22  ;;  %v6443_v22 = vld [vmem:[#allocation16 + $0xb0] sm:$0xff]  ;;  %v6447_v2 = vld [vmem:[#allocation16 + $0x88] sm:$0xff] }
 0x6ba   :  { %6776 = vst [vmem:[#allocation56_spill] sm:$0xff] %v6321_v15  ;;  %3669 = vmatmul.mubr.f32.vlgmr.msra.gmra.mxu0 %v6321_v15  ;;  %3740 = vmatmul.mubr.f32.vlgmr.msra.gmra.mxu1 %v6321_v15  ;;  %v6461_v15 = vld [vmem:[#allocation16 + $0x78] sm:$0xff] }
 0x6bb   :  { %3841 = vmatpush1.msra.mxu0 %v6323_v61  ;;  %3912 = vmatpush1.msra.mxu1 %v6325_v59 }
 0x6bc   :  { %3842 = vmatprep.subr.mxu0 %v6327_v3  ;;  %3913 = vmatprep.subr.mxu1 %v6329_v37 }
 0x6bd   :  { %3843 = vmatpush1.msra.mxu0 %v6333_v39  ;;  %3914 = vmatpush1.msra.mxu1 %v6335_v53 }
 0x6be   :  { %3844 = vmatprep.subr.mxu0 %v6339_v47  ;;  %3915 = vmatprep.subr.mxu1 %v6341_v46 }
 0x6bf   :  { %3845 = vmatpush1.msra.mxu0 %v6345_v12  ;;  %3916 = vmatpush1.msra.mxu1 %v6347_v57 }
 0x6c0   :  { %3846 = vmatprep.subr.mxu0 %v6351_v27  ;;  %3917 = vmatprep.subr.mxu1 %v6353_v11 }
 0x6c1   :  { %3847 = vmatpush1.msra.mxu0 %v6357_v56  ;;  %3918 = vmatpush1.msra.mxu1 %v6359_v13 }
 0x6c2   :  { %3848 = vmatprep.subr.mxu0 %v6363_v16  ;;  %3919 = vmatprep.subr.mxu1 %v6365_v0 }
 0x6c3   :  { %3849 = vmatpush1.msra.mxu0 %v6369_v25  ;;  %3920 = vmatpush1.msra.mxu1 %v6371_v5 }
 0x6c4   :  { %3850 = vmatprep.subr.mxu0 %v6375_v28  ;;  %3921 = vmatprep.subr.mxu1 %v6377_v20 }
 0x6c5   :  { %3851 = vmatpush1.msra.mxu0 %v6381_v62  ;;  %3922 = vmatpush1.msra.mxu1 %v6383_v23 }
 0x6c6   :  { %3852 = vmatprep.subr.mxu0 %v6387_v38  ;;  %3923 = vmatprep.subr.mxu1 %v6389_v49 }
 0x6c7   :  { %3853 = vmatpush1.msra.mxu0 %v6393_v42  ;;  %3924 = vmatpush1.msra.mxu1 %v6395_v14 }
 0x6c8   :  { %3854 = vmatprep.subr.mxu0 %v6399_v48  ;;  %3925 = vmatprep.subr.mxu1 %v6401_v50 }
 0x6c9   :  { %3855 = vmatpush1.msra.mxu0 %v6405_v54  ;;  %3926 = vmatpush1.msra.mxu1 %v6407_v60 }
 0x6ca   :  { %3856 = vmatprep.subr.mxu0 %v6411_v17  ;;  %3927 = vmatprep.subr.mxu1 %v6413_v18 }
 0x6cb   :  { %3857 = vmatpush1.msra.mxu0 %v6417_v34  ;;  %3928 = vmatpush1.msra.mxu1 %v6419_v19 }
 0x6cc   :  { %3858 = vmatprep.subr.mxu0 %v6423_v21  ;;  %3929 = vmatprep.subr.mxu1 %v6425_v1 }
 0x6cd   :  { %3859 = vmatpush1.msra.mxu0 %v6429_v26  ;;  %3930 = vmatpush1.msra.mxu1 %v6431_v51 }
 0x6ce   :  { %3860 = vmatprep.subr.mxu0 %v6435_v8  ;;  %3931 = vmatprep.subr.mxu1 %v6437_v55 }
 0x6cf   :  { %3861 = vmatpush1.msra.mxu0 %v6441_v7  ;;  %3932 = vmatpush1.msra.mxu1 %v6443_v22 }
 0x6d0   :  { %3862 = vmatprep.subr.mxu0 %v6447_v2  ;;  %3933 = vmatprep.subr.mxu1 %v6449_v44 }
 0x6d1   :  { %3863 = vmatpush1.msra.mxu0 %v6453_v10  ;;  %3934 = vmatpush1.msra.mxu1 %v6455_v33 }
 0x6d2   :  { %3864 = vmatprep.subr.mxu0 %v6459_v43  ;;  %3935 = vmatprep.subr.mxu1 %v6461_v15 }
 0x6d3   :  { %3865 = vmatpush1.msra.mxu0 %v6465_v45  ;;  %3936 = vmatpush1.msra.mxu1 %v6467_v58 }
 0x6d4   :  { %3866 = vmatprep.subr.mxu0 %v6471_v41  ;;  %3937 = vmatprep.subr.mxu1 %v6473_v36  ;;  %v6505_v36 = vld [vmem:[#allocation16 + $0x10] sm:$0xff] }
 0x6d5   :  { %3867 = vmatpush1.msra.mxu0 %v6477_v29  ;;  %3938 = vmatpush1.msra.mxu1 %v6479_v9 }
 0x6d6   :  { %3868 = vmatprep.subr.mxu0 %v6483_v6  ;;  %3939 = vmatprep.subr.mxu1 %v6485_v4 }
 0x6d7   :  { %3869 = vmatpush1.msra.mxu0 %v6489_v31  ;;  %3940 = vmatpush1.msra.mxu1 %v6491_v32 }
 0x6d8   :  { %3870 = vmatprep.subr.mxu0 %v6495_v30  ;;  %3941 = vmatprep.subr.mxu1 %v6497_v52 }
 0x6d9   :  { %3871 = vmatpush1.msra.mxu0 %v6501_v40  ;;  %3904 = vmatprep.mubr.f32.mxu0 %v6732_v35 }
 0x6da   :  { %3942 = vmatpush1.msra.mxu1 %v6505_v36  ;;  %3975 = vmatprep.mubr.f32.mxu1 %v6732_v35 }
 0x6db   :  { %3905 = vmatmul.mubr.f32.vlgmr.msra.gmra.mxu0 %v6732_v35  ;;  %3976 = vmatmul.mubr.f32.vlgmr.msra.gmra.mxu1 %v6732_v35 }
 0x6dc   :  { %4011 = vmatprep.subr.mxu0 %v6276_v24  ;;  %4082 = vmatprep.subr.mxu1 %v6278_v63  ;;  %v6778_v24 = vld [vmem:[#allocation57_spill] sm:$0xff] }
 0x6dd   :  { %4012 = vmatpush1.msra.mxu0 %v6323_v61  ;;  %4083 = vmatpush1.msra.mxu1 %v6325_v59  ;;  %v6783_v59 = vld [vmem:[#allocation47_spill] sm:$0xff] }
 0x6de   :  { %4013 = vmatprep.subr.mxu0 %v6327_v3  ;;  %4084 = vmatprep.subr.mxu1 %v6329_v37  ;;  %v6784_v3 = vld [vmem:[#allocation38_spill] sm:$0xff] }
 0x6df   :  { %4014 = vmatpush1.msra.mxu0 %v6333_v39  ;;  %4085 = vmatpush1.msra.mxu1 %v6335_v53  ;;  %v3288_v37 = vadd.f32 %v6784_v3, %v6783_v59  ;;  %v4241_v59 = vld [vmem:[#allocation18 + $0xf8] sm:$0xff] }
 0x6e0   :  { %4015 = vmatprep.subr.mxu0 %v6339_v47  ;;  %4086 = vmatprep.subr.mxu1 %v6341_v46  ;;  %v6785_v46 = vld [vmem:[#allocation50_spill] sm:$0xff]  ;;  %v4225_v3 = vld [vmem:[#allocation18 + $0x78] sm:$0xff] }
 0x6e1   :  { %4016 = vmatpush1.msra.mxu0 %v6345_v12  ;;  %4087 = vmatpush1.msra.mxu1 %v6347_v57  ;;  %v6786_v12 = vld [vmem:[#allocation42_spill] sm:$0xff] }
 0x6e2   :  { %4017 = vmatprep.subr.mxu0 %v6351_v27  ;;  %4088 = vmatprep.subr.mxu1 %v6353_v11  ;;  %v3290_v57 = vadd.f32 %v6786_v12, %v6785_v46  ;;  %v4238_v46 = vld [vmem:[#allocation18 + $0xe0] sm:$0xff] }
 0x6e3   :  { %4018 = vmatpush1.msra.mxu0 %v6357_v56  ;;  %4089 = vmatpush1.msra.mxu1 %v6359_v13  ;;  %v4222_v12 = vld [vmem:[#allocation18 + $0x60] sm:$0xff] }
 0x6e4   :  { %4019 = vmatprep.subr.mxu0 %v6363_v16  ;;  %4090 = vmatprep.subr.mxu1 %v6365_v0 }
 0x6e5   :  { %4020 = vmatpush1.msra.mxu0 %v6369_v25  ;;  %4091 = vmatpush1.msra.mxu1 %v6371_v5  ;;  %v6787_v5 = vld [vmem:[#allocation53_spill] sm:$0xff] }
 0x6e6   :  { %4021 = vmatprep.subr.mxu0 %v6375_v28  ;;  %4092 = vmatprep.subr.mxu1 %v6377_v20 }
 0x6e7   :  { %4022 = vmatpush1.msra.mxu0 %v6381_v62  ;;  %4093 = vmatpush1.msra.mxu1 %v6383_v23 }
 0x6e8   :  { %4023 = vmatprep.subr.mxu0 %v6387_v38  ;;  %4094 = vmatprep.subr.mxu1 %v6389_v49  ;;  %v6788_v49 = vld [vmem:[#allocation46_spill] sm:$0xff] }
 0x6e9   :  { %4024 = vmatpush1.msra.mxu0 %v6393_v42  ;;  %4095 = vmatpush1.msra.mxu1 %v6395_v14  ;;  %v6789_v42 = vld [vmem:[#allocation43_spill] sm:$0xff] }
 0x6ea   :  { %4025 = vmatprep.subr.mxu0 %v6399_v48  ;;  %4096 = vmatprep.subr.mxu1 %v6401_v50  ;;  %v3367_v14 = vadd.f32 %v6789_v42, %v6788_v49  ;;  %v6790_v50 = vld [vmem:[#allocation45_spill] sm:$0xff] }
 0x6eb   :  { %4026 = vmatpush1.msra.mxu0 %v6405_v54  ;;  %4097 = vmatpush1.msra.mxu1 %v6407_v60  ;;  %v6791_v54 = vld [vmem:[#allocation52_spill] sm:$0xff] }
 0x6ec   :  { %4027 = vmatprep.subr.mxu0 %v6411_v17  ;;  %4098 = vmatprep.subr.mxu1 %v6413_v18  ;;  %v3365_v60 = vadd.f32 %v6791_v54, %v6790_v50  ;;  %v6792_v17 = vld [vmem:[#allocation56_spill] sm:$0xff]  ;;  %v4228_v50 = vld [vmem:[#allocation18 + $0x90] sm:$0xff] }
 0x6ed   :  { %4028 = vmatpush1.msra.mxu0 %v6417_v34  ;;  %4099 = vmatpush1.msra.mxu1 %v6419_v19  ;;  %v4186_v18 = vrot.slane %v6792_v17, 4  ;;  %v4230_v49 = vld [vmem:[#allocation18 + $0xa0] sm:$0xff]  ;;  %v4212_v54 = vld [vmem:[#allocation18 + $0x10] sm:$0xff] }
 0x6ee   :  { %4029 = vmatprep.subr.mxu0 %v6423_v21  ;;  %4100 = vmatprep.subr.mxu1 %v6425_v1  ;;  %v4214_v42 = vld [vmem:[#allocation18 + $0x20] sm:$0xff] }
 0x6ef   :  { %4030 = vmatpush1.msra.mxu0 %v6429_v26  ;;  %4101 = vmatpush1.msra.mxu1 %v6431_v51  ;;  %v4187_v1 = vmax.f32 %v6792_v17, %v4186_v18  ;;  %v4211_v17 = vld [vmem:[#allocation18 + $0x8] sm:$0xff]  ;;  %v4226_v18 = vld [vmem:[#allocation18 + $0x80] sm:$0xff] }
 0x6f0   :  { %4031 = vmatprep.subr.mxu0 %v6435_v8  ;;  %4102 = vmatprep.subr.mxu1 %v6437_v55 }
 0x6f1   :  { %4032 = vmatpush1.msra.mxu0 %v6441_v7  ;;  %4103 = vmatpush1.msra.mxu1 %v6443_v22 }
 0x6f2   :  { %4033 = vmatprep.subr.mxu0 %v6447_v2  ;;  %4104 = vmatprep.subr.mxu1 %v6449_v44  ;;  %v4188_v2 = vrot.slane %v4187_v1, 2 }
 0x6f3   :  { %4034 = vmatpush1.msra.mxu0 %v6453_v10  ;;  %4105 = vmatpush1.msra.mxu1 %v6455_v33 }
 0x6f4   :  { %4035 = vmatprep.subr.mxu0 %v6459_v43  ;;  %4106 = vmatprep.subr.mxu1 %v6461_v15  ;;  %v6780_v43 = vld [vmem:[#allocation39_spill] sm:$0xff] }
 0x6f5   :  { %4036 = vmatpush1.msra.mxu0 %v6465_v45  ;;  %4107 = vmatpush1.msra.mxu1 %v6467_v58 }
 0x6f6   :  { %4037 = vmatprep.subr.mxu0 %v6471_v41  ;;  %4108 = vmatprep.subr.mxu1 %v6778_v24 }
 0x6f7   :  { %4038 = vmatpush1.msra.mxu0 %v6477_v29  ;;  %4109 = vmatpush1.msra.mxu1 %v6479_v9 }
 0x6f8   :  { %4039 = vmatprep.subr.mxu0 %v6483_v6  ;;  %4110 = vmatprep.subr.mxu1 %v6485_v4  ;;  %v6779_v6 = vld [vmem:[#allocation35_spill] sm:$0xff] }
 0x6f9   :  { %4040 = vmatpush1.msra.mxu0 %v6489_v31  ;;  %4111 = vmatpush1.msra.mxu1 %v6491_v32 }
 0x6fa   :  { %4041 = vmatprep.subr.mxu0 %v6495_v30  ;;  %4112 = vmatprep.subr.mxu1 %v6497_v52  ;;  %v6781_v52 = vld [vmem:[#allocation40_spill] sm:$0xff] }
 0x6fb   :  { %4042 = vmatpush1.msra.mxu0 %v6501_v40  ;;  %4075 = vmatprep.mubr.f32.mxu0 %v6732_v35  ;;  %v6782_v40 = vld [vmem:[#allocation41_spill] sm:$0xff] }
 0x6fc   :  { %4113 = vmatpush1.msra.mxu1 %v6505_v36  ;;  %4146 = vmatprep.mubr.f32.mxu1 %v6732_v35 }
 0x6fd   :  { %4534 = vmatprep.subr.mxu1 %v6732_v35  ;;  %4482 = vmatprep.subr.mxu0 %v4241_v59 }
 0x77a   :  { %v3670_v63 = vpop.f32.mrf.mxu0  ;;  %v3741_v58 = vpop.f32.mrf.mxu1 }
 0x77b   :  { %v3746_v31 = vadd.f32 %v3670_v63, %v6779_v6  ;;  %v3748_v32 = vadd.f32 %v3741_v58, %v6780_v43  ;;  %v4189_v63 = vmax.f32 %v4187_v1, %v4188_v2  ;;  %v4342_v1 = vld [vmem:[#allocation21 + $0x68] sm:$0xff]  ;;  %v4335_v2 = vld [vmem:[#allocation21 + $0x30] sm:$0xff] }
 0x77c   :  { %v3672_v44 = vpop.f32.mrf.mxu0  ;;  %v3743_v30 = vpop.f32.mrf.mxu1 }
 0x77d   :  { %v4471_v33 = vmul.f32 -1.442695, %v3746_v31  ;;  %v3747_v10 = vadd.f32 %v3672_v44, %v6781_v52  ;;  %v3749_v4 = vadd.f32 %v3743_v30, %v6782_v40  ;;  %v4190_v31 = vrot.slane %v4189_v63, 1 }
 0x77f   :  { %4670 = vpow2.f32 %v4471_v33  ;;  %v4472_v9 = vmul.f32 -1.442695, %v3747_v10  ;;  %v4473_v36 = vmul.f32 -1.442695, %v3749_v4  ;;  %v4191_v52 = vmax.f32 %v4189_v63, %v4190_v31 }
 0x781   :  { %4672 = vpow2.f32 %v4472_v9 }
 0x782   :  { %4674 = vpow2.f32 %v4473_v36 }
 0x783   :  { %4676 = vtanh.f32 %v3748_v32 }
 0x78c   :  { %v4671_v45 = vpop.eup %4670 }
 0x78d   :  { %v3753_v41 = vadd.f32 1.0, %v4671_v45 }
 0x78e   :  { %v4673_v29 = vpop.eup %4672 }
 0x78f   :  { %4678 = vrcp.f32 %v3753_v41  ;;  %v3759_v15 = vadd.f32 1.0, %v4673_v29  ;;  %v4675_v61 = vpop.eup %4674 }
 0x790   :  { %v4677_v39 = vpop.eup %4676  ;;  %v3766_v56 = vadd.f32 1.0, %v4675_v61 }
 0x791   :  { %4680 = vrcp.f32 %v3759_v15 }
 0x79b   :  { %v3906_v53 = vpop.f32.mrf.mxu0  ;;  %v3977_v20 = vpop.f32.mrf.mxu1 }
 0x79c   :  { %v4679_v47 = vpop.eup %4678  ;;  %v3982_v27 = vadd.f32 %v3906_v53, %v3288_v37  ;;  %v3984_v34 = vadd.f32 %v3977_v20, %v3365_v60  ;;  %v4240_v37 = vld [vmem:[#allocation18 + $0xf0] sm:$0xff]  ;;  %v4239_v53 = vld [vmem:[#allocation18 + $0xe8] sm:$0xff] }
 0x79d   :  { %v3770_v11 = vmul.f32 %v4679_v47, %v4677_v39  ;;  %v3908_v13 = vpop.f32.mrf.mxu0  ;;  %v3979_v38 = vpop.f32.mrf.mxu1  ;;  %v4224_v39 = vld [vmem:[#allocation18 + $0x70] sm:$0xff]  ;;  %v4223_v47 = vld [vmem:[#allocation18 + $0x68] sm:$0xff] }
 0x79e   :  { %v4681_v16 = vpop.eup %4680  ;;  %v4474_v0 = vmul.f32 -1.442695, %v3982_v27  ;;  %v3983_v25 = vadd.f32 %v3908_v13, %v3290_v57  ;;  %v3985_v48 = vadd.f32 %v3979_v38, %v3367_v14  ;;  %v4237_v57 = vld [vmem:[#allocation18 + $0xd8] sm:$0xff]  ;;  %v4235_v13 = vld [vmem:[#allocation18 + $0xc8] sm:$0xff]  ;;  %v4232_v20 = vld [vmem:[#allocation18 + $0xb0] sm:$0xff] }
 0x79f   :  { %v3769_v28 = vmul.f32 %v4681_v16, %v6787_v5  ;;  %v4221_v27 = vld [vmem:[#allocation18 + $0x58] sm:$0xff]  ;;  %v4219_v16 = vld [vmem:[#allocation18 + $0x48] sm:$0xff] }
 0x7a0   :  { %4682 = vpow2.f32 %v4474_v0  ;;  %v4475_v62 = vmul.f32 -1.442695, %v3983_v25  ;;  %v4476_v19 = vmul.f32 -1.442695, %v3985_v48  ;;  %v4234_v0 = vld [vmem:[#allocation18 + $0xc0] sm:$0xff]  ;;  %v4233_v5 = vld [vmem:[#allocation18 + $0xb8] sm:$0xff] }
 0x7a1   :  { %v3771_v23 = vadd.f32 %v3770_v11, %v3769_v28  ;;  %4684 = vrcp.f32 %v3766_v56  ;;  %v4236_v11 = vld [vmem:[#allocation18 + $0xd0] sm:$0xff]  ;;  %v4218_v25 = vld [vmem:[#allocation18 + $0x40] sm:$0xff]  ;;  %v4217_v28 = vld [vmem:[#allocation18 + $0x38] sm:$0xff] }
 0x7a2   :  { %4686 = vpow2.f32 %v4475_v62  ;;  %v4220_v56 = vld [vmem:[#allocation18 + $0x50] sm:$0xff]  ;;  %v4215_v38 = vld [vmem:[#allocation18 + $0x28] sm:$0xff]  ;;  %v4229_v14 = vld [vmem:[#allocation18 + $0x98] sm:$0xff] }
 0x7a3   :  { %4688 = vtanh.f32 %v3771_v23  ;;  %v4216_v62 = vld [vmem:[#allocation18 + $0x30] sm:$0xff]  ;;  %v4231_v23 = vld [vmem:[#allocation18 + $0xa8] sm:$0xff]  ;;  %v4213_v48 = vld [vmem:[#allocation18 + $0x18] sm:$0xff] }
 0x7a4   :  { %4690 = vtanh.f32 %v3984_v34  ;;  %v4227_v60 = vld [vmem:[#allocation18 + $0x88] sm:$0xff]  ;;  %v4210_v34 = vld [vmem:[#allocation18] sm:$0xff] }
 0x7a5   :  { %4692 = vpow2.f32 %v4476_v19  ;;  %v4344_v19 = vld [vmem:[#allocation21 + $0x78] sm:$0xff] }
 0x7ad   :  { %v4683_v21 = vpop.eup %4682 }
 0x7ae   :  { %v4685_v26 = vpop.eup %4684  ;;  %v3989_v51 = vadd.f32 1.0, %v4683_v21  ;;  %v4343_v21 = vld [vmem:[#allocation21 + $0x70] sm:$0xff] }
 0x7af   :  { %v4687_v8 = vpop.eup %4686 }
 0x7b0   :  { %v4689_v55 = vpop.eup %4688  ;;  %4694 = vrcp.f32 %v3989_v51  ;;  %v3995_v7 = vadd.f32 1.0, %v4687_v8  ;;  %v4340_v51 = vld [vmem:[#allocation21 + $0x58] sm:$0xff]  ;;  %v4339_v8 = vld [vmem:[#allocation21 + $0x50] sm:$0xff] }
 0x7b1   :  { %v3773_v22 = vmul.f32 %v4689_v55, %v4685_v26  ;;  %v4691_v32 = vpop.eup %4690  ;;  %v4341_v26 = vld [vmem:[#allocation21 + $0x60] sm:$0xff]  ;;  %v4338_v55 = vld [vmem:[#allocation21 + $0x48] sm:$0xff] }
 0x7b2   :  { %4696 = vrcp.f32 %v3995_v7  ;;  %v4693_v30 = vpop.eup %4692  ;;  %v4337_v7 = vld [vmem:[#allocation21 + $0x40] sm:$0xff] }
 0x7b3   :  { %v4198_v24 = vrot.slane %v3773_v22, 4  ;;  %v4002_v9 = vadd.f32 1.0, %v4693_v30 }
 0x7b5   :  { %v4199_v58 = vmax.f32 %v3773_v22, %v4198_v24  ;;  %4698 = vrcp.f32 %v4002_v9  ;;  %v4336_v22 = vld [vmem:[#allocation21 + $0x38] sm:$0xff]  ;;  %v4334_v24 = vld [vmem:[#allocation21 + $0x28] sm:$0xff] }
 0x7b7   :  { %v4200_v6 = vrot.slane %v4199_v58, 2 }
 0x7b9   :  { %v4201_v43 = vmax.f32 %v4199_v58, %v4200_v6  ;;  %v6793_v58 = vld [vmem:[#allocation44_spill] sm:$0xff] }
 0x7bb   :  { %v4202_v44 = vrot.slane %v4201_v43, 1 }
 0x7bd   :  { %v4695_v33 = vpop.eup %4694  ;;  %v4203_v10 = vmax.f32 %v4201_v43, %v4202_v44 }
 0x7be   :  { %v4006_v40 = vmul.f32 %v4695_v33, %v4691_v32  ;;  %v6794_v32 = vld [vmem:[#allocation48_spill] sm:$0xff] }
 0x7bf   :  { %v4697_v4 = vpop.eup %4696  ;;  %v6598_v36 = vsel %vm4253_vm0, %v4203_v10, %v4191_v52  ;;  %v6795_v10 = vld [vmem:[#allocation49_spill] sm:$0xff] }
 0x7c0   :  { %v4005_v45 = vmul.f32 0.0, %v4697_v4  ;;  %v6796_v4 = vld [vmem:[#allocation51_spill] sm:$0xff] }
 0x7c2   :  { %v6600_v41 = vadd.f32 %v4006_v40, %v4005_v45  ;;  %v4699_v29 = vpop.eup %4698 }
 0x7c4   :  { %4700 = vtanh.f32 %v6600_v41 }
 0x7d1   :  { %v4701_v15 = vpop.eup %4700 }
 0x7d2   :  { %v6603_v61 = vmul.f32 %v4701_v15, %v4699_v29 }
 0x7d4   :  { %4076 = vmatmul.mubr.f32.vlgmr.msra.gmra.mxu0 %v6603_v61  ;;  %4147 = vmatmul.mubr.f32.vlgmr.msra.gmra.mxu1 %v6603_v61 }
 0x7d5   :  { %4483 = vmatpush3.msra.mxu0 %v4225_v3  ;;  %4535 = vmatpush3.msra.mxu1 %v4344_v19 }
 0x7d6   :  { %4484 = vmatprep.subr.mxu0 %v4240_v37  ;;  %4536 = vmatprep.subr.mxu1 %v6732_v35 }
 0x7d7   :  { %4485 = vmatpush3.msra.mxu0 %v4224_v39  ;;  %4537 = vmatpush3.msra.mxu1 %v4343_v21 }
 0x7d8   :  { %4486 = vmatprep.subr.mxu0 %v4239_v53  ;;  %4538 = vmatprep.subr.mxu1 %v6732_v35 }
 0x7d9   :  { %4487 = vmatpush3.msra.mxu0 %v4223_v47  ;;  %4539 = vmatpush3.msra.mxu1 %v4342_v1  ;;  %v4481_v1 = vld [vmem:[#allocation22] ss:$0 sm:$0xff] }
 0x7da   :  { %4488 = vmatprep.subr.mxu0 %v4238_v46  ;;  %4540 = vmatprep.subr.mxu1 %v6732_v35 }
 0x7db   :  { %4489 = vmatpush3.msra.mxu0 %v4222_v12  ;;  %4541 = vmatpush3.msra.mxu1 %v4341_v26 }
 0x7dc   :  { %4490 = vmatprep.subr.mxu0 %v4237_v57  ;;  %4542 = vmatprep.subr.mxu1 %v6732_v35 }
 0x7dd   :  { %4491 = vmatpush3.msra.mxu0 %v4221_v27  ;;  %4543 = vmatpush3.msra.mxu1 %v4340_v51 }
 0x7de   :  { %4492 = vmatprep.subr.mxu0 %v4236_v11  ;;  %4544 = vmatprep.subr.mxu1 %v6732_v35  ;;  %v4204_v11 = vrot.slane %v6603_v61, 4 }
 0x7df   :  { %4493 = vmatpush3.msra.mxu0 %v4220_v56  ;;  %4545 = vmatpush3.msra.mxu1 %v4339_v8 }
 0x7e0   :  { %4494 = vmatprep.subr.mxu0 %v4235_v13  ;;  %4546 = vmatprep.subr.mxu1 %v6732_v35  ;;  %v4205_v56 = vmax.f32 %v6603_v61, %v4204_v11  ;;  %v4332_v61 = vld [vmem:[#allocation21 + $0x18] sm:$0xff] }
 0x7e1   :  { %4495 = vmatpush3.msra.mxu0 %v4219_v16  ;;  %4547 = vmatpush3.msra.mxu1 %v4338_v55 }
 0x7e2   :  { %4496 = vmatprep.subr.mxu0 %v4234_v0  ;;  %4548 = vmatprep.subr.mxu1 %v6732_v35 }
 0x7e3   :  { %4497 = vmatpush3.msra.mxu0 %v4218_v25  ;;  %4549 = vmatpush3.msra.mxu1 %v4337_v7  ;;  %v4206_v25 = vrot.slane %v4205_v56, 2 }
 0x7e4   :  { %4498 = vmatprep.subr.mxu0 %v4233_v5  ;;  %4550 = vmatprep.subr.mxu1 %v6732_v35 }
 0x7e5   :  { %4499 = vmatpush3.msra.mxu0 %v4217_v28  ;;  %4551 = vmatpush3.msra.mxu1 %v4336_v22 }
 0x7e6   :  { %4500 = vmatprep.subr.mxu0 %v4232_v20  ;;  %4552 = vmatprep.subr.mxu1 %v6732_v35  ;;  %v4207_v20 = vmax.f32 %v4205_v56, %v4206_v25 }
 0x7e7   :  { %4501 = vmatpush3.msra.mxu0 %v4216_v62  ;;  %4553 = vmatpush3.msra.mxu1 %v4335_v2 }
 0x7e8   :  { %4502 = vmatprep.subr.mxu0 %v4231_v23  ;;  %4554 = vmatprep.subr.mxu1 %v6732_v35 }
 0x7e9   :  { %4503 = vmatpush3.msra.mxu0 %v4215_v38  ;;  %4555 = vmatpush3.msra.mxu1 %v4334_v24  ;;  %v4208_v38 = vrot.slane %v4207_v20, 1 }
 0x7ea   :  { %4504 = vmatprep.subr.mxu0 %v4230_v49  ;;  %4556 = vmatprep.subr.mxu1 %v6732_v35 }
 0x7eb   :  { %4505 = vmatpush3.msra.mxu0 %v4214_v42  ;;  %4566 = vmatprep.mubr.msk.f32.mxu1 %vm5032_vm1, %v6732_v35 }
 0x7ec   :  { %4506 = vmatprep.subr.mxu0 %v4229_v14 }
 0x7ed   :  { %4507 = vmatpush3.msra.mxu0 %v4213_v48  ;;  %v4333_v48 = vld [vmem:[#allocation21 + $0x20] sm:$0xff] }
 0x7ee   :  { %4508 = vmatprep.subr.mxu0 %v4228_v50  ;;  %4557 = vmatpush3.msra.mxu1 %v4333_v48  ;;  %v4331_v50 = vld [vmem:[#allocation21 + $0x10] sm:$0xff] }
 0x7ef   :  { %4509 = vmatpush3.msra.mxu0 %v4212_v54  ;;  %4558 = vmatprep.subr.mxu1 %v6732_v35  ;;  %v4330_v54 = vld [vmem:[#allocation21 + $0x8] sm:$0xff] }
 0x7f0   :  { %4510 = vmatprep.subr.mxu0 %v4227_v60  ;;  %4559 = vmatpush3.msra.mxu1 %v4332_v61  ;;  %v4329_v60 = vld [vmem:[#allocation21] sm:$0xff] }
 0x7f1   :  { %4511 = vmatpush3.msra.mxu0 %v4211_v17  ;;  %4560 = vmatprep.subr.mxu1 %v6732_v35  ;;  %v4480_v17 = vld [vmem:[#allocation19] ss:$0 sm:$0xff] }
 0x7f2   :  { %4512 = vmatprep.subr.mxu0 %v4226_v18  ;;  %4561 = vmatpush3.msra.mxu1 %v4331_v50 }
 0x7f3   :  { %4513 = vmatpush3.msra.mxu0 %v4210_v34  ;;  %4562 = vmatprep.subr.mxu1 %v6732_v35 }
 0x7f4   :  { %4563 = vmatpush3.msra.mxu1 %v4330_v54 }
 0x7f5   :  { %4564 = vmatprep.subr.mxu1 %v6732_v35 }
 0x7f6   :  { %4565 = vmatpush3.msra.mxu1 %v4329_v60 }
 0x894   :  { %v4077_v63 = vpop.f32.mrf.mxu0  ;;  %v4148_v30 = vpop.f32.mrf.mxu1 }
 0x895   :  { %v4153_v6 = vadd.f32 %v4077_v63, %v6793_v58  ;;  %v4155_v9 = vadd.f32 %v4148_v30, %v6796_v4 }
 0x896   :  { %v4079_v31 = vpop.f32.mrf.mxu0  ;;  %v4150_v52 = vpop.f32.mrf.mxu1 }
 0x897   :  { %v4477_v43 = vmul.f32 -1.442695, %v4153_v6  ;;  %v4154_v44 = vadd.f32 %v4079_v31, %v6794_v32  ;;  %v4156_v40 = vadd.f32 %v4150_v52, %v6795_v10 }
 0x899   :  { %4702 = vpow2.f32 %v4477_v43  ;;  %v4478_v33 = vmul.f32 -1.442695, %v4154_v44  ;;  %v4479_v45 = vmul.f32 -1.442695, %v4156_v40 }
 0x89b   :  { %4704 = vpow2.f32 %v4478_v33 }
 0x89c   :  { %4706 = vtanh.f32 %v4155_v9 }
 0x89d   :  { %4708 = vpow2.f32 %v4479_v45 }
 0x8a6   :  { %v4703_v29 = vpop.eup %4702 }
 0x8a7   :  { %v4160_v15 = vadd.f32 1.0, %v4703_v29 }
 0x8a8   :  { %v4705_v59 = vpop.eup %4704 }
 0x8a9   :  { %4710 = vrcp.f32 %v4160_v15  ;;  %v4166_v3 = vadd.f32 1.0, %v4705_v59  ;;  %v4707_v37 = vpop.eup %4706 }
 0x8aa   :  { %v4709_v39 = vpop.eup %4708 }
 0x8ab   :  { %4712 = vrcp.f32 %v4166_v3  ;;  %v4173_v12 = vadd.f32 1.0, %v4709_v39 }
 0x8ad   :  { %4714 = vrcp.f32 %v4173_v12 }
 0x8b6   :  { %v4711_v53 = vpop.eup %4710 }
 0x8b7   :  { %v4177_v47 = vmul.f32 %v4711_v53, %v4707_v37 }
 0x8b8   :  { %v4713_v46 = vpop.eup %4712 }
 0x8b9   :  { %v4176_v57 = vmul.f32 %v4713_v46, %v6600_v41  ;;  %v4209_v41 = vmax.f32 %v4207_v20, %v4208_v38 }
 0x8ba   :  { %v4715_v13 = vpop.eup %4714 }
 0x8bb   :  { %v4178_v27 = vadd.f32 %v4177_v47, %v4176_v57 }
 0x8bd   :  { %4716 = vtanh.f32 %v4178_v27 }
 0x8ca   :  { %v4717_v16 = vpop.eup %4716 }
 0x8cb   :  { %v4180_v0 = vmul.f32 %v4717_v16, %v4715_v13 }
 0x8cd   :  { %v4192_v5 = vrot.slane %v4180_v0, 4 }
 0x8cf   :  { %v4193_v28 = vmax.f32 %v4180_v0, %v4192_v5 }
 0x8d1   :  { %v4194_v62 = vrot.slane %v4193_v28, 2 }
 0x8d3   :  { %v4195_v23 = vmax.f32 %v4193_v28, %v4194_v62 }
 0x8d5   :  { %v4196_v49 = vrot.slane %v4195_v23, 1 }
 0x8d7   :  { %v4197_v42 = vmax.f32 %v4195_v23, %v4196_v49 }
 0x8d9   :  { %v4255_v14 = vsel %vm4253_vm0, %v4209_v41, %v4197_v42 }
 0x8da   :  { %4322 = vmatprep.mubr.f32.mxu0 %v4255_v14 }
 0x8db   :  { %4323 = vmatmul.mubr.f32.vlgmr.msra.gmra.mxu0 %v6598_v36 }
 0x99b   :  { %v4514_v36 = vpop.f32.mrf.mxu0 }
 0x99d   :  { %v4515_v18 = vpop.f32.mrf.mxu0 }
 0x99e   :  { %v4516_v34 = vadd.f32 %v4515_v18, %v4514_v36 }
 0x9a0   :  { %v4325_v19 = vadd.f32 %v4516_v34, %v4480_v17 }
 0x9a2   :  { %v4328_v21 = vmax.f32 %v4325_v19, 0.0 }
 0x9a4   :  { %4567 = vmatmul.mubr.f32.vlgmr.msra.gmra.mxu1 %v4328_v21 }
 0xa64   :  { %v4418_v26 = vpop.f32.mrf.mxu1 }
 0xa65   :  { %v4419_v51 = vadd.f32 %v4481_v1, %v4418_v26 }
 0xa66   :  { %v4568_v8 = vpop.f32.mrf.mxu1 }
 0xa67   :  { %v4423_v55 = vsel %vm4422_vm2, %v4419_v51, -inf }
 0xa68   :  { %4424 = vmax.xlane.f32.xlu0 %v4423_v55 }
 0xaf1   :  { %v4425_v7 = vpop.xlane.xlu0 %4424 }
 0xaf2   :  { %v4426_v22 = vsub.f32 %v4419_v51, %v4425_v7 }
 0xaf4   :  { %v4427_v2 = vmul.f32 1.442695, %v4426_v22 }
 0xaf6   :  { %4718 = vpow2.f32 %v4427_v2 }
 0xb03   :  { %v4719_v35 = vpop.eup %4718 }
 0xb04   :  { %v4429_v24 = vsel %vm4422_vm2, %v4719_v35, 0.0 }
 0xb05   :  { %4430 = vadd.xlane.f32.xlu0 %v4429_v24 }
 0xb8e   :  { %v4431_v63 = vpop.xlane.xlu0 %4430 }
 0xb8f   :  { %4720 = vrcp.f32 %v4431_v63 }
 0xb9c   :  { %v4721_v58 = vpop.eup %4720 }
 0xb9d   :  { %v4433_v6 = vmul.f32 %v4721_v58, %v4719_v35 }
 0xb9f   :  { %4434 = vst [vmem:[#allocation24] sm:$0x3] %v4433_v6 }
 0xba0   :  { %4988 = shalt.err (!%p4985_p8)
}
 0xba1   :  { %4444 = dma.vmem_to_hbm [thread:$0]  %s4442_s18, 32, %s6648_s13, [#allocation6]  }
 0xba2   :  { %5011 = dma.done.wait [#allocation6], 32  }
 0xba3   :  { %5012 = vsyncadd [#allocation6], 4294967264 }
 0xba4   :  { %4448 = vsyncpa [#allocation5], 1 }
 0xba5   :  { %4449 = vsyncpa [#allocation8], 1 }
 0xba6   :  { %4450 = vsyncpa [#allocation11], 1 }
 0xba7   :  { %4451 = vsyncpa [#allocation14], 1 }
 0xba8   :  { %4452 = vsyncpa [#allocation17], 1 }
 0xba9   :  { %4453 = vsyncpa [#allocation20], 1 }
 0xbaa   :  { %4454 = vsyncpa [#allocation23], 1 }
 0xbab   :  { %4455 = vsyncpa [#allocation6], 1 }

</bundles_post_ra>
